<compile_context>
chip_gen: v7x
topology: tpu7x:2x2x1
jax: 0.10.0
libtpu: 0.0.40
codegen_flags: <defaults>
</compile_context>

<pallas_src>
import functools

import jax
import jax.numpy as jnp
from jax.experimental import pallas as pl
from jax.experimental.pallas import tpu as pltpu

DISCR_FILTERS = 64

_VMEM_LIMIT = 32 * 1024 * 1024


# ---------------------------------------------------------------------------
# Pallas kernels
# ---------------------------------------------------------------------------

def _conv_matmul_kernel(x_ref, w_ref, b_ref, o_ref, *, activation):
    """One grid step: (tm, K) @ (K, tn) bf16 in, f32 acc, + bias + activation."""
    y = jnp.dot(x_ref[...], w_ref[...], preferred_element_type=jnp.float32)
    y = y + b_ref[...]
    if activation == "relu":
        y = jnp.maximum(y, 0.0)
    elif activation == "sigmoid":
        y = jax.nn.sigmoid(y)
    o_ref[...] = y.astype(o_ref.dtype)


def _conv4_head_kernel(x_ref, w4_ref, b4_ref, w5_ref, b5_ref, o_ref,
                       *, batch, spatial):
    """Layer 4 (conv+ReLU) fused with layer 5 (4x4 VALID conv -> 1, sigmoid).

    Layer 5 has a single output channel: running it on the MXU would use one
    lane and masked stores, so it is computed as an f32 VPU elementwise
    multiply + reduction over the layer-4 activations held in registers.
    """
    y = jnp.dot(x_ref[...], w4_ref[...], preferred_element_type=jnp.float32)
    y = jnp.maximum(y + b4_ref[...], 0.0)                 # (batch*spatial, C4)
    c4 = y.shape[-1]
    y = y.reshape(batch, spatial, c4)
    prod = y * w5_ref[...][None, :, :]                    # broadcast (1, S, C4)
    logits = jnp.sum(jnp.sum(prod, axis=2), axis=1, keepdims=True)  # (batch, 1)
    o_ref[...] = jax.nn.sigmoid(logits + b5_ref[0, 0]).astype(o_ref.dtype)


# ---------------------------------------------------------------------------
# pallas_call wrappers
# ---------------------------------------------------------------------------

def fused_conv_matmul(x, w, b, activation, *, tile_m=None, tile_n=None,
                      out_dtype=jnp.bfloat16):
    """x: (M, K) bf16, w: (K, N) bf16, b: (1, N) f32 -> (M, N) out_dtype."""
    M, K = x.shape
    _, N = w.shape
    tm = M if (tile_m is None or M % tile_m) else tile_m
    tn = N if (tile_n is None or N % tile_n) else tile_n
    kernel = functools.partial(_conv_matmul_kernel, activation=activation)
    return pl.pallas_call(
        kernel,
        out_shape=jax.ShapeDtypeStruct((M, N), out_dtype),
        grid=(M // tm, N // tn),
        in_specs=[
            pl.BlockSpec((tm, K), lambda i, j: (i, 0)),
            pl.BlockSpec((K, tn), lambda i, j: (0, j)),
            pl.BlockSpec((1, tn), lambda i, j: (0, j)),
        ],
        out_specs=pl.BlockSpec((tm, tn), lambda i, j: (i, j)),
        compiler_params=pltpu.CompilerParams(
            dimension_semantics=("parallel", "parallel"),
            vmem_limit_bytes=_VMEM_LIMIT,
        ),
    )(x, w, b)


def fused_conv4_head(patches4, w4_mat, b4, w5_mat, b5, batch, spatial):
    """Layer-4 conv+ReLU and the (->1, sigmoid) head in one kernel."""
    M, K = patches4.shape
    _, C4 = w4_mat.shape
    kernel = functools.partial(_conv4_head_kernel, batch=batch, spatial=spatial)
    return pl.pallas_call(
        kernel,
        out_shape=jax.ShapeDtypeStruct((batch, 1), jnp.float32),
        grid=(1,),
        in_specs=[
            pl.BlockSpec((M, K), lambda i: (0, 0)),
            pl.BlockSpec((K, C4), lambda i: (0, 0)),
            pl.BlockSpec((1, C4), lambda i: (0, 0)),
            pl.BlockSpec((spatial, C4), lambda i: (0, 0)),
            pl.BlockSpec(memory_space=pltpu.MemorySpace.SMEM),   # scalar b5
        ],
        out_specs=pl.BlockSpec((batch, 1), lambda i: (0, 0)),
        compiler_params=pltpu.CompilerParams(
            dimension_semantics=("arbitrary",),
            vmem_limit_bytes=_VMEM_LIMIT,
        ),
    )(patches4, w4_mat, b4, w5_mat, b5)


# ---------------------------------------------------------------------------
# Host-side im2col (pure data movement; stays in the layer's dtype = bf16)
# ---------------------------------------------------------------------------

def _im2col(x_nhwc, ksize, stride, pad):
    N, H, W, C = x_nhwc.shape
    xp = jnp.pad(x_nhwc, ((0, 0), (pad, pad), (pad, pad), (0, 0)))
    H_out = (H + 2 * pad - ksize) // stride + 1
    W_out = (W + 2 * pad - ksize) // stride + 1
    cols = []
    for kh in range(ksize):
        for kw in range(ksize):
            cols.append(xp[:, kh:kh + stride * H_out:stride,
                           kw:kw + stride * W_out:stride, :])
    patches = jnp.concatenate(cols, axis=-1)          # (N, Ho, Wo, K*K*C)
    return patches.reshape(N * H_out * W_out, ksize * ksize * C), H_out, W_out


# ---------------------------------------------------------------------------
# Parameters
# ---------------------------------------------------------------------------

def init_params(key, in_channels):
    """Deterministic synthetic init (DCGAN-style N(0, 0.02), zero bias), f32 HWIO."""
    specs = [
        (in_channels, DISCR_FILTERS),
        (DISCR_FILTERS, DISCR_FILTERS * 2),
        (DISCR_FILTERS * 2, DISCR_FILTERS * 4),
        (DISCR_FILTERS * 4, DISCR_FILTERS * 8),
        (DISCR_FILTERS * 8, 1),
    ]
    params = []
    for cin, cout in specs:
        key, wk = jax.random.split(key)
        w = 0.02 * jax.random.normal(wk, (4, 4, cin, cout), jnp.float32)  # HWIO
        b = jnp.zeros((cout,), jnp.float32)
        params.append((w, b))
    return params


def prepare_kernel_params(params):
    """One-time (outside jit) conversion into the kernels' bf16 matmul layout."""
    (w1, b1), (w2, b2), (w3, b3), (w4, b4), (w5, b5) = params

    # Layer 1: pad C_in up to a multiple of 8 so K = 16*C_pad is a multiple of
    # 128, and build the block-diagonal "row pair" weight so the kernel runs a
    # lane-dense (M/2, 2K) @ (2K, 2*C_out) matmul with full 128-lane stores.
    kh, kw, cin, cout1 = w1.shape
    cin_p = ((cin + 7) // 8) * 8
    w1p = jnp.pad(w1, ((0, 0), (0, 0), (0, cin_p - cin), (0, 0)))
    w1m = w1p.reshape(kh * kw * cin_p, cout1)
    k1 = w1m.shape[0]
    w1dup = jnp.zeros((2 * k1, 2 * cout1), jnp.float32)
    w1dup = w1dup.at[:k1, :cout1].set(w1m).at[k1:, cout1:].set(w1m)
    b1dup = jnp.concatenate([b1, b1])

    def mat(w):
        a, b_, ci, co = w.shape
        return w.reshape(a * b_ * ci, co)

    return {
        "w1": w1dup.astype(jnp.bfloat16),
        "b1": b1dup.reshape(1, -1).astype(jnp.float32),
        "w2": mat(w2).astype(jnp.bfloat16),
        "b2": b2.reshape(1, -1).astype(jnp.float32),
        "w3": mat(w3).astype(jnp.bfloat16),
        "b3": b3.reshape(1, -1).astype(jnp.float32),
        "w4": mat(w4).astype(jnp.bfloat16),
        "b4": b4.reshape(1, -1).astype(jnp.float32),
        # Head weight: (4,4,C4,1) -> (16, C4), rows in (kh, kw) order; f32 (VPU).
        "w5": w5.reshape(w5.shape[0] * w5.shape[1], w5.shape[2]).astype(jnp.float32),
        "b5": b5.reshape(1, 1).astype(jnp.float32),
    }


# ---------------------------------------------------------------------------
# Model
# ---------------------------------------------------------------------------

def discriminator_forward(kp, x_nchw):
    x = jnp.transpose(x_nchw, (0, 2, 3, 1)).astype(jnp.bfloat16)  # NCHW -> NHWC
    batch = x.shape[0]
    cin = x.shape[3]

    # ---- Layer 1: Conv(4x4, s2, p1) + ReLU (lane-dense pair-folded matmul).
    k1 = kp["w1"].shape[0] // 2
    cin_p = k1 // 16
    if cin_p > cin:
        x = jnp.pad(x, ((0, 0), (0, 0), (0, 0), (0, cin_p - cin)))
    p1, Ho, Wo = _im2col(x, 4, 2, 1)                   # (B*Ho*Wo, 16*cin_p) bf16
    m1 = p1.shape[0]
    assert m1 % 2 == 0
    p1 = p1.reshape(m1 // 2, 2 * k1)                   # free row-major pair fold
    y = fused_conv_matmul(p1, kp["w1"], kp["b1"], "relu", tile_m=256)
    x = y.reshape(batch, Ho, Wo, -1)                   # free unfold back

    # ---- Layer 2: Conv(4x4, s2, p1) + ReLU.
    p2, Ho, Wo = _im2col(x, 4, 2, 1)                   # (512, 1024)
    y = fused_conv_matmul(p2, kp["w2"], kp["b2"], "relu", tile_m=128)
    x = y.reshape(batch, Ho, Wo, -1)

    # ---- Layer 3: Conv(4x4, s2, p1) + ReLU (N tiled so v7x can split cores).
    p3, Ho, Wo = _im2col(x, 4, 2, 1)                   # (128, 2048)
    y = fused_conv_matmul(p3, kp["w3"], kp["b3"], "relu", tile_n=128)
    x = y.reshape(batch, Ho, Wo, -1)

    # ---- Layers 4 + 5 fused: Conv+ReLU then 4x4 VALID Conv(->1) + Sigmoid.
    p4, Ho, Wo = _im2col(x, 4, 2, 1)                   # (32, 4096)
    spatial = Ho * Wo
    assert spatial == kp["w5"].shape[0], "head expects 4x4 spatial (64x64 input)"
    out = fused_conv4_head(p4, kp["w4"], kp["b4"], kp["w5"], kp["b5"],
                           batch, spatial)

    # PyTorch: conv_pipe(x) is (N,1,1,1); .view(-1,1).squeeze(1) -> (N,)
    return out.reshape(-1)


def discriminator_reference(params, x_nchw):
    cfg = [(2, 1, "relu")] * 4 + [(1, 0, "sigmoid")]
    x = jnp.transpose(x_nchw, (0, 2, 3, 1)).astype(jnp.float32)
    for (w, b), (s, p, act) in zip(params, cfg):
        x = jax.lax.conv_general_dilated(
            x, w, window_strides=(s, s), padding=[(p, p), (p, p)],
            dimension_numbers=("NHWC", "HWIO", "NHWC"))
        x = x + b
        x = jnp.maximum(x, 0.0) if act == "relu" else jax.nn.sigmoid(x)
    return x.reshape(-1)


if __name__ == "__main__":
    key = jax.random.PRNGKey(0)
    kx, kparams_key = jax.random.split(key)

    # Spatial must be 64 so the final 4x4 VALID conv yields 1x1 (DCGAN arch).
    N, C, H, W = 2, 3, 64, 64
    x = jax.random.normal(kx, (N, C, H, W), jnp.float32)
    params = init_params(kparams_key, C)
    kparams = prepare_kernel_params(params)      # one-time, outside jit

    fwd = jax.jit(discriminator_forward)
    out = jax.block_until_ready(fwd(kparams, x))

    ref = jax.block_until_ready(discriminator_reference(params, x))
    assert out.shape == (N,), out.shape
    # bf16 MXU operands / bf16 inter-layer activations (f32 accumulate) vs the
    # pure-f32 reference -> same tolerance as the previously validated version.
    assert jnp.allclose(out, ref, rtol=2e-3, atol=2e-3), (out, ref)

    print("KERNEL_OK")
</pallas_src>

<mosaic_0001>
module attributes {stable_mosaic.version = 11 : i64} {
  func.func @_conv_matmul_kernel(%arg0: i32, %arg1: i32, %arg2: memref<256x256xbf16, #tpu.memory_space<vmem>>, %arg3: memref<256x128xbf16, #tpu.memory_space<vmem>>, %arg4: memref<1x128xf32, #tpu.memory_space<vmem>>, %arg5: memref<256x128xbf16, #tpu.memory_space<vmem>>) attributes {dimension_semantics = [#tpu.dimension_semantics<parallel>, #tpu.dimension_semantics<parallel>], iteration_bounds = array<i64: 4, 1>, scalar_prefetch = 0 : i64, scratch_operands = 0 : i64, tpu.core_type = #tpu.core_type<tc>, window_params = [{transform_indices = @transform_0, window_bounds = array<i64: 256, 256>}, {transform_indices = @transform_1, window_bounds = array<i64: 256, 128>}, {transform_indices = @transform_2, window_bounds = array<i64: 1, 128>}, {transform_indices = @transform_3, window_bounds = array<i64: 256, 128>}]} {
    %c0 = arith.constant 0 : index
    %c0_0 = arith.constant 0 : index
    %0 = vector.load %arg2[%c0, %c0_0] : memref<256x256xbf16, #tpu.memory_space<vmem>>, vector<256x256xbf16>
    %c0_1 = arith.constant 0 : index
    %c0_2 = arith.constant 0 : index
    %1 = vector.load %arg3[%c0_1, %c0_2] : memref<256x128xbf16, #tpu.memory_space<vmem>>, vector<256x128xbf16>
    %cst = arith.constant dense<0.000000e+00> : vector<256x128xf32>
    %2 = tpu.matmul %0, %1, %cst {dimension_numbers = #tpu.dot_dimension_numbers<[1], [0], [0], [1], [0, 0, 1, 1], [], []>} : vector<256x256xbf16>, vector<256x128xbf16>, vector<256x128xf32> -> vector<256x128xf32>
    %c0_3 = arith.constant 0 : index
    %c0_4 = arith.constant 0 : index
    %3 = vector.load %arg4[%c0_3, %c0_4] : memref<1x128xf32, #tpu.memory_space<vmem>>, vector<1x128xf32>
    %4 = vector.broadcast %3 : vector<1x128xf32> to vector<256x128xf32>
    %5 = arith.addf %2, %4 : vector<256x128xf32>
    %cst_5 = arith.constant 0.000000e+00 : f32
    %6 = vector.broadcast %cst_5 : f32 to vector<256x128xf32>
    %7 = arith.maximumf %5, %6 : vector<256x128xf32>
    %8 = arith.truncf %7 : vector<256x128xf32> to vector<256x128xbf16>
    %c0_6 = arith.constant 0 : index
    %c0_7 = arith.constant 0 : index
    %9 = vector.load %arg5[%c0_6, %c0_7] : memref<256x128xbf16, #tpu.memory_space<vmem>>, vector<256x128xbf16>
    tpu.vector_store %arg5[%c0_6, %c0_7], %8 {strides = array<i32>} : memref<256x128xbf16, #tpu.memory_space<vmem>>, vector<256x128xbf16>,
    return
  }
  func.func @transform_0(%arg0: i32, %arg1: i32) -> (i32, i32) {
    %c0_i32 = arith.constant 0 : i32
    %c0_i32_0 = arith.constant 0 : i32
    return %arg0, %c0_i32 : i32, i32
  }
  func.func @transform_1(%arg0: i32, %arg1: i32) -> (i32, i32) {
    %c0_i32 = arith.constant 0 : i32
    %c0_i32_0 = arith.constant 0 : i32
    return %c0_i32, %arg1 : i32, i32
  }
  func.func @transform_2(%arg0: i32, %arg1: i32) -> (i32, i32) {
    %c0_i32 = arith.constant 0 : i32
    %c0_i32_0 = arith.constant 0 : i32
    return %c0_i32, %arg1 : i32, i32
  }
  func.func @transform_3(%arg0: i32, %arg1: i32) -> (i32, i32) {
    %c0_i32 = arith.constant 0 : i32
    return %arg0, %arg1 : i32, i32
  }
}

module attributes {stable_mosaic.version = 11 : i64} {
  func.func @_conv_matmul_kernel(%arg0: i32, %arg1: i32, %arg2: memref<128x1024xbf16, #tpu.memory_space<vmem>>, %arg3: memref<1024x128xbf16, #tpu.memory_space<vmem>>, %arg4: memref<1x128xf32, #tpu.memory_space<vmem>>, %arg5: memref<128x128xbf16, #tpu.memory_space<vmem>>) attributes {dimension_semantics = [#tpu.dimension_semantics<parallel>, #tpu.dimension_semantics<parallel>], iteration_bounds = array<i64: 4, 1>, scalar_prefetch = 0 : i64, scratch_operands = 0 : i64, tpu.core_type = #tpu.core_type<tc>, window_params = [{transform_indices = @transform_0, window_bounds = array<i64: 128, 1024>}, {transform_indices = @transform_1, window_bounds = array<i64: 1024, 128>}, {transform_indices = @transform_2, window_bounds = array<i64: 1, 128>}, {transform_indices = @transform_3, window_bounds = array<i64: 128, 128>}]} {
    %c0 = arith.constant 0 : index
    %c0_0 = arith.constant 0 : index
    %0 = vector.load %arg2[%c0, %c0_0] : memref<128x1024xbf16, #tpu.memory_space<vmem>>, vector<128x1024xbf16>
    %c0_1 = arith.constant 0 : index
    %c0_2 = arith.constant 0 : index
    %1 = vector.load %arg3[%c0_1, %c0_2] : memref<1024x128xbf16, #tpu.memory_space<vmem>>, vector<1024x128xbf16>
    %cst = arith.constant dense<0.000000e+00> : vector<128x128xf32>
    %2 = tpu.matmul %0, %1, %cst {dimension_numbers = #tpu.dot_dimension_numbers<[1], [0], [0], [1], [0, 0, 1, 1], [], []>} : vector<128x1024xbf16>, vector<1024x128xbf16>, vector<128x128xf32> -> vector<128x128xf32>
    %c0_3 = arith.constant 0 : index
    %c0_4 = arith.constant 0 : index
    %3 = vector.load %arg4[%c0_3, %c0_4] : memref<1x128xf32, #tpu.memory_space<vmem>>, vector<1x128xf32>
    %4 = vector.broadcast %3 : vector<1x128xf32> to vector<128x128xf32>
    %5 = arith.addf %2, %4 : vector<128x128xf32>
    %cst_5 = arith.constant 0.000000e+00 : f32
    %6 = vector.broadcast %cst_5 : f32 to vector<128x128xf32>
    %7 = arith.maximumf %5, %6 : vector<128x128xf32>
    %8 = arith.truncf %7 : vector<128x128xf32> to vector<128x128xbf16>
    %c0_6 = arith.constant 0 : index
    %c0_7 = arith.constant 0 : index
    %9 = vector.load %arg5[%c0_6, %c0_7] : memref<128x128xbf16, #tpu.memory_space<vmem>>, vector<128x128xbf16>
    tpu.vector_store %arg5[%c0_6, %c0_7], %8 {strides = array<i32>} : memref<128x128xbf16, #tpu.memory_space<vmem>>, vector<128x128xbf16>,
    return
  }
  func.func @transform_0(%arg0: i32, %arg1: i32) -> (i32, i32) {
    %c0_i32 = arith.constant 0 : i32
    %c0_i32_0 = arith.constant 0 : i32
    return %arg0, %c0_i32 : i32, i32
  }
  func.func @transform_1(%arg0: i32, %arg1: i32) -> (i32, i32) {
    %c0_i32 = arith.constant 0 : i32
    %c0_i32_0 = arith.constant 0 : i32
    return %c0_i32, %arg1 : i32, i32
  }
  func.func @transform_2(%arg0: i32, %arg1: i32) -> (i32, i32) {
    %c0_i32 = arith.constant 0 : i32
    %c0_i32_0 = arith.constant 0 : i32
    return %c0_i32, %arg1 : i32, i32
  }
  func.func @transform_3(%arg0: i32, %arg1: i32) -> (i32, i32) {
    %c0_i32 = arith.constant 0 : i32
    return %arg0, %arg1 : i32, i32
  }
}

module attributes {stable_mosaic.version = 11 : i64} {
  func.func @_conv_matmul_kernel(%arg0: i32, %arg1: i32, %arg2: memref<128x2048xbf16, #tpu.memory_space<vmem>>, %arg3: memref<2048x128xbf16, #tpu.memory_space<vmem>>, %arg4: memref<1x128xf32, #tpu.memory_space<vmem>>, %arg5: memref<128x128xbf16, #tpu.memory_space<vmem>>) attributes {dimension_semantics = [#tpu.dimension_semantics<parallel>, #tpu.dimension_semantics<parallel>], iteration_bounds = array<i64: 1, 2>, scalar_prefetch = 0 : i64, scratch_operands = 0 : i64, tpu.core_type = #tpu.core_type<tc>, window_params = [{transform_indices = @transform_0, window_bounds = array<i64: 128, 2048>}, {transform_indices = @transform_1, window_bounds = array<i64: 2048, 128>}, {transform_indices = @transform_2, window_bounds = array<i64: 1, 128>}, {transform_indices = @transform_3, window_bounds = array<i64: 128, 128>}]} {
    %c0 = arith.constant 0 : index
    %c0_0 = arith.constant 0 : index
    %0 = vector.load %arg2[%c0, %c0_0] : memref<128x2048xbf16, #tpu.memory_space<vmem>>, vector<128x2048xbf16>
    %c0_1 = arith.constant 0 : index
    %c0_2 = arith.constant 0 : index
    %1 = vector.load %arg3[%c0_1, %c0_2] : memref<2048x128xbf16, #tpu.memory_space<vmem>>, vector<2048x128xbf16>
    %cst = arith.constant dense<0.000000e+00> : vector<128x128xf32>
    %2 = tpu.matmul %0, %1, %cst {dimension_numbers = #tpu.dot_dimension_numbers<[1], [0], [0], [1], [0, 0, 1, 1], [], []>} : vector<128x2048xbf16>, vector<2048x128xbf16>, vector<128x128xf32> -> vector<128x128xf32>
    %c0_3 = arith.constant 0 : index
    %c0_4 = arith.constant 0 : index
    %3 = vector.load %arg4[%c0_3, %c0_4] : memref<1x128xf32, #tpu.memory_space<vmem>>, vector<1x128xf32>
    %4 = vector.broadcast %3 : vector<1x128xf32> to vector<128x128xf32>
    %5 = arith.addf %2, %4 : vector<128x128xf32>
    %cst_5 = arith.constant 0.000000e+00 : f32
    %6 = vector.broadcast %cst_5 : f32 to vector<128x128xf32>
    %7 = arith.maximumf %5, %6 : vector<128x128xf32>
    %8 = arith.truncf %7 : vector<128x128xf32> to vector<128x128xbf16>
    %c0_6 = arith.constant 0 : index
    %c0_7 = arith.constant 0 : index
    %9 = vector.load %arg5[%c0_6, %c0_7] : memref<128x128xbf16, #tpu.memory_space<vmem>>, vector<128x128xbf16>
    tpu.vector_store %arg5[%c0_6, %c0_7], %8 {strides = array<i32>} : memref<128x128xbf16, #tpu.memory_space<vmem>>, vector<128x128xbf16>,
    return
  }
  func.func @transform_0(%arg0: i32, %arg1: i32) -> (i32, i32) {
    %c0_i32 = arith.constant 0 : i32
    %c0_i32_0 = arith.constant 0 : i32
    return %arg0, %c0_i32 : i32, i32
  }
  func.func @transform_1(%arg0: i32, %arg1: i32) -> (i32, i32) {
    %c0_i32 = arith.constant 0 : i32
    %c0_i32_0 = arith.constant 0 : i32
    return %c0_i32, %arg1 : i32, i32
  }
  func.func @transform_2(%arg0: i32, %arg1: i32) -> (i32, i32) {
    %c0_i32 = arith.constant 0 : i32
    %c0_i32_0 = arith.constant 0 : i32
    return %c0_i32, %arg1 : i32, i32
  }
  func.func @transform_3(%arg0: i32, %arg1: i32) -> (i32, i32) {
    %c0_i32 = arith.constant 0 : i32
    return %arg0, %arg1 : i32, i32
  }
}

module attributes {stable_mosaic.version = 11 : i64} {
  func.func @_conv4_head_kernel(%arg0: i32, %arg1: memref<32x4096xbf16, #tpu.memory_space<vmem>>, %arg2: memref<4096x512xbf16, #tpu.memory_space<vmem>>, %arg3: memref<1x512xf32, #tpu.memory_space<vmem>>, %arg4: memref<16x512xf32, #tpu.memory_space<vmem>>, %arg5: memref<1x1xf32, #tpu.memory_space<smem>>, %arg6: memref<2x1xf32, #tpu.memory_space<vmem>>) attributes {dimension_semantics = [#tpu.dimension_semantics<arbitrary>], iteration_bounds = array<i64: 1>, scalar_prefetch = 0 : i64, scratch_operands = 0 : i64, tpu.core_type = #tpu.core_type<tc>, window_params = [{pipeline_mode = #tpu.pipeline_mode<synchronous>, transform_indices = @transform_0, window_bounds = array<i64: 32, 4096>}, {pipeline_mode = #tpu.pipeline_mode<synchronous>, transform_indices = @transform_1, window_bounds = array<i64: 4096, 512>}, {pipeline_mode = #tpu.pipeline_mode<synchronous>, transform_indices = @transform_2, window_bounds = array<i64: 1, 512>}, {pipeline_mode = #tpu.pipeline_mode<synchronous>, transform_indices = @transform_3, window_bounds = array<i64: 16, 512>}, {transform_indices = @transform_4, window_bounds = array<i64: 1, 1>}, {pipeline_mode = #tpu.pipeline_mode<synchronous>, transform_indices = @transform_5, window_bounds = array<i64: 2, 1>}]} {
    %c0 = arith.constant 0 : index
    %c0_0 = arith.constant 0 : index
    %0 = vector.load %arg1[%c0, %c0_0] : memref<32x4096xbf16, #tpu.memory_space<vmem>>, vector<32x4096xbf16>
    %c0_1 = arith.constant 0 : index
    %c0_2 = arith.constant 0 : index
    %1 = vector.load %arg2[%c0_1, %c0_2] : memref<4096x512xbf16, #tpu.memory_space<vmem>>, vector<4096x512xbf16>
    %cst = arith.constant dense<0.000000e+00> : vector<32x512xf32>
    %2 = tpu.matmul %0, %1, %cst {dimension_numbers = #tpu.dot_dimension_numbers<[1], [0], [0], [1], [0, 0, 1, 1], [], []>} : vector<32x4096xbf16>, vector<4096x512xbf16>, vector<32x512xf32> -> vector<32x512xf32>
    %c0_3 = arith.constant 0 : index
    %c0_4 = arith.constant 0 : index
    %3 = vector.load %arg3[%c0_3, %c0_4] : memref<1x512xf32, #tpu.memory_space<vmem>>, vector<1x512xf32>
    %4 = vector.broadcast %3 : vector<1x512xf32> to vector<32x512xf32>
    %5 = arith.addf %2, %4 : vector<32x512xf32>
    %cst_5 = arith.constant 0.000000e+00 : f32
    %6 = vector.broadcast %cst_5 : f32 to vector<32x512xf32>
    %7 = arith.maximumf %5, %6 : vector<32x512xf32>
    %8 = vector.shape_cast %7 : vector<32x512xf32> to vector<2x16x512xf32>
    %c0_6 = arith.constant 0 : index
    %c0_7 = arith.constant 0 : index
    %9 = vector.load %arg4[%c0_6, %c0_7] : memref<16x512xf32, #tpu.memory_space<vmem>>, vector<16x512xf32>
    %10 = vector.shape_cast %9 : vector<16x512xf32> to vector<1x16x512xf32>
    %11 = vector.broadcast %10 : vector<1x16x512xf32> to vector<2x16x512xf32>
    %12 = arith.mulf %8, %11 : vector<2x16x512xf32>
    %cst_8 = arith.constant dense<0.000000e+00> : vector<2x16xf32>
    %13 = vector.multi_reduction <add>, %12, %cst_8 [2] : vector<2x16x512xf32> to vector<2x16xf32>
    %cst_9 = arith.constant dense<0.000000e+00> : vector<2xf32>
    %14 = vector.multi_reduction <add>, %13, %cst_9 [1] : vector<2x16xf32> to vector<2xf32>
    %15 = vector.shape_cast %14 : vector<2xf32> to vector<2x1xf32>
    %c0_10 = arith.constant 0 : index
    %c0_11 = arith.constant 0 : index
    %16 = memref.load %arg5[%c0_10, %c0_11] : memref<1x1xf32, #tpu.memory_space<smem>>
    %17 = vector.broadcast %16 : f32 to vector<2x1xf32>
    %18 = arith.addf %15, %17 : vector<2x1xf32>
    %19 = arith.negf %18 : vector<2x1xf32>
    %20 = math.exp %19 : vector<2x1xf32>
    %cst_12 = arith.constant 1.000000e+00 : f32
    %21 = vector.broadcast %cst_12 : f32 to vector<2x1xf32>
    %22 = arith.addf %21, %20 : vector<2x1xf32>
    %23 = arith.divf %21, %22 : vector<2x1xf32>
    %c0_13 = arith.constant 0 : index
    %c0_14 = arith.constant 0 : index
    %24 = vector.load %arg6[%c0_13, %c0_14] : memref<2x1xf32, #tpu.memory_space<vmem>>, vector<2x1xf32>
    tpu.vector_store %arg6[%c0_13, %c0_14], %23 {strides = array<i32>} : memref<2x1xf32, #tpu.memory_space<vmem>>, vector<2x1xf32>,
    return
  }
  func.func @transform_0(%arg0: i32) -> (i32, i32) {
    %c0_i32 = arith.constant 0 : i32
    %c0_i32_0 = arith.constant 0 : i32
    %c0_i32_1 = arith.constant 0 : i32
    return %c0_i32, %c0_i32_0 : i32, i32
  }
  func.func @transform_1(%arg0: i32) -> (i32, i32) {
    %c0_i32 = arith.constant 0 : i32
    %c0_i32_0 = arith.constant 0 : i32
    %c0_i32_1 = arith.constant 0 : i32
    return %c0_i32, %c0_i32_0 : i32, i32
  }
  func.func @transform_2(%arg0: i32) -> (i32, i32) {
    %c0_i32 = arith.constant 0 : i32
    %c0_i32_0 = arith.constant 0 : i32
    %c0_i32_1 = arith.constant 0 : i32
    return %c0_i32, %c0_i32_0 : i32, i32
  }
  func.func @transform_3(%arg0: i32) -> (i32, i32) {
    %c0_i32 = arith.constant 0 : i32
    %c0_i32_0 = arith.constant 0 : i32
    %c0_i32_1 = arith.constant 0 : i32
    return %c0_i32, %c0_i32_0 : i32, i32
  }
  func.func @transform_4(%arg0: i32) -> (i32, i32) {
    %c0_i32 = arith.constant 0 : i32
    %c0_i32_0 = arith.constant 0 : i32
    %c0_i32_1 = arith.constant 0 : i32
    return %c0_i32, %c0_i32_0 : i32, i32
  }
  func.func @transform_5(%arg0: i32) -> (i32, i32) {
    %c0_i32 = arith.constant 0 : i32
    %c0_i32_0 = arith.constant 0 : i32
    %c0_i32_1 = arith.constant 0 : i32
    return %c0_i32, %c0_i32_0 : i32, i32
  }
}

</mosaic_0001>

<bundles_post_ra>
// kernel: discriminator_forward.4
= control target key start
LH: loop header
LB: loop body
LE: loop exit
PB: predicated region body
PF: predicated region fallthrough
CT: control target
= control target key end

     0   :  { %s1494_s12 = smov 0   ;;  %s1496_s13 = smov 0   ;;  %s1668_s0 = inlined_call_operand.vmem [shape: bf16[1024,256], index: 0, kind: input, shape index: {}]   ;;  %s1669_s1 = inlined_call_operand.vmem [shape: bf16[256,128], index: 1, kind: input, shape index: {}]   ;;  %s1670_s2 = inlined_call_operand.vmem [shape: f32[1,128], index: 2, kind: input, shape index: {}]   ;;  %s1671_s3 = inlined_call_operand.vmem [shape: bf16[1024,128], index: 3, kind: output, shape index: {}]  }
   0x1   :  { %s1498_s14 = smov 0  }
   0x2 LB: > { %s25_s15 = sadd.s32 1, %s1468_s13  ;;  %p1017_p0 = scmp.ge.s32.totalorder %s1472_s14, 1  ;;  %s1472_s14 = sphi %s1498_s14, %s13_s14   ;;  %s1468_s13 = sphi %s1496_s13, %s1673_s13   ;;  %s1464_s12 = sphi %s1494_s12, %s1672_s12  }
   0x3   : > { %p27_p1 = scmp.ge.s32.totalorder %s25_s15, 4  ;;  %p170_p2 = scmp.lt.s32.totalorder %s1472_s14, 5 }
   0x5   : > { %s1675_s15 = smov (%p27_p1, %s25_s15), 0  ;;  %p171_p3 = pnand %p1017_p0, %p170_p2 }
   0x6   : > { %v1386_v0 = vld [vmem:[%s1669_s1 + $0x40] sm:$0xff] (!%p171_p3)   ;;  %s1018_s18 = sshll.u32 (!%p171_p3), %s1464_s12, 5  ;;  %v1388_v2 = vld [vmem:[%s1669_s1 + $0x48] sm:$0xff] (!%p171_p3)   ;;  %v1390_v4 = vld [vmem:[%s1669_s1 + $0x50] sm:$0xff] (!%p171_p3)  }
   0x7   : > { %174 = sbr.rel (%p171_p3) target bundleno = 320 (0x140), region = 32  ;;  %v1387_v1 = vld [vmem:[%s1669_s1] sm:$0xff] (!%p171_p3)   ;;  %1234 = vmatprep.subr.bf16.mxu0 (!%p171_p3), %v1386_v0  ;;  %1346 = vmatprep.subr.bf16.mxu1 (!%p171_p3), %v1386_v0  ;;  %v1389_v3 = vld [vmem:[%s1669_s1 + $0x8] sm:$0xff] (!%p171_p3)   ;;  %p206_p4 = scmp.lt.s32.totalorder (!%p171_p3), %s1018_s18, 127  ;;  %v1391_v5 = vld [vmem:[%s1669_s1 + $0x10] sm:$0xff] (!%p171_p3)  }
   0x8   : > { %1235 = vmatpush3.bf16.msra.mxu0 (!%p171_p3), %v1387_v1  ;;  %1354 = vmatpush3.bf16.msra.mxu1 (!%p171_p3), %v1387_v1  ;;  %v1392_v6 = vld [vmem:[%s1669_s1 + $0x58] sm:$0xff] (!%p171_p3)   ;;  %v1394_v8 = vld [vmem:[%s1669_s1 + $0x60] sm:$0xff] (!%p171_p3)   ;;  %v1396_v10 = vld [vmem:[%s1669_s1 + $0x68] sm:$0xff] (!%p171_p3)  }
   0x9   : > { %1236 = vmatprep.subr.bf16.mxu0 (!%p171_p3), %v1388_v2  ;;  %1347 = vmatprep.subr.bf16.mxu1 (!%p171_p3), %v1388_v2  ;;  %v1393_v7 = vld [vmem:[%s1669_s1 + $0x18] sm:$0xff] (!%p171_p3)   ;;  %v1395_v9 = vld [vmem:[%s1669_s1 + $0x20] sm:$0xff] (!%p171_p3)   ;;  %v1397_v13 = vld [vmem:[%s1669_s1 + $0x28] sm:$0xff] (!%p171_p3)  }
   0xa   : > { %v1398_v14 = vld [vmem:[%s1669_s1 + $0x70] sm:$0xff] (!%p171_p3)   ;;  %v1400_v16 = vld [vmem:[%s1669_s1 + $0x78] sm:$0xff] (!%p171_p3)   ;;  %v1603_v50 = vld [vmem:[%s1670_s2] ss:$0 sm:$0xff] (!%p171_p3) }
   0xb   : > { %v1399_v15 = vld [vmem:[%s1669_s1 + $0x30] sm:$0xff] (!%p171_p3)   ;;  %v1401_v17 = vld [vmem:[%s1669_s1 + $0x38] sm:$0xff] (!%p171_p3)  }
   0xc   : > { %1237 = vmatpush3.bf16.msra.mxu0 (!%p171_p3), %v1389_v3  ;;  %1355 = vmatpush3.bf16.msra.mxu1 (!%p171_p3), %v1389_v3 }
   0xd   : > { %1238 = vmatprep.subr.bf16.mxu0 (!%p171_p3), %v1390_v4  ;;  %1348 = vmatprep.subr.bf16.mxu1 (!%p171_p3), %v1390_v4 }
   0xe   : > { %s1677_s18 = smov (!%p206_p4, %s1018_s18), 127 }
   0xf   : > { %s1106_s6 = sshll.u32 %s1677_s18, 3  ;;  %s1022_s5 = sshll.u32 %s1677_s18, 2 }
  0x10   : > { %1239 = vmatpush3.bf16.msra.mxu0 %v1391_v5  ;;  %1356 = vmatpush3.bf16.msra.mxu1 %v1391_v5  ;;  %s1545_s11 = scalar_lea.vmem %s1668_s0, %s1106_s6  ;;  %s1613_s8 = scalar_lea.vmem %s1671_s3, %s1022_s5 }
  0x11   : > { %1240 = vmatprep.subr.bf16.mxu0 %v1392_v6  ;;  %1349 = vmatprep.subr.bf16.mxu1 %v1392_v6  ;;  %v1404_v11 = vld [vmem:[%s1545_s11 + $0x4] ss:$8 sps:$4 sm:$0xff]   ;;  %v1402_v18 = vld [vmem:[%s1545_s11] ss:$8 sps:$4 sm:$0xff]   ;;  %v1408_v20 = vld [vmem:[%s1545_s11 + $0x14] ss:$8 sps:$4 sm:$0xff]  }
  0x12   : > { %v1407_v12 = vld [vmem:[%s1545_s11 + $0x84] ss:$8 sps:$4 sm:$0xff]   ;;  %588 = vmatprep.mubr.bf16.mxu0 %v1404_v11  ;;  %v1405_v19 = vld [vmem:[%s1545_s11 + $0x80] ss:$8 sps:$4 sm:$0xff]   ;;  %v1410_v21 = vld [vmem:[%s1545_s11 + $0x94] ss:$8 sps:$4 sm:$0xff]  }
  0x13   : > { %652 = vmatprep.mubr.bf16.mxu1 %v1407_v12  ;;  %v1412_v22 = vld [vmem:[%s1545_s11 + $0x10] ss:$8 sps:$4 sm:$0xff]   ;;  %v1414_v24 = vld [vmem:[%s1545_s11 + $0x24] ss:$8 sps:$4 sm:$0xff]   ;;  %v1418_v26 = vld [vmem:[%s1545_s11 + $0x20] ss:$8 sps:$4 sm:$0xff]  }
  0x14   : > { %1241 = vmatpush3.bf16.msra.mxu0 %v1393_v7  ;;  %1357 = vmatpush3.bf16.msra.mxu1 %v1393_v7  ;;  %v1413_v23 = vld [vmem:[%s1545_s11 + $0x90] ss:$8 sps:$4 sm:$0xff]   ;;  %v1416_v25 = vld [vmem:[%s1545_s11 + $0xa4] ss:$8 sps:$4 sm:$0xff]   ;;  %v1419_v27 = vld [vmem:[%s1545_s11 + $0xa0] ss:$8 sps:$4 sm:$0xff]  }
  0x15   : > { %1242 = vmatprep.subr.bf16.mxu0 %v1394_v8  ;;  %1350 = vmatprep.subr.bf16.mxu1 %v1394_v8  ;;  %v1420_v28 = vld [vmem:[%s1545_s11 + $0x34] ss:$8 sps:$4 sm:$0xff]   ;;  %v1424_v30 = vld [vmem:[%s1545_s11 + $0x30] ss:$8 sps:$4 sm:$0xff]   ;;  %v1426_v32 = vld [vmem:[%s1545_s11 + $0x44] ss:$8 sps:$4 sm:$0xff]  }
  0x16   : > { %v1422_v29 = vld [vmem:[%s1545_s11 + $0xb4] ss:$8 sps:$4 sm:$0xff]   ;;  %v1425_v31 = vld [vmem:[%s1545_s11 + $0xb0] ss:$8 sps:$4 sm:$0xff]   ;;  %v1428_v33 = vld [vmem:[%s1545_s11 + $0xc4] ss:$8 sps:$4 sm:$0xff]  }
  0x17   : > { %v1430_v34 = vld [vmem:[%s1545_s11 + $0x40] ss:$8 sps:$4 sm:$0xff]   ;;  %v1432_v36 = vld [vmem:[%s1545_s11 + $0x54] ss:$8 sps:$4 sm:$0xff]   ;;  %v1436_v38 = vld [vmem:[%s1545_s11 + $0x50] ss:$8 sps:$4 sm:$0xff]  }
  0x18   : > { %1243 = vmatpush3.bf16.msra.mxu0 %v1395_v9  ;;  %1358 = vmatpush3.bf16.msra.mxu1 %v1395_v9  ;;  %v1431_v35 = vld [vmem:[%s1545_s11 + $0xc0] ss:$8 sps:$4 sm:$0xff]   ;;  %v1434_v37 = vld [vmem:[%s1545_s11 + $0xd4] ss:$8 sps:$4 sm:$0xff]   ;;  %v1437_v39 = vld [vmem:[%s1545_s11 + $0xd0] ss:$8 sps:$4 sm:$0xff]  }
  0x19   : > { %1244 = vmatprep.subr.bf16.mxu0 %v1396_v10  ;;  %1351 = vmatprep.subr.bf16.mxu1 %v1396_v10  ;;  %v1438_v40 = vld [vmem:[%s1545_s11 + $0x64] ss:$8 sps:$4 sm:$0xff]   ;;  %v1442_v42 = vld [vmem:[%s1545_s11 + $0x60] ss:$8 sps:$4 sm:$0xff]   ;;  %v1444_v44 = vld [vmem:[%s1545_s11 + $0x74] ss:$8 sps:$4 sm:$0xff]  }
  0x1a   : > { %v1440_v41 = vld [vmem:[%s1545_s11 + $0xe4] ss:$8 sps:$4 sm:$0xff]   ;;  %v1443_v43 = vld [vmem:[%s1545_s11 + $0xe0] ss:$8 sps:$4 sm:$0xff]   ;;  %v1446_v45 = vld [vmem:[%s1545_s11 + $0xf4] ss:$8 sps:$4 sm:$0xff]  }
  0x1b   : > { %v1448_v46 = vld [vmem:[%s1545_s11 + $0x70] ss:$8 sps:$4 sm:$0xff]  }
  0x1c   : > { %1245 = vmatpush3.bf16.msra.mxu0 %v1397_v13  ;;  %1359 = vmatpush3.bf16.msra.mxu1 %v1397_v13  ;;  %v1449_v47 = vld [vmem:[%s1545_s11 + $0xf0] ss:$8 sps:$4 sm:$0xff]  }
  0x1d   : > { %1246 = vmatprep.subr.bf16.mxu0 %v1398_v14  ;;  %1352 = vmatprep.subr.bf16.mxu1 %v1398_v14 }
  0x20   : > { %1247 = vmatpush3.bf16.msra.mxu0 %v1399_v15  ;;  %1360 = vmatpush3.bf16.msra.mxu1 %v1399_v15 }
  0x21   : > { %1248 = vmatprep.subr.bf16.mxu0 %v1400_v16  ;;  %1353 = vmatprep.subr.bf16.mxu1 %v1400_v16 }
  0x24   : > { %1249 = vmatpush3.bf16.msra.mxu0 %v1401_v17  ;;  %1361 = vmatpush3.bf16.msra.mxu1 %v1401_v17 }
  0x27   : > { %589 = vmatmul.mubr.bf16.vlgmr.msra.gmra.mrb[0].mxu0 %v1402_v18  ;;  %653 = vmatmul.mubr.bf16.vlgmr.msra.gmra.mrb[0].mxu1 %v1405_v19 }
  0x28   : > { %596 = vmatprep.mubr.bf16.mxu0 %v1408_v20  ;;  %660 = vmatprep.mubr.bf16.mxu1 %v1410_v21 }
  0x2f   : > { %597 = vmatmul.mubr.bf16.gmra.mrb[4].mxu0 %v1412_v22  ;;  %661 = vmatmul.mubr.bf16.gmra.mrb[4].mxu1 %v1413_v23 }
  0x30   : > { %604 = vmatprep.mubr.bf16.mxu0 %v1414_v24  ;;  %668 = vmatprep.mubr.bf16.mxu1 %v1416_v25 }
  0x37   : > { %605 = vmatmul.mubr.bf16.gmra.mrb[8].mxu0 %v1418_v26  ;;  %669 = vmatmul.mubr.bf16.gmra.mrb[8].mxu1 %v1419_v27 }
  0x38   : > { %612 = vmatprep.mubr.bf16.mxu0 %v1420_v28  ;;  %676 = vmatprep.mubr.bf16.mxu1 %v1422_v29 }
  0x3f   : > { %613 = vmatmul.mubr.bf16.gmra.mrb[12].mxu0 %v1424_v30  ;;  %677 = vmatmul.mubr.bf16.gmra.mrb[12].mxu1 %v1425_v31 }
  0x40   : > { %620 = vmatprep.mubr.bf16.mxu0 %v1426_v32  ;;  %684 = vmatprep.mubr.bf16.mxu1 %v1428_v33 }
  0x47   : > { %621 = vmatmul.mubr.bf16.gmra.mrb[16].mxu0 %v1430_v34  ;;  %685 = vmatmul.mubr.bf16.gmra.mrb[16].mxu1 %v1431_v35 }
  0x48   : > { %628 = vmatprep.mubr.bf16.mxu0 %v1432_v36  ;;  %692 = vmatprep.mubr.bf16.mxu1 %v1434_v37 }
  0x4f   : > { %629 = vmatmul.mubr.bf16.gmra.mrb[20].mxu0 %v1436_v38  ;;  %693 = vmatmul.mubr.bf16.gmra.mrb[20].mxu1 %v1437_v39 }
  0x50   : > { %636 = vmatprep.mubr.bf16.mxu0 %v1438_v40  ;;  %700 = vmatprep.mubr.bf16.mxu1 %v1440_v41 }
  0x57   : > { %637 = vmatmul.mubr.bf16.gmra.mrb[24].mxu0 %v1442_v42  ;;  %701 = vmatmul.mubr.bf16.gmra.mrb[24].mxu1 %v1443_v43 }
  0x58   : > { %644 = vmatprep.mubr.bf16.mxu0 %v1444_v44  ;;  %708 = vmatprep.mubr.bf16.mxu1 %v1446_v45 }
  0x5f   : > { %645 = vmatmul.mubr.bf16.gmra.mrb[28].mxu0 %v1448_v46  ;;  %709 = vmatmul.mubr.bf16.gmra.mrb[28].mxu1 %v1449_v47 }
  0xfa   : > { %v1250_v48 = vpop.f32.mrb[0].mxu0  ;;  %v1298_v49 = vpop.f32.mrb[0].mxu1 }
  0xfb   : > { %v1251_v51 = vpop.f32.mrb[1].mxu0  ;;  %v1299_v52 = vpop.f32.mrb[1].mxu1 }
  0xfc   : > { %v1252_v53 = vadd.f32 %v1251_v51, %v1250_v48  ;;  %v1300_v54 = vadd.f32 %v1299_v52, %v1298_v49  ;;  %v1253_v55 = vpop.f32.mrb[2].mxu0  ;;  %v1301_v56 = vpop.f32.mrb[2].mxu1 }
  0xfd   : > { %v1254_v57 = vpop.f32.mrb[3].mxu0  ;;  %v1302_v58 = vpop.f32.mrb[3].mxu1 }
  0xfe   : > { %v591_v59 = vadd.f32 %v1252_v53, %v1603_v50  ;;  %v655_v60 = vadd.f32 %v1300_v54, %v1603_v50  ;;  %v1255_v61 = vadd.f32 %v1254_v57, %v1253_v55  ;;  %v1303_v62 = vadd.f32 %v1302_v58, %v1301_v56 }
 0x100   : > { %v594_v63 = vadd.f32 %v1255_v61, %v1603_v50  ;;  %v658_v0 = vadd.f32 %v1303_v62, %v1603_v50  ;;  %v717_v1 = vmax.f32 %v591_v59, 0.0  ;;  %v733_v2 = vmax.f32 %v655_v60, 0.0 }
 0x102   : > { %v718_v3 = vmax.f32 %v594_v63, 0.0  ;;  %v734_v4 = vmax.f32 %v658_v0, 0.0  ;;  %v1256_v5 = vpop.f32.mrb[4].mxu0  ;;  %v1304_v6 = vpop.f32.mrb[4].mxu1 }
 0x103   : > { %v1257_v7 = vpop.f32.mrb[5].mxu0  ;;  %v1305_v8 = vpop.f32.mrb[5].mxu1 }
 0x104   : > { %v1142_v9 = vpack.c.bf16 %v718_v3, %v717_v1  ;;  %v1182_v10 = vpack.c.bf16 %v734_v4, %v733_v2  ;;  %v1258_v11 = vadd.f32 %v1257_v7, %v1256_v5  ;;  %v1306_v12 = vadd.f32 %v1305_v8, %v1304_v6  ;;  %v1259_v13 = vpop.f32.mrb[6].mxu0  ;;  %v1307_v14 = vpop.f32.mrb[6].mxu1 }
 0x105   : > { %v1260_v15 = vpop.f32.mrb[7].mxu0  ;;  %v1308_v16 = vpop.f32.mrb[7].mxu1 }
 0x106   : > { %1143 = vst [vmem:[%s1613_s8] sm:$0xff] %v1142_v9   ;;  %1226 = vst [vmem:[%s1613_s8 + $0x40] sm:$0xff] %v1182_v10   ;;  %v599_v17 = vadd.f32 %v1258_v11, %v1603_v50  ;;  %v663_v18 = vadd.f32 %v1306_v12, %v1603_v50  ;;  %v1261_v19 = vadd.f32 %v1260_v15, %v1259_v13 }
 0x107   : > { %v1309_v20 = vadd.f32 %v1308_v16, %v1307_v14 }
 0x108   : > { %v602_v21 = vadd.f32 %v1261_v19, %v1603_v50  ;;  %v719_v23 = vmax.f32 %v599_v17, 0.0  ;;  %v735_v24 = vmax.f32 %v663_v18, 0.0 }
 0x109   : > { %v666_v22 = vadd.f32 %v1309_v20, %v1603_v50 }
 0x10a   : > { %v720_v25 = vmax.f32 %v602_v21, 0.0  ;;  %v1262_v27 = vpop.f32.mrb[8].mxu0  ;;  %v1310_v28 = vpop.f32.mrb[8].mxu1 }
 0x10b   : > { %v736_v26 = vmax.f32 %v666_v22, 0.0  ;;  %v1263_v29 = vpop.f32.mrb[9].mxu0  ;;  %v1311_v30 = vpop.f32.mrb[9].mxu1 }
 0x10c   : > { %v1147_v31 = vpack.c.bf16 %v720_v25, %v719_v23  ;;  %v1264_v33 = vadd.f32 %v1263_v29, %v1262_v27  ;;  %v1312_v34 = vadd.f32 %v1311_v30, %v1310_v28  ;;  %v1265_v35 = vpop.f32.mrb[10].mxu0  ;;  %v1313_v36 = vpop.f32.mrb[10].mxu1 }
 0x10d   : > { %v1187_v32 = vpack.c.bf16 %v736_v26, %v735_v24  ;;  %v1266_v37 = vpop.f32.mrb[11].mxu0  ;;  %v1314_v38 = vpop.f32.mrb[11].mxu1 }
 0x10e   : > { %1219 = vst [vmem:[%s1613_s8 + $0x8] sm:$0xff] %v1147_v31   ;;  %v607_v39 = vadd.f32 %v1264_v33, %v1603_v50  ;;  %v671_v40 = vadd.f32 %v1312_v34, %v1603_v50  ;;  %v1267_v41 = vadd.f32 %v1266_v37, %v1265_v35  ;;  %v1315_v42 = vadd.f32 %v1314_v38, %v1313_v36 }
 0x10f   : > { %1227 = vst [vmem:[%s1613_s8 + $0x48] sm:$0xff] %v1187_v32  }
 0x110   : > { %v610_v43 = vadd.f32 %v1267_v41, %v1603_v50  ;;  %v674_v44 = vadd.f32 %v1315_v42, %v1603_v50  ;;  %v721_v45 = vmax.f32 %v607_v39, 0.0  ;;  %v737_v46 = vmax.f32 %v671_v40, 0.0 }
 0x112   : > { %v722_v47 = vmax.f32 %v610_v43, 0.0  ;;  %v738_v48 = vmax.f32 %v674_v44, 0.0  ;;  %v1268_v49 = vpop.f32.mrb[12].mxu0  ;;  %v1316_v51 = vpop.f32.mrb[12].mxu1 }
 0x113   : > { %v1269_v52 = vpop.f32.mrb[13].mxu0  ;;  %v1317_v53 = vpop.f32.mrb[13].mxu1 }
 0x114   : > { %v1152_v54 = vpack.c.bf16 %v722_v47, %v721_v45  ;;  %v1192_v55 = vpack.c.bf16 %v738_v48, %v737_v46  ;;  %v1270_v56 = vadd.f32 %v1269_v52, %v1268_v49  ;;  %v1318_v57 = vadd.f32 %v1317_v53, %v1316_v51  ;;  %v1271_v58 = vpop.f32.mrb[14].mxu0  ;;  %v1319_v59 = vpop.f32.mrb[14].mxu1 }
 0x115   : > { %v1272_v60 = vpop.f32.mrb[15].mxu0  ;;  %v1320_v61 = vpop.f32.mrb[15].mxu1 }
 0x116   : > { %1220 = vst [vmem:[%s1613_s8 + $0x10] sm:$0xff] %v1152_v54   ;;  %1228 = vst [vmem:[%s1613_s8 + $0x50] sm:$0xff] %v1192_v55   ;;  %v615_v62 = vadd.f32 %v1270_v56, %v1603_v50  ;;  %v679_v63 = vadd.f32 %v1318_v57, %v1603_v50  ;;  %v1273_v0 = vadd.f32 %v1272_v60, %v1271_v58 }
 0x117   : > { %v1321_v1 = vadd.f32 %v1320_v61, %v1319_v59 }
 0x118   : > { %v618_v2 = vadd.f32 %v1273_v0, %v1603_v50  ;;  %v723_v4 = vmax.f32 %v615_v62, 0.0  ;;  %v739_v5 = vmax.f32 %v679_v63, 0.0 }
 0x119   : > { %v682_v3 = vadd.f32 %v1321_v1, %v1603_v50 }
 0x11a   : > { %v724_v6 = vmax.f32 %v618_v2, 0.0  ;;  %v1274_v8 = vpop.f32.mrb[16].mxu0  ;;  %v1322_v9 = vpop.f32.mrb[16].mxu1 }
 0x11b   : > { %v740_v7 = vmax.f32 %v682_v3, 0.0  ;;  %v1275_v10 = vpop.f32.mrb[17].mxu0  ;;  %v1323_v11 = vpop.f32.mrb[17].mxu1 }
 0x11c   : > { %v1157_v12 = vpack.c.bf16 %v724_v6, %v723_v4  ;;  %v1276_v14 = vadd.f32 %v1275_v10, %v1274_v8  ;;  %v1324_v15 = vadd.f32 %v1323_v11, %v1322_v9  ;;  %v1277_v16 = vpop.f32.mrb[18].mxu0  ;;  %v1325_v17 = vpop.f32.mrb[18].mxu1 }
 0x11d   : > { %v1197_v13 = vpack.c.bf16 %v740_v7, %v739_v5  ;;  %v1278_v18 = vpop.f32.mrb[19].mxu0  ;;  %v1326_v19 = vpop.f32.mrb[19].mxu1 }
 0x11e   : > { %1221 = vst [vmem:[%s1613_s8 + $0x18] sm:$0xff] %v1157_v12   ;;  %v623_v20 = vadd.f32 %v1276_v14, %v1603_v50  ;;  %v687_v21 = vadd.f32 %v1324_v15, %v1603_v50  ;;  %v1279_v22 = vadd.f32 %v1278_v18, %v1277_v16  ;;  %v1327_v23 = vadd.f32 %v1326_v19, %v1325_v17 }
 0x11f   : > { %1229 = vst [vmem:[%s1613_s8 + $0x58] sm:$0xff] %v1197_v13  }
 0x120   : > { %v626_v24 = vadd.f32 %v1279_v22, %v1603_v50  ;;  %v690_v25 = vadd.f32 %v1327_v23, %v1603_v50  ;;  %v725_v26 = vmax.f32 %v623_v20, 0.0  ;;  %v741_v27 = vmax.f32 %v687_v21, 0.0 }
 0x122   : > { %v726_v28 = vmax.f32 %v626_v24, 0.0  ;;  %v742_v29 = vmax.f32 %v690_v25, 0.0  ;;  %v1280_v30 = vpop.f32.mrb[20].mxu0  ;;  %v1328_v31 = vpop.f32.mrb[20].mxu1 }
 0x123   : > { %v1281_v32 = vpop.f32.mrb[21].mxu0  ;;  %v1329_v33 = vpop.f32.mrb[21].mxu1 }
 0x124   : > { %v1162_v34 = vpack.c.bf16 %v726_v28, %v725_v26  ;;  %v1202_v35 = vpack.c.bf16 %v742_v29, %v741_v27  ;;  %v1282_v36 = vadd.f32 %v1281_v32, %v1280_v30  ;;  %v1330_v37 = vadd.f32 %v1329_v33, %v1328_v31  ;;  %v1283_v38 = vpop.f32.mrb[22].mxu0  ;;  %v1331_v39 = vpop.f32.mrb[22].mxu1 }
 0x125   : > { %v1284_v40 = vpop.f32.mrb[23].mxu0  ;;  %v1332_v41 = vpop.f32.mrb[23].mxu1 }
 0x126   : > { %1222 = vst [vmem:[%s1613_s8 + $0x20] sm:$0xff] %v1162_v34   ;;  %1230 = vst [vmem:[%s1613_s8 + $0x60] sm:$0xff] %v1202_v35   ;;  %v631_v42 = vadd.f32 %v1282_v36, %v1603_v50  ;;  %v695_v43 = vadd.f32 %v1330_v37, %v1603_v50  ;;  %v1285_v44 = vadd.f32 %v1284_v40, %v1283_v38 }
 0x127   : > { %v1333_v45 = vadd.f32 %v1332_v41, %v1331_v39 }
 0x128   : > { %v634_v46 = vadd.f32 %v1285_v44, %v1603_v50  ;;  %v727_v48 = vmax.f32 %v631_v42, 0.0  ;;  %v743_v49 = vmax.f32 %v695_v43, 0.0 }
 0x129   : > { %v698_v47 = vadd.f32 %v1333_v45, %v1603_v50 }
 0x12a   : > { %v728_v51 = vmax.f32 %v634_v46, 0.0  ;;  %v1286_v53 = vpop.f32.mrb[24].mxu0  ;;  %v1334_v54 = vpop.f32.mrb[24].mxu1 }
 0x12b   : > { %v744_v52 = vmax.f32 %v698_v47, 0.0  ;;  %v1287_v55 = vpop.f32.mrb[25].mxu0  ;;  %v1335_v56 = vpop.f32.mrb[25].mxu1 }
 0x12c   : > { %v1167_v57 = vpack.c.bf16 %v728_v51, %v727_v48  ;;  %v1288_v59 = vadd.f32 %v1287_v55, %v1286_v53  ;;  %v1336_v60 = vadd.f32 %v1335_v56, %v1334_v54  ;;  %v1289_v61 = vpop.f32.mrb[26].mxu0  ;;  %v1337_v62 = vpop.f32.mrb[26].mxu1 }
 0x12d   : > { %v1207_v58 = vpack.c.bf16 %v744_v52, %v743_v49  ;;  %v1290_v63 = vpop.f32.mrb[27].mxu0  ;;  %v1338_v0 = vpop.f32.mrb[27].mxu1 }
 0x12e   : > { %1223 = vst [vmem:[%s1613_s8 + $0x28] sm:$0xff] %v1167_v57   ;;  %v639_v1 = vadd.f32 %v1288_v59, %v1603_v50  ;;  %v703_v2 = vadd.f32 %v1336_v60, %v1603_v50  ;;  %v1291_v3 = vadd.f32 %v1290_v63, %v1289_v61  ;;  %v1339_v4 = vadd.f32 %v1338_v0, %v1337_v62 }
 0x12f   : > { %1231 = vst [vmem:[%s1613_s8 + $0x68] sm:$0xff] %v1207_v58  }
 0x130   : > { %v642_v5 = vadd.f32 %v1291_v3, %v1603_v50  ;;  %v706_v6 = vadd.f32 %v1339_v4, %v1603_v50  ;;  %v729_v7 = vmax.f32 %v639_v1, 0.0  ;;  %v745_v8 = vmax.f32 %v703_v2, 0.0 }
 0x132   : > { %v730_v9 = vmax.f32 %v642_v5, 0.0  ;;  %v746_v10 = vmax.f32 %v706_v6, 0.0  ;;  %v1292_v11 = vpop.f32.mrb[28].mxu0  ;;  %v1340_v12 = vpop.f32.mrb[28].mxu1 }
 0x133   : > { %v1293_v13 = vpop.f32.mrb[29].mxu0  ;;  %v1341_v14 = vpop.f32.mrb[29].mxu1 }
 0x134   : > { %v1172_v15 = vpack.c.bf16 %v730_v9, %v729_v7  ;;  %v1212_v16 = vpack.c.bf16 %v746_v10, %v745_v8  ;;  %v1294_v17 = vadd.f32 %v1293_v13, %v1292_v11  ;;  %v1342_v18 = vadd.f32 %v1341_v14, %v1340_v12  ;;  %v1295_v19 = vpop.f32.mrb[30].mxu0  ;;  %v1343_v20 = vpop.f32.mrb[30].mxu1 }
 0x135   : > { %v1296_v21 = vpop.f32.mrb[31].mxu0  ;;  %v1344_v22 = vpop.f32.mrb[31].mxu1 }
 0x136   : > { %1224 = vst [vmem:[%s1613_s8 + $0x30] sm:$0xff] %v1172_v15   ;;  %1232 = vst [vmem:[%s1613_s8 + $0x70] sm:$0xff] %v1212_v16   ;;  %v647_v23 = vadd.f32 %v1294_v17, %v1603_v50  ;;  %v711_v24 = vadd.f32 %v1342_v18, %v1603_v50  ;;  %v1297_v25 = vadd.f32 %v1296_v21, %v1295_v19 }
 0x137   : > { %v1345_v26 = vadd.f32 %v1344_v22, %v1343_v20 }
 0x138   : > { %v650_v27 = vadd.f32 %v1297_v25, %v1603_v50  ;;  %v731_v29 = vmax.f32 %v647_v23, 0.0  ;;  %v747_v30 = vmax.f32 %v711_v24, 0.0 }
 0x139   : > { %v714_v28 = vadd.f32 %v1345_v26, %v1603_v50 }
 0x13a   : > { %v732_v31 = vmax.f32 %v650_v27, 0.0 }
 0x13b   : > { %v748_v32 = vmax.f32 %v714_v28, 0.0 }
 0x13c   : > { %v1177_v33 = vpack.c.bf16 %v732_v31, %v731_v29 }
 0x13d   : > { %v1217_v34 = vpack.c.bf16 %v748_v32, %v747_v30 }
 0x13e   : > { %1225 = vst [vmem:[%s1613_s8 + $0x38] sm:$0xff] %v1177_v33  }
 0x13f   : > { %1233 = vst [vmem:[%s1613_s8 + $0x78] sm:$0xff] %v1217_v34  }
 0x140 PF: > { %s13_s14 = sadd.s32 1, %s1472_s14   ;;  %s1672_s12 = smov %s1468_s13 }
 0x141   : > { %p10_p5 = scmp.ge.s32.totalorder %s13_s14, 6   ;;  %s1673_s13 = smov %s1675_s15 }
 0x143   :  { %12 = sbr.rel (!%p10_p5) target bundleno = 2 (0x2), region = 68 }

// kernel: discriminator_forward.5
= control target key start
LH: loop header
LB: loop body
LE: loop exit
PB: predicated region body
PF: predicated region fallthrough
CT: control target
= control target key end

     0   :  { %s2329_s12 = smov 0   ;;  %s2331_s13 = smov 0   ;;  %s2706_s0 = inlined_call_operand.vmem [shape: bf16[512,1024], index: 0, kind: input, shape index: {}]   ;;  %s2707_s1 = inlined_call_operand.vmem [shape: bf16[1024,128], index: 1, kind: input, shape index: {}]   ;;  %s2708_s2 = inlined_call_operand.vmem [shape: f32[1,128], index: 2, kind: input, shape index: {}]   ;;  %s2709_s3 = inlined_call_operand.vmem [shape: bf16[512,128], index: 3, kind: output, shape index: {}]  }
   0x1   :  { %s2333_s14 = smov 0  }
   0x2 LB: > { %s25_s15 = sadd.s32 1, %s2303_s13  ;;  %p1724_p0 = scmp.ge.s32.totalorder %s2307_s14, 1  ;;  %s2307_s14 = sphi %s2333_s14, %s13_s14   ;;  %s2303_s13 = sphi %s2331_s13, %s2711_s13   ;;  %s2299_s12 = sphi %s2329_s12, %s2710_s12  }
   0x3   : > { %p27_p1 = scmp.ge.s32.totalorder %s25_s15, 4  ;;  %p170_p2 = scmp.lt.s32.totalorder %s2307_s14, 5 }
   0x5   : > { %s2713_s15 = smov (%p27_p1, %s25_s15), 0  ;;  %p171_p3 = pnand %p1724_p0, %p170_p2 }
   0x6   : > { %v2221_v0 = vld [vmem:[%s2707_s1 + $0x40] sm:$0xff] (!%p171_p3)   ;;  %v2225_v4 = vld [vmem:[%s2707_s1 + $0x48] sm:$0xff] (!%p171_p3)   ;;  %v2229_v8 = vld [vmem:[%s2707_s1 + $0x50] sm:$0xff] (!%p171_p3)   ;;  %s1725_s25 = sshll.u32 (!%p171_p3), %s2299_s12, 4 }
   0x7   : > { %174 = sbr.rel (%p171_p3) target bundleno = 386 (0x182), region = 32  ;;  %v2222_v1 = vld [vmem:[%s2707_s1 + $0xc0] sm:$0xff] (!%p171_p3)   ;;  %1941 = vmatprep.subr.bf16.mxu0 (!%p171_p3), %v2221_v0  ;;  %v2226_v5 = vld [vmem:[%s2707_s1 + $0xc8] sm:$0xff] (!%p171_p3)   ;;  %v2230_v9 = vld [vmem:[%s2707_s1 + $0xd0] sm:$0xff] (!%p171_p3)   ;;  %p206_p4 = scmp.lt.s32.totalorder (!%p171_p3), %s1725_s25, 63 }
   0x8   : > { %v2223_v2 = vld [vmem:[%s2707_s1] sm:$0xff] (!%p171_p3)   ;;  %2005 = vmatprep.subr.bf16.mxu1 (!%p171_p3), %v2222_v1  ;;  %v2227_v6 = vld [vmem:[%s2707_s1 + $0x8] sm:$0xff] (!%p171_p3)   ;;  %v2231_v10 = vld [vmem:[%s2707_s1 + $0x10] sm:$0xff] (!%p171_p3)  }
   0x9   : > { %v2224_v3 = vld [vmem:[%s2707_s1 + $0x80] sm:$0xff] (!%p171_p3)   ;;  %1942 = vmatpush3.bf16.msra.mxu0 (!%p171_p3), %v2223_v2  ;;  %v2228_v7 = vld [vmem:[%s2707_s1 + $0x88] sm:$0xff] (!%p171_p3)   ;;  %v2232_v11 = vld [vmem:[%s2707_s1 + $0x90] sm:$0xff] (!%p171_p3)  }
   0xa   : > { %2006 = vmatpush3.bf16.msra.mxu1 (!%p171_p3), %v2224_v3  ;;  %1943 = vmatprep.subr.bf16.mxu0 (!%p171_p3), %v2225_v4  ;;  %v2233_v12 = vld [vmem:[%s2707_s1 + $0x58] sm:$0xff] (!%p171_p3)   ;;  %v2237_v16 = vld [vmem:[%s2707_s1 + $0x60] sm:$0xff] (!%p171_p3)   ;;  %v2241_v20 = vld [vmem:[%s2707_s1 + $0x68] sm:$0xff] (!%p171_p3)  }
   0xb   : > { %2007 = vmatprep.subr.bf16.mxu1 (!%p171_p3), %v2226_v5  ;;  %v2234_v13 = vld [vmem:[%s2707_s1 + $0xd8] sm:$0xff] (!%p171_p3)   ;;  %v2238_v17 = vld [vmem:[%s2707_s1 + $0xe0] sm:$0xff] (!%p171_p3)   ;;  %v2242_v21 = vld [vmem:[%s2707_s1 + $0xe8] sm:$0xff] (!%p171_p3)  }
   0xc   : > { %v2235_v14 = vld [vmem:[%s2707_s1 + $0x18] sm:$0xff] (!%p171_p3)   ;;  %v2239_v18 = vld [vmem:[%s2707_s1 + $0x20] sm:$0xff] (!%p171_p3)   ;;  %v2243_v22 = vld [vmem:[%s2707_s1 + $0x28] sm:$0xff] (!%p171_p3)  }
   0xd   : > { %1944 = vmatpush3.bf16.msra.mxu0 (!%p171_p3), %v2227_v6  ;;  %v2236_v15 = vld [vmem:[%s2707_s1 + $0x98] sm:$0xff] (!%p171_p3)   ;;  %v2240_v19 = vld [vmem:[%s2707_s1 + $0xa0] sm:$0xff] (!%p171_p3)   ;;  %v2244_v23 = vld [vmem:[%s2707_s1 + $0xa8] sm:$0xff] (!%p171_p3)  }
   0xe   : > { %2008 = vmatpush3.bf16.msra.mxu1 %v2228_v7  ;;  %1945 = vmatprep.subr.bf16.mxu0 %v2229_v8  ;;  %s2715_s25 = smov (!%p206_p4, %s1725_s25), 63  ;;  %v2245_v24 = vld [vmem:[%s2707_s1 + $0x70] sm:$0xff]   ;;  %v2249_v28 = vld [vmem:[%s2707_s1 + $0x78] sm:$0xff]   ;;  %v2253_v40 = vld [vmem:[%s2707_s1 + $0x140] sm:$0xff]  }
   0xf   : > { %2009 = vmatprep.subr.bf16.mxu1 %v2230_v9  ;;  %v2246_v25 = vld [vmem:[%s2707_s1 + $0xf0] sm:$0xff]   ;;  %s1877_s24 = sshll.u32 %s2715_s25, 5  ;;  %v2250_v29 = vld [vmem:[%s2707_s1 + $0xf8] sm:$0xff]   ;;  %v2254_v41 = vld [vmem:[%s2707_s1 + $0x100] sm:$0xff]  }
  0x10   : > { %v2247_v26 = vld [vmem:[%s2707_s1 + $0x30] sm:$0xff]   ;;  %s2446_s12 = scalar_lea.vmem %s2706_s0, %s1877_s24  ;;  %v2251_v30 = vld [vmem:[%s2707_s1 + $0x38] sm:$0xff]   ;;  %v2255_v42 = vld [vmem:[%s2707_s1 + $0x1c0] sm:$0xff]  }
  0x11   : > { %1946 = vmatpush3.bf16.msra.mxu0 %v2231_v10  ;;  %v2248_v27 = vld [vmem:[%s2707_s1 + $0xb0] sm:$0xff]   ;;  %v2252_v31 = vld [vmem:[%s2707_s1 + $0xb8] sm:$0xff]   ;;  %v229_v32 = vld [vmem:[%s2446_s12] sm:$0xff] }
  0x12   : > { %2010 = vmatpush3.bf16.msra.mxu1 %v2232_v11  ;;  %1947 = vmatprep.subr.bf16.mxu0 %v2233_v12  ;;  %v233_v33 = vld [vmem:[%s2446_s12 + $0x20] sm:$0xff]  ;;  %v230_v34 = vld [vmem:[%s2446_s12 + $0x8] sm:$0xff]  ;;  %v2261_v62 = vld [vmem:[%s2707_s1 + $0x150] sm:$0xff]  }
  0x13   : > { %2011 = vmatprep.subr.bf16.mxu1 %v2234_v13  ;;  %v1731_v35 = vcombine.low %v229_v32, %v233_v33  ;;  %v1732_v36 = vcombine.high %v229_v32, %v233_v33  ;;  %v234_v37 = vld [vmem:[%s2446_s12 + $0x28] sm:$0xff]  ;;  %v2256_v43 = vld [vmem:[%s2707_s1 + $0x180] sm:$0xff]   ;;  %v2262_v63 = vld [vmem:[%s2707_s1 + $0x110] sm:$0xff]  }
  0x14   : > { %v1733_v38 = vcombine.low %v230_v34, %v234_v37  ;;  %v1734_v39 = vcombine.high %v230_v34, %v234_v37  ;;  %v237_v44 = vld [vmem:[%s2446_s12 + $0x40] sm:$0xff]  ;;  %v238_v47 = vld [vmem:[%s2446_s12 + $0x48] sm:$0xff]  ;;  %v2263_v0 = vld [vmem:[%s2707_s1 + $0x1d0] sm:$0xff]  }
  0x15   : > { %1948 = vmatpush3.bf16.msra.mxu0 %v2235_v14  ;;  %1164 = vmatprep.mubr.bf16.mxu0 %v1732_v36  ;;  %v241_v45 = vld [vmem:[%s2446_s12 + $0x60] sm:$0xff]  ;;  %v242_v48 = vld [vmem:[%s2446_s12 + $0x68] sm:$0xff]  ;;  %v2264_v1 = vld [vmem:[%s2707_s1 + $0x190] sm:$0xff]  }
  0x16   : > { %2012 = vmatpush3.bf16.msra.mxu1 %v2236_v15  ;;  %1949 = vmatprep.subr.bf16.mxu0 %v2237_v16  ;;  %v1740_v46 = vcombine.high %v237_v44, %v241_v45  ;;  %v1742_v49 = vcombine.high %v238_v47, %v242_v48  ;;  %v2257_v50 = vld [vmem:[%s2707_s1 + $0x148] sm:$0xff]   ;;  %v1739_v51 = vcombine.low %v237_v44, %v241_v45  ;;  %v245_v56 = vld [vmem:[%s2446_s12 + $0x80] sm:$0xff]  ;;  %v2265_v10 = vld [vmem:[%s2707_s1 + $0x158] sm:$0xff]  }
  0x17   : > { %2013 = vmatprep.subr.bf16.mxu1 %v2238_v17  ;;  %1261 = vmatprep.mubr.bf16.mxu1 %v1734_v39  ;;  %v2258_v52 = vld [vmem:[%s2707_s1 + $0x108] sm:$0xff]   ;;  %v1741_v53 = vcombine.low %v238_v47, %v242_v48  ;;  %v249_v57 = vld [vmem:[%s2446_s12 + $0xa0] sm:$0xff]  ;;  %v2266_v11 = vld [vmem:[%s2707_s1 + $0x118] sm:$0xff]  }
  0x18   : > { %v2259_v54 = vld [vmem:[%s2707_s1 + $0x1c8] sm:$0xff]   ;;  %v1748_v60 = vcombine.high %v245_v56, %v249_v57  ;;  %v1747_v2 = vcombine.low %v245_v56, %v249_v57  ;;  %v253_v3 = vld [vmem:[%s2446_s12 + $0xc0] sm:$0xff]  ;;  %v2267_v12 = vld [vmem:[%s2707_s1 + $0x1d8] sm:$0xff]  }
  0x19   : > { %1950 = vmatpush3.bf16.msra.mxu0 %v2239_v18  ;;  %v2260_v55 = vld [vmem:[%s2707_s1 + $0x188] sm:$0xff]   ;;  %v257_v4 = vld [vmem:[%s2446_s12 + $0xe0] sm:$0xff]  ;;  %v2268_v13 = vld [vmem:[%s2707_s1 + $0x198] sm:$0xff]  }
  0x1a   : > { %2014 = vmatpush3.bf16.msra.mxu1 %v2240_v19  ;;  %1951 = vmatprep.subr.bf16.mxu0 %v2241_v20  ;;  %v246_v58 = vld [vmem:[%s2446_s12 + $0x88] sm:$0xff]  ;;  %v1756_v7 = vcombine.high %v253_v3, %v257_v4  ;;  %v261_v14 = vld [vmem:[%s2446_s12 + $0x100] sm:$0xff]  ;;  %v1755_v19 = vcombine.low %v253_v3, %v257_v4  ;;  %v2278_v39 = vld [vmem:[%s2707_s1 + $0x130] sm:$0xff]  }
  0x1b   : > { %2015 = vmatprep.subr.bf16.mxu1 %v2242_v21  ;;  %v250_v59 = vld [vmem:[%s2446_s12 + $0xa8] sm:$0xff]  ;;  %v265_v15 = vld [vmem:[%s2446_s12 + $0x120] sm:$0xff]  ;;  %v2282_v48 = vld [vmem:[%s2707_s1 + $0x138] sm:$0xff]  }
  0x1c   : > { %v1750_v61 = vcombine.high %v246_v58, %v250_v59  ;;  %v254_v5 = vld [vmem:[%s2446_s12 + $0xc8] sm:$0xff]  ;;  %v1749_v6 = vcombine.low %v246_v58, %v250_v59  ;;  %v2269_v18 = vld [vmem:[%s2707_s1 + $0x160] sm:$0xff]   ;;  %v1763_v34 = vcombine.low %v261_v14, %v265_v15 }
  0x1d   : > { %1952 = vmatpush3.bf16.msra.mxu0 %v2243_v22  ;;  %v258_v8 = vld [vmem:[%s2446_s12 + $0xe8] sm:$0xff]  ;;  %v2270_v20 = vld [vmem:[%s2707_s1 + $0x120] sm:$0xff]   ;;  %v1764_v22 = vcombine.high %v261_v14, %v265_v15  ;;  %v247_v14 = vld [vmem:[%s2446_s12 + $0x90] sm:$0xff] }
  0x1e   : > { %2016 = vmatpush3.bf16.msra.mxu1 %v2244_v23  ;;  %1953 = vmatprep.subr.bf16.mxu0 %v2245_v24  ;;  %v1758_v9 = vcombine.high %v254_v5, %v258_v8  ;;  %v262_v16 = vld [vmem:[%s2446_s12 + $0x108] sm:$0xff]  ;;  %v1757_v21 = vcombine.low %v254_v5, %v258_v8  ;;  %v2271_v23 = vld [vmem:[%s2707_s1 + $0x1e0] sm:$0xff]   ;;  %v240_v8 = vld [vmem:[%s2446_s12 + $0x58] sm:$0xff] }
  0x1f   : > { %2017 = vmatprep.subr.bf16.mxu1 %v2246_v25  ;;  %v266_v17 = vld [vmem:[%s2446_s12 + $0x128] sm:$0xff]  ;;  %v2272_v25 = vld [vmem:[%s2707_s1 + $0x1a0] sm:$0xff]   ;;  %v251_v15 = vld [vmem:[%s2446_s12 + $0xb0] sm:$0xff] }
  0x20   : > { %v1766_v24 = vcombine.high %v262_v16, %v266_v17  ;;  %v2275_v32 = vld [vmem:[%s2707_s1 + $0x1e8] sm:$0xff]  }
  0x21   : > { %1954 = vmatpush3.bf16.msra.mxu0 %v2247_v26  ;;  %v269_v26 = vld [vmem:[%s2446_s12 + $0x140] sm:$0xff]  ;;  %v2276_v33 = vld [vmem:[%s2707_s1 + $0x1a8] sm:$0xff]  }
  0x22   : > { %2018 = vmatpush3.bf16.msra.mxu1 %v2248_v27  ;;  %1955 = vmatprep.subr.bf16.mxu0 %v2249_v28  ;;  %v273_v27 = vld [vmem:[%s2446_s12 + $0x160] sm:$0xff]  ;;  %v2273_v28 = vld [vmem:[%s2707_s1 + $0x168] sm:$0xff]  }
  0x23   : > { %2019 = vmatprep.subr.bf16.mxu1 %v2250_v29  ;;  %v270_v29 = vld [vmem:[%s2446_s12 + $0x148] sm:$0xff]  ;;  %v1772_v36 = vcombine.high %v269_v26, %v273_v27  ;;  %v1771_v47 = vcombine.low %v269_v26, %v273_v27  ;;  %v1751_v26 = vcombine.low %v247_v14, %v251_v15 }
  0x24   : > { %v278_v44 = vld [vmem:[%s2446_s12 + $0x188] sm:$0xff] }
  0x25   : > { %1956 = vmatpush3.bf16.msra.mxu0 %v2251_v30  ;;  %v274_v30 = vld [vmem:[%s2446_s12 + $0x168] sm:$0xff] }
  0x26   : > { %2020 = vmatpush3.bf16.msra.mxu1 %v2252_v31  ;;  %2069 = vmatprep.subr.bf16.mxu0 %v2253_v40  ;;  %v2274_v31 = vld [vmem:[%s2707_s1 + $0x128] sm:$0xff]   ;;  %v1774_v37 = vcombine.high %v270_v29, %v274_v30  ;;  %v2279_v40 = vld [vmem:[%s2707_s1 + $0x1f0] sm:$0xff]  }
  0x27   : > { %2133 = vmatprep.subr.bf16.mxu1 %v2255_v42  ;;  %v281_v42 = vld [vmem:[%s2446_s12 + $0x1a0] sm:$0xff]  ;;  %v282_v45 = vld [vmem:[%s2446_s12 + $0x1a8] sm:$0xff] }
  0x28   : > { %1165 = vmatmul.mubr.bf16.vlgmr.msra.gmra.mrb[0].mxu0 %v1731_v35  ;;  %v1765_v35 = vcombine.low %v262_v16, %v266_v17  ;;  %v286_v56 = vld [vmem:[%s2446_s12 + $0x1c8] sm:$0xff]  ;;  %v1781_v59 = vcombine.low %v278_v44, %v282_v45  ;;  %v248_v16 = vld [vmem:[%s2446_s12 + $0x98] sm:$0xff] }
  0x29   : > { %1262 = vmatmul.mubr.bf16.vlgmr.msra.gmra.mrb[0].mxu1 %v1733_v38  ;;  %2070 = vmatpush3.bf16.msra.mxu0 %v2254_v41  ;;  %v2277_v38 = vld [vmem:[%s2707_s1 + $0x170] sm:$0xff]   ;;  %v277_v41 = vld [vmem:[%s2446_s12 + $0x180] sm:$0xff]  ;;  %v290_v57 = vld [vmem:[%s2446_s12 + $0x1e8] sm:$0xff] }
  0x2a   : > { %2134 = vmatpush3.bf16.msra.mxu1 %v2256_v43  ;;  %1172 = vmatprep.mubr.bf16.mxu0 %v1740_v46  ;;  %v2280_v43 = vld [vmem:[%s2707_s1 + $0x1b0] sm:$0xff]   ;;  %v2281_v46 = vld [vmem:[%s2707_s1 + $0x178] sm:$0xff]   ;;  %v1779_v58 = vcombine.low %v277_v41, %v281_v42  ;;  %v1789_v3 = vcombine.low %v286_v56, %v290_v57 }
  0x2b   : > { %1269 = vmatprep.mubr.bf16.mxu1 %v1742_v49  ;;  %2071 = vmatprep.subr.bf16.mxu0 %v2257_v50  ;;  %v1773_v49 = vcombine.low %v270_v29, %v274_v30  ;;  %v1780_v50 = vcombine.high %v277_v41, %v281_v42  ;;  %v252_v17 = vld [vmem:[%s2446_s12 + $0xb8] sm:$0xff]  ;;  %v263_v30 = vld [vmem:[%s2446_s12 + $0x110] sm:$0xff] }
  0x2c   : > { %2135 = vmatprep.subr.bf16.mxu1 %v2259_v54  ;;  %v285_v54 = vld [vmem:[%s2446_s12 + $0x1c0] sm:$0xff]  ;;  %v1753_v27 = vcombine.low %v248_v16, %v252_v17  ;;  %v276_v41 = vld [vmem:[%s2446_s12 + $0x178] sm:$0xff] }
  0x2d   : > { %2072 = vmatpush3.bf16.msra.mxu0 %v2258_v52  ;;  %v1782_v52 = vcombine.high %v278_v44, %v282_v45 }
  0x2e   : > { %2136 = vmatpush3.bf16.msra.mxu1 %v2260_v55  ;;  %2073 = vmatprep.subr.bf16.mxu0 %v2261_v62  ;;  %v289_v55 = vld [vmem:[%s2446_s12 + $0x1e0] sm:$0xff]  ;;  %v231_v62 = vld [vmem:[%s2446_s12 + $0x10] sm:$0xff] }
  0x2f   : > { %2137 = vmatprep.subr.bf16.mxu1 %v2263_v0  ;;  %v232_v0 = vld [vmem:[%s2446_s12 + $0x18] sm:$0xff] }
  0x30   : > { %1173 = vmatmul.mubr.bf16.gmra.mrb[4].mxu0 %v1739_v51  ;;  %v2283_v51 = vld [vmem:[%s2707_s1 + $0x1f8] sm:$0xff]  }
  0x31   : > { %1270 = vmatmul.mubr.bf16.gmra.mrb[4].mxu1 %v1741_v53  ;;  %1180 = vmatprep.mubr.bf16.mxu0 %v1748_v60  ;;  %v2284_v53 = vld [vmem:[%s2707_s1 + $0x1b8] sm:$0xff]   ;;  %v1788_v60 = vcombine.high %v285_v54, %v289_v55 }
  0x32   : > { %1277 = vmatprep.mubr.bf16.mxu1 %v1750_v61  ;;  %2074 = vmatpush3.bf16.msra.mxu0 %v2262_v63  ;;  %v1790_v61 = vcombine.high %v286_v56, %v290_v57  ;;  %v235_v63 = vld [vmem:[%s2446_s12 + $0x30] sm:$0xff]  ;;  %v288_v56 = vld [vmem:[%s2446_s12 + $0x1d8] sm:$0xff] }
  0x33   : > { %2138 = vmatpush3.bf16.msra.mxu1 %v2264_v1  ;;  %2075 = vmatprep.subr.bf16.mxu0 %v2265_v10  ;;  %v236_v1 = vld [vmem:[%s2446_s12 + $0x38] sm:$0xff]  ;;  %v1736_v4 = vcombine.high %v231_v62, %v235_v63  ;;  %v1735_v10 = vcombine.low %v231_v62, %v235_v63 }
  0x34   : > { %2139 = vmatprep.subr.bf16.mxu1 %v2267_v12  ;;  %v1738_v5 = vcombine.high %v232_v0, %v236_v1  ;;  %v292_v57 = vld [vmem:[%s2446_s12 + $0x1f8] sm:$0xff] }
  0x35   : > { %v1793_v63 = vcombine.low %v288_v56, %v292_v57 }
  0x36   : > { %2076 = vmatpush3.bf16.msra.mxu0 %v2266_v11  ;;  %v1737_v11 = vcombine.low %v232_v0, %v236_v1 }
  0x37   : > { %2140 = vmatpush3.bf16.msra.mxu1 %v2268_v13  ;;  %2077 = vmatprep.subr.bf16.mxu0 %v2269_v18 }
  0x38   : > { %1181 = vmatmul.mubr.bf16.gmra.mrb[8].mxu0 %v1747_v2  ;;  %2141 = vmatprep.subr.bf16.mxu1 %v2271_v23  ;;  %v1787_v2 = vcombine.low %v285_v54, %v289_v55  ;;  %v259_v23 = vld [vmem:[%s2446_s12 + $0xf0] sm:$0xff] }
  0x39   : > { %1278 = vmatmul.mubr.bf16.gmra.mrb[8].mxu1 %v1749_v6  ;;  %1188 = vmatprep.mubr.bf16.mxu0 %v1756_v7  ;;  %v239_v6 = vld [vmem:[%s2446_s12 + $0x50] sm:$0xff] }
  0x3a   : > { %1285 = vmatprep.mubr.bf16.mxu1 %v1758_v9  ;;  %2078 = vmatpush3.bf16.msra.mxu0 %v2270_v20  ;;  %v243_v7 = vld [vmem:[%s2446_s12 + $0x70] sm:$0xff]  ;;  %v244_v9 = vld [vmem:[%s2446_s12 + $0x78] sm:$0xff]  ;;  %v1752_v20 = vcombine.high %v247_v14, %v251_v15 }
  0x3b   : > { %2142 = vmatpush3.bf16.msra.mxu1 %v2272_v25  ;;  %2079 = vmatprep.subr.bf16.mxu0 %v2273_v28  ;;  %v1744_v12 = vcombine.high %v239_v6, %v243_v7  ;;  %v1746_v13 = vcombine.high %v240_v8, %v244_v9  ;;  %v1743_v18 = vcombine.low %v239_v6, %v243_v7  ;;  %v260_v25 = vld [vmem:[%s2446_s12 + $0xf8] sm:$0xff]  ;;  %v287_v54 = vld [vmem:[%s2446_s12 + $0x1d0] sm:$0xff] }
  0x3c   : > { %2143 = vmatprep.subr.bf16.mxu1 %v2275_v32  ;;  %v264_v32 = vld [vmem:[%s2446_s12 + $0x118] sm:$0xff]  ;;  %v291_v55 = vld [vmem:[%s2446_s12 + $0x1f0] sm:$0xff] }
  0x3d   : > { %v1791_v62 = vcombine.low %v287_v54, %v291_v55 }
  0x3e   : > { %2080 = vmatpush3.bf16.msra.mxu0 %v2274_v31  ;;  %v267_v31 = vld [vmem:[%s2446_s12 + $0x130] sm:$0xff] }
  0x3f   : > { %2144 = vmatpush3.bf16.msra.mxu1 %v2276_v33  ;;  %2081 = vmatprep.subr.bf16.mxu0 %v2277_v38  ;;  %v268_v33 = vld [vmem:[%s2446_s12 + $0x138] sm:$0xff]  ;;  %v271_v38 = vld [vmem:[%s2446_s12 + $0x150] sm:$0xff]  ;;  %v1767_v42 = vcombine.low %v263_v30, %v267_v31 }
  0x40   : > { %1189 = vmatmul.mubr.bf16.gmra.mrb[12].mxu0 %v1755_v19  ;;  %2145 = vmatprep.subr.bf16.mxu1 %v2279_v40  ;;  %v1745_v19 = vcombine.low %v240_v8, %v244_v9  ;;  %v272_v40 = vld [vmem:[%s2446_s12 + $0x158] sm:$0xff] }
  0x41   : > { %1286 = vmatmul.mubr.bf16.gmra.mrb[12].mxu1 %v1757_v21  ;;  %1196 = vmatprep.mubr.bf16.mxu0 %v1764_v22  ;;  %v1754_v21 = vcombine.high %v248_v16, %v252_v17  ;;  %v255_v22 = vld [vmem:[%s2446_s12 + $0xd0] sm:$0xff]  ;;  %v1778_v45 = vcombine.high %v272_v40, %v276_v41 }
  0x42   : > { %1293 = vmatprep.mubr.bf16.mxu1 %v1766_v24  ;;  %2082 = vmatpush3.bf16.msra.mxu0 %v2278_v39  ;;  %v256_v24 = vld [vmem:[%s2446_s12 + $0xd8] sm:$0xff]  ;;  %v1760_v28 = vcombine.high %v255_v22, %v259_v23  ;;  %v275_v39 = vld [vmem:[%s2446_s12 + $0x170] sm:$0xff] }
  0x43   : > { %2146 = vmatpush3.bf16.msra.mxu1 %v2280_v43  ;;  %2083 = vmatprep.subr.bf16.mxu0 %v2281_v46  ;;  %v1762_v29 = vcombine.high %v256_v24, %v260_v25  ;;  %v1769_v43 = vcombine.low %v264_v32, %v268_v33  ;;  %v1776_v44 = vcombine.high %v271_v38, %v275_v39  ;;  %v279_v46 = vld [vmem:[%s2446_s12 + $0x190] sm:$0xff] }
  0x44   : > { %2147 = vmatprep.subr.bf16.mxu1 %v2283_v51  ;;  %v1777_v51 = vcombine.low %v272_v40, %v276_v41 }
  0x46   : > { %2084 = vmatpush3.bf16.msra.mxu0 %v2282_v48  ;;  %v280_v48 = vld [vmem:[%s2446_s12 + $0x198] sm:$0xff] }
  0x47   : > { %2148 = vmatpush3.bf16.msra.mxu1 %v2284_v53 }
  0x48   : > { %1197 = vmatmul.mubr.bf16.gmra.mrb[16].mxu0 %v1763_v34  ;;  %v1759_v34 = vcombine.low %v255_v22, %v259_v23 }
  0x49   : > { %1294 = vmatmul.mubr.bf16.gmra.mrb[16].mxu1 %v1765_v35  ;;  %1204 = vmatprep.mubr.bf16.mxu0 %v1772_v36  ;;  %v1761_v35 = vcombine.low %v256_v24, %v260_v25  ;;  %v1768_v36 = vcombine.high %v263_v30, %v267_v31 }
  0x4a   : > { %1301 = vmatprep.mubr.bf16.mxu1 %v1774_v37  ;;  %v1770_v37 = vcombine.high %v264_v32, %v268_v33 }
  0x50   : > { %1205 = vmatmul.mubr.bf16.gmra.mrb[20].mxu0 %v1771_v47  ;;  %v283_v47 = vld [vmem:[%s2446_s12 + $0x1b0] sm:$0xff] }
  0x51   : > { %1302 = vmatmul.mubr.bf16.gmra.mrb[20].mxu1 %v1773_v49  ;;  %1212 = vmatprep.mubr.bf16.mxu0 %v1780_v50  ;;  %v284_v49 = vld [vmem:[%s2446_s12 + $0x1b8] sm:$0xff]  ;;  %v1775_v50 = vcombine.low %v271_v38, %v275_v39  ;;  %s1729_s12 = sshll.u32 %s2715_s25, 2 }
  0x52   : > { %1309 = vmatprep.mubr.bf16.mxu1 %v1782_v52  ;;  %v1784_v52 = vcombine.high %v279_v46, %v283_v47  ;;  %v1786_v53 = vcombine.high %v280_v48, %v284_v49  ;;  %s2673_s17 = scalar_lea.vmem %s2709_s3, %s1729_s12 }
  0x58   : > { %1213 = vmatmul.mubr.bf16.gmra.mrb[24].mxu0 %v1779_v58  ;;  %v1783_v58 = vcombine.low %v279_v46, %v283_v47 }
  0x59   : > { %1310 = vmatmul.mubr.bf16.gmra.mrb[24].mxu1 %v1781_v59  ;;  %1220 = vmatprep.mubr.bf16.mxu0 %v1788_v60  ;;  %v1785_v59 = vcombine.low %v280_v48, %v284_v49  ;;  %v1792_v60 = vcombine.high %v287_v54, %v291_v55 }
  0x5a   : > { %1317 = vmatprep.mubr.bf16.mxu1 %v1790_v61  ;;  %v1794_v61 = vcombine.high %v288_v56, %v292_v57 }
  0x60   : > { %1221 = vmatmul.mubr.bf16.gmra.mrb[28].mxu0 %v1787_v2  ;;  %v2617_v2 = vld [vmem:[%s2708_s2] ss:$0 sm:$0xff] }
  0x61   : > { %1318 = vmatmul.mubr.bf16.gmra.mrb[28].mxu1 %v1789_v3  ;;  %1358 = vmatprep.mubr.bf16.mxu0 %v1736_v4 }
  0x62   : > { %1455 = vmatprep.mubr.bf16.mxu1 %v1738_v5 }
  0x68   : > { %1359 = vmatmul.mubr.bf16.vlgmr.msra.gmra.mrb[32].mxu0 %v1735_v10 }
  0x69   : > { %1456 = vmatmul.mubr.bf16.vlgmr.msra.gmra.mrb[32].mxu1 %v1737_v11  ;;  %1366 = vmatprep.mubr.bf16.mxu0 %v1744_v12 }
  0x6a   : > { %1463 = vmatprep.mubr.bf16.mxu1 %v1746_v13 }
  0x70   : > { %1367 = vmatmul.mubr.bf16.gmra.mrb[36].mxu0 %v1743_v18 }
  0x71   : > { %1464 = vmatmul.mubr.bf16.gmra.mrb[36].mxu1 %v1745_v19  ;;  %1374 = vmatprep.mubr.bf16.mxu0 %v1752_v20 }
  0x72   : > { %1471 = vmatprep.mubr.bf16.mxu1 %v1754_v21 }
  0x78   : > { %1375 = vmatmul.mubr.bf16.gmra.mrb[40].mxu0 %v1751_v26 }
  0x79   : > { %1472 = vmatmul.mubr.bf16.gmra.mrb[40].mxu1 %v1753_v27  ;;  %1382 = vmatprep.mubr.bf16.mxu0 %v1760_v28 }
  0x7a   : > { %1479 = vmatprep.mubr.bf16.mxu1 %v1762_v29 }
  0x80   : > { %1383 = vmatmul.mubr.bf16.gmra.mrb[44].mxu0 %v1759_v34 }
  0x81   : > { %1480 = vmatmul.mubr.bf16.gmra.mrb[44].mxu1 %v1761_v35  ;;  %1390 = vmatprep.mubr.bf16.mxu0 %v1768_v36 }
  0x82   : > { %1487 = vmatprep.mubr.bf16.mxu1 %v1770_v37 }
  0x88   : > { %1391 = vmatmul.mubr.bf16.gmra.mrb[48].mxu0 %v1767_v42 }
  0x89   : > { %1488 = vmatmul.mubr.bf16.gmra.mrb[48].mxu1 %v1769_v43  ;;  %1398 = vmatprep.mubr.bf16.mxu0 %v1776_v44 }
  0x8a   : > { %1495 = vmatprep.mubr.bf16.mxu1 %v1778_v45 }
  0x90   : > { %1399 = vmatmul.mubr.bf16.gmra.mrb[52].mxu0 %v1775_v50 }
  0x91   : > { %1496 = vmatmul.mubr.bf16.gmra.mrb[52].mxu1 %v1777_v51  ;;  %1406 = vmatprep.mubr.bf16.mxu0 %v1784_v52 }
  0x92   : > { %1503 = vmatprep.mubr.bf16.mxu1 %v1786_v53 }
  0x98   : > { %1407 = vmatmul.mubr.bf16.gmra.mrb[56].mxu0 %v1783_v58 }
  0x99   : > { %1504 = vmatmul.mubr.bf16.gmra.mrb[56].mxu1 %v1785_v59  ;;  %1414 = vmatprep.mubr.bf16.mxu0 %v1792_v60 }
  0x9a   : > { %1511 = vmatprep.mubr.bf16.mxu1 %v1794_v61 }
  0xa0   : > { %1415 = vmatmul.mubr.bf16.gmra.mrb[60].mxu0 %v1791_v62 }
  0xa1   : > { %1512 = vmatmul.mubr.bf16.gmra.mrb[60].mxu1 %v1793_v63 }
  0xfb   : > { %v1957_v0 = vpop.f32.mrb[0].mxu0 }
  0xfc   : > { %v2021_v1 = vpop.f32.mrb[0].mxu1  ;;  %v1958_v3 = vpop.f32.mrb[1].mxu0 }
  0xfd   : > { %v1959_v4 = vadd.f32 %v1958_v3, %v1957_v0  ;;  %v2022_v5 = vpop.f32.mrb[1].mxu1  ;;  %v1960_v6 = vpop.f32.mrb[2].mxu0 }
  0xfe   : > { %v2023_v7 = vadd.f32 %v2022_v5, %v2021_v1  ;;  %v2024_v8 = vpop.f32.mrb[2].mxu1  ;;  %v1961_v9 = vpop.f32.mrb[3].mxu0 }
  0xff   : > { %v1167_v10 = vadd.f32 %v1959_v4, %v2617_v2  ;;  %v1962_v11 = vadd.f32 %v1961_v9, %v1960_v6  ;;  %v2025_v12 = vpop.f32.mrb[3].mxu1 }
 0x100   : > { %v2026_v13 = vadd.f32 %v2025_v12, %v2024_v8 }
 0x101   : > { %v2620_v14 = vadd.f32 %v2023_v7, %v1167_v10  ;;  %v1170_v15 = vadd.f32 %v1962_v11, %v2617_v2 }
 0x103   : > { %v2623_v16 = vadd.f32 %v2026_v13, %v1170_v15  ;;  %v1963_v17 = vpop.f32.mrb[4].mxu0 }
 0x104   : > { %v2027_v18 = vpop.f32.mrb[4].mxu1  ;;  %v1964_v19 = vpop.f32.mrb[5].mxu0 }
 0x105   : > { %v1965_v20 = vadd.f32 %v1964_v19, %v1963_v17  ;;  %v2028_v21 = vpop.f32.mrb[5].mxu1  ;;  %v1966_v22 = vpop.f32.mrb[6].mxu0 }
 0x106   : > { %v2029_v23 = vadd.f32 %v2028_v21, %v2027_v18  ;;  %v2030_v24 = vpop.f32.mrb[6].mxu1  ;;  %v1967_v25 = vpop.f32.mrb[7].mxu0 }
 0x107   : > { %v1175_v26 = vadd.f32 %v1965_v20, %v2617_v2  ;;  %v1968_v27 = vadd.f32 %v1967_v25, %v1966_v22  ;;  %v2031_v28 = vpop.f32.mrb[7].mxu1 }
 0x108   : > { %v2032_v29 = vadd.f32 %v2031_v28, %v2030_v24 }
 0x109   : > { %v2626_v30 = vadd.f32 %v2029_v23, %v1175_v26  ;;  %v1178_v31 = vadd.f32 %v1968_v27, %v2617_v2 }
 0x10b   : > { %v2629_v32 = vadd.f32 %v2032_v29, %v1178_v31  ;;  %v1969_v33 = vpop.f32.mrb[8].mxu0 }
 0x10c   : > { %v2033_v34 = vpop.f32.mrb[8].mxu1  ;;  %v1970_v35 = vpop.f32.mrb[9].mxu0 }
 0x10d   : > { %v1971_v36 = vadd.f32 %v1970_v35, %v1969_v33  ;;  %v2034_v37 = vpop.f32.mrb[9].mxu1  ;;  %v1972_v38 = vpop.f32.mrb[10].mxu0 }
 0x10e   : > { %v2035_v39 = vadd.f32 %v2034_v37, %v2033_v34  ;;  %v2036_v40 = vpop.f32.mrb[10].mxu1  ;;  %v1973_v41 = vpop.f32.mrb[11].mxu0 }
 0x10f   : > { %v1183_v42 = vadd.f32 %v1971_v36, %v2617_v2  ;;  %v1974_v43 = vadd.f32 %v1973_v41, %v1972_v38  ;;  %v2037_v44 = vpop.f32.mrb[11].mxu1 }
 0x110   : > { %v2038_v45 = vadd.f32 %v2037_v44, %v2036_v40 }
 0x111   : > { %v2632_v46 = vadd.f32 %v2035_v39, %v1183_v42  ;;  %v1186_v47 = vadd.f32 %v1974_v43, %v2617_v2 }
 0x113   : > { %v2635_v48 = vadd.f32 %v2038_v45, %v1186_v47  ;;  %v1975_v49 = vpop.f32.mrb[12].mxu0 }
 0x114   : > { %v2039_v50 = vpop.f32.mrb[12].mxu1  ;;  %v1976_v51 = vpop.f32.mrb[13].mxu0 }
 0x115   : > { %v1977_v52 = vadd.f32 %v1976_v51, %v1975_v49  ;;  %v2040_v53 = vpop.f32.mrb[13].mxu1  ;;  %v1978_v54 = vpop.f32.mrb[14].mxu0 }
 0x116   : > { %v2041_v55 = vadd.f32 %v2040_v53, %v2039_v50  ;;  %v2042_v56 = vpop.f32.mrb[14].mxu1  ;;  %v1979_v57 = vpop.f32.mrb[15].mxu0 }
 0x117   : > { %v1191_v58 = vadd.f32 %v1977_v52, %v2617_v2  ;;  %v1980_v59 = vadd.f32 %v1979_v57, %v1978_v54  ;;  %v2043_v60 = vpop.f32.mrb[15].mxu1 }
 0x118   : > { %v2044_v61 = vadd.f32 %v2043_v60, %v2042_v56 }
 0x119   : > { %v2638_v62 = vadd.f32 %v2041_v55, %v1191_v58  ;;  %v1194_v63 = vadd.f32 %v1980_v59, %v2617_v2 }
 0x11b   : > { %v2641_v0 = vadd.f32 %v2044_v61, %v1194_v63  ;;  %v1981_v1 = vpop.f32.mrb[16].mxu0 }
 0x11c   : > { %v2045_v3 = vpop.f32.mrb[16].mxu1  ;;  %v1982_v4 = vpop.f32.mrb[17].mxu0 }
 0x11d   : > { %v1983_v5 = vadd.f32 %v1982_v4, %v1981_v1  ;;  %v2046_v6 = vpop.f32.mrb[17].mxu1  ;;  %v1984_v7 = vpop.f32.mrb[18].mxu0 }
 0x11e   : > { %v2047_v8 = vadd.f32 %v2046_v6, %v2045_v3  ;;  %v2048_v9 = vpop.f32.mrb[18].mxu1  ;;  %v1985_v10 = vpop.f32.mrb[19].mxu0 }
 0x11f   : > { %v1199_v11 = vadd.f32 %v1983_v5, %v2617_v2  ;;  %v1986_v12 = vadd.f32 %v1985_v10, %v1984_v7  ;;  %v2049_v13 = vpop.f32.mrb[19].mxu1 }
 0x120   : > { %v2050_v15 = vadd.f32 %v2049_v13, %v2048_v9 }
 0x121   : > { %v2644_v17 = vadd.f32 %v2047_v8, %v1199_v11  ;;  %v1202_v18 = vadd.f32 %v1986_v12, %v2617_v2 }
 0x123   : > { %v2647_v19 = vadd.f32 %v2050_v15, %v1202_v18  ;;  %v1987_v20 = vpop.f32.mrb[20].mxu0 }
 0x124   : > { %v2051_v21 = vpop.f32.mrb[20].mxu1  ;;  %v1988_v22 = vpop.f32.mrb[21].mxu0 }
 0x125   : > { %v1989_v23 = vadd.f32 %v1988_v22, %v1987_v20  ;;  %v2052_v24 = vpop.f32.mrb[21].mxu1  ;;  %v1990_v25 = vpop.f32.mrb[22].mxu0 }
 0x126   : > { %v2053_v26 = vadd.f32 %v2052_v24, %v2051_v21  ;;  %v2054_v27 = vpop.f32.mrb[22].mxu1  ;;  %v1991_v28 = vpop.f32.mrb[23].mxu0 }
 0x127   : > { %v1207_v29 = vadd.f32 %v1989_v23, %v2617_v2  ;;  %v1992_v31 = vadd.f32 %v1991_v28, %v1990_v25  ;;  %v2055_v33 = vpop.f32.mrb[23].mxu1 }
 0x128   : > { %v2056_v34 = vadd.f32 %v2055_v33, %v2054_v27 }
 0x129   : > { %v2650_v35 = vadd.f32 %v2053_v26, %v1207_v29  ;;  %v1210_v36 = vadd.f32 %v1992_v31, %v2617_v2 }
 0x12b   : > { %v2653_v37 = vadd.f32 %v2056_v34, %v1210_v36  ;;  %v1993_v38 = vpop.f32.mrb[24].mxu0 }
 0x12c   : > { %v2057_v39 = vpop.f32.mrb[24].mxu1  ;;  %v1994_v40 = vpop.f32.mrb[25].mxu0 }
 0x12d   : > { %v1995_v41 = vadd.f32 %v1994_v40, %v1993_v38  ;;  %v2058_v42 = vpop.f32.mrb[25].mxu1  ;;  %v1996_v43 = vpop.f32.mrb[26].mxu0 }
 0x12e   : > { %v2059_v44 = vadd.f32 %v2058_v42, %v2057_v39  ;;  %v2060_v45 = vpop.f32.mrb[26].mxu1  ;;  %v1997_v47 = vpop.f32.mrb[27].mxu0 }
 0x12f   : > { %v1215_v49 = vadd.f32 %v1995_v41, %v2617_v2  ;;  %v1998_v50 = vadd.f32 %v1997_v47, %v1996_v43  ;;  %v2061_v51 = vpop.f32.mrb[27].mxu1 }
 0x130   : > { %v2062_v52 = vadd.f32 %v2061_v51, %v2060_v45 }
 0x131   : > { %v2656_v53 = vadd.f32 %v2059_v44, %v1215_v49  ;;  %v1218_v54 = vadd.f32 %v1998_v50, %v2617_v2 }
 0x133   : > { %v2659_v55 = vadd.f32 %v2062_v52, %v1218_v54  ;;  %v1999_v56 = vpop.f32.mrb[28].mxu0 }
 0x134   : > { %v2063_v57 = vpop.f32.mrb[28].mxu1  ;;  %v2000_v58 = vpop.f32.mrb[29].mxu0 }
 0x135   : > { %v2001_v59 = vadd.f32 %v2000_v58, %v1999_v56  ;;  %v2064_v60 = vpop.f32.mrb[29].mxu1  ;;  %v2002_v61 = vpop.f32.mrb[30].mxu0 }
 0x136   : > { %v2065_v63 = vadd.f32 %v2064_v60, %v2063_v57  ;;  %v2066_v1 = vpop.f32.mrb[30].mxu1  ;;  %v2003_v3 = vpop.f32.mrb[31].mxu0 }
 0x137   : > { %v1223_v4 = vadd.f32 %v2001_v59, %v2617_v2  ;;  %v2004_v5 = vadd.f32 %v2003_v3, %v2002_v61  ;;  %v2067_v6 = vpop.f32.mrb[31].mxu1 }
 0x138   : > { %v2068_v7 = vadd.f32 %v2067_v6, %v2066_v1 }
 0x139   : > { %v2662_v8 = vadd.f32 %v2065_v63, %v1223_v4  ;;  %v1226_v9 = vadd.f32 %v2004_v5, %v2617_v2 }
 0x13b   : > { %v2665_v10 = vadd.f32 %v2068_v7, %v1226_v9  ;;  %v2085_v11 = vpop.f32.mrb[32].mxu0 }
 0x13c   : > { %v2149_v12 = vpop.f32.mrb[32].mxu1  ;;  %v2086_v13 = vpop.f32.mrb[33].mxu0 }
 0x13d   : > { %v2087_v15 = vadd.f32 %v2086_v13, %v2085_v11  ;;  %v2150_v18 = vpop.f32.mrb[33].mxu1  ;;  %v2088_v20 = vpop.f32.mrb[34].mxu0 }
 0x13e   : > { %v2151_v21 = vadd.f32 %v2150_v18, %v2149_v12  ;;  %v2152_v22 = vpop.f32.mrb[34].mxu1  ;;  %v2089_v23 = vpop.f32.mrb[35].mxu0 }
 0x13f   : > { %v1361_v24 = vadd.f32 %v2087_v15, %v2620_v14  ;;  %v2090_v25 = vadd.f32 %v2089_v23, %v2088_v20  ;;  %v2153_v26 = vpop.f32.mrb[35].mxu1 }
 0x140   : > { %v2154_v27 = vadd.f32 %v2153_v26, %v2152_v22 }
 0x141   : > { %v1458_v28 = vadd.f32 %v2151_v21, %v1361_v24  ;;  %v1364_v2 = vadd.f32 %v2090_v25, %v2623_v16 }
 0x143   : > { %v1461_v29 = vadd.f32 %v2154_v27, %v1364_v2  ;;  %v2091_v31 = vpop.f32.mrb[36].mxu0  ;;  %v1520_v36 = vmax.f32 %v1458_v28, 0.0 }
 0x144   : > { %v2155_v33 = vpop.f32.mrb[36].mxu1  ;;  %v2092_v34 = vpop.f32.mrb[37].mxu0 }
 0x145   : > { %v1521_v38 = vmax.f32 %v1461_v29, 0.0  ;;  %v2093_v39 = vadd.f32 %v2092_v34, %v2091_v31  ;;  %v2156_v40 = vpop.f32.mrb[37].mxu1  ;;  %v2094_v41 = vpop.f32.mrb[38].mxu0 }
 0x146   : > { %v2157_v14 = vadd.f32 %v2156_v40, %v2155_v33  ;;  %v2158_v42 = vpop.f32.mrb[38].mxu1  ;;  %v2095_v43 = vpop.f32.mrb[39].mxu0 }
 0x147   : > { %v1897_v16 = vpack.c.bf16 %v1521_v38, %v1520_v36  ;;  %v1369_v44 = vadd.f32 %v2093_v39, %v2626_v30  ;;  %v2096_v45 = vadd.f32 %v2095_v43, %v2094_v41  ;;  %v2159_v47 = vpop.f32.mrb[39].mxu1 }
 0x148   : > { %v2160_v49 = vadd.f32 %v2159_v47, %v2158_v42 }
 0x149   : > { %1898 = vst [vmem:[%s2673_s17] sm:$0xff] %v1897_v16   ;;  %v1466_v50 = vadd.f32 %v2157_v14, %v1369_v44  ;;  %v1372_v51 = vadd.f32 %v2096_v45, %v2629_v32 }
 0x14b   : > { %v1469_v52 = vadd.f32 %v2160_v49, %v1372_v51  ;;  %v2097_v54 = vpop.f32.mrb[40].mxu0  ;;  %v1522_v58 = vmax.f32 %v1466_v50, 0.0 }
 0x14c   : > { %v2161_v56 = vpop.f32.mrb[40].mxu1  ;;  %v2098_v57 = vpop.f32.mrb[41].mxu0 }
 0x14d   : > { %v1523_v59 = vmax.f32 %v1469_v52, 0.0  ;;  %v2099_v60 = vadd.f32 %v2098_v57, %v2097_v54  ;;  %v2162_v61 = vpop.f32.mrb[41].mxu1  ;;  %v2100_v63 = vpop.f32.mrb[42].mxu0 }
 0x14e   : > { %v2163_v1 = vadd.f32 %v2162_v61, %v2161_v56  ;;  %v2164_v3 = vpop.f32.mrb[42].mxu1  ;;  %v2101_v30 = vpop.f32.mrb[43].mxu0 }
 0x14f   : > { %v1902_v4 = vpack.c.bf16 %v1523_v59, %v1522_v58  ;;  %v1377_v5 = vadd.f32 %v2099_v60, %v2632_v46  ;;  %v2102_v6 = vadd.f32 %v2101_v30, %v2100_v63  ;;  %v2165_v7 = vpop.f32.mrb[43].mxu1 }
 0x150   : > { %v2166_v9 = vadd.f32 %v2165_v7, %v2164_v3 }
 0x151   : > { %1934 = vst [vmem:[%s2673_s17 + $0x8] sm:$0xff] %v1902_v4   ;;  %v1474_v32 = vadd.f32 %v2163_v1, %v1377_v5  ;;  %v1380_v11 = vadd.f32 %v2102_v6, %v2635_v48 }
 0x153   : > { %v1477_v12 = vadd.f32 %v2166_v9, %v1380_v11  ;;  %v2103_v13 = vpop.f32.mrb[44].mxu0  ;;  %v1524_v20 = vmax.f32 %v1474_v32, 0.0 }
 0x154   : > { %v2167_v15 = vpop.f32.mrb[44].mxu1  ;;  %v2104_v18 = vpop.f32.mrb[45].mxu0 }
 0x155   : > { %v1525_v21 = vmax.f32 %v1477_v12, 0.0  ;;  %v2105_v22 = vadd.f32 %v2104_v18, %v2103_v13  ;;  %v2168_v23 = vpop.f32.mrb[45].mxu1  ;;  %v2106_v24 = vpop.f32.mrb[46].mxu0 }
 0x156   : > { %v2169_v25 = vadd.f32 %v2168_v23, %v2167_v15  ;;  %v2170_v26 = vpop.f32.mrb[46].mxu1  ;;  %v2107_v46 = vpop.f32.mrb[47].mxu0 }
 0x157   : > { %v1907_v27 = vpack.c.bf16 %v1525_v21, %v1524_v20  ;;  %v1385_v28 = vadd.f32 %v2105_v22, %v2638_v62  ;;  %v2108_v2 = vadd.f32 %v2107_v46, %v2106_v24  ;;  %v2171_v29 = vpop.f32.mrb[47].mxu1 }
 0x158   : > { %v2172_v31 = vadd.f32 %v2171_v29, %v2170_v26 }
 0x159   : > { %1935 = vst [vmem:[%s2673_s17 + $0x10] sm:$0xff] %v1907_v27   ;;  %v1482_v48 = vadd.f32 %v2169_v25, %v1385_v28  ;;  %v1388_v33 = vadd.f32 %v2108_v2, %v2641_v0 }
 0x15b   : > { %v1485_v34 = vadd.f32 %v2172_v31, %v1388_v33  ;;  %v2109_v36 = vpop.f32.mrb[48].mxu0  ;;  %v1526_v40 = vmax.f32 %v1482_v48, 0.0 }
 0x15c   : > { %v2173_v38 = vpop.f32.mrb[48].mxu1  ;;  %v2110_v39 = vpop.f32.mrb[49].mxu0 }
 0x15d   : > { %v1527_v41 = vmax.f32 %v1485_v34, 0.0  ;;  %v2111_v14 = vadd.f32 %v2110_v39, %v2109_v36  ;;  %v2174_v42 = vpop.f32.mrb[49].mxu1  ;;  %v2112_v43 = vpop.f32.mrb[50].mxu0 }
 0x15e   : > { %v2175_v16 = vadd.f32 %v2174_v42, %v2173_v38  ;;  %v2176_v44 = vpop.f32.mrb[50].mxu1  ;;  %v2113_v62 = vpop.f32.mrb[51].mxu0 }
 0x15f   : > { %v1912_v45 = vpack.c.bf16 %v1527_v41, %v1526_v40  ;;  %v1393_v47 = vadd.f32 %v2111_v14, %v2644_v17  ;;  %v2114_v49 = vadd.f32 %v2113_v62, %v2112_v43  ;;  %v2177_v50 = vpop.f32.mrb[51].mxu1 }
 0x160   : > { %v2178_v51 = vadd.f32 %v2177_v50, %v2176_v44 }
 0x161   : > { %1936 = vst [vmem:[%s2673_s17 + $0x18] sm:$0xff] %v1912_v45   ;;  %v1490_v0 = vadd.f32 %v2175_v16, %v1393_v47  ;;  %v1396_v52 = vadd.f32 %v2114_v49, %v2647_v19 }
 0x163   : > { %v1493_v54 = vadd.f32 %v2178_v51, %v1396_v52  ;;  %v2115_v56 = vpop.f32.mrb[52].mxu0  ;;  %v1528_v59 = vmax.f32 %v1490_v0, 0.0 }
 0x164   : > { %v2179_v57 = vpop.f32.mrb[52].mxu1  ;;  %v2116_v58 = vpop.f32.mrb[53].mxu0 }
 0x165   : > { %v1529_v60 = vmax.f32 %v1493_v54, 0.0  ;;  %v2117_v61 = vadd.f32 %v2116_v58, %v2115_v56  ;;  %v2180_v63 = vpop.f32.mrb[53].mxu1  ;;  %v2118_v1 = vpop.f32.mrb[54].mxu0 }
 0x166   : > { %v2181_v3 = vadd.f32 %v2180_v63, %v2179_v57  ;;  %v2182_v30 = vpop.f32.mrb[54].mxu1  ;;  %v2119_v17 = vpop.f32.mrb[55].mxu0 }
 0x167   : > { %v1917_v4 = vpack.c.bf16 %v1529_v60, %v1528_v59  ;;  %v1401_v5 = vadd.f32 %v2117_v61, %v2650_v35  ;;  %v2120_v6 = vadd.f32 %v2119_v17, %v2118_v1  ;;  %v2183_v7 = vpop.f32.mrb[55].mxu1 }
 0x168   : > { %v2184_v9 = vadd.f32 %v2183_v7, %v2182_v30 }
 0x169   : > { %1937 = vst [vmem:[%s2673_s17 + $0x20] sm:$0xff] %v1917_v4   ;;  %v1498_v19 = vadd.f32 %v2181_v3, %v1401_v5  ;;  %v1404_v32 = vadd.f32 %v2120_v6, %v2653_v37 }
 0x16b   : > { %v1501_v11 = vadd.f32 %v2184_v9, %v1404_v32  ;;  %v2121_v12 = vpop.f32.mrb[56].mxu0  ;;  %v1530_v18 = vmax.f32 %v1498_v19, 0.0 }
 0x16c   : > { %v2185_v13 = vpop.f32.mrb[56].mxu1  ;;  %v2122_v15 = vpop.f32.mrb[57].mxu0 }
 0x16d   : > { %v1531_v20 = vmax.f32 %v1501_v11, 0.0  ;;  %v2123_v21 = vadd.f32 %v2122_v15, %v2121_v12  ;;  %v2186_v22 = vpop.f32.mrb[57].mxu1  ;;  %v2124_v23 = vpop.f32.mrb[58].mxu0 }
 0x16e   : > { %v2187_v24 = vadd.f32 %v2186_v22, %v2185_v13  ;;  %v2188_v25 = vpop.f32.mrb[58].mxu1  ;;  %v2125_v35 = vpop.f32.mrb[59].mxu0 }
 0x16f   : > { %v1922_v26 = vpack.c.bf16 %v1531_v20, %v1530_v18  ;;  %v1409_v46 = vadd.f32 %v2123_v21, %v2656_v53  ;;  %v2126_v27 = vadd.f32 %v2125_v35, %v2124_v23  ;;  %v2189_v28 = vpop.f32.mrb[59].mxu1 }
 0x170   : > { %v2190_v2 = vadd.f32 %v2189_v28, %v2188_v25 }
 0x171   : > { %1938 = vst [vmem:[%s2673_s17 + $0x28] sm:$0xff] %v1922_v26   ;;  %v1506_v37 = vadd.f32 %v2187_v24, %v1409_v46  ;;  %v1412_v29 = vadd.f32 %v2126_v27, %v2659_v55 }
 0x173   : > { %v1509_v31 = vadd.f32 %v2190_v2, %v1412_v29  ;;  %v2127_v48 = vpop.f32.mrb[60].mxu0  ;;  %v1532_v36 = vmax.f32 %v1506_v37, 0.0 }
 0x174   : > { %v2191_v33 = vpop.f32.mrb[60].mxu1  ;;  %v2128_v34 = vpop.f32.mrb[61].mxu0 }
 0x175   : > { %v1533_v38 = vmax.f32 %v1509_v31, 0.0  ;;  %v2129_v39 = vadd.f32 %v2128_v34, %v2127_v48  ;;  %v2192_v40 = vpop.f32.mrb[61].mxu1  ;;  %v2130_v41 = vpop.f32.mrb[62].mxu0 }
 0x176   : > { %v2193_v14 = vadd.f32 %v2192_v40, %v2191_v33  ;;  %v2194_v53 = vpop.f32.mrb[62].mxu1  ;;  %v2131_v42 = vpop.f32.mrb[63].mxu0 }
 0x177   : > { %v1927_v43 = vpack.c.bf16 %v1533_v38, %v1532_v36  ;;  %v1417_v16 = vadd.f32 %v2129_v39, %v2662_v8  ;;  %v2132_v44 = vadd.f32 %v2131_v42, %v2130_v41  ;;  %v2195_v62 = vpop.f32.mrb[63].mxu1 }
 0x178   : > { %v2196_v55 = vadd.f32 %v2195_v62, %v2194_v53 }
 0x179   : > { %1939 = vst [vmem:[%s2673_s17 + $0x30] sm:$0xff] %v1927_v43   ;;  %v1514_v45 = vadd.f32 %v2193_v14, %v1417_v16  ;;  %v1420_v47 = vadd.f32 %v2132_v44, %v2665_v10 }
 0x17b   : > { %v1517_v49 = vadd.f32 %v2196_v55, %v1420_v47  ;;  %v1534_v50 = vmax.f32 %v1514_v45, 0.0 }
 0x17d   : > { %v1535_v51 = vmax.f32 %v1517_v49, 0.0 }
 0x17f   : > { %v1932_v0 = vpack.c.bf16 %v1535_v51, %v1534_v50 }
 0x181   : > { %1940 = vst [vmem:[%s2673_s17 + $0x38] sm:$0xff] %v1932_v0  }
 0x182 PF: > { %s13_s14 = sadd.s32 1, %s2307_s14   ;;  %s2710_s12 = smov %s2303_s13 }
 0x183   : > { %p10_p5 = scmp.ge.s32.totalorder %s13_s14, 6   ;;  %s2711_s13 = smov %s2713_s15 }
 0x185   :  { %12 = sbr.rel (!%p10_p5) target bundleno = 2 (0x2), region = 68 }

// kernel: discriminator_forward.6
= control target key start
LH: loop header
LB: loop body
LE: loop exit
PB: predicated region body
PF: predicated region fallthrough
CT: control target
= control target key end

     0   :  { %s5244_s12 = smov 0   ;;  %s5246_s13 = smov 0   ;;  %s6559_s0 = inlined_call_operand.vmem [shape: bf16[128,2048], index: 0, kind: input, shape index: {}]   ;;  %s6560_s1 = inlined_call_operand.vmem [shape: bf16[2048,256], index: 1, kind: input, shape index: {}]   ;;  %s6561_s2 = inlined_call_operand.vmem [shape: f32[1,256], index: 2, kind: input, shape index: {}]   ;;  %s6562_s3 = inlined_call_operand.vmem [shape: bf16[128,256], index: 3, kind: output, shape index: {}]  }
   0x1   :  { %s5248_s14 = smov 0   ;;  %s5250_s15 = smov 0  }
   0x2   :  { %s5252_s16 = smov 0  }
   0x3 LB: > { %s22_s17 = sadd.s32 1, %s5218_s15  ;;  %s4154_s18 = sadd.s32 4294967295, %s5222_s16   ;;  %s5222_s16 = sphi %s5252_s16, %s13_s16   ;;  %s5218_s15 = sphi %s5250_s15, %s6567_s15   ;;  %s5214_s14 = sphi %s5248_s14, %s6566_s14   ;;  %s5210_s13 = sphi %s5246_s13, %s6565_s13   ;;  %s5206_s12 = sphi %s5244_s12, %s6564_s12  }
   0x4   : > { %p23_p0 = scmp.ge.s32.totalorder %s22_s17, 2  ;;  %p65_p1 = scmp.ne.s32.totalorder %s5210_s13, %s5206_s12 }
   0x5   : > { %p66_p2 = scmp.eq.s32.totalorder %s5222_s16, 0  ;;  %p123_p4 = scmp.eq.s32.totalorder %s4154_s18, 1 }
   0x6   : > { %s6569_s17 = smov (%p23_p0, %s22_s17), 0  ;;  %s58_s20 = sadd.s32 1, %s5210_s13 }
   0x7   : > { %p67_p3 = por %p66_p2, %p65_p1  ;;  %s55_s19 = ssub.s32 %s5218_s15, %s6569_s17 }
   0x8   : > { %p56_p5 = scmp.eq.s32.totalorder %s55_s19, 0  ;;  %p5279_p6 = por %p123_p4, %p65_p1 }
   0x9   : > { %p4158_p7 = scmp.ge.s32.totalorder %s5222_s16, 2 }
   0xa   : > { %s5284_s22 = scalar_select %p56_p5, %s5210_s13, %s58_s20  }
   0xb   : > { %155 = sbr.rel (%p4158_p7) target bundleno = 192 (0xc0), region = 20 }
  0x12   : > { %158 = sbr.rel (!%p67_p3) target bundleno = 192 (0xc0), region = 24  ;;  %s160_s23 = sand.u32 (%p67_p3), 1, %s5210_s13  }
  0x13   : > { %s4160_s24 = sshll.u32 (%p67_p3), %s5218_s15, 2  ;;  %s4159_s25 = sshll.u32 (%p67_p3), %s160_s23, 10 }
  0x14   : > { %s5292_s28 = scalar_lea.vmem (%p67_p3), %s6560_s1, %s4160_s24  ;;  %s5296_s29 = scalar_lea.vmem (%p67_p3), [#allocation2], %s4159_s25 }
  0x15   : > { %v180_v0 = vld [vmem:[%s5292_s28] sm:$0xf] (%p67_p3)  ;;  %v182_v1 = vld [vmem:[%s5292_s28 + $0x8] sm:$0xf] (%p67_p3)  ;;  %v184_v2 = vld [vmem:[%s5292_s28 + $0x10] sm:$0xf] (%p67_p3) }
  0x16   : > { %181 = vst [vmem:[%s5296_s29] sm:$0xf] (%p67_p3), %v180_v0  ;;  %183 = vst [vmem:[%s5296_s29 + $0x4] sm:$0xf] (%p67_p3), %v182_v1  ;;  %v186_v3 = vld [vmem:[%s5292_s28 + $0x18] sm:$0xf] (%p67_p3) }
  0x17   : > { %v188_v4 = vld [vmem:[%s5292_s28 + $0x20] sm:$0xf] (%p67_p3)  ;;  %185 = vst [vmem:[%s5296_s29 + $0x8] sm:$0xf] (%p67_p3), %v184_v2  ;;  %187 = vst [vmem:[%s5296_s29 + $0xc] sm:$0xf] (%p67_p3), %v186_v3 }
  0x18   : > { %189 = vst [vmem:[%s5296_s29 + $0x10] sm:$0xf] (%p67_p3), %v188_v4  ;;  %v190_v5 = vld [vmem:[%s5292_s28 + $0x28] sm:$0xf] (%p67_p3)  ;;  %v192_v6 = vld [vmem:[%s5292_s28 + $0x30] sm:$0xf] (%p67_p3) }
  0x19   : > { %v194_v7 = vld [vmem:[%s5292_s28 + $0x38] sm:$0xf]  ;;  %191 = vst [vmem:[%s5296_s29 + $0x14] sm:$0xf] %v190_v5  ;;  %193 = vst [vmem:[%s5296_s29 + $0x18] sm:$0xf] %v192_v6 }
  0x1a   : > { %195 = vst [vmem:[%s5296_s29 + $0x1c] sm:$0xf] %v194_v7  ;;  %v196_v8 = vld [vmem:[%s5292_s28 + $0x40] sm:$0xf]  ;;  %v198_v9 = vld [vmem:[%s5292_s28 + $0x48] sm:$0xf] }
  0x1b   : > { %v200_v10 = vld [vmem:[%s5292_s28 + $0x50] sm:$0xf]  ;;  %197 = vst [vmem:[%s5296_s29 + $0x20] sm:$0xf] %v196_v8  ;;  %199 = vst [vmem:[%s5296_s29 + $0x24] sm:$0xf] %v198_v9 }
  0x1c   : > { %201 = vst [vmem:[%s5296_s29 + $0x28] sm:$0xf] %v200_v10  ;;  %v202_v11 = vld [vmem:[%s5292_s28 + $0x58] sm:$0xf]  ;;  %v204_v12 = vld [vmem:[%s5292_s28 + $0x60] sm:$0xf] }
  0x1d   : > { %v206_v13 = vld [vmem:[%s5292_s28 + $0x68] sm:$0xf]  ;;  %203 = vst [vmem:[%s5296_s29 + $0x2c] sm:$0xf] %v202_v11  ;;  %205 = vst [vmem:[%s5296_s29 + $0x30] sm:$0xf] %v204_v12 }
  0x1e   : > { %207 = vst [vmem:[%s5296_s29 + $0x34] sm:$0xf] %v206_v13  ;;  %v208_v14 = vld [vmem:[%s5292_s28 + $0x70] sm:$0xf]  ;;  %v210_v15 = vld [vmem:[%s5292_s28 + $0x78] sm:$0xf] }
  0x1f   : > { %v212_v16 = vld [vmem:[%s5292_s28 + $0x80] sm:$0xf]  ;;  %209 = vst [vmem:[%s5296_s29 + $0x38] sm:$0xf] %v208_v14  ;;  %211 = vst [vmem:[%s5296_s29 + $0x3c] sm:$0xf] %v210_v15 }
  0x20   : > { %213 = vst [vmem:[%s5296_s29 + $0x40] sm:$0xf] %v212_v16  ;;  %v214_v17 = vld [vmem:[%s5292_s28 + $0x88] sm:$0xf]  ;;  %v216_v18 = vld [vmem:[%s5292_s28 + $0x90] sm:$0xf] }
  0x21   : > { %v218_v19 = vld [vmem:[%s5292_s28 + $0x98] sm:$0xf]  ;;  %215 = vst [vmem:[%s5296_s29 + $0x44] sm:$0xf] %v214_v17  ;;  %217 = vst [vmem:[%s5296_s29 + $0x48] sm:$0xf] %v216_v18 }
  0x22   : > { %219 = vst [vmem:[%s5296_s29 + $0x4c] sm:$0xf] %v218_v19  ;;  %v220_v20 = vld [vmem:[%s5292_s28 + $0xa0] sm:$0xf]  ;;  %v222_v21 = vld [vmem:[%s5292_s28 + $0xa8] sm:$0xf] }
  0x23   : > { %v224_v22 = vld [vmem:[%s5292_s28 + $0xb0] sm:$0xf]  ;;  %221 = vst [vmem:[%s5296_s29 + $0x50] sm:$0xf] %v220_v20  ;;  %223 = vst [vmem:[%s5296_s29 + $0x54] sm:$0xf] %v222_v21 }
  0x24   : > { %225 = vst [vmem:[%s5296_s29 + $0x58] sm:$0xf] %v224_v22  ;;  %v226_v23 = vld [vmem:[%s5292_s28 + $0xb8] sm:$0xf]  ;;  %v228_v24 = vld [vmem:[%s5292_s28 + $0xc0] sm:$0xf] }
  0x25   : > { %v230_v25 = vld [vmem:[%s5292_s28 + $0xc8] sm:$0xf]  ;;  %227 = vst [vmem:[%s5296_s29 + $0x5c] sm:$0xf] %v226_v23  ;;  %229 = vst [vmem:[%s5296_s29 + $0x60] sm:$0xf] %v228_v24 }
  0x26   : > { %231 = vst [vmem:[%s5296_s29 + $0x64] sm:$0xf] %v230_v25  ;;  %v232_v26 = vld [vmem:[%s5292_s28 + $0xd0] sm:$0xf]  ;;  %v234_v27 = vld [vmem:[%s5292_s28 + $0xd8] sm:$0xf] }
  0x27   : > { %v236_v28 = vld [vmem:[%s5292_s28 + $0xe0] sm:$0xf]  ;;  %233 = vst [vmem:[%s5296_s29 + $0x68] sm:$0xf] %v232_v26  ;;  %235 = vst [vmem:[%s5296_s29 + $0x6c] sm:$0xf] %v234_v27 }
  0x28   : > { %237 = vst [vmem:[%s5296_s29 + $0x70] sm:$0xf] %v236_v28  ;;  %v238_v29 = vld [vmem:[%s5292_s28 + $0xe8] sm:$0xf]  ;;  %v240_v30 = vld [vmem:[%s5292_s28 + $0xf0] sm:$0xf] }
  0x29   : > { %v242_v31 = vld [vmem:[%s5292_s28 + $0xf8] sm:$0xf]  ;;  %239 = vst [vmem:[%s5296_s29 + $0x74] sm:$0xf] %v238_v29  ;;  %241 = vst [vmem:[%s5296_s29 + $0x78] sm:$0xf] %v240_v30 }
  0x2a   : > { %243 = vst [vmem:[%s5296_s29 + $0x7c] sm:$0xf] %v242_v31  ;;  %v244_v32 = vld [vmem:[%s5292_s28 + $0x100] sm:$0xf]  ;;  %v246_v33 = vld [vmem:[%s5292_s28 + $0x108] sm:$0xf] }
  0x2b   : > { %v248_v34 = vld [vmem:[%s5292_s28 + $0x110] sm:$0xf]  ;;  %245 = vst [vmem:[%s5296_s29 + $0x80] sm:$0xf] %v244_v32  ;;  %247 = vst [vmem:[%s5296_s29 + $0x84] sm:$0xf] %v246_v33 }
  0x2c   : > { %249 = vst [vmem:[%s5296_s29 + $0x88] sm:$0xf] %v248_v34  ;;  %v250_v35 = vld [vmem:[%s5292_s28 + $0x118] sm:$0xf]  ;;  %v252_v36 = vld [vmem:[%s5292_s28 + $0x120] sm:$0xf] }
  0x2d   : > { %v254_v37 = vld [vmem:[%s5292_s28 + $0x128] sm:$0xf]  ;;  %251 = vst [vmem:[%s5296_s29 + $0x8c] sm:$0xf] %v250_v35  ;;  %253 = vst [vmem:[%s5296_s29 + $0x90] sm:$0xf] %v252_v36 }
  0x2e   : > { %255 = vst [vmem:[%s5296_s29 + $0x94] sm:$0xf] %v254_v37  ;;  %v256_v38 = vld [vmem:[%s5292_s28 + $0x130] sm:$0xf]  ;;  %v258_v39 = vld [vmem:[%s5292_s28 + $0x138] sm:$0xf] }
  0x2f   : > { %v260_v40 = vld [vmem:[%s5292_s28 + $0x140] sm:$0xf]  ;;  %257 = vst [vmem:[%s5296_s29 + $0x98] sm:$0xf] %v256_v38  ;;  %259 = vst [vmem:[%s5296_s29 + $0x9c] sm:$0xf] %v258_v39 }
  0x30   : > { %261 = vst [vmem:[%s5296_s29 + $0xa0] sm:$0xf] %v260_v40  ;;  %v262_v41 = vld [vmem:[%s5292_s28 + $0x148] sm:$0xf]  ;;  %v264_v42 = vld [vmem:[%s5292_s28 + $0x150] sm:$0xf] }
  0x31   : > { %v266_v43 = vld [vmem:[%s5292_s28 + $0x158] sm:$0xf]  ;;  %263 = vst [vmem:[%s5296_s29 + $0xa4] sm:$0xf] %v262_v41  ;;  %265 = vst [vmem:[%s5296_s29 + $0xa8] sm:$0xf] %v264_v42 }
  0x32   : > { %267 = vst [vmem:[%s5296_s29 + $0xac] sm:$0xf] %v266_v43  ;;  %v268_v44 = vld [vmem:[%s5292_s28 + $0x160] sm:$0xf]  ;;  %v270_v45 = vld [vmem:[%s5292_s28 + $0x168] sm:$0xf] }
  0x33   : > { %v272_v46 = vld [vmem:[%s5292_s28 + $0x170] sm:$0xf]  ;;  %269 = vst [vmem:[%s5296_s29 + $0xb0] sm:$0xf] %v268_v44  ;;  %271 = vst [vmem:[%s5296_s29 + $0xb4] sm:$0xf] %v270_v45 }
  0x34   : > { %273 = vst [vmem:[%s5296_s29 + $0xb8] sm:$0xf] %v272_v46  ;;  %v274_v47 = vld [vmem:[%s5292_s28 + $0x178] sm:$0xf]  ;;  %v276_v48 = vld [vmem:[%s5292_s28 + $0x180] sm:$0xf] }
  0x35   : > { %v278_v49 = vld [vmem:[%s5292_s28 + $0x188] sm:$0xf]  ;;  %275 = vst [vmem:[%s5296_s29 + $0xbc] sm:$0xf] %v274_v47  ;;  %277 = vst [vmem:[%s5296_s29 + $0xc0] sm:$0xf] %v276_v48 }
  0x36   : > { %279 = vst [vmem:[%s5296_s29 + $0xc4] sm:$0xf] %v278_v49  ;;  %v280_v50 = vld [vmem:[%s5292_s28 + $0x190] sm:$0xf]  ;;  %v282_v51 = vld [vmem:[%s5292_s28 + $0x198] sm:$0xf] }
  0x37   : > { %v284_v52 = vld [vmem:[%s5292_s28 + $0x1a0] sm:$0xf]  ;;  %281 = vst [vmem:[%s5296_s29 + $0xc8] sm:$0xf] %v280_v50  ;;  %283 = vst [vmem:[%s5296_s29 + $0xcc] sm:$0xf] %v282_v51 }
  0x38   : > { %285 = vst [vmem:[%s5296_s29 + $0xd0] sm:$0xf] %v284_v52  ;;  %v286_v53 = vld [vmem:[%s5292_s28 + $0x1a8] sm:$0xf]  ;;  %v288_v54 = vld [vmem:[%s5292_s28 + $0x1b0] sm:$0xf] }
  0x39   : > { %v290_v55 = vld [vmem:[%s5292_s28 + $0x1b8] sm:$0xf]  ;;  %287 = vst [vmem:[%s5296_s29 + $0xd4] sm:$0xf] %v286_v53  ;;  %289 = vst [vmem:[%s5296_s29 + $0xd8] sm:$0xf] %v288_v54 }
  0x3a   : > { %291 = vst [vmem:[%s5296_s29 + $0xdc] sm:$0xf] %v290_v55  ;;  %v292_v56 = vld [vmem:[%s5292_s28 + $0x1c0] sm:$0xf]  ;;  %v294_v57 = vld [vmem:[%s5292_s28 + $0x1c8] sm:$0xf] }
  0x3b   : > { %v296_v58 = vld [vmem:[%s5292_s28 + $0x1d0] sm:$0xf]  ;;  %293 = vst [vmem:[%s5296_s29 + $0xe0] sm:$0xf] %v292_v56  ;;  %295 = vst [vmem:[%s5296_s29 + $0xe4] sm:$0xf] %v294_v57 }
  0x3c   : > { %297 = vst [vmem:[%s5296_s29 + $0xe8] sm:$0xf] %v296_v58  ;;  %v298_v59 = vld [vmem:[%s5292_s28 + $0x1d8] sm:$0xf]  ;;  %v300_v60 = vld [vmem:[%s5292_s28 + $0x1e0] sm:$0xf] }
  0x3d   : > { %v302_v61 = vld [vmem:[%s5292_s28 + $0x1e8] sm:$0xf]  ;;  %299 = vst [vmem:[%s5296_s29 + $0xec] sm:$0xf] %v298_v59  ;;  %301 = vst [vmem:[%s5296_s29 + $0xf0] sm:$0xf] %v300_v60 }
  0x3e   : > { %303 = vst [vmem:[%s5296_s29 + $0xf4] sm:$0xf] %v302_v61  ;;  %v304_v62 = vld [vmem:[%s5292_s28 + $0x1f0] sm:$0xf]  ;;  %v306_v63 = vld [vmem:[%s5292_s28 + $0x1f8] sm:$0xf] }
  0x3f   : > { %v308_v0 = vld [vmem:[%s5292_s28 + $0x200] sm:$0xf]  ;;  %305 = vst [vmem:[%s5296_s29 + $0xf8] sm:$0xf] %v304_v62  ;;  %307 = vst [vmem:[%s5296_s29 + $0xfc] sm:$0xf] %v306_v63 }
  0x40   : > { %309 = vst [vmem:[%s5296_s29 + $0x100] sm:$0xf] %v308_v0  ;;  %v310_v1 = vld [vmem:[%s5292_s28 + $0x208] sm:$0xf]  ;;  %v312_v2 = vld [vmem:[%s5292_s28 + $0x210] sm:$0xf] }
  0x41   : > { %v314_v3 = vld [vmem:[%s5292_s28 + $0x218] sm:$0xf]  ;;  %311 = vst [vmem:[%s5296_s29 + $0x104] sm:$0xf] %v310_v1  ;;  %313 = vst [vmem:[%s5296_s29 + $0x108] sm:$0xf] %v312_v2 }
  0x42   : > { %315 = vst [vmem:[%s5296_s29 + $0x10c] sm:$0xf] %v314_v3  ;;  %v316_v4 = vld [vmem:[%s5292_s28 + $0x220] sm:$0xf]  ;;  %v318_v5 = vld [vmem:[%s5292_s28 + $0x228] sm:$0xf] }
  0x43   : > { %v320_v6 = vld [vmem:[%s5292_s28 + $0x230] sm:$0xf]  ;;  %317 = vst [vmem:[%s5296_s29 + $0x110] sm:$0xf] %v316_v4  ;;  %319 = vst [vmem:[%s5296_s29 + $0x114] sm:$0xf] %v318_v5 }
  0x44   : > { %321 = vst [vmem:[%s5296_s29 + $0x118] sm:$0xf] %v320_v6  ;;  %v322_v7 = vld [vmem:[%s5292_s28 + $0x238] sm:$0xf]  ;;  %v324_v8 = vld [vmem:[%s5292_s28 + $0x240] sm:$0xf] }
  0x45   : > { %v326_v9 = vld [vmem:[%s5292_s28 + $0x248] sm:$0xf]  ;;  %323 = vst [vmem:[%s5296_s29 + $0x11c] sm:$0xf] %v322_v7  ;;  %325 = vst [vmem:[%s5296_s29 + $0x120] sm:$0xf] %v324_v8 }
  0x46   : > { %327 = vst [vmem:[%s5296_s29 + $0x124] sm:$0xf] %v326_v9  ;;  %v328_v10 = vld [vmem:[%s5292_s28 + $0x250] sm:$0xf]  ;;  %v330_v11 = vld [vmem:[%s5292_s28 + $0x258] sm:$0xf] }
  0x47   : > { %v332_v12 = vld [vmem:[%s5292_s28 + $0x260] sm:$0xf]  ;;  %329 = vst [vmem:[%s5296_s29 + $0x128] sm:$0xf] %v328_v10  ;;  %331 = vst [vmem:[%s5296_s29 + $0x12c] sm:$0xf] %v330_v11 }
  0x48   : > { %333 = vst [vmem:[%s5296_s29 + $0x130] sm:$0xf] %v332_v12  ;;  %v334_v13 = vld [vmem:[%s5292_s28 + $0x268] sm:$0xf]  ;;  %v336_v14 = vld [vmem:[%s5292_s28 + $0x270] sm:$0xf] }
  0x49   : > { %v338_v15 = vld [vmem:[%s5292_s28 + $0x278] sm:$0xf]  ;;  %335 = vst [vmem:[%s5296_s29 + $0x134] sm:$0xf] %v334_v13  ;;  %337 = vst [vmem:[%s5296_s29 + $0x138] sm:$0xf] %v336_v14 }
  0x4a   : > { %339 = vst [vmem:[%s5296_s29 + $0x13c] sm:$0xf] %v338_v15  ;;  %v340_v16 = vld [vmem:[%s5292_s28 + $0x280] sm:$0xf]  ;;  %v342_v17 = vld [vmem:[%s5292_s28 + $0x288] sm:$0xf] }
  0x4b   : > { %v344_v18 = vld [vmem:[%s5292_s28 + $0x290] sm:$0xf]  ;;  %341 = vst [vmem:[%s5296_s29 + $0x140] sm:$0xf] %v340_v16  ;;  %343 = vst [vmem:[%s5296_s29 + $0x144] sm:$0xf] %v342_v17 }
  0x4c   : > { %345 = vst [vmem:[%s5296_s29 + $0x148] sm:$0xf] %v344_v18  ;;  %v346_v19 = vld [vmem:[%s5292_s28 + $0x298] sm:$0xf]  ;;  %v348_v20 = vld [vmem:[%s5292_s28 + $0x2a0] sm:$0xf] }
  0x4d   : > { %v350_v21 = vld [vmem:[%s5292_s28 + $0x2a8] sm:$0xf]  ;;  %347 = vst [vmem:[%s5296_s29 + $0x14c] sm:$0xf] %v346_v19  ;;  %349 = vst [vmem:[%s5296_s29 + $0x150] sm:$0xf] %v348_v20 }
  0x4e   : > { %351 = vst [vmem:[%s5296_s29 + $0x154] sm:$0xf] %v350_v21  ;;  %v352_v22 = vld [vmem:[%s5292_s28 + $0x2b0] sm:$0xf]  ;;  %v354_v23 = vld [vmem:[%s5292_s28 + $0x2b8] sm:$0xf] }
  0x4f   : > { %v356_v24 = vld [vmem:[%s5292_s28 + $0x2c0] sm:$0xf]  ;;  %353 = vst [vmem:[%s5296_s29 + $0x158] sm:$0xf] %v352_v22  ;;  %355 = vst [vmem:[%s5296_s29 + $0x15c] sm:$0xf] %v354_v23 }
  0x50   : > { %357 = vst [vmem:[%s5296_s29 + $0x160] sm:$0xf] %v356_v24  ;;  %v358_v25 = vld [vmem:[%s5292_s28 + $0x2c8] sm:$0xf]  ;;  %v360_v26 = vld [vmem:[%s5292_s28 + $0x2d0] sm:$0xf] }
  0x51   : > { %v362_v27 = vld [vmem:[%s5292_s28 + $0x2d8] sm:$0xf]  ;;  %359 = vst [vmem:[%s5296_s29 + $0x164] sm:$0xf] %v358_v25  ;;  %361 = vst [vmem:[%s5296_s29 + $0x168] sm:$0xf] %v360_v26 }
  0x52   : > { %363 = vst [vmem:[%s5296_s29 + $0x16c] sm:$0xf] %v362_v27  ;;  %v364_v28 = vld [vmem:[%s5292_s28 + $0x2e0] sm:$0xf]  ;;  %v366_v29 = vld [vmem:[%s5292_s28 + $0x2e8] sm:$0xf] }
  0x53   : > { %v368_v30 = vld [vmem:[%s5292_s28 + $0x2f0] sm:$0xf]  ;;  %365 = vst [vmem:[%s5296_s29 + $0x170] sm:$0xf] %v364_v28  ;;  %367 = vst [vmem:[%s5296_s29 + $0x174] sm:$0xf] %v366_v29 }
  0x54   : > { %369 = vst [vmem:[%s5296_s29 + $0x178] sm:$0xf] %v368_v30  ;;  %v370_v31 = vld [vmem:[%s5292_s28 + $0x2f8] sm:$0xf]  ;;  %v372_v32 = vld [vmem:[%s5292_s28 + $0x300] sm:$0xf] }
  0x55   : > { %v374_v33 = vld [vmem:[%s5292_s28 + $0x308] sm:$0xf]  ;;  %371 = vst [vmem:[%s5296_s29 + $0x17c] sm:$0xf] %v370_v31  ;;  %373 = vst [vmem:[%s5296_s29 + $0x180] sm:$0xf] %v372_v32 }
  0x56   : > { %375 = vst [vmem:[%s5296_s29 + $0x184] sm:$0xf] %v374_v33  ;;  %v376_v34 = vld [vmem:[%s5292_s28 + $0x310] sm:$0xf]  ;;  %v378_v35 = vld [vmem:[%s5292_s28 + $0x318] sm:$0xf] }
  0x57   : > { %v380_v36 = vld [vmem:[%s5292_s28 + $0x320] sm:$0xf]  ;;  %377 = vst [vmem:[%s5296_s29 + $0x188] sm:$0xf] %v376_v34  ;;  %379 = vst [vmem:[%s5296_s29 + $0x18c] sm:$0xf] %v378_v35 }
  0x58   : > { %381 = vst [vmem:[%s5296_s29 + $0x190] sm:$0xf] %v380_v36  ;;  %v382_v37 = vld [vmem:[%s5292_s28 + $0x328] sm:$0xf]  ;;  %v384_v38 = vld [vmem:[%s5292_s28 + $0x330] sm:$0xf] }
  0x59   : > { %v386_v39 = vld [vmem:[%s5292_s28 + $0x338] sm:$0xf]  ;;  %383 = vst [vmem:[%s5296_s29 + $0x194] sm:$0xf] %v382_v37  ;;  %385 = vst [vmem:[%s5296_s29 + $0x198] sm:$0xf] %v384_v38 }
  0x5a   : > { %387 = vst [vmem:[%s5296_s29 + $0x19c] sm:$0xf] %v386_v39  ;;  %v388_v40 = vld [vmem:[%s5292_s28 + $0x340] sm:$0xf]  ;;  %v390_v41 = vld [vmem:[%s5292_s28 + $0x348] sm:$0xf] }
  0x5b   : > { %v392_v42 = vld [vmem:[%s5292_s28 + $0x350] sm:$0xf]  ;;  %389 = vst [vmem:[%s5296_s29 + $0x1a0] sm:$0xf] %v388_v40  ;;  %391 = vst [vmem:[%s5296_s29 + $0x1a4] sm:$0xf] %v390_v41 }
  0x5c   : > { %393 = vst [vmem:[%s5296_s29 + $0x1a8] sm:$0xf] %v392_v42  ;;  %v394_v43 = vld [vmem:[%s5292_s28 + $0x358] sm:$0xf]  ;;  %v396_v44 = vld [vmem:[%s5292_s28 + $0x360] sm:$0xf] }
  0x5d   : > { %v398_v45 = vld [vmem:[%s5292_s28 + $0x368] sm:$0xf]  ;;  %395 = vst [vmem:[%s5296_s29 + $0x1ac] sm:$0xf] %v394_v43  ;;  %397 = vst [vmem:[%s5296_s29 + $0x1b0] sm:$0xf] %v396_v44 }
  0x5e   : > { %399 = vst [vmem:[%s5296_s29 + $0x1b4] sm:$0xf] %v398_v45  ;;  %v400_v46 = vld [vmem:[%s5292_s28 + $0x370] sm:$0xf]  ;;  %v402_v47 = vld [vmem:[%s5292_s28 + $0x378] sm:$0xf] }
  0x5f   : > { %v404_v48 = vld [vmem:[%s5292_s28 + $0x380] sm:$0xf]  ;;  %401 = vst [vmem:[%s5296_s29 + $0x1b8] sm:$0xf] %v400_v46  ;;  %403 = vst [vmem:[%s5296_s29 + $0x1bc] sm:$0xf] %v402_v47 }
  0x60   : > { %405 = vst [vmem:[%s5296_s29 + $0x1c0] sm:$0xf] %v404_v48  ;;  %v406_v49 = vld [vmem:[%s5292_s28 + $0x388] sm:$0xf]  ;;  %v408_v50 = vld [vmem:[%s5292_s28 + $0x390] sm:$0xf] }
  0x61   : > { %v410_v51 = vld [vmem:[%s5292_s28 + $0x398] sm:$0xf]  ;;  %407 = vst [vmem:[%s5296_s29 + $0x1c4] sm:$0xf] %v406_v49  ;;  %409 = vst [vmem:[%s5296_s29 + $0x1c8] sm:$0xf] %v408_v50 }
  0x62   : > { %411 = vst [vmem:[%s5296_s29 + $0x1cc] sm:$0xf] %v410_v51  ;;  %v412_v52 = vld [vmem:[%s5292_s28 + $0x3a0] sm:$0xf]  ;;  %v414_v53 = vld [vmem:[%s5292_s28 + $0x3a8] sm:$0xf] }
  0x63   : > { %v416_v54 = vld [vmem:[%s5292_s28 + $0x3b0] sm:$0xf]  ;;  %413 = vst [vmem:[%s5296_s29 + $0x1d0] sm:$0xf] %v412_v52  ;;  %415 = vst [vmem:[%s5296_s29 + $0x1d4] sm:$0xf] %v414_v53 }
  0x64   : > { %417 = vst [vmem:[%s5296_s29 + $0x1d8] sm:$0xf] %v416_v54  ;;  %v418_v55 = vld [vmem:[%s5292_s28 + $0x3b8] sm:$0xf]  ;;  %v420_v56 = vld [vmem:[%s5292_s28 + $0x3c0] sm:$0xf] }
  0x65   : > { %v422_v57 = vld [vmem:[%s5292_s28 + $0x3c8] sm:$0xf]  ;;  %419 = vst [vmem:[%s5296_s29 + $0x1dc] sm:$0xf] %v418_v55  ;;  %421 = vst [vmem:[%s5296_s29 + $0x1e0] sm:$0xf] %v420_v56 }
  0x66   : > { %423 = vst [vmem:[%s5296_s29 + $0x1e4] sm:$0xf] %v422_v57  ;;  %v424_v58 = vld [vmem:[%s5292_s28 + $0x3d0] sm:$0xf]  ;;  %v426_v59 = vld [vmem:[%s5292_s28 + $0x3d8] sm:$0xf] }
  0x67   : > { %v428_v60 = vld [vmem:[%s5292_s28 + $0x3e0] sm:$0xf]  ;;  %425 = vst [vmem:[%s5296_s29 + $0x1e8] sm:$0xf] %v424_v58  ;;  %427 = vst [vmem:[%s5296_s29 + $0x1ec] sm:$0xf] %v426_v59 }
  0x68   : > { %429 = vst [vmem:[%s5296_s29 + $0x1f0] sm:$0xf] %v428_v60  ;;  %v430_v61 = vld [vmem:[%s5292_s28 + $0x3e8] sm:$0xf]  ;;  %v432_v62 = vld [vmem:[%s5292_s28 + $0x3f0] sm:$0xf] }
  0x69   : > { %v434_v63 = vld [vmem:[%s5292_s28 + $0x3f8] sm:$0xf]  ;;  %431 = vst [vmem:[%s5296_s29 + $0x1f4] sm:$0xf] %v430_v61  ;;  %433 = vst [vmem:[%s5296_s29 + $0x1f8] sm:$0xf] %v432_v62 }
  0x6a   : > { %435 = vst [vmem:[%s5296_s29 + $0x1fc] sm:$0xf] %v434_v63  ;;  %v436_v0 = vld [vmem:[%s5292_s28 + $0x400] sm:$0xf]  ;;  %v438_v1 = vld [vmem:[%s5292_s28 + $0x408] sm:$0xf] }
  0x6b   : > { %v440_v2 = vld [vmem:[%s5292_s28 + $0x410] sm:$0xf]  ;;  %437 = vst [vmem:[%s5296_s29 + $0x200] sm:$0xf] %v436_v0  ;;  %439 = vst [vmem:[%s5296_s29 + $0x204] sm:$0xf] %v438_v1 }
  0x6c   : > { %441 = vst [vmem:[%s5296_s29 + $0x208] sm:$0xf] %v440_v2  ;;  %v442_v3 = vld [vmem:[%s5292_s28 + $0x418] sm:$0xf]  ;;  %v444_v4 = vld [vmem:[%s5292_s28 + $0x420] sm:$0xf] }
  0x6d   : > { %v446_v5 = vld [vmem:[%s5292_s28 + $0x428] sm:$0xf]  ;;  %443 = vst [vmem:[%s5296_s29 + $0x20c] sm:$0xf] %v442_v3  ;;  %445 = vst [vmem:[%s5296_s29 + $0x210] sm:$0xf] %v444_v4 }
  0x6e   : > { %447 = vst [vmem:[%s5296_s29 + $0x214] sm:$0xf] %v446_v5  ;;  %v448_v6 = vld [vmem:[%s5292_s28 + $0x430] sm:$0xf]  ;;  %v450_v7 = vld [vmem:[%s5292_s28 + $0x438] sm:$0xf] }
  0x6f   : > { %v452_v8 = vld [vmem:[%s5292_s28 + $0x440] sm:$0xf]  ;;  %449 = vst [vmem:[%s5296_s29 + $0x218] sm:$0xf] %v448_v6  ;;  %451 = vst [vmem:[%s5296_s29 + $0x21c] sm:$0xf] %v450_v7 }
  0x70   : > { %453 = vst [vmem:[%s5296_s29 + $0x220] sm:$0xf] %v452_v8  ;;  %v454_v9 = vld [vmem:[%s5292_s28 + $0x448] sm:$0xf]  ;;  %v456_v10 = vld [vmem:[%s5292_s28 + $0x450] sm:$0xf] }
  0x71   : > { %v458_v11 = vld [vmem:[%s5292_s28 + $0x458] sm:$0xf]  ;;  %455 = vst [vmem:[%s5296_s29 + $0x224] sm:$0xf] %v454_v9  ;;  %457 = vst [vmem:[%s5296_s29 + $0x228] sm:$0xf] %v456_v10 }
  0x72   : > { %459 = vst [vmem:[%s5296_s29 + $0x22c] sm:$0xf] %v458_v11  ;;  %v460_v12 = vld [vmem:[%s5292_s28 + $0x460] sm:$0xf]  ;;  %v462_v13 = vld [vmem:[%s5292_s28 + $0x468] sm:$0xf] }
  0x73   : > { %v464_v14 = vld [vmem:[%s5292_s28 + $0x470] sm:$0xf]  ;;  %461 = vst [vmem:[%s5296_s29 + $0x230] sm:$0xf] %v460_v12  ;;  %463 = vst [vmem:[%s5296_s29 + $0x234] sm:$0xf] %v462_v13 }
  0x74   : > { %465 = vst [vmem:[%s5296_s29 + $0x238] sm:$0xf] %v464_v14  ;;  %v466_v15 = vld [vmem:[%s5292_s28 + $0x478] sm:$0xf]  ;;  %v468_v16 = vld [vmem:[%s5292_s28 + $0x480] sm:$0xf] }
  0x75   : > { %v470_v17 = vld [vmem:[%s5292_s28 + $0x488] sm:$0xf]  ;;  %467 = vst [vmem:[%s5296_s29 + $0x23c] sm:$0xf] %v466_v15  ;;  %469 = vst [vmem:[%s5296_s29 + $0x240] sm:$0xf] %v468_v16 }
  0x76   : > { %471 = vst [vmem:[%s5296_s29 + $0x244] sm:$0xf] %v470_v17  ;;  %v472_v18 = vld [vmem:[%s5292_s28 + $0x490] sm:$0xf]  ;;  %v474_v19 = vld [vmem:[%s5292_s28 + $0x498] sm:$0xf] }
  0x77   : > { %v476_v20 = vld [vmem:[%s5292_s28 + $0x4a0] sm:$0xf]  ;;  %473 = vst [vmem:[%s5296_s29 + $0x248] sm:$0xf] %v472_v18  ;;  %475 = vst [vmem:[%s5296_s29 + $0x24c] sm:$0xf] %v474_v19 }
  0x78   : > { %477 = vst [vmem:[%s5296_s29 + $0x250] sm:$0xf] %v476_v20  ;;  %v478_v21 = vld [vmem:[%s5292_s28 + $0x4a8] sm:$0xf]  ;;  %v480_v22 = vld [vmem:[%s5292_s28 + $0x4b0] sm:$0xf] }
  0x79   : > { %v482_v23 = vld [vmem:[%s5292_s28 + $0x4b8] sm:$0xf]  ;;  %479 = vst [vmem:[%s5296_s29 + $0x254] sm:$0xf] %v478_v21  ;;  %481 = vst [vmem:[%s5296_s29 + $0x258] sm:$0xf] %v480_v22 }
  0x7a   : > { %483 = vst [vmem:[%s5296_s29 + $0x25c] sm:$0xf] %v482_v23  ;;  %v484_v24 = vld [vmem:[%s5292_s28 + $0x4c0] sm:$0xf]  ;;  %v486_v25 = vld [vmem:[%s5292_s28 + $0x4c8] sm:$0xf] }
  0x7b   : > { %v488_v26 = vld [vmem:[%s5292_s28 + $0x4d0] sm:$0xf]  ;;  %485 = vst [vmem:[%s5296_s29 + $0x260] sm:$0xf] %v484_v24  ;;  %487 = vst [vmem:[%s5296_s29 + $0x264] sm:$0xf] %v486_v25 }
  0x7c   : > { %489 = vst [vmem:[%s5296_s29 + $0x268] sm:$0xf] %v488_v26  ;;  %v490_v27 = vld [vmem:[%s5292_s28 + $0x4d8] sm:$0xf]  ;;  %v492_v28 = vld [vmem:[%s5292_s28 + $0x4e0] sm:$0xf] }
  0x7d   : > { %v494_v29 = vld [vmem:[%s5292_s28 + $0x4e8] sm:$0xf]  ;;  %491 = vst [vmem:[%s5296_s29 + $0x26c] sm:$0xf] %v490_v27  ;;  %493 = vst [vmem:[%s5296_s29 + $0x270] sm:$0xf] %v492_v28 }
  0x7e   : > { %495 = vst [vmem:[%s5296_s29 + $0x274] sm:$0xf] %v494_v29  ;;  %v496_v30 = vld [vmem:[%s5292_s28 + $0x4f0] sm:$0xf]  ;;  %v498_v31 = vld [vmem:[%s5292_s28 + $0x4f8] sm:$0xf] }
  0x7f   : > { %v500_v32 = vld [vmem:[%s5292_s28 + $0x500] sm:$0xf]  ;;  %497 = vst [vmem:[%s5296_s29 + $0x278] sm:$0xf] %v496_v30  ;;  %499 = vst [vmem:[%s5296_s29 + $0x27c] sm:$0xf] %v498_v31 }
  0x80   : > { %501 = vst [vmem:[%s5296_s29 + $0x280] sm:$0xf] %v500_v32  ;;  %v502_v33 = vld [vmem:[%s5292_s28 + $0x508] sm:$0xf]  ;;  %v504_v34 = vld [vmem:[%s5292_s28 + $0x510] sm:$0xf] }
  0x81   : > { %v506_v35 = vld [vmem:[%s5292_s28 + $0x518] sm:$0xf]  ;;  %503 = vst [vmem:[%s5296_s29 + $0x284] sm:$0xf] %v502_v33  ;;  %505 = vst [vmem:[%s5296_s29 + $0x288] sm:$0xf] %v504_v34 }
  0x82   : > { %507 = vst [vmem:[%s5296_s29 + $0x28c] sm:$0xf] %v506_v35  ;;  %v508_v36 = vld [vmem:[%s5292_s28 + $0x520] sm:$0xf]  ;;  %v510_v37 = vld [vmem:[%s5292_s28 + $0x528] sm:$0xf] }
  0x83   : > { %v512_v38 = vld [vmem:[%s5292_s28 + $0x530] sm:$0xf]  ;;  %509 = vst [vmem:[%s5296_s29 + $0x290] sm:$0xf] %v508_v36  ;;  %511 = vst [vmem:[%s5296_s29 + $0x294] sm:$0xf] %v510_v37 }
  0x84   : > { %513 = vst [vmem:[%s5296_s29 + $0x298] sm:$0xf] %v512_v38  ;;  %v514_v39 = vld [vmem:[%s5292_s28 + $0x538] sm:$0xf]  ;;  %v516_v40 = vld [vmem:[%s5292_s28 + $0x540] sm:$0xf] }
  0x85   : > { %v518_v41 = vld [vmem:[%s5292_s28 + $0x548] sm:$0xf]  ;;  %515 = vst [vmem:[%s5296_s29 + $0x29c] sm:$0xf] %v514_v39  ;;  %517 = vst [vmem:[%s5296_s29 + $0x2a0] sm:$0xf] %v516_v40 }
  0x86   : > { %519 = vst [vmem:[%s5296_s29 + $0x2a4] sm:$0xf] %v518_v41  ;;  %v520_v42 = vld [vmem:[%s5292_s28 + $0x550] sm:$0xf]  ;;  %v522_v43 = vld [vmem:[%s5292_s28 + $0x558] sm:$0xf] }
  0x87   : > { %v524_v44 = vld [vmem:[%s5292_s28 + $0x560] sm:$0xf]  ;;  %521 = vst [vmem:[%s5296_s29 + $0x2a8] sm:$0xf] %v520_v42  ;;  %523 = vst [vmem:[%s5296_s29 + $0x2ac] sm:$0xf] %v522_v43 }
  0x88   : > { %525 = vst [vmem:[%s5296_s29 + $0x2b0] sm:$0xf] %v524_v44  ;;  %v526_v45 = vld [vmem:[%s5292_s28 + $0x568] sm:$0xf]  ;;  %v528_v46 = vld [vmem:[%s5292_s28 + $0x570] sm:$0xf] }
  0x89   : > { %v530_v47 = vld [vmem:[%s5292_s28 + $0x578] sm:$0xf]  ;;  %527 = vst [vmem:[%s5296_s29 + $0x2b4] sm:$0xf] %v526_v45  ;;  %529 = vst [vmem:[%s5296_s29 + $0x2b8] sm:$0xf] %v528_v46 }
  0x8a   : > { %531 = vst [vmem:[%s5296_s29 + $0x2bc] sm:$0xf] %v530_v47  ;;  %v532_v48 = vld [vmem:[%s5292_s28 + $0x580] sm:$0xf]  ;;  %v534_v49 = vld [vmem:[%s5292_s28 + $0x588] sm:$0xf] }
  0x8b   : > { %v536_v50 = vld [vmem:[%s5292_s28 + $0x590] sm:$0xf]  ;;  %533 = vst [vmem:[%s5296_s29 + $0x2c0] sm:$0xf] %v532_v48  ;;  %535 = vst [vmem:[%s5296_s29 + $0x2c4] sm:$0xf] %v534_v49 }
  0x8c   : > { %537 = vst [vmem:[%s5296_s29 + $0x2c8] sm:$0xf] %v536_v50  ;;  %v538_v51 = vld [vmem:[%s5292_s28 + $0x598] sm:$0xf]  ;;  %v540_v52 = vld [vmem:[%s5292_s28 + $0x5a0] sm:$0xf] }
  0x8d   : > { %v542_v53 = vld [vmem:[%s5292_s28 + $0x5a8] sm:$0xf]  ;;  %539 = vst [vmem:[%s5296_s29 + $0x2cc] sm:$0xf] %v538_v51  ;;  %541 = vst [vmem:[%s5296_s29 + $0x2d0] sm:$0xf] %v540_v52 }
  0x8e   : > { %543 = vst [vmem:[%s5296_s29 + $0x2d4] sm:$0xf] %v542_v53  ;;  %v544_v54 = vld [vmem:[%s5292_s28 + $0x5b0] sm:$0xf]  ;;  %v546_v55 = vld [vmem:[%s5292_s28 + $0x5b8] sm:$0xf] }
  0x8f   : > { %v548_v56 = vld [vmem:[%s5292_s28 + $0x5c0] sm:$0xf]  ;;  %545 = vst [vmem:[%s5296_s29 + $0x2d8] sm:$0xf] %v544_v54  ;;  %547 = vst [vmem:[%s5296_s29 + $0x2dc] sm:$0xf] %v546_v55 }
  0x90   : > { %549 = vst [vmem:[%s5296_s29 + $0x2e0] sm:$0xf] %v548_v56  ;;  %v550_v57 = vld [vmem:[%s5292_s28 + $0x5c8] sm:$0xf]  ;;  %v552_v58 = vld [vmem:[%s5292_s28 + $0x5d0] sm:$0xf] }
  0x91   : > { %v554_v59 = vld [vmem:[%s5292_s28 + $0x5d8] sm:$0xf]  ;;  %551 = vst [vmem:[%s5296_s29 + $0x2e4] sm:$0xf] %v550_v57  ;;  %553 = vst [vmem:[%s5296_s29 + $0x2e8] sm:$0xf] %v552_v58 }
  0x92   : > { %555 = vst [vmem:[%s5296_s29 + $0x2ec] sm:$0xf] %v554_v59  ;;  %v556_v60 = vld [vmem:[%s5292_s28 + $0x5e0] sm:$0xf]  ;;  %v558_v61 = vld [vmem:[%s5292_s28 + $0x5e8] sm:$0xf] }
  0x93   : > { %v560_v62 = vld [vmem:[%s5292_s28 + $0x5f0] sm:$0xf]  ;;  %557 = vst [vmem:[%s5296_s29 + $0x2f0] sm:$0xf] %v556_v60  ;;  %559 = vst [vmem:[%s5296_s29 + $0x2f4] sm:$0xf] %v558_v61 }
  0x94   : > { %561 = vst [vmem:[%s5296_s29 + $0x2f8] sm:$0xf] %v560_v62  ;;  %v562_v63 = vld [vmem:[%s5292_s28 + $0x5f8] sm:$0xf]  ;;  %v564_v0 = vld [vmem:[%s5292_s28 + $0x600] sm:$0xf] }
  0x95   : > { %v566_v1 = vld [vmem:[%s5292_s28 + $0x608] sm:$0xf]  ;;  %563 = vst [vmem:[%s5296_s29 + $0x2fc] sm:$0xf] %v562_v63  ;;  %565 = vst [vmem:[%s5296_s29 + $0x300] sm:$0xf] %v564_v0 }
  0x96   : > { %567 = vst [vmem:[%s5296_s29 + $0x304] sm:$0xf] %v566_v1  ;;  %v568_v2 = vld [vmem:[%s5292_s28 + $0x610] sm:$0xf]  ;;  %v570_v3 = vld [vmem:[%s5292_s28 + $0x618] sm:$0xf] }
  0x97   : > { %v572_v4 = vld [vmem:[%s5292_s28 + $0x620] sm:$0xf]  ;;  %569 = vst [vmem:[%s5296_s29 + $0x308] sm:$0xf] %v568_v2  ;;  %571 = vst [vmem:[%s5296_s29 + $0x30c] sm:$0xf] %v570_v3 }
  0x98   : > { %573 = vst [vmem:[%s5296_s29 + $0x310] sm:$0xf] %v572_v4  ;;  %v574_v5 = vld [vmem:[%s5292_s28 + $0x628] sm:$0xf]  ;;  %v576_v6 = vld [vmem:[%s5292_s28 + $0x630] sm:$0xf] }
  0x99   : > { %v578_v7 = vld [vmem:[%s5292_s28 + $0x638] sm:$0xf]  ;;  %575 = vst [vmem:[%s5296_s29 + $0x314] sm:$0xf] %v574_v5  ;;  %577 = vst [vmem:[%s5296_s29 + $0x318] sm:$0xf] %v576_v6 }
  0x9a   : > { %579 = vst [vmem:[%s5296_s29 + $0x31c] sm:$0xf] %v578_v7  ;;  %v580_v8 = vld [vmem:[%s5292_s28 + $0x640] sm:$0xf]  ;;  %v582_v9 = vld [vmem:[%s5292_s28 + $0x648] sm:$0xf] }
  0x9b   : > { %v584_v10 = vld [vmem:[%s5292_s28 + $0x650] sm:$0xf]  ;;  %581 = vst [vmem:[%s5296_s29 + $0x320] sm:$0xf] %v580_v8  ;;  %583 = vst [vmem:[%s5296_s29 + $0x324] sm:$0xf] %v582_v9 }
  0x9c   : > { %585 = vst [vmem:[%s5296_s29 + $0x328] sm:$0xf] %v584_v10  ;;  %v586_v11 = vld [vmem:[%s5292_s28 + $0x658] sm:$0xf]  ;;  %v588_v12 = vld [vmem:[%s5292_s28 + $0x660] sm:$0xf] }
  0x9d   : > { %v590_v13 = vld [vmem:[%s5292_s28 + $0x668] sm:$0xf]  ;;  %587 = vst [vmem:[%s5296_s29 + $0x32c] sm:$0xf] %v586_v11  ;;  %589 = vst [vmem:[%s5296_s29 + $0x330] sm:$0xf] %v588_v12 }
  0x9e   : > { %591 = vst [vmem:[%s5296_s29 + $0x334] sm:$0xf] %v590_v13  ;;  %v592_v14 = vld [vmem:[%s5292_s28 + $0x670] sm:$0xf]  ;;  %v594_v15 = vld [vmem:[%s5292_s28 + $0x678] sm:$0xf] }
  0x9f   : > { %v596_v16 = vld [vmem:[%s5292_s28 + $0x680] sm:$0xf]  ;;  %593 = vst [vmem:[%s5296_s29 + $0x338] sm:$0xf] %v592_v14  ;;  %595 = vst [vmem:[%s5296_s29 + $0x33c] sm:$0xf] %v594_v15 }
  0xa0   : > { %597 = vst [vmem:[%s5296_s29 + $0x340] sm:$0xf] %v596_v16  ;;  %v598_v17 = vld [vmem:[%s5292_s28 + $0x688] sm:$0xf]  ;;  %v600_v18 = vld [vmem:[%s5292_s28 + $0x690] sm:$0xf] }
  0xa1   : > { %v602_v19 = vld [vmem:[%s5292_s28 + $0x698] sm:$0xf]  ;;  %599 = vst [vmem:[%s5296_s29 + $0x344] sm:$0xf] %v598_v17  ;;  %601 = vst [vmem:[%s5296_s29 + $0x348] sm:$0xf] %v600_v18 }
  0xa2   : > { %603 = vst [vmem:[%s5296_s29 + $0x34c] sm:$0xf] %v602_v19  ;;  %v604_v20 = vld [vmem:[%s5292_s28 + $0x6a0] sm:$0xf]  ;;  %v606_v21 = vld [vmem:[%s5292_s28 + $0x6a8] sm:$0xf] }
  0xa3   : > { %v608_v22 = vld [vmem:[%s5292_s28 + $0x6b0] sm:$0xf]  ;;  %605 = vst [vmem:[%s5296_s29 + $0x350] sm:$0xf] %v604_v20  ;;  %607 = vst [vmem:[%s5296_s29 + $0x354] sm:$0xf] %v606_v21 }
  0xa4   : > { %609 = vst [vmem:[%s5296_s29 + $0x358] sm:$0xf] %v608_v22  ;;  %v610_v23 = vld [vmem:[%s5292_s28 + $0x6b8] sm:$0xf]  ;;  %v612_v24 = vld [vmem:[%s5292_s28 + $0x6c0] sm:$0xf] }
  0xa5   : > { %v614_v25 = vld [vmem:[%s5292_s28 + $0x6c8] sm:$0xf]  ;;  %611 = vst [vmem:[%s5296_s29 + $0x35c] sm:$0xf] %v610_v23  ;;  %613 = vst [vmem:[%s5296_s29 + $0x360] sm:$0xf] %v612_v24 }
  0xa6   : > { %615 = vst [vmem:[%s5296_s29 + $0x364] sm:$0xf] %v614_v25  ;;  %v616_v26 = vld [vmem:[%s5292_s28 + $0x6d0] sm:$0xf]  ;;  %v618_v27 = vld [vmem:[%s5292_s28 + $0x6d8] sm:$0xf] }
  0xa7   : > { %v620_v28 = vld [vmem:[%s5292_s28 + $0x6e0] sm:$0xf]  ;;  %617 = vst [vmem:[%s5296_s29 + $0x368] sm:$0xf] %v616_v26  ;;  %619 = vst [vmem:[%s5296_s29 + $0x36c] sm:$0xf] %v618_v27 }
  0xa8   : > { %621 = vst [vmem:[%s5296_s29 + $0x370] sm:$0xf] %v620_v28  ;;  %v622_v29 = vld [vmem:[%s5292_s28 + $0x6e8] sm:$0xf]  ;;  %v624_v30 = vld [vmem:[%s5292_s28 + $0x6f0] sm:$0xf] }
  0xa9   : > { %v626_v31 = vld [vmem:[%s5292_s28 + $0x6f8] sm:$0xf]  ;;  %623 = vst [vmem:[%s5296_s29 + $0x374] sm:$0xf] %v622_v29  ;;  %625 = vst [vmem:[%s5296_s29 + $0x378] sm:$0xf] %v624_v30 }
  0xaa   : > { %627 = vst [vmem:[%s5296_s29 + $0x37c] sm:$0xf] %v626_v31  ;;  %v628_v32 = vld [vmem:[%s5292_s28 + $0x700] sm:$0xf]  ;;  %v630_v33 = vld [vmem:[%s5292_s28 + $0x708] sm:$0xf] }
  0xab   : > { %v632_v34 = vld [vmem:[%s5292_s28 + $0x710] sm:$0xf]  ;;  %629 = vst [vmem:[%s5296_s29 + $0x380] sm:$0xf] %v628_v32  ;;  %631 = vst [vmem:[%s5296_s29 + $0x384] sm:$0xf] %v630_v33 }
  0xac   : > { %633 = vst [vmem:[%s5296_s29 + $0x388] sm:$0xf] %v632_v34  ;;  %v634_v35 = vld [vmem:[%s5292_s28 + $0x718] sm:$0xf]  ;;  %v636_v36 = vld [vmem:[%s5292_s28 + $0x720] sm:$0xf] }
  0xad   : > { %v638_v37 = vld [vmem:[%s5292_s28 + $0x728] sm:$0xf]  ;;  %635 = vst [vmem:[%s5296_s29 + $0x38c] sm:$0xf] %v634_v35  ;;  %637 = vst [vmem:[%s5296_s29 + $0x390] sm:$0xf] %v636_v36 }
  0xae   : > { %639 = vst [vmem:[%s5296_s29 + $0x394] sm:$0xf] %v638_v37  ;;  %v640_v38 = vld [vmem:[%s5292_s28 + $0x730] sm:$0xf]  ;;  %v642_v39 = vld [vmem:[%s5292_s28 + $0x738] sm:$0xf] }
  0xaf   : > { %v644_v40 = vld [vmem:[%s5292_s28 + $0x740] sm:$0xf]  ;;  %641 = vst [vmem:[%s5296_s29 + $0x398] sm:$0xf] %v640_v38  ;;  %643 = vst [vmem:[%s5296_s29 + $0x39c] sm:$0xf] %v642_v39 }
  0xb0   : > { %645 = vst [vmem:[%s5296_s29 + $0x3a0] sm:$0xf] %v644_v40  ;;  %v646_v41 = vld [vmem:[%s5292_s28 + $0x748] sm:$0xf]  ;;  %v648_v42 = vld [vmem:[%s5292_s28 + $0x750] sm:$0xf] }
  0xb1   : > { %v650_v43 = vld [vmem:[%s5292_s28 + $0x758] sm:$0xf]  ;;  %647 = vst [vmem:[%s5296_s29 + $0x3a4] sm:$0xf] %v646_v41  ;;  %649 = vst [vmem:[%s5296_s29 + $0x3a8] sm:$0xf] %v648_v42 }
  0xb2   : > { %651 = vst [vmem:[%s5296_s29 + $0x3ac] sm:$0xf] %v650_v43  ;;  %v652_v44 = vld [vmem:[%s5292_s28 + $0x760] sm:$0xf]  ;;  %v654_v45 = vld [vmem:[%s5292_s28 + $0x768] sm:$0xf] }
  0xb3   : > { %v656_v46 = vld [vmem:[%s5292_s28 + $0x770] sm:$0xf]  ;;  %653 = vst [vmem:[%s5296_s29 + $0x3b0] sm:$0xf] %v652_v44  ;;  %655 = vst [vmem:[%s5296_s29 + $0x3b4] sm:$0xf] %v654_v45 }
  0xb4   : > { %657 = vst [vmem:[%s5296_s29 + $0x3b8] sm:$0xf] %v656_v46  ;;  %v658_v47 = vld [vmem:[%s5292_s28 + $0x778] sm:$0xf]  ;;  %v660_v48 = vld [vmem:[%s5292_s28 + $0x780] sm:$0xf] }
  0xb5   : > { %v662_v49 = vld [vmem:[%s5292_s28 + $0x788] sm:$0xf]  ;;  %659 = vst [vmem:[%s5296_s29 + $0x3bc] sm:$0xf] %v658_v47  ;;  %661 = vst [vmem:[%s5296_s29 + $0x3c0] sm:$0xf] %v660_v48 }
  0xb6   : > { %663 = vst [vmem:[%s5296_s29 + $0x3c4] sm:$0xf] %v662_v49  ;;  %v664_v50 = vld [vmem:[%s5292_s28 + $0x790] sm:$0xf]  ;;  %v666_v51 = vld [vmem:[%s5292_s28 + $0x798] sm:$0xf] }
  0xb7   : > { %v668_v52 = vld [vmem:[%s5292_s28 + $0x7a0] sm:$0xf]  ;;  %665 = vst [vmem:[%s5296_s29 + $0x3c8] sm:$0xf] %v664_v50  ;;  %667 = vst [vmem:[%s5296_s29 + $0x3cc] sm:$0xf] %v666_v51 }
  0xb8   : > { %669 = vst [vmem:[%s5296_s29 + $0x3d0] sm:$0xf] %v668_v52  ;;  %v670_v53 = vld [vmem:[%s5292_s28 + $0x7a8] sm:$0xf]  ;;  %v672_v54 = vld [vmem:[%s5292_s28 + $0x7b0] sm:$0xf] }
  0xb9   : > { %v674_v55 = vld [vmem:[%s5292_s28 + $0x7b8] sm:$0xf]  ;;  %671 = vst [vmem:[%s5296_s29 + $0x3d4] sm:$0xf] %v670_v53  ;;  %673 = vst [vmem:[%s5296_s29 + $0x3d8] sm:$0xf] %v672_v54 }
  0xba   : > { %675 = vst [vmem:[%s5296_s29 + $0x3dc] sm:$0xf] %v674_v55  ;;  %v676_v56 = vld [vmem:[%s5292_s28 + $0x7c0] sm:$0xf]  ;;  %v678_v57 = vld [vmem:[%s5292_s28 + $0x7c8] sm:$0xf] }
  0xbb   : > { %v680_v58 = vld [vmem:[%s5292_s28 + $0x7d0] sm:$0xf]  ;;  %677 = vst [vmem:[%s5296_s29 + $0x3e0] sm:$0xf] %v676_v56  ;;  %679 = vst [vmem:[%s5296_s29 + $0x3e4] sm:$0xf] %v678_v57 }
  0xbc   : > { %681 = vst [vmem:[%s5296_s29 + $0x3e8] sm:$0xf] %v680_v58  ;;  %v682_v59 = vld [vmem:[%s5292_s28 + $0x7d8] sm:$0xf]  ;;  %v684_v60 = vld [vmem:[%s5292_s28 + $0x7e0] sm:$0xf] }
  0xbd   : > { %v686_v61 = vld [vmem:[%s5292_s28 + $0x7e8] sm:$0xf]  ;;  %683 = vst [vmem:[%s5296_s29 + $0x3ec] sm:$0xf] %v682_v59  ;;  %685 = vst [vmem:[%s5296_s29 + $0x3f0] sm:$0xf] %v684_v60 }
  0xbe   : > { %687 = vst [vmem:[%s5296_s29 + $0x3f4] sm:$0xf] %v686_v61  ;;  %v688_v62 = vld [vmem:[%s5292_s28 + $0x7f0] sm:$0xf]  ;;  %v690_v63 = vld [vmem:[%s5292_s28 + $0x7f8] sm:$0xf] }
  0xbf   : > { %689 = vst [vmem:[%s5296_s29 + $0x3f8] sm:$0xf] %v688_v62  ;;  %691 = vst [vmem:[%s5296_s29 + $0x3fc] sm:$0xf] %v690_v63 }
  0xc0 PF: > { %p4161_p8 = scmp.ge.s32.totalorder %s5222_s16, 1  ;;  %p1231_p9 = scmp.lt.s32.totalorder %s5222_s16, 3 }
  0xc2   : > { %p1232_p10 = pnand %p4161_p8, %p1231_p9 }
  0xc3   : > { %s1238_s30 = sand.u32 (!%p1232_p10), 1, %s5206_s12   ;;  %v5814_v0 = vld [vmem:[%s6559_s0] sm:$0xff] (!%p1232_p10)  ;;  %v5824_v2 = vld [vmem:[%s6559_s0 + $0x8] sm:$0xff] (!%p1232_p10)  ;;  %p1276_p11 = scmp.lt.s32.totalorder (!%p1232_p10), %s5214_s14, 1 }
  0xc4   : > { %1235 = sbr.rel (%p1232_p10) target bundleno = 714 (0x2ca), region = 69  ;;  %v5819_v1 = vld [vmem:[%s6559_s0 + $0x40] sm:$0xff] (!%p1232_p10)  ;;  %s4162_s10 = sshll.u32 (!%p1232_p10), %s1238_s30, 10  ;;  %v5833_v4 = vld [vmem:[%s6559_s0 + $0x48] sm:$0xff] (!%p1232_p10) }
  0xc5   : > { %v4166_v3 = vcombine.high (!%p1232_p10), %v5814_v0, %v5819_v1  ;;  %v4168_v5 = vcombine.high (!%p1232_p10), %v5824_v2, %v5833_v4  ;;  %s5837_s19 = scalar_lea.vmem (!%p1232_p10), [#allocation2], %s4162_s10  ;;  %v1297_v35 = vld [vmem:[%s6559_s0 + $0x80] sm:$0xff] (!%p1232_p10)  ;;  %v1298_v38 = vld [vmem:[%s6559_s0 + $0x88] sm:$0xff] (!%p1232_p10)  ;;  %v4165_v42 = vcombine.low (!%p1232_p10), %v5814_v0, %v5819_v1  ;;  %v4167_v43 = vcombine.low (!%p1232_p10), %v5824_v2, %v5833_v4 }
  0xc6   : > { %v5056_v6 = vld [vmem:[%s5837_s19 + $0x40] sm:$0xff] (!%p1232_p10)   ;;  %v5060_v10 = vld [vmem:[%s5837_s19 + $0x48] sm:$0xff] (!%p1232_p10)   ;;  %v5064_v14 = vld [vmem:[%s5837_s19 + $0x50] sm:$0xff] (!%p1232_p10)  }
  0xc7   : > { %3112 = vmatprep.mubr.bf16.mxu0 (!%p1232_p10), %v4166_v3  ;;  %v5057_v7 = vld [vmem:[%s5837_s19 + $0xc0] sm:$0xff] (!%p1232_p10)   ;;  %3209 = vmatprep.mubr.bf16.mxu1 (!%p1232_p10), %v4168_v5  ;;  %v5061_v11 = vld [vmem:[%s5837_s19 + $0xc8] sm:$0xff] (!%p1232_p10)   ;;  %v5065_v15 = vld [vmem:[%s5837_s19 + $0xd0] sm:$0xff] (!%p1232_p10)  }
  0xc8   : > { %4504 = vmatprep.subr.bf16.mxu0 (!%p1232_p10), %v5056_v6  ;;  %v5058_v8 = vld [vmem:[%s5837_s19] sm:$0xff] (!%p1232_p10)   ;;  %4568 = vmatprep.subr.bf16.mxu1 (!%p1232_p10), %v5057_v7  ;;  %v5062_v12 = vld [vmem:[%s5837_s19 + $0x8] sm:$0xff] (!%p1232_p10)   ;;  %v5066_v16 = vld [vmem:[%s5837_s19 + $0x10] sm:$0xff] (!%p1232_p10)  }
  0xc9   : > { %v5059_v9 = vld [vmem:[%s5837_s19 + $0x80] sm:$0xff] (!%p1232_p10)   ;;  %4505 = vmatpush3.bf16.msra.mxu0 (!%p1232_p10), %v5058_v8  ;;  %v5063_v13 = vld [vmem:[%s5837_s19 + $0x88] sm:$0xff] (!%p1232_p10)   ;;  %v5067_v17 = vld [vmem:[%s5837_s19 + $0x90] sm:$0xff] (!%p1232_p10)  }
  0xca   : > { %4569 = vmatpush3.bf16.msra.mxu1 (!%p1232_p10), %v5059_v9  ;;  %4506 = vmatprep.subr.bf16.mxu0 (!%p1232_p10), %v5060_v10  ;;  %v5068_v18 = vld [vmem:[%s5837_s19 + $0x58] sm:$0xff] (!%p1232_p10)   ;;  %v5072_v22 = vld [vmem:[%s5837_s19 + $0x60] sm:$0xff] (!%p1232_p10)   ;;  %v5076_v26 = vld [vmem:[%s5837_s19 + $0x68] sm:$0xff] (!%p1232_p10)  }
  0xcb   : > { %4570 = vmatprep.subr.bf16.mxu1 %v5061_v11  ;;  %v5069_v19 = vld [vmem:[%s5837_s19 + $0xd8] sm:$0xff]   ;;  %v5073_v23 = vld [vmem:[%s5837_s19 + $0xe0] sm:$0xff]   ;;  %v5077_v27 = vld [vmem:[%s5837_s19 + $0xe8] sm:$0xff]   ;;  %s1277_s5 = scalar_select %p1276_p11, %s5214_s14, 1 }
  0xcc   : > { %v5070_v20 = vld [vmem:[%s5837_s19 + $0x18] sm:$0xff]   ;;  %v5074_v24 = vld [vmem:[%s5837_s19 + $0x20] sm:$0xff]   ;;  %v5078_v28 = vld [vmem:[%s5837_s19 + $0x28] sm:$0xff]  }
  0xcd   : > { %4507 = vmatpush3.bf16.msra.mxu0 %v5062_v12  ;;  %v5071_v21 = vld [vmem:[%s5837_s19 + $0x98] sm:$0xff]   ;;  %v5075_v25 = vld [vmem:[%s5837_s19 + $0xa0] sm:$0xff]   ;;  %v5079_v29 = vld [vmem:[%s5837_s19 + $0xa8] sm:$0xff]   ;;  %s1278_s8 = scalar_lea.vmem %s6561_s2, %s1277_s5  ;;  %s4163_s5 = sshll.u32 %s1238_s30, 6 }
  0xce   : > { %4571 = vmatpush3.bf16.msra.mxu1 %v5063_v13  ;;  %4508 = vmatprep.subr.bf16.mxu0 %v5064_v14  ;;  %v5080_v30 = vld [vmem:[%s5837_s19 + $0x70] sm:$0xff]   ;;  %v5084_v34 = vld [vmem:[%s5837_s19 + $0x78] sm:$0xff]   ;;  %v1305_v36 = vld [vmem:[%s6559_s0 + $0xc0] sm:$0xff]  ;;  %s6499_s12 = scalar_lea.vmem [#allocation3], %s4163_s5  ;;  %s4438_s30 = sshll.u32 (%p5279_p6), %s5214_s14, 2 }
  0xcf   : > { %4572 = vmatprep.subr.bf16.mxu1 %v5065_v15  ;;  %v5081_v31 = vld [vmem:[%s5837_s19 + $0xf0] sm:$0xff]   ;;  %v5085_v37 = vld [vmem:[%s5837_s19 + $0xf8] sm:$0xff]   ;;  %v1306_v39 = vld [vmem:[%s6559_s0 + $0xc8] sm:$0xff]  ;;  %v4182_v46 = vcombine.high %v1297_v35, %v1305_v36  ;;  %v4181_v54 = vcombine.low %v1297_v35, %v1305_v36 }
  0xd0   : > { %v5082_v32 = vld [vmem:[%s5837_s19 + $0x30] sm:$0xff]   ;;  %v5086_v40 = vld [vmem:[%s5837_s19 + $0x38] sm:$0xff]   ;;  %v5088_v44 = vld [vmem:[%s5837_s19 + $0x140] sm:$0xff]   ;;  %v4184_v48 = vcombine.high %v1298_v38, %v1306_v39  ;;  %v4183_v56 = vcombine.low %v1298_v38, %v1306_v39 }
  0xd1   : > { %4509 = vmatpush3.bf16.msra.mxu0 %v5066_v16  ;;  %v5083_v33 = vld [vmem:[%s5837_s19 + $0xb0] sm:$0xff]   ;;  %v5087_v41 = vld [vmem:[%s5837_s19 + $0xb8] sm:$0xff]   ;;  %v5089_v45 = vld [vmem:[%s5837_s19 + $0x100] sm:$0xff]  }
  0xd2   : > { %4573 = vmatpush3.bf16.msra.mxu1 %v5067_v17  ;;  %4510 = vmatprep.subr.bf16.mxu0 %v5068_v18  ;;  %v5090_v47 = vld [vmem:[%s5837_s19 + $0x1c0] sm:$0xff]   ;;  %v5092_v50 = vld [vmem:[%s5837_s19 + $0x148] sm:$0xff]   ;;  %v5096_v62 = vld [vmem:[%s5837_s19 + $0x150] sm:$0xff]  }
  0xd3   : > { %4574 = vmatprep.subr.bf16.mxu1 %v5069_v19  ;;  %v5091_v49 = vld [vmem:[%s5837_s19 + $0x180] sm:$0xff]   ;;  %v5093_v52 = vld [vmem:[%s5837_s19 + $0x108] sm:$0xff]   ;;  %v5097_v63 = vld [vmem:[%s5837_s19 + $0x110] sm:$0xff]  }
  0xd4   : > { %v1313_v51 = vld [vmem:[%s6559_s0 + $0x100] sm:$0xff]  ;;  %v5094_v53 = vld [vmem:[%s5837_s19 + $0x1c8] sm:$0xff]   ;;  %v5098_v0 = vld [vmem:[%s5837_s19 + $0x1d0] sm:$0xff]  }
  0xd5   : > { %4511 = vmatpush3.bf16.msra.mxu0 %v5070_v20  ;;  %v5095_v55 = vld [vmem:[%s5837_s19 + $0x188] sm:$0xff]   ;;  %v1321_v57 = vld [vmem:[%s6559_s0 + $0x140] sm:$0xff]  ;;  %v5099_v1 = vld [vmem:[%s5837_s19 + $0x190] sm:$0xff]  }
  0xd6   : > { %4575 = vmatpush3.bf16.msra.mxu1 %v5071_v21  ;;  %4512 = vmatprep.subr.bf16.mxu0 %v5072_v22  ;;  %v1314_v58 = vld [vmem:[%s6559_s0 + $0x108] sm:$0xff]  ;;  %v4198_v60 = vcombine.high %v1313_v51, %v1321_v57  ;;  %v1329_v2 = vld [vmem:[%s6559_s0 + $0x180] sm:$0xff]  ;;  %v4197_v6 = vcombine.low %v1313_v51, %v1321_v57  ;;  %v5100_v7 = vld [vmem:[%s5837_s19 + $0x158] sm:$0xff]  }
  0xd7   : > { %4576 = vmatprep.subr.bf16.mxu1 %v5073_v23  ;;  %v1322_v59 = vld [vmem:[%s6559_s0 + $0x148] sm:$0xff]  ;;  %v1337_v3 = vld [vmem:[%s6559_s0 + $0x1c0] sm:$0xff]  ;;  %v5101_v10 = vld [vmem:[%s5837_s19 + $0x118] sm:$0xff]  }
  0xd8   : > { %v4200_v61 = vcombine.high %v1314_v58, %v1322_v59  ;;  %v1330_v4 = vld [vmem:[%s6559_s0 + $0x188] sm:$0xff]  ;;  %v4199_v8 = vcombine.low %v1314_v58, %v1322_v59  ;;  %v4214_v9 = vcombine.high %v1329_v2, %v1337_v3  ;;  %v5102_v12 = vld [vmem:[%s5837_s19 + $0x1d8] sm:$0xff]   ;;  %v1345_v14 = vld [vmem:[%s6559_s0 + $0x200] sm:$0xff]  ;;  %v4213_v21 = vcombine.low %v1329_v2, %v1337_v3 }
  0xd9   : > { %4513 = vmatpush3.bf16.msra.mxu0 %v5074_v24  ;;  %v1338_v5 = vld [vmem:[%s6559_s0 + $0x1c8] sm:$0xff]  ;;  %v5103_v13 = vld [vmem:[%s5837_s19 + $0x198] sm:$0xff]   ;;  %v1353_v15 = vld [vmem:[%s6559_s0 + $0x240] sm:$0xff] }
  0xda   : > { %4577 = vmatpush3.bf16.msra.mxu1 %v5075_v25  ;;  %4514 = vmatprep.subr.bf16.mxu0 %v5076_v26  ;;  %v4216_v11 = vcombine.high %v1330_v4, %v1338_v5  ;;  %v1346_v16 = vld [vmem:[%s6559_s0 + $0x208] sm:$0xff]  ;;  %v5104_v18 = vld [vmem:[%s5837_s19 + $0x160] sm:$0xff]   ;;  %v4215_v23 = vcombine.low %v1330_v4, %v1338_v5  ;;  %v4230_v24 = vcombine.high %v1345_v14, %v1353_v15  ;;  %v5112_v35 = vld [vmem:[%s5837_s19 + $0x170] sm:$0xff]  }
  0xdb   : > { %4578 = vmatprep.subr.bf16.mxu1 %v5077_v27  ;;  %v1354_v17 = vld [vmem:[%s6559_s0 + $0x248] sm:$0xff]  ;;  %v5105_v19 = vld [vmem:[%s5837_s19 + $0x120] sm:$0xff]   ;;  %v5113_v38 = vld [vmem:[%s5837_s19 + $0x130] sm:$0xff]  }
  0xdc   : > { %v5106_v20 = vld [vmem:[%s5837_s19 + $0x1e0] sm:$0xff]   ;;  %v4232_v25 = vcombine.high %v1346_v16, %v1354_v17  ;;  %v5108_v26 = vld [vmem:[%s5837_s19 + $0x168] sm:$0xff]   ;;  %v4231_v36 = vcombine.low %v1346_v16, %v1354_v17  ;;  %v1284_v2 = vld [vmem:[%s6559_s0 + $0x18] sm:$0xff] }
  0xdd   : > { %4515 = vmatpush3.bf16.msra.mxu0 %v5078_v28  ;;  %v5107_v22 = vld [vmem:[%s5837_s19 + $0x1a0] sm:$0xff]   ;;  %v5109_v27 = vld [vmem:[%s5837_s19 + $0x128] sm:$0xff]   ;;  %v1292_v3 = vld [vmem:[%s6559_s0 + $0x58] sm:$0xff] }
  0xde   : > { %4579 = vmatpush3.bf16.msra.mxu1 %v5079_v29  ;;  %4516 = vmatprep.subr.bf16.mxu0 %v5080_v30  ;;  %v5110_v28 = vld [vmem:[%s5837_s19 + $0x1e8] sm:$0xff]   ;;  %v1361_v30 = vld [vmem:[%s6559_s0 + $0x280] sm:$0xff] }
  0xdf   : > { %4580 = vmatprep.subr.bf16.mxu1 %v5081_v31  ;;  %v5111_v29 = vld [vmem:[%s5837_s19 + $0x1a8] sm:$0xff]   ;;  %v1369_v31 = vld [vmem:[%s6559_s0 + $0x2c0] sm:$0xff] }
  0xe0   : > { %v1401_v57 = vld [vmem:[%s6559_s0 + $0x3c0] sm:$0xff]  ;;  %v1394_v58 = vld [vmem:[%s6559_s0 + $0x388] sm:$0xff] }
  0xe1   : > { %4517 = vmatpush3.bf16.msra.mxu0 %v5082_v32  ;;  %v1362_v32 = vld [vmem:[%s6559_s0 + $0x288] sm:$0xff] }
  0xe2   : > { %4581 = vmatpush3.bf16.msra.mxu1 %v5083_v33  ;;  %4518 = vmatprep.subr.bf16.mxu0 %v5084_v34  ;;  %v1370_v33 = vld [vmem:[%s6559_s0 + $0x2c8] sm:$0xff]  ;;  %v4229_v34 = vcombine.low %v1345_v14, %v1353_v15  ;;  %v5121_v14 = vld [vmem:[%s5837_s19 + $0x200] sm:$0xff]  }
  0xe3   : > { %4582 = vmatprep.subr.bf16.mxu1 %v5085_v37  ;;  %v4246_v37 = vcombine.high %v1361_v30, %v1369_v31  ;;  %v4248_v39 = vcombine.high %v1362_v32, %v1370_v33  ;;  %v4247_v51 = vcombine.low %v1362_v32, %v1370_v33  ;;  %v1402_v59 = vld [vmem:[%s6559_s0 + $0x3c8] sm:$0xff]  ;;  %v5123_v15 = vld [vmem:[%s5837_s19 + $0x280] sm:$0xff]   ;;  %v5131_v33 = vld [vmem:[%s5837_s19 + $0x290] sm:$0xff]  }
  0xe4   : > { %v4279_v5 = vcombine.low %v1394_v58, %v1402_v59 }
  0xe5   : > { %4519 = vmatpush3.bf16.msra.mxu0 %v5086_v40  ;;  %v5114_v40 = vld [vmem:[%s5837_s19 + $0x1f0] sm:$0xff]  }
  0xe6   : > { %4583 = vmatpush3.bf16.msra.mxu1 %v5087_v41  ;;  %4632 = vmatprep.subr.bf16.mxu0 %v5088_v44  ;;  %v5115_v41 = vld [vmem:[%s5837_s19 + $0x1b0] sm:$0xff]   ;;  %v1378_v44 = vld [vmem:[%s6559_s0 + $0x308] sm:$0xff] }
  0xe7   : > { %4696 = vmatprep.subr.bf16.mxu1 %v5090_v47  ;;  %v5117_v47 = vld [vmem:[%s5837_s19 + $0x138] sm:$0xff]  }
  0xe8   : > { %3113 = vmatmul.mubr.bf16.vlgmr.msra.gmra.mrb[0].mxu0 %v4165_v42  ;;  %v1377_v42 = vld [vmem:[%s6559_s0 + $0x300] sm:$0xff] }
  0xe9   : > { %3210 = vmatmul.mubr.bf16.vlgmr.msra.gmra.mrb[0].mxu1 %v4167_v43  ;;  %4633 = vmatpush3.bf16.msra.mxu0 %v5089_v45  ;;  %v1385_v43 = vld [vmem:[%s6559_s0 + $0x340] sm:$0xff]  ;;  %v1386_v45 = vld [vmem:[%s6559_s0 + $0x348] sm:$0xff] }
  0xea   : > { %3120 = vmatprep.mubr.bf16.mxu0 %v4182_v46  ;;  %4697 = vmatpush3.bf16.msra.mxu1 %v5091_v49  ;;  %v5116_v46 = vld [vmem:[%s5837_s19 + $0x178] sm:$0xff]   ;;  %v4245_v49 = vcombine.low %v1361_v30, %v1369_v31  ;;  %v5129_v31 = vld [vmem:[%s5837_s19 + $0x210] sm:$0xff]  }
  0xeb   : > { %3217 = vmatprep.mubr.bf16.mxu1 %v4184_v48  ;;  %4634 = vmatprep.subr.bf16.mxu0 %v5092_v50  ;;  %v5118_v48 = vld [vmem:[%s5837_s19 + $0x1f8] sm:$0xff]  }
  0xec   : > { %4698 = vmatprep.subr.bf16.mxu1 %v5094_v53  ;;  %v5119_v50 = vld [vmem:[%s5837_s19 + $0x1b8] sm:$0xff]   ;;  %v4264_v53 = vcombine.high %v1378_v44, %v1386_v45 }
  0xed   : > { %4635 = vmatpush3.bf16.msra.mxu0 %v5093_v52  ;;  %v4262_v52 = vcombine.high %v1377_v42, %v1385_v43 }
  0xee   : > { %4699 = vmatpush3.bf16.msra.mxu1 %v5095_v55  ;;  %4636 = vmatprep.subr.bf16.mxu0 %v5096_v62  ;;  %v5122_v55 = vld [vmem:[%s5837_s19 + $0x2c0] sm:$0xff]  }
  0xef   : > { %4700 = vmatprep.subr.bf16.mxu1 %v5098_v0  ;;  %v1283_v0 = vld [vmem:[%s6559_s0 + $0x10] sm:$0xff] }
  0xf0   : > { %3121 = vmatmul.mubr.bf16.gmra.mrb[4].mxu0 %v4181_v54  ;;  %v5120_v54 = vld [vmem:[%s5837_s19 + $0x240] sm:$0xff]  }
  0xf1   : > { %3218 = vmatmul.mubr.bf16.gmra.mrb[4].mxu1 %v4183_v56  ;;  %3128 = vmatprep.mubr.bf16.mxu0 %v4198_v60  ;;  %v1393_v56 = vld [vmem:[%s6559_s0 + $0x380] sm:$0xff]  ;;  %v4261_v60 = vcombine.low %v1377_v42, %v1385_v43 }
  0xf2   : > { %3225 = vmatprep.mubr.bf16.mxu1 %v4200_v61  ;;  %4637 = vmatpush3.bf16.msra.mxu0 %v5097_v63  ;;  %v4263_v61 = vcombine.low %v1378_v44, %v1386_v45  ;;  %v4278_v62 = vcombine.high %v1393_v56, %v1401_v57  ;;  %v4280_v63 = vcombine.high %v1394_v58, %v1402_v59  ;;  %v5136_v42 = vld [vmem:[%s5837_s19 + $0x260] sm:$0xff]   ;;  %v5144_v58 = vld [vmem:[%s5837_s19 + $0x270] sm:$0xff]  }
  0xf3   : > { %4701 = vmatpush3.bf16.msra.mxu1 %v5099_v1  ;;  %4638 = vmatprep.subr.bf16.mxu0 %v5100_v7  ;;  %v1291_v1 = vld [vmem:[%s6559_s0 + $0x50] sm:$0xff]  ;;  %v4277_v4 = vcombine.low %v1393_v56, %v1401_v57  ;;  %v4172_v7 = vcombine.high %v1284_v2, %v1292_v3  ;;  %v5138_v44 = vld [vmem:[%s5837_s19 + $0x2e0] sm:$0xff]   ;;  %v5141_v56 = vld [vmem:[%s5837_s19 + $0x228] sm:$0xff]  }
  0xf4   : > { %4702 = vmatprep.subr.bf16.mxu1 %v5102_v12  ;;  %v1308_v12 = vld [vmem:[%s6559_s0 + $0xd8] sm:$0xff]  ;;  %v5143_v57 = vld [vmem:[%s5837_s19 + $0x2a8] sm:$0xff]  }
  0xf6   : > { %4639 = vmatpush3.bf16.msra.mxu0 %v5101_v10  ;;  %v1300_v10 = vld [vmem:[%s6559_s0 + $0x98] sm:$0xff] }
  0xf7   : > { %4703 = vmatpush3.bf16.msra.mxu1 %v5103_v13  ;;  %4640 = vmatprep.subr.bf16.mxu0 %v5104_v18  ;;  %v4171_v13 = vcombine.low %v1284_v2, %v1292_v3  ;;  %v4188_v17 = vcombine.high %v1300_v10, %v1308_v12  ;;  %v5124_v18 = vld [vmem:[%s5837_s19 + $0x248] sm:$0xff]   ;;  %v5148_v2 = vld [vmem:[%s5837_s19 + $0x278] sm:$0xff]   ;;  %v1363_v3 = vld [vmem:[%s6559_s0 + $0x290] sm:$0xff] }
  0xf8   : > { %3129 = vmatmul.mubr.bf16.gmra.mrb[8].mxu0 %v4197_v6  ;;  %4704 = vmatprep.subr.bf16.mxu1 %v5106_v20  ;;  %v4170_v6 = vcombine.high %v1283_v0, %v1291_v1  ;;  %v5126_v20 = vld [vmem:[%s5837_s19 + $0x2c8] sm:$0xff]  }
  0xf9   : > { %3226 = vmatmul.mubr.bf16.gmra.mrb[8].mxu1 %v4199_v8  ;;  %3136 = vmatprep.mubr.bf16.mxu0 %v4214_v9  ;;  %v1299_v8 = vld [vmem:[%s6559_s0 + $0x90] sm:$0xff] }
  0xfa   : > { %3233 = vmatprep.mubr.bf16.mxu1 %v4216_v11  ;;  %4641 = vmatpush3.bf16.msra.mxu0 %v5105_v19  ;;  %v1307_v9 = vld [vmem:[%s6559_s0 + $0xd0] sm:$0xff]  ;;  %v4169_v11 = vcombine.low %v1283_v0, %v1291_v1  ;;  %v5125_v19 = vld [vmem:[%s5837_s19 + $0x208] sm:$0xff]  }
  0xfb   : > { %4705 = vmatpush3.bf16.msra.mxu1 %v5107_v22  ;;  %4642 = vmatprep.subr.bf16.mxu0 %v5108_v26  ;;  %v4186_v16 = vcombine.high %v1299_v8, %v1307_v9  ;;  %v1315_v22 = vld [vmem:[%s6559_s0 + $0x110] sm:$0xff] }
  0xfc   : > { %4706 = vmatprep.subr.bf16.mxu1 %v5110_v28  ;;  %v5128_v26 = vld [vmem:[%s5837_s19 + $0x250] sm:$0xff]   ;;  %v4185_v28 = vcombine.low %v1299_v8, %v1307_v9  ;;  %v5149_v8 = vld [vmem:[%s5837_s19 + $0x238] sm:$0xff]  }
  0xfd   : > { %v5147_v1 = vld [vmem:[%s5837_s19 + $0x2b0] sm:$0xff]   ;;  %v5151_v9 = vld [vmem:[%s5837_s19 + $0x2b8] sm:$0xff]  }
  0xfe   : > { %4643 = vmatpush3.bf16.msra.mxu0 %v5109_v27  ;;  %v5130_v27 = vld [vmem:[%s5837_s19 + $0x2d0] sm:$0xff]  }
  0xff   : > { %4707 = vmatpush3.bf16.msra.mxu1 %v5111_v29  ;;  %4644 = vmatprep.subr.bf16.mxu0 %v5112_v35  ;;  %v4187_v29 = vcombine.low %v1300_v10, %v1308_v12  ;;  %v1331_v35 = vld [vmem:[%s6559_s0 + $0x190] sm:$0xff]  ;;  %v5152_v10 = vld [vmem:[%s5837_s19 + $0x340] sm:$0xff]  }
 0x100   : > { %3137 = vmatmul.mubr.bf16.gmra.mrb[12].mxu0 %v4213_v21  ;;  %4708 = vmatprep.subr.bf16.mxu1 %v5114_v40  ;;  %v5127_v21 = vld [vmem:[%s5837_s19 + $0x288] sm:$0xff]   ;;  %v5133_v40 = vld [vmem:[%s5837_s19 + $0x218] sm:$0xff]   ;;  %v5154_v12 = vld [vmem:[%s5837_s19 + $0x3c0] sm:$0xff]  }
 0x101   : > { %3234 = vmatmul.mubr.bf16.gmra.mrb[12].mxu1 %v4215_v23  ;;  %3144 = vmatprep.mubr.bf16.mxu0 %v4230_v24  ;;  %v1323_v23 = vld [vmem:[%s6559_s0 + $0x150] sm:$0xff]  ;;  %v1316_v24 = vld [vmem:[%s6559_s0 + $0x118] sm:$0xff] }
 0x102   : > { %3241 = vmatprep.mubr.bf16.mxu1 %v4232_v25  ;;  %4645 = vmatpush3.bf16.msra.mxu0 %v5113_v38  ;;  %v1324_v25 = vld [vmem:[%s6559_s0 + $0x158] sm:$0xff]  ;;  %v4202_v30 = vcombine.high %v1315_v22, %v1323_v23  ;;  %v4201_v43 = vcombine.low %v1315_v22, %v1323_v23 }
 0x103   : > { %4709 = vmatpush3.bf16.msra.mxu1 %v5115_v41  ;;  %4646 = vmatprep.subr.bf16.mxu0 %v5116_v46  ;;  %v4204_v32 = vcombine.high %v1316_v24, %v1324_v25  ;;  %v1332_v38 = vld [vmem:[%s6559_s0 + $0x198] sm:$0xff]  ;;  %v4203_v45 = vcombine.low %v1316_v24, %v1324_v25  ;;  %v1395_v24 = vld [vmem:[%s6559_s0 + $0x390] sm:$0xff] }
 0x104   : > { %4710 = vmatprep.subr.bf16.mxu1 %v5118_v48  ;;  %v5135_v41 = vld [vmem:[%s5837_s19 + $0x298] sm:$0xff]   ;;  %v5137_v48 = vld [vmem:[%s5837_s19 + $0x220] sm:$0xff]   ;;  %v1403_v25 = vld [vmem:[%s6559_s0 + $0x3d0] sm:$0xff] }
 0x106   : > { %4647 = vmatpush3.bf16.msra.mxu0 %v5117_v47 }
 0x107   : > { %4711 = vmatpush3.bf16.msra.mxu1 %v5119_v50  ;;  %4760 = vmatprep.subr.bf16.mxu0 %v5120_v54  ;;  %v5140_v50 = vld [vmem:[%s5837_s19 + $0x268] sm:$0xff]   ;;  %v1348_v54 = vld [vmem:[%s6559_s0 + $0x218] sm:$0xff] }
 0x108   : > { %3145 = vmatmul.mubr.bf16.gmra.mrb[16].mxu0 %v4229_v34  ;;  %4824 = vmatprep.subr.bf16.mxu1 %v5122_v55  ;;  %v5132_v34 = vld [vmem:[%s5837_s19 + $0x258] sm:$0xff]  }
 0x109   : > { %3242 = vmatmul.mubr.bf16.gmra.mrb[16].mxu1 %v4231_v36  ;;  %3152 = vmatprep.mubr.bf16.mxu0 %v4246_v37  ;;  %v1339_v36 = vld [vmem:[%s6559_s0 + $0x1d0] sm:$0xff]  ;;  %v5134_v37 = vld [vmem:[%s5837_s19 + $0x2d8] sm:$0xff]  }
 0x10a   : > { %3249 = vmatprep.mubr.bf16.mxu1 %v4248_v39  ;;  %v1340_v39 = vld [vmem:[%s6559_s0 + $0x1d8] sm:$0xff]  ;;  %v4218_v46 = vcombine.high %v1331_v35, %v1339_v36  ;;  %v4217_v59 = vcombine.low %v1331_v35, %v1339_v36  ;;  %v1294_v35 = vld [vmem:[%s6559_s0 + $0x68] sm:$0xff]  ;;  %v4281_v36 = vcombine.low %v1395_v24, %v1403_v25 }
 0x10b   : > { %v4220_v47 = vcombine.high %v1332_v38, %v1340_v39  ;;  %v1356_v55 = vld [vmem:[%s6559_s0 + $0x258] sm:$0xff] }
 0x10c   : > { %v4236_v0 = vcombine.high %v1348_v54, %v1356_v55 }
 0x110   : > { %3153 = vmatmul.mubr.bf16.gmra.mrb[20].mxu0 %v4245_v49  ;;  %v5139_v49 = vld [vmem:[%s5837_s19 + $0x2a0] sm:$0xff]  }
 0x111   : > { %3250 = vmatmul.mubr.bf16.gmra.mrb[20].mxu1 %v4247_v51  ;;  %3160 = vmatprep.mubr.bf16.mxu0 %v4262_v52  ;;  %v1347_v51 = vld [vmem:[%s6559_s0 + $0x210] sm:$0xff] }
 0x112   : > { %3257 = vmatprep.mubr.bf16.mxu1 %v4264_v53  ;;  %v1355_v52 = vld [vmem:[%s6559_s0 + $0x250] sm:$0xff]  ;;  %v5142_v53 = vld [vmem:[%s5837_s19 + $0x2e8] sm:$0xff]  }
 0x118   : > { %3161 = vmatmul.mubr.bf16.gmra.mrb[24].mxu0 %v4261_v60  ;;  %v5146_v60 = vld [vmem:[%s5837_s19 + $0x2f0] sm:$0xff]  }
 0x119   : > { %3258 = vmatmul.mubr.bf16.gmra.mrb[24].mxu1 %v4263_v61  ;;  %3168 = vmatprep.mubr.bf16.mxu0 %v4278_v62  ;;  %v4219_v61 = vcombine.low %v1332_v38, %v1340_v39  ;;  %v4234_v62 = vcombine.high %v1347_v51, %v1355_v52 }
 0x11a   : > { %3265 = vmatprep.mubr.bf16.mxu1 %v4280_v63  ;;  %v5145_v63 = vld [vmem:[%s5837_s19 + $0x230] sm:$0xff]  }
 0x120   : > { %3169 = vmatmul.mubr.bf16.gmra.mrb[28].mxu0 %v4277_v4  ;;  %v1371_v4 = vld [vmem:[%s6559_s0 + $0x2d0] sm:$0xff] }
 0x121   : > { %3266 = vmatmul.mubr.bf16.gmra.mrb[28].mxu1 %v4279_v5  ;;  %3306 = vmatprep.mubr.bf16.mxu0 %v4170_v6  ;;  %v5150_v5 = vld [vmem:[%s5837_s19 + $0x2f8] sm:$0xff]  }
 0x122   : > { %3403 = vmatprep.mubr.bf16.mxu1 %v4172_v7  ;;  %v1364_v6 = vld [vmem:[%s6559_s0 + $0x298] sm:$0xff] }
 0x123   : > { %v1372_v7 = vld [vmem:[%s6559_s0 + $0x2d8] sm:$0xff] }
 0x128   : > { %3307 = vmatmul.mubr.bf16.vlgmr.msra.gmra.mrb[32].mxu0 %v4169_v11  ;;  %v4233_v11 = vcombine.low %v1347_v51, %v1355_v52  ;;  %v5158_v51 = vld [vmem:[%s5837_s19 + $0x3c8] sm:$0xff]  }
 0x129   : > { %3404 = vmatmul.mubr.bf16.vlgmr.msra.gmra.mrb[32].mxu1 %v4171_v13  ;;  %4761 = vmatpush3.bf16.msra.mxu0 %v5121_v14  ;;  %v4235_v13 = vcombine.low %v1348_v54, %v1356_v55  ;;  %v4250_v14 = vcombine.high %v1363_v3, %v1371_v4  ;;  %v5157_v52 = vld [vmem:[%s5837_s19 + $0x308] sm:$0xff]   ;;  %v1317_v54 = vld [vmem:[%s6559_s0 + $0x120] sm:$0xff] }
 0x12a   : > { %4825 = vmatpush3.bf16.msra.mxu1 %v5123_v15  ;;  %3314 = vmatprep.mubr.bf16.mxu0 %v4186_v16  ;;  %v4252_v15 = vcombine.high %v1364_v6, %v1372_v7  ;;  %v1379_v16 = vld [vmem:[%s6559_s0 + $0x310] sm:$0xff]  ;;  %v1325_v55 = vld [vmem:[%s6559_s0 + $0x160] sm:$0xff] }
 0x12b   : > { %3411 = vmatprep.mubr.bf16.mxu1 %v4188_v17  ;;  %4762 = vmatprep.subr.bf16.mxu0 %v5124_v18  ;;  %v1387_v17 = vld [vmem:[%s6559_s0 + $0x350] sm:$0xff]  ;;  %v1380_v18 = vld [vmem:[%s6559_s0 + $0x318] sm:$0xff] }
 0x12c   : > { %4826 = vmatprep.subr.bf16.mxu1 %v5126_v20  ;;  %v4249_v20 = vcombine.low %v1363_v3, %v1371_v4  ;;  %v4266_v22 = vcombine.high %v1379_v16, %v1387_v17  ;;  %v5166_v3 = vld [vmem:[%s5837_s19 + $0x3d8] sm:$0xff]   ;;  %v1333_v4 = vld [vmem:[%s6559_s0 + $0x1a0] sm:$0xff] }
 0x12d   : > { %4763 = vmatpush3.bf16.msra.mxu0 %v5125_v19  ;;  %v1388_v19 = vld [vmem:[%s6559_s0 + $0x358] sm:$0xff] }
 0x12e   : > { %4827 = vmatpush3.bf16.msra.mxu1 %v5127_v21  ;;  %4764 = vmatprep.subr.bf16.mxu0 %v5128_v26  ;;  %v4251_v21 = vcombine.low %v1364_v6, %v1372_v7  ;;  %v4268_v23 = vcombine.high %v1380_v18, %v1388_v19  ;;  %v1396_v26 = vld [vmem:[%s6559_s0 + $0x398] sm:$0xff]  ;;  %v1334_v6 = vld [vmem:[%s6559_s0 + $0x1a8] sm:$0xff] }
 0x12f   : > { %4828 = vmatprep.subr.bf16.mxu1 %v5130_v27  ;;  %v1404_v27 = vld [vmem:[%s6559_s0 + $0x3d8] sm:$0xff] }
 0x130   : > { %3315 = vmatmul.mubr.bf16.gmra.mrb[36].mxu0 %v4185_v28  ;;  %v4265_v28 = vcombine.low %v1379_v16, %v1387_v17  ;;  %v5165_v7 = vld [vmem:[%s5837_s19 + $0x318] sm:$0xff]   ;;  %v5169_v16 = vld [vmem:[%s5837_s19 + $0x320] sm:$0xff]  }
 0x131   : > { %3412 = vmatmul.mubr.bf16.gmra.mrb[36].mxu1 %v4187_v29  ;;  %3322 = vmatprep.mubr.bf16.mxu0 %v4202_v30  ;;  %v4267_v29 = vcombine.low %v1380_v18, %v1388_v19  ;;  %v4282_v30 = vcombine.high %v1395_v24, %v1403_v25  ;;  %v5171_v17 = vld [vmem:[%s5837_s19 + $0x3a0] sm:$0xff]   ;;  %v5172_v18 = vld [vmem:[%s5837_s19 + $0x368] sm:$0xff]  }
 0x132   : > { %3419 = vmatprep.mubr.bf16.mxu1 %v4204_v32  ;;  %4765 = vmatpush3.bf16.msra.mxu0 %v5129_v31  ;;  %v4284_v31 = vcombine.high %v1396_v26, %v1404_v27  ;;  %v1285_v32 = vld [vmem:[%s6559_s0 + $0x20] sm:$0xff]  ;;  %v5174_v19 = vld [vmem:[%s5837_s19 + $0x3e8] sm:$0xff]  }
 0x133   : > { %4829 = vmatpush3.bf16.msra.mxu1 %v5131_v33  ;;  %4766 = vmatprep.subr.bf16.mxu0 %v5132_v34  ;;  %v1293_v33 = vld [vmem:[%s6559_s0 + $0x60] sm:$0xff]  ;;  %v1286_v34 = vld [vmem:[%s6559_s0 + $0x28] sm:$0xff] }
 0x134   : > { %4830 = vmatprep.subr.bf16.mxu1 %v5134_v37  ;;  %v4283_v37 = vcombine.low %v1396_v26, %v1404_v27  ;;  %v4174_v38 = vcombine.high %v1285_v32, %v1293_v33  ;;  %v4176_v39 = vcombine.high %v1286_v34, %v1294_v35  ;;  %v1358_v24 = vld [vmem:[%s6559_s0 + $0x268] sm:$0xff]  ;;  %v5176_v26 = vld [vmem:[%s5837_s19 + $0x370] sm:$0xff]  }
 0x135   : > { %v5175_v25 = vld [vmem:[%s5837_s19 + $0x3a8] sm:$0xff]  }
 0x136   : > { %4767 = vmatpush3.bf16.msra.mxu0 %v5133_v40  ;;  %v1301_v40 = vld [vmem:[%s6559_s0 + $0xa0] sm:$0xff] }
 0x137   : > { %4831 = vmatpush3.bf16.msra.mxu1 %v5135_v41  ;;  %4768 = vmatprep.subr.bf16.mxu0 %v5136_v42  ;;  %v1309_v41 = vld [vmem:[%s6559_s0 + $0xe0] sm:$0xff]  ;;  %v4173_v42 = vcombine.low %v1285_v32, %v1293_v33  ;;  %v5177_v32 = vld [vmem:[%s5837_s19 + $0x330] sm:$0xff]  }
 0x138   : > { %3323 = vmatmul.mubr.bf16.gmra.mrb[40].mxu0 %v4201_v43  ;;  %4832 = vmatprep.subr.bf16.mxu1 %v5138_v44  ;;  %v1302_v43 = vld [vmem:[%s6559_s0 + $0xa8] sm:$0xff]  ;;  %v5179_v33 = vld [vmem:[%s5837_s19 + $0x3b0] sm:$0xff]  }
 0x139   : > { %3420 = vmatmul.mubr.bf16.gmra.mrb[40].mxu1 %v4203_v45  ;;  %3330 = vmatprep.mubr.bf16.mxu0 %v4218_v46  ;;  %v1310_v44 = vld [vmem:[%s6559_s0 + $0xe8] sm:$0xff]  ;;  %v4175_v45 = vcombine.low %v1286_v34, %v1294_v35  ;;  %v5153_v46 = vld [vmem:[%s5837_s19 + $0x300] sm:$0xff]   ;;  %v5180_v34 = vld [vmem:[%s5837_s19 + $0x378] sm:$0xff]  }
 0x13a   : > { %3427 = vmatprep.mubr.bf16.mxu1 %v4220_v47  ;;  %4769 = vmatpush3.bf16.msra.mxu0 %v5137_v48  ;;  %v5155_v47 = vld [vmem:[%s5837_s19 + $0x380] sm:$0xff]   ;;  %v4190_v48 = vcombine.high %v1301_v40, %v1309_v41  ;;  %v5182_v35 = vld [vmem:[%s5837_s19 + $0x3f8] sm:$0xff]  }
 0x13b   : > { %4833 = vmatpush3.bf16.msra.mxu1 %v5139_v49  ;;  %4770 = vmatprep.subr.bf16.mxu0 %v5140_v50  ;;  %v4192_v49 = vcombine.high %v1302_v43, %v1310_v44  ;;  %v5156_v50 = vld [vmem:[%s5837_s19 + $0x348] sm:$0xff]  }
 0x13c   : > { %4834 = vmatprep.subr.bf16.mxu1 %v5142_v53  ;;  %v5159_v53 = vld [vmem:[%s5837_s19 + $0x388] sm:$0xff]  }
 0x13e   : > { %4771 = vmatpush3.bf16.msra.mxu0 %v5141_v56  ;;  %v5160_v56 = vld [vmem:[%s5837_s19 + $0x350] sm:$0xff]  }
 0x13f   : > { %4835 = vmatpush3.bf16.msra.mxu1 %v5143_v57  ;;  %4772 = vmatprep.subr.bf16.mxu0 %v5144_v58  ;;  %v1318_v57 = vld [vmem:[%s6559_s0 + $0x128] sm:$0xff] }
 0x140   : > { %3331 = vmatmul.mubr.bf16.gmra.mrb[44].mxu0 %v4217_v59  ;;  %4836 = vmatprep.subr.bf16.mxu1 %v5146_v60  ;;  %v1326_v58 = vld [vmem:[%s6559_s0 + $0x168] sm:$0xff]  ;;  %v5162_v59 = vld [vmem:[%s5837_s19 + $0x3d0] sm:$0xff]   ;;  %v4189_v60 = vcombine.low %v1301_v40, %v1309_v41  ;;  %v5183_v41 = vld [vmem:[%s5837_s19 + $0x3b8] sm:$0xff]  }
 0x141   : > { %3428 = vmatmul.mubr.bf16.gmra.mrb[44].mxu1 %v4219_v61  ;;  %3338 = vmatprep.mubr.bf16.mxu0 %v4234_v62  ;;  %v4191_v61 = vcombine.low %v1302_v43, %v1310_v44  ;;  %v4206_v62 = vcombine.high %v1317_v54, %v1325_v55  ;;  %v1374_v40 = vld [vmem:[%s6559_s0 + $0x2e8] sm:$0xff] }
 0x142   : > { %3435 = vmatprep.mubr.bf16.mxu1 %v4236_v0  ;;  %4773 = vmatpush3.bf16.msra.mxu0 %v5145_v63  ;;  %v4208_v63 = vcombine.high %v1318_v57, %v1326_v58  ;;  %v5161_v0 = vld [vmem:[%s5837_s19 + $0x310] sm:$0xff]  }
 0x143   : > { %4837 = vmatpush3.bf16.msra.mxu1 %v5147_v1  ;;  %4774 = vmatprep.subr.bf16.mxu0 %v5148_v2  ;;  %v5163_v1 = vld [vmem:[%s5837_s19 + $0x390] sm:$0xff]   ;;  %v5164_v2 = vld [vmem:[%s5837_s19 + $0x358] sm:$0xff]  }
 0x144   : > { %4838 = vmatprep.subr.bf16.mxu1 %v5150_v5  ;;  %v1341_v5 = vld [vmem:[%s6559_s0 + $0x1e0] sm:$0xff] }
 0x145   : > { %v4221_v27 = vcombine.low %v1333_v4, %v1341_v5 }
 0x146   : > { %4775 = vmatpush3.bf16.msra.mxu0 %v5149_v8  ;;  %v1342_v8 = vld [vmem:[%s6559_s0 + $0x1e8] sm:$0xff] }
 0x147   : > { %4839 = vmatpush3.bf16.msra.mxu1 %v5151_v9  ;;  %4888 = vmatprep.subr.bf16.mxu0 %v5152_v10  ;;  %v5167_v9 = vld [vmem:[%s5837_s19 + $0x398] sm:$0xff]   ;;  %v5168_v10 = vld [vmem:[%s5837_s19 + $0x360] sm:$0xff]  }
 0x148   : > { %3339 = vmatmul.mubr.bf16.gmra.mrb[48].mxu0 %v4233_v11  ;;  %4952 = vmatprep.subr.bf16.mxu1 %v5154_v12  ;;  %v4205_v11 = vcombine.low %v1317_v54, %v1325_v55  ;;  %v5170_v12 = vld [vmem:[%s5837_s19 + $0x3e0] sm:$0xff]  }
 0x149   : > { %3436 = vmatmul.mubr.bf16.gmra.mrb[48].mxu1 %v4235_v13  ;;  %3346 = vmatprep.mubr.bf16.mxu0 %v4250_v14  ;;  %v4207_v13 = vcombine.low %v1318_v57, %v1326_v58  ;;  %v4222_v14 = vcombine.high %v1333_v4, %v1341_v5  ;;  %v1397_v54 = vld [vmem:[%s6559_s0 + $0x3a0] sm:$0xff]  ;;  %v1406_v57 = vld [vmem:[%s6559_s0 + $0x3e8] sm:$0xff] }
 0x14a   : > { %3443 = vmatprep.mubr.bf16.mxu1 %v4252_v15  ;;  %v4224_v15 = vcombine.high %v1334_v6, %v1342_v8  ;;  %v1405_v55 = vld [vmem:[%s6559_s0 + $0x3e0] sm:$0xff] }
 0x150   : > { %3347 = vmatmul.mubr.bf16.gmra.mrb[52].mxu0 %v4249_v20  ;;  %v1349_v20 = vld [vmem:[%s6559_s0 + $0x220] sm:$0xff] }
 0x151   : > { %3444 = vmatmul.mubr.bf16.gmra.mrb[52].mxu1 %v4251_v21  ;;  %3354 = vmatprep.mubr.bf16.mxu0 %v4266_v22  ;;  %v1357_v21 = vld [vmem:[%s6559_s0 + $0x260] sm:$0xff]  ;;  %v1350_v22 = vld [vmem:[%s6559_s0 + $0x228] sm:$0xff] }
 0x152   : > { %3451 = vmatprep.mubr.bf16.mxu1 %v4268_v23  ;;  %v5173_v23 = vld [vmem:[%s5837_s19 + $0x328] sm:$0xff]   ;;  %v4239_v43 = vcombine.low %v1350_v22, %v1358_v24 }
 0x158   : > { %3355 = vmatmul.mubr.bf16.gmra.mrb[56].mxu0 %v4265_v28  ;;  %v5178_v28 = vld [vmem:[%s5837_s19 + $0x3f0] sm:$0xff]  }
 0x159   : > { %3452 = vmatmul.mubr.bf16.gmra.mrb[56].mxu1 %v4267_v29  ;;  %3362 = vmatprep.mubr.bf16.mxu0 %v4282_v30  ;;  %v4223_v29 = vcombine.low %v1334_v6, %v1342_v8  ;;  %v4238_v30 = vcombine.high %v1349_v20, %v1357_v21  ;;  %v1303_v6 = vld [vmem:[%s6559_s0 + $0xb0] sm:$0xff]  ;;  %v1304_v8 = vld [vmem:[%s6559_s0 + $0xb8] sm:$0xff] }
 0x15a   : > { %3459 = vmatprep.mubr.bf16.mxu1 %v4284_v31  ;;  %v4240_v31 = vcombine.high %v1350_v22, %v1358_v24  ;;  %v1335_v22 = vld [vmem:[%s6559_s0 + $0x1b0] sm:$0xff]  ;;  %v1336_v24 = vld [vmem:[%s6559_s0 + $0x1b8] sm:$0xff] }
 0x160   : > { %3363 = vmatmul.mubr.bf16.gmra.mrb[60].mxu0 %v4281_v36  ;;  %v1365_v36 = vld [vmem:[%s6559_s0 + $0x2a0] sm:$0xff] }
 0x161   : > { %3460 = vmatmul.mubr.bf16.gmra.mrb[60].mxu1 %v4283_v37  ;;  %3500 = vmatprep.mubr.bf16.mxu0 %v4174_v38  ;;  %v1373_v37 = vld [vmem:[%s6559_s0 + $0x2e0] sm:$0xff]  ;;  %v5181_v38 = vld [vmem:[%s5837_s19 + $0x338] sm:$0xff]  }
 0x162   : > { %3597 = vmatprep.mubr.bf16.mxu1 %v4176_v39  ;;  %v1366_v39 = vld [vmem:[%s6559_s0 + $0x2a8] sm:$0xff]  ;;  %v4254_v44 = vcombine.high %v1365_v36, %v1373_v37 }
 0x168   : > { %3501 = vmatmul.mubr.bf16.vlgmr.msra.gmra.mrb[64].mxu0 %v4173_v42  ;;  %v4237_v42 = vcombine.low %v1349_v20, %v1357_v21 }
 0x169   : > { %3598 = vmatmul.mubr.bf16.vlgmr.msra.gmra.mrb[64].mxu1 %v4175_v45  ;;  %4889 = vmatpush3.bf16.msra.mxu0 %v5153_v46  ;;  %v4256_v45 = vcombine.high %v1366_v39, %v1374_v40  ;;  %v1381_v46 = vld [vmem:[%s6559_s0 + $0x320] sm:$0xff] }
 0x16a   : > { %4953 = vmatpush3.bf16.msra.mxu1 %v5155_v47  ;;  %3508 = vmatprep.mubr.bf16.mxu0 %v4190_v48  ;;  %v1389_v47 = vld [vmem:[%s6559_s0 + $0x360] sm:$0xff]  ;;  %v1382_v48 = vld [vmem:[%s6559_s0 + $0x328] sm:$0xff] }
 0x16b   : > { %3605 = vmatprep.mubr.bf16.mxu1 %v4192_v49  ;;  %4890 = vmatprep.subr.bf16.mxu0 %v5156_v50  ;;  %v1390_v49 = vld [vmem:[%s6559_s0 + $0x368] sm:$0xff]  ;;  %v4253_v50 = vcombine.low %v1365_v36, %v1373_v37  ;;  %v4269_v58 = vcombine.low %v1381_v46, %v1389_v47  ;;  %v6312_v36 = vld [vmem:[%s1278_s8] ss:$0 sm:$0xff]  ;;  %s3963_s8 = scalar_lea.vmem (%p5279_p6), %s6562_s3, %s4438_s30 }
 0x16c   : > { %4954 = vmatprep.subr.bf16.mxu1 %v5158_v51  ;;  %v4255_v51 = vcombine.low %v1366_v39, %v1374_v40 }
 0x16d   : > { %4891 = vmatpush3.bf16.msra.mxu0 %v5157_v52  ;;  %v4270_v52 = vcombine.high %v1381_v46, %v1389_v47 }
 0x16e   : > { %4955 = vmatpush3.bf16.msra.mxu1 %v5159_v53  ;;  %4892 = vmatprep.subr.bf16.mxu0 %v5160_v56  ;;  %v4272_v53 = vcombine.high %v1382_v48, %v1390_v49  ;;  %v1398_v56 = vld [vmem:[%s6559_s0 + $0x3a8] sm:$0xff] }
 0x16f   : > { %4956 = vmatprep.subr.bf16.mxu1 %v5162_v59  ;;  %v4271_v59 = vcombine.low %v1382_v48, %v1390_v49 }
 0x170   : > { %3509 = vmatmul.mubr.bf16.gmra.mrb[68].mxu0 %v4189_v60  ;;  %v4286_v60 = vcombine.high %v1397_v54, %v1405_v55 }
 0x171   : > { %3606 = vmatmul.mubr.bf16.gmra.mrb[68].mxu1 %v4191_v61  ;;  %3516 = vmatprep.mubr.bf16.mxu0 %v4206_v62  ;;  %v4288_v61 = vcombine.high %v1398_v56, %v1406_v57  ;;  %v1287_v62 = vld [vmem:[%s6559_s0 + $0x30] sm:$0xff] }
 0x172   : > { %3613 = vmatprep.mubr.bf16.mxu1 %v4208_v63  ;;  %4893 = vmatpush3.bf16.msra.mxu0 %v5161_v0  ;;  %v1295_v63 = vld [vmem:[%s6559_s0 + $0x70] sm:$0xff]  ;;  %v1288_v0 = vld [vmem:[%s6559_s0 + $0x38] sm:$0xff] }
 0x173   : > { %4957 = vmatpush3.bf16.msra.mxu1 %v5163_v1  ;;  %4894 = vmatprep.subr.bf16.mxu0 %v5164_v2  ;;  %v1296_v1 = vld [vmem:[%s6559_s0 + $0x78] sm:$0xff]  ;;  %v4285_v2 = vcombine.low %v1397_v54, %v1405_v55  ;;  %v4178_v4 = vcombine.high %v1287_v62, %v1295_v63  ;;  %v1367_v54 = vld [vmem:[%s6559_s0 + $0x2b0] sm:$0xff] }
 0x174   : > { %4958 = vmatprep.subr.bf16.mxu1 %v5166_v3  ;;  %v4287_v3 = vcombine.low %v1398_v56, %v1406_v57  ;;  %v4180_v5 = vcombine.high %v1288_v0, %v1296_v1  ;;  %v1375_v55 = vld [vmem:[%s6559_s0 + $0x2f0] sm:$0xff] }
 0x176   : > { %4895 = vmatpush3.bf16.msra.mxu0 %v5165_v7  ;;  %v1311_v7 = vld [vmem:[%s6559_s0 + $0xf0] sm:$0xff] }
 0x177   : > { %4959 = vmatpush3.bf16.msra.mxu1 %v5167_v9  ;;  %4896 = vmatprep.subr.bf16.mxu0 %v5168_v10  ;;  %v1312_v9 = vld [vmem:[%s6559_s0 + $0xf8] sm:$0xff]  ;;  %v4177_v10 = vcombine.low %v1287_v62, %v1295_v63 }
 0x178   : > { %3517 = vmatmul.mubr.bf16.gmra.mrb[72].mxu0 %v4205_v11  ;;  %4960 = vmatprep.subr.bf16.mxu1 %v5170_v12  ;;  %v4179_v11 = vcombine.low %v1288_v0, %v1296_v1  ;;  %v4194_v12 = vcombine.high %v1303_v6, %v1311_v7 }
 0x179   : > { %3614 = vmatmul.mubr.bf16.gmra.mrb[72].mxu1 %v4207_v13  ;;  %3524 = vmatprep.mubr.bf16.mxu0 %v4222_v14  ;;  %v4196_v13 = vcombine.high %v1304_v8, %v1312_v9  ;;  %v1319_v14 = vld [vmem:[%s6559_s0 + $0x130] sm:$0xff] }
 0x17a   : > { %3621 = vmatprep.mubr.bf16.mxu1 %v4224_v15  ;;  %4897 = vmatpush3.bf16.msra.mxu0 %v5169_v16  ;;  %v1327_v15 = vld [vmem:[%s6559_s0 + $0x170] sm:$0xff]  ;;  %v1320_v16 = vld [vmem:[%s6559_s0 + $0x138] sm:$0xff] }
 0x17b   : > { %4961 = vmatpush3.bf16.msra.mxu1 %v5171_v17  ;;  %4898 = vmatprep.subr.bf16.mxu0 %v5172_v18  ;;  %v1328_v17 = vld [vmem:[%s6559_s0 + $0x178] sm:$0xff]  ;;  %v4193_v18 = vcombine.low %v1303_v6, %v1311_v7  ;;  %v4210_v20 = vcombine.high %v1319_v14, %v1327_v15 }
 0x17c   : > { %4962 = vmatprep.subr.bf16.mxu1 %v5174_v19  ;;  %v4195_v19 = vcombine.low %v1304_v8, %v1312_v9  ;;  %v4212_v21 = vcombine.high %v1320_v16, %v1328_v17 }
 0x17e   : > { %4899 = vmatpush3.bf16.msra.mxu0 %v5173_v23  ;;  %v1343_v23 = vld [vmem:[%s6559_s0 + $0x1f0] sm:$0xff] }
 0x17f   : > { %4963 = vmatpush3.bf16.msra.mxu1 %v5175_v25  ;;  %4900 = vmatprep.subr.bf16.mxu0 %v5176_v26  ;;  %v1344_v25 = vld [vmem:[%s6559_s0 + $0x1f8] sm:$0xff]  ;;  %v4209_v26 = vcombine.low %v1319_v14, %v1327_v15  ;;  %v1383_v14 = vld [vmem:[%s6559_s0 + $0x330] sm:$0xff] }
 0x180   : > { %3525 = vmatmul.mubr.bf16.gmra.mrb[76].mxu0 %v4221_v27  ;;  %4964 = vmatprep.subr.bf16.mxu1 %v5178_v28  ;;  %v4211_v27 = vcombine.low %v1320_v16, %v1328_v17  ;;  %v4226_v28 = vcombine.high %v1335_v22, %v1343_v23  ;;  %v1391_v15 = vld [vmem:[%s6559_s0 + $0x370] sm:$0xff] }
 0x181   : > { %3622 = vmatmul.mubr.bf16.gmra.mrb[76].mxu1 %v4223_v29  ;;  %3532 = vmatprep.mubr.bf16.mxu0 %v4238_v30  ;;  %v4228_v29 = vcombine.high %v1336_v24, %v1344_v25  ;;  %v1351_v30 = vld [vmem:[%s6559_s0 + $0x230] sm:$0xff] }
 0x182   : > { %3629 = vmatprep.mubr.bf16.mxu1 %v4240_v31  ;;  %4901 = vmatpush3.bf16.msra.mxu0 %v5177_v32  ;;  %v1359_v31 = vld [vmem:[%s6559_s0 + $0x270] sm:$0xff] }
 0x183   : > { %4965 = vmatpush3.bf16.msra.mxu1 %v5179_v33  ;;  %4902 = vmatprep.subr.bf16.mxu0 %v5180_v34  ;;  %v1352_v33 = vld [vmem:[%s6559_s0 + $0x238] sm:$0xff]  ;;  %v4241_v62 = vcombine.low %v1351_v30, %v1359_v31 }
 0x184   : > { %4966 = vmatprep.subr.bf16.mxu1 %v5182_v35  ;;  %v1360_v34 = vld [vmem:[%s6559_s0 + $0x278] sm:$0xff] }
 0x185   : > { %v4244_v47 = vcombine.high %v1352_v33, %v1360_v34 }
 0x186   : > { %4903 = vmatpush3.bf16.msra.mxu0 %v5181_v38  ;;  %v4225_v38 = vcombine.low %v1335_v22, %v1343_v23  ;;  %v4257_v22 = vcombine.low %v1367_v54, %v1375_v55 }
 0x187   : > { %4967 = vmatpush3.bf16.msra.mxu1 %v5183_v41 }
 0x188   : > { %3533 = vmatmul.mubr.bf16.gmra.mrb[80].mxu0 %v4237_v42  ;;  %v4227_v42 = vcombine.low %v1336_v24, %v1344_v25 }
 0x189   : > { %3630 = vmatmul.mubr.bf16.gmra.mrb[80].mxu1 %v4239_v43  ;;  %3540 = vmatprep.mubr.bf16.mxu0 %v4254_v44  ;;  %v4242_v43 = vcombine.high %v1351_v30, %v1359_v31 }
 0x18a   : > { %3637 = vmatprep.mubr.bf16.mxu1 %v4256_v45 }
 0x190   : > { %3541 = vmatmul.mubr.bf16.gmra.mrb[84].mxu0 %v4253_v50 }
 0x191   : > { %3638 = vmatmul.mubr.bf16.gmra.mrb[84].mxu1 %v4255_v51  ;;  %3548 = vmatprep.mubr.bf16.mxu0 %v4270_v52 }
 0x192   : > { %3645 = vmatprep.mubr.bf16.mxu1 %v4272_v53 }
 0x198   : > { %3549 = vmatmul.mubr.bf16.gmra.mrb[88].mxu0 %v4269_v58  ;;  %v1368_v58 = vld [vmem:[%s6559_s0 + $0x2b8] sm:$0xff] }
 0x199   : > { %3646 = vmatmul.mubr.bf16.gmra.mrb[88].mxu1 %v4271_v59  ;;  %3556 = vmatprep.mubr.bf16.mxu0 %v4286_v60  ;;  %v1376_v59 = vld [vmem:[%s6559_s0 + $0x2f8] sm:$0xff] }
 0x19a   : > { %3653 = vmatprep.mubr.bf16.mxu1 %v4288_v61  ;;  %v4260_v7 = vcombine.high %v1368_v58, %v1376_v59 }
 0x1a0   : > { %3557 = vmatmul.mubr.bf16.gmra.mrb[92].mxu0 %v4285_v2  ;;  %v4243_v2 = vcombine.low %v1352_v33, %v1360_v34 }
 0x1a1   : > { %3654 = vmatmul.mubr.bf16.gmra.mrb[92].mxu1 %v4287_v3  ;;  %3694 = vmatprep.mubr.bf16.mxu0 %v4178_v4  ;;  %v4258_v3 = vcombine.high %v1367_v54, %v1375_v55 }
 0x1a2   : > { %3791 = vmatprep.mubr.bf16.mxu1 %v4180_v5 }
 0x1a8   : > { %3695 = vmatmul.mubr.bf16.vlgmr.msra.gmra.mrb[96].mxu0 %v4177_v10 }
 0x1a9   : > { %3792 = vmatmul.mubr.bf16.vlgmr.msra.gmra.mrb[96].mxu1 %v4179_v11  ;;  %3702 = vmatprep.mubr.bf16.mxu0 %v4194_v12 }
 0x1aa   : > { %3799 = vmatprep.mubr.bf16.mxu1 %v4196_v13 }
 0x1b0   : > { %3703 = vmatmul.mubr.bf16.gmra.mrb[100].mxu0 %v4193_v18  ;;  %v1384_v18 = vld [vmem:[%s6559_s0 + $0x338] sm:$0xff] }
 0x1b1   : > { %3800 = vmatmul.mubr.bf16.gmra.mrb[100].mxu1 %v4195_v19  ;;  %3710 = vmatprep.mubr.bf16.mxu0 %v4210_v20  ;;  %v1392_v19 = vld [vmem:[%s6559_s0 + $0x378] sm:$0xff] }
 0x1b2   : > { %3807 = vmatprep.mubr.bf16.mxu1 %v4212_v21  ;;  %v4276_v31 = vcombine.high %v1384_v18, %v1392_v19 }
 0x1b8   : > { %3711 = vmatmul.mubr.bf16.gmra.mrb[104].mxu0 %v4209_v26  ;;  %v4259_v26 = vcombine.low %v1368_v58, %v1376_v59 }
 0x1b9   : > { %3808 = vmatmul.mubr.bf16.gmra.mrb[104].mxu1 %v4211_v27  ;;  %3718 = vmatprep.mubr.bf16.mxu0 %v4226_v28  ;;  %v4274_v27 = vcombine.high %v1383_v14, %v1391_v15 }
 0x1ba   : > { %3815 = vmatprep.mubr.bf16.mxu1 %v4228_v29 }
 0x1bb   : > { %v4520_v32 = vpop.f32.mrb[0].mxu0 }
 0x1bc   : > { %v4584_v35 = vpop.f32.mrb[0].mxu1  ;;  %v4521_v37 = vpop.f32.mrb[1].mxu0 }
 0x1bd   : > { %v4522_v39 = vadd.f32 %v4521_v37, %v4520_v32  ;;  %v4585_v40 = vpop.f32.mrb[1].mxu1  ;;  %v4523_v41 = vpop.f32.mrb[2].mxu0 }
 0x1be   : > { %v4586_v44 = vadd.f32 %v4585_v40, %v4584_v35  ;;  %v4587_v45 = vpop.f32.mrb[2].mxu1  ;;  %v4524_v46 = vpop.f32.mrb[3].mxu0  ;;  %v1407_v40 = vld [vmem:[%s6559_s0 + $0x3f0] sm:$0xff] }
 0x1bf   : > { %v3115_v48 = vadd.f32 %v4522_v39, %v6312_v36  ;;  %v4525_v49 = vadd.f32 %v4524_v46, %v4523_v41  ;;  %v4588_v50 = vpop.f32.mrb[3].mxu1  ;;  %v1399_v39 = vld [vmem:[%s6559_s0 + $0x3b0] sm:$0xff] }
 0x1c0   : > { %v4589_v51 = vadd.f32 %v4588_v50, %v4587_v45  ;;  %3719 = vmatmul.mubr.bf16.gmra.mrb[108].mxu0 %v4225_v38 }
 0x1c1   : > { %v6315_v52 = vadd.f32 %v4586_v44, %v3115_v48  ;;  %v3118_v53 = vadd.f32 %v4525_v49, %v6312_v36  ;;  %3816 = vmatmul.mubr.bf16.gmra.mrb[108].mxu1 %v4227_v42  ;;  %3726 = vmatprep.mubr.bf16.mxu0 %v4242_v43  ;;  %v1400_v43 = vld [vmem:[%s6559_s0 + $0x3b8] sm:$0xff] }
 0x1c2   : > { %3823 = vmatprep.mubr.bf16.mxu1 %v4244_v47  ;;  %v1408_v44 = vld [vmem:[%s6559_s0 + $0x3f8] sm:$0xff]  ;;  %v4273_v47 = vcombine.low %v1383_v14, %v1391_v15 }
 0x1c3   : > { %v6324_v56 = vadd.f32 %v4589_v51, %v3118_v53  ;;  %v4526_v57 = vpop.f32.mrb[4].mxu0  ;;  %v4275_v51 = vcombine.low %v1384_v18, %v1392_v19  ;;  %v4290_v53 = vcombine.high %v1399_v39, %v1407_v40  ;;  %v4292_v58 = vcombine.high %v1400_v43, %v1408_v44 }
 0x1c4   : > { %v4590_v60 = vpop.f32.mrb[4].mxu1  ;;  %v4527_v61 = vpop.f32.mrb[5].mxu0 }
 0x1c5   : > { %v4528_v63 = vadd.f32 %v4527_v61, %v4526_v57  ;;  %v4591_v0 = vpop.f32.mrb[5].mxu1  ;;  %v4529_v1 = vpop.f32.mrb[6].mxu0 }
 0x1c6   : > { %v4592_v4 = vadd.f32 %v4591_v0, %v4590_v60  ;;  %v4593_v5 = vpop.f32.mrb[6].mxu1  ;;  %v4530_v6 = vpop.f32.mrb[7].mxu0 }
 0x1c7   : > { %v3123_v8 = vadd.f32 %v4528_v63, %v6312_v36  ;;  %v4531_v9 = vadd.f32 %v4530_v6, %v4529_v1  ;;  %v4594_v10 = vpop.f32.mrb[7].mxu1 }
 0x1c8   : > { %v4595_v11 = vadd.f32 %v4594_v10, %v4593_v5  ;;  %3727 = vmatmul.mubr.bf16.gmra.mrb[112].mxu0 %v4241_v62  ;;  %v4289_v5 = vcombine.low %v1399_v39, %v1407_v40 }
 0x1c9   : > { %v6333_v12 = vadd.f32 %v4592_v4, %v3123_v8  ;;  %v3126_v13 = vadd.f32 %v4531_v9, %v6312_v36  ;;  %3824 = vmatmul.mubr.bf16.gmra.mrb[112].mxu1 %v4243_v2  ;;  %3734 = vmatprep.mubr.bf16.mxu0 %v4258_v3  ;;  %v4291_v9 = vcombine.low %v1400_v43, %v1408_v44 }
 0x1ca   : > { %3831 = vmatprep.mubr.bf16.mxu1 %v4260_v7 }
 0x1cb   : > { %v6342_v16 = vadd.f32 %v4595_v11, %v3126_v13  ;;  %v4532_v17 = vpop.f32.mrb[8].mxu0 }
 0x1cc   : > { %v4596_v20 = vpop.f32.mrb[8].mxu1  ;;  %v4533_v21 = vpop.f32.mrb[9].mxu0 }
 0x1cd   : > { %v4534_v23 = vadd.f32 %v4533_v21, %v4532_v17  ;;  %v4597_v24 = vpop.f32.mrb[9].mxu1  ;;  %v4535_v25 = vpop.f32.mrb[10].mxu0 }
 0x1ce   : > { %v4598_v28 = vadd.f32 %v4597_v24, %v4596_v20  ;;  %v4599_v29 = vpop.f32.mrb[10].mxu1  ;;  %v4536_v30 = vpop.f32.mrb[11].mxu0 }
 0x1cf   : > { %v3131_v32 = vadd.f32 %v4534_v23, %v6312_v36  ;;  %v4537_v33 = vadd.f32 %v4536_v30, %v4535_v25  ;;  %v4600_v34 = vpop.f32.mrb[11].mxu1 }
 0x1d0   : > { %v4601_v35 = vadd.f32 %v4600_v34, %v4599_v29  ;;  %3735 = vmatmul.mubr.bf16.gmra.mrb[116].mxu0 %v4257_v22 }
 0x1d1   : > { %v6351_v37 = vadd.f32 %v4598_v28, %v3131_v32  ;;  %v3134_v38 = vadd.f32 %v4537_v33, %v6312_v36  ;;  %3832 = vmatmul.mubr.bf16.gmra.mrb[116].mxu1 %v4259_v26  ;;  %3742 = vmatprep.mubr.bf16.mxu0 %v4274_v27 }
 0x1d2   : > { %3839 = vmatprep.mubr.bf16.mxu1 %v4276_v31 }
 0x1d3   : > { %v6360_v41 = vadd.f32 %v4601_v35, %v3134_v38  ;;  %v4538_v42 = vpop.f32.mrb[12].mxu0 }
 0x1d4   : > { %v4602_v45 = vpop.f32.mrb[12].mxu1  ;;  %v4539_v46 = vpop.f32.mrb[13].mxu0 }
 0x1d5   : > { %v4540_v48 = vadd.f32 %v4539_v46, %v4538_v42  ;;  %v4603_v49 = vpop.f32.mrb[13].mxu1  ;;  %v4541_v50 = vpop.f32.mrb[14].mxu0 }
 0x1d6   : > { %v4604_v54 = vadd.f32 %v4603_v49, %v4602_v45  ;;  %v4605_v55 = vpop.f32.mrb[14].mxu1  ;;  %v4542_v57 = vpop.f32.mrb[15].mxu0 }
 0x1d7   : > { %v3139_v59 = vadd.f32 %v4540_v48, %v6312_v36  ;;  %v4543_v60 = vadd.f32 %v4542_v57, %v4541_v50  ;;  %v4606_v61 = vpop.f32.mrb[15].mxu1 }
 0x1d8   : > { %v4607_v62 = vadd.f32 %v4606_v61, %v4605_v55  ;;  %3743 = vmatmul.mubr.bf16.gmra.mrb[120].mxu0 %v4273_v47 }
 0x1d9   : > { %v6369_v63 = vadd.f32 %v4604_v54, %v3139_v59  ;;  %v3142_v0 = vadd.f32 %v4543_v60, %v6312_v36  ;;  %3840 = vmatmul.mubr.bf16.gmra.mrb[120].mxu1 %v4275_v51  ;;  %3750 = vmatprep.mubr.bf16.mxu0 %v4290_v53 }
 0x1da   : > { %3847 = vmatprep.mubr.bf16.mxu1 %v4292_v58 }
 0x1db   : > { %v6372_v1 = vadd.f32 %v4607_v62, %v3142_v0  ;;  %v4544_v2 = vpop.f32.mrb[16].mxu0 }
 0x1dc   : > { %v4608_v3 = vpop.f32.mrb[16].mxu1  ;;  %v4545_v4 = vpop.f32.mrb[17].mxu0 }
 0x1dd   : > { %v4546_v6 = vadd.f32 %v4545_v4, %v4544_v2  ;;  %v4609_v7 = vpop.f32.mrb[17].mxu1  ;;  %v4547_v8 = vpop.f32.mrb[18].mxu0 }
 0x1de   : > { %v4610_v10 = vadd.f32 %v4609_v7, %v4608_v3  ;;  %v4611_v11 = vpop.f32.mrb[18].mxu1  ;;  %v4548_v13 = vpop.f32.mrb[19].mxu0 }
 0x1df   : > { %v3147_v14 = vadd.f32 %v4546_v6, %v6312_v36  ;;  %v4549_v15 = vadd.f32 %v4548_v13, %v4547_v8  ;;  %v4612_v17 = vpop.f32.mrb[19].mxu1 }
 0x1e0   : > { %v4613_v18 = vadd.f32 %v4612_v17, %v4611_v11  ;;  %3751 = vmatmul.mubr.bf16.gmra.mrb[124].mxu0 %v4289_v5 }
 0x1e1   : > { %v6375_v19 = vadd.f32 %v4610_v10, %v3147_v14  ;;  %v3150_v20 = vadd.f32 %v4549_v15, %v6312_v36  ;;  %3848 = vmatmul.mubr.bf16.gmra.mrb[124].mxu1 %v4291_v9 }
 0x1e3   : > { %v6378_v21 = vadd.f32 %v4613_v18, %v3150_v20  ;;  %v4550_v22 = vpop.f32.mrb[20].mxu0 }
 0x1e4   : > { %v4614_v23 = vpop.f32.mrb[20].mxu1  ;;  %v4551_v24 = vpop.f32.mrb[21].mxu0 }
 0x1e5   : > { %v4552_v25 = vadd.f32 %v4551_v24, %v4550_v22  ;;  %v4615_v26 = vpop.f32.mrb[21].mxu1  ;;  %v4553_v27 = vpop.f32.mrb[22].mxu0 }
 0x1e6   : > { %v4616_v28 = vadd.f32 %v4615_v26, %v4614_v23  ;;  %v4617_v29 = vpop.f32.mrb[22].mxu1  ;;  %v4554_v30 = vpop.f32.mrb[23].mxu0 }
 0x1e7   : > { %v3155_v31 = vadd.f32 %v4552_v25, %v6312_v36  ;;  %v4555_v32 = vadd.f32 %v4554_v30, %v4553_v27  ;;  %v4618_v33 = vpop.f32.mrb[23].mxu1 }
 0x1e8   : > { %v4619_v34 = vadd.f32 %v4618_v33, %v4617_v29 }
 0x1e9   : > { %v6381_v35 = vadd.f32 %v4616_v28, %v3155_v31  ;;  %v3158_v38 = vadd.f32 %v4555_v32, %v6312_v36 }
 0x1eb   : > { %v6384_v39 = vadd.f32 %v4619_v34, %v3158_v38  ;;  %v4556_v40 = vpop.f32.mrb[24].mxu0 }
 0x1ec   : > { %v4620_v42 = vpop.f32.mrb[24].mxu1  ;;  %v4557_v43 = vpop.f32.mrb[25].mxu0 }
 0x1ed   : > { %v4558_v44 = vadd.f32 %v4557_v43, %v4556_v40  ;;  %v4621_v45 = vpop.f32.mrb[25].mxu1  ;;  %v4559_v46 = vpop.f32.mrb[26].mxu0 }
 0x1ee   : > { %v4622_v47 = vadd.f32 %v4621_v45, %v4620_v42  ;;  %v4623_v48 = vpop.f32.mrb[26].mxu1  ;;  %v4560_v49 = vpop.f32.mrb[27].mxu0 }
 0x1ef   : > { %v3163_v50 = vadd.f32 %v4558_v44, %v6312_v36  ;;  %v4561_v51 = vadd.f32 %v4560_v49, %v4559_v46  ;;  %v4624_v53 = vpop.f32.mrb[27].mxu1 }
 0x1f0   : > { %v4625_v54 = vadd.f32 %v4624_v53, %v4623_v48 }
 0x1f1   : > { %v6387_v55 = vadd.f32 %v4622_v47, %v3163_v50  ;;  %v3166_v57 = vadd.f32 %v4561_v51, %v6312_v36 }
 0x1f3   : > { %v6390_v58 = vadd.f32 %v4625_v54, %v3166_v57  ;;  %v4562_v59 = vpop.f32.mrb[28].mxu0 }
 0x1f4   : > { %v4626_v60 = vpop.f32.mrb[28].mxu1  ;;  %v4563_v61 = vpop.f32.mrb[29].mxu0 }
 0x1f5   : > { %v4564_v62 = vadd.f32 %v4563_v61, %v4562_v59  ;;  %v4627_v0 = vpop.f32.mrb[29].mxu1  ;;  %v4565_v2 = vpop.f32.mrb[30].mxu0 }
 0x1f6   : > { %v4628_v3 = vadd.f32 %v4627_v0, %v4626_v60  ;;  %v4629_v4 = vpop.f32.mrb[30].mxu1  ;;  %v4566_v5 = vpop.f32.mrb[31].mxu0 }
 0x1f7   : > { %v3171_v6 = vadd.f32 %v4564_v62, %v6312_v36  ;;  %v4567_v7 = vadd.f32 %v4566_v5, %v4565_v2  ;;  %v4630_v8 = vpop.f32.mrb[31].mxu1 }
 0x1f8   : > { %v4631_v9 = vadd.f32 %v4630_v8, %v4629_v4 }
 0x1f9   : > { %v6393_v10 = vadd.f32 %v4628_v3, %v3171_v6  ;;  %v3174_v11 = vadd.f32 %v4567_v7, %v6312_v36 }
 0x1fb   : > { %v6396_v13 = vadd.f32 %v4631_v9, %v3174_v11  ;;  %v4648_v14 = vpop.f32.mrb[32].mxu0 }
 0x1fc   : > { %v4712_v15 = vpop.f32.mrb[32].mxu1  ;;  %v4649_v17 = vpop.f32.mrb[33].mxu0 }
 0x1fd   : > { %v4650_v18 = vadd.f32 %v4649_v17, %v4648_v14  ;;  %v4713_v20 = vpop.f32.mrb[33].mxu1  ;;  %v4651_v22 = vpop.f32.mrb[34].mxu0 }
 0x1fe   : > { %v4714_v23 = vadd.f32 %v4713_v20, %v4712_v15  ;;  %v4715_v24 = vpop.f32.mrb[34].mxu1  ;;  %v4652_v25 = vpop.f32.mrb[35].mxu0 }
 0x1ff   : > { %v3309_v26 = vadd.f32 %v4650_v18, %v6315_v52  ;;  %v4653_v27 = vadd.f32 %v4652_v25, %v4651_v22  ;;  %v4716_v28 = vpop.f32.mrb[35].mxu1 }
 0x200   : > { %v4717_v29 = vadd.f32 %v4716_v28, %v4715_v24 }
 0x201   : > { %v6399_v30 = vadd.f32 %v4714_v23, %v3309_v26  ;;  %v3312_v36 = vadd.f32 %v4653_v27, %v6324_v56 }
 0x203   : > { %v6402_v31 = vadd.f32 %v4717_v29, %v3312_v36  ;;  %v4654_v32 = vpop.f32.mrb[36].mxu0 }
 0x204   : > { %v4718_v33 = vpop.f32.mrb[36].mxu1  ;;  %v4655_v34 = vpop.f32.mrb[37].mxu0 }
 0x205   : > { %v4656_v38 = vadd.f32 %v4655_v34, %v4654_v32  ;;  %v4719_v40 = vpop.f32.mrb[37].mxu1  ;;  %v4657_v42 = vpop.f32.mrb[38].mxu0 }
 0x206   : > { %v4720_v43 = vadd.f32 %v4719_v40, %v4718_v33  ;;  %v4721_v44 = vpop.f32.mrb[38].mxu1  ;;  %v4658_v45 = vpop.f32.mrb[39].mxu0 }
 0x207   : > { %v3317_v52 = vadd.f32 %v4656_v38, %v6333_v12  ;;  %v4659_v46 = vadd.f32 %v4658_v45, %v4657_v42  ;;  %v4722_v47 = vpop.f32.mrb[39].mxu1 }
 0x208   : > { %v4723_v48 = vadd.f32 %v4722_v47, %v4721_v44 }
 0x209   : > { %v6405_v49 = vadd.f32 %v4720_v43, %v3317_v52  ;;  %v3320_v56 = vadd.f32 %v4659_v46, %v6342_v16 }
 0x20b   : > { %v6408_v50 = vadd.f32 %v4723_v48, %v3320_v56  ;;  %v4660_v51 = vpop.f32.mrb[40].mxu0 }
 0x20c   : > { %v4724_v53 = vpop.f32.mrb[40].mxu1  ;;  %v4661_v54 = vpop.f32.mrb[41].mxu0 }
 0x20d   : > { %v4662_v57 = vadd.f32 %v4661_v54, %v4660_v51  ;;  %v4725_v59 = vpop.f32.mrb[41].mxu1  ;;  %v4663_v60 = vpop.f32.mrb[42].mxu0 }
 0x20e   : > { %v4726_v61 = vadd.f32 %v4725_v59, %v4724_v53  ;;  %v4727_v62 = vpop.f32.mrb[42].mxu1  ;;  %v4664_v0 = vpop.f32.mrb[43].mxu0 }
 0x20f   : > { %v3325_v12 = vadd.f32 %v4662_v57, %v6351_v37  ;;  %v4665_v2 = vadd.f32 %v4664_v0, %v4663_v60  ;;  %v4728_v3 = vpop.f32.mrb[43].mxu1 }
 0x210   : > { %v4729_v4 = vadd.f32 %v4728_v3, %v4727_v62 }
 0x211   : > { %v6411_v5 = vadd.f32 %v4726_v61, %v3325_v12  ;;  %v3328_v16 = vadd.f32 %v4665_v2, %v6360_v41 }
 0x213   : > { %v6414_v6 = vadd.f32 %v4729_v4, %v3328_v16  ;;  %v4666_v7 = vpop.f32.mrb[44].mxu0 }
 0x214   : > { %v4730_v8 = vpop.f32.mrb[44].mxu1  ;;  %v4667_v9 = vpop.f32.mrb[45].mxu0 }
 0x215   : > { %v4668_v11 = vadd.f32 %v4667_v9, %v4666_v7  ;;  %v4731_v14 = vpop.f32.mrb[45].mxu1  ;;  %v4669_v15 = vpop.f32.mrb[46].mxu0 }
 0x216   : > { %v4732_v17 = vadd.f32 %v4731_v14, %v4730_v8  ;;  %v4733_v18 = vpop.f32.mrb[46].mxu1  ;;  %v4670_v20 = vpop.f32.mrb[47].mxu0 }
 0x217   : > { %v3333_v37 = vadd.f32 %v4668_v11, %v6369_v63  ;;  %v4671_v22 = vadd.f32 %v4670_v20, %v4669_v15  ;;  %v4734_v23 = vpop.f32.mrb[47].mxu1 }
 0x218   : > { %v4735_v24 = vadd.f32 %v4734_v23, %v4733_v18 }
 0x219   : > { %v6417_v25 = vadd.f32 %v4732_v17, %v3333_v37  ;;  %v3336_v41 = vadd.f32 %v4671_v22, %v6372_v1 }
 0x21b   : > { %v6420_v26 = vadd.f32 %v4735_v24, %v3336_v41  ;;  %v4672_v27 = vpop.f32.mrb[48].mxu0 }
 0x21c   : > { %v4736_v28 = vpop.f32.mrb[48].mxu1  ;;  %v4673_v29 = vpop.f32.mrb[49].mxu0 }
 0x21d   : > { %v4674_v36 = vadd.f32 %v4673_v29, %v4672_v27  ;;  %v4737_v32 = vpop.f32.mrb[49].mxu1  ;;  %v4675_v33 = vpop.f32.mrb[50].mxu0 }
 0x21e   : > { %v4738_v34 = vadd.f32 %v4737_v32, %v4736_v28  ;;  %v4739_v38 = vpop.f32.mrb[50].mxu1  ;;  %v4676_v40 = vpop.f32.mrb[51].mxu0 }
 0x21f   : > { %v3341_v63 = vadd.f32 %v4674_v36, %v6375_v19  ;;  %v4677_v42 = vadd.f32 %v4676_v40, %v4675_v33  ;;  %v4740_v43 = vpop.f32.mrb[51].mxu1 }
 0x220   : > { %v4741_v44 = vadd.f32 %v4740_v43, %v4739_v38 }
 0x221   : > { %v6423_v45 = vadd.f32 %v4738_v34, %v3341_v63  ;;  %v3344_v1 = vadd.f32 %v4677_v42, %v6378_v21 }
 0x223   : > { %v6426_v52 = vadd.f32 %v4741_v44, %v3344_v1  ;;  %v4678_v46 = vpop.f32.mrb[52].mxu0 }
 0x224   : > { %v4742_v47 = vpop.f32.mrb[52].mxu1  ;;  %v4679_v48 = vpop.f32.mrb[53].mxu0 }
 0x225   : > { %v4680_v56 = vadd.f32 %v4679_v48, %v4678_v46  ;;  %v4743_v51 = vpop.f32.mrb[53].mxu1  ;;  %v4681_v53 = vpop.f32.mrb[54].mxu0 }
 0x226   : > { %v4744_v54 = vadd.f32 %v4743_v51, %v4742_v47  ;;  %v4745_v57 = vpop.f32.mrb[54].mxu1  ;;  %v4682_v59 = vpop.f32.mrb[55].mxu0 }
 0x227   : > { %v3349_v19 = vadd.f32 %v4680_v56, %v6381_v35  ;;  %v4683_v60 = vadd.f32 %v4682_v59, %v4681_v53  ;;  %v4746_v61 = vpop.f32.mrb[55].mxu1 }
 0x228   : > { %v4747_v62 = vadd.f32 %v4746_v61, %v4745_v57 }
 0x229   : > { %v6429_v0 = vadd.f32 %v4744_v54, %v3349_v19  ;;  %v3352_v21 = vadd.f32 %v4683_v60, %v6384_v39 }
 0x22b   : > { %v6432_v12 = vadd.f32 %v4747_v62, %v3352_v21  ;;  %v4684_v2 = vpop.f32.mrb[56].mxu0 }
 0x22c   : > { %v4748_v3 = vpop.f32.mrb[56].mxu1  ;;  %v4685_v4 = vpop.f32.mrb[57].mxu0 }
 0x22d   : > { %v4686_v16 = vadd.f32 %v4685_v4, %v4684_v2  ;;  %v4749_v7 = vpop.f32.mrb[57].mxu1  ;;  %v4687_v8 = vpop.f32.mrb[58].mxu0 }
 0x22e   : > { %v4750_v9 = vadd.f32 %v4749_v7, %v4748_v3  ;;  %v4751_v11 = vpop.f32.mrb[58].mxu1  ;;  %v4688_v14 = vpop.f32.mrb[59].mxu0 }
 0x22f   : > { %v3357_v35 = vadd.f32 %v4686_v16, %v6387_v55  ;;  %v4689_v15 = vadd.f32 %v4688_v14, %v4687_v8  ;;  %v4752_v17 = vpop.f32.mrb[59].mxu1 }
 0x230   : > { %v4753_v18 = vadd.f32 %v4752_v17, %v4751_v11 }
 0x231   : > { %v6435_v20 = vadd.f32 %v4750_v9, %v3357_v35  ;;  %v3360_v39 = vadd.f32 %v4689_v15, %v6390_v58 }
 0x233   : > { %v6438_v37 = vadd.f32 %v4753_v18, %v3360_v39  ;;  %v4690_v22 = vpop.f32.mrb[60].mxu0 }
 0x234   : > { %v4754_v23 = vpop.f32.mrb[60].mxu1  ;;  %v4691_v24 = vpop.f32.mrb[61].mxu0 }
 0x235   : > { %v4692_v41 = vadd.f32 %v4691_v24, %v4690_v22  ;;  %v4755_v27 = vpop.f32.mrb[61].mxu1  ;;  %v4693_v28 = vpop.f32.mrb[62].mxu0 }
 0x236   : > { %v4756_v29 = vadd.f32 %v4755_v27, %v4754_v23  ;;  %v4757_v36 = vpop.f32.mrb[62].mxu1  ;;  %v4694_v32 = vpop.f32.mrb[63].mxu0 }
 0x237   : > { %v3365_v55 = vadd.f32 %v4692_v41, %v6393_v10  ;;  %v4695_v33 = vadd.f32 %v4694_v32, %v4693_v28  ;;  %v4758_v34 = vpop.f32.mrb[63].mxu1 }
 0x238   : > { %v4759_v38 = vadd.f32 %v4758_v34, %v4757_v36 }
 0x239   : > { %v6441_v40 = vadd.f32 %v4756_v29, %v3365_v55  ;;  %v3368_v58 = vadd.f32 %v4695_v33, %v6396_v13 }
 0x23b   : > { %v6444_v63 = vadd.f32 %v4759_v38, %v3368_v58  ;;  %v4776_v42 = vpop.f32.mrb[64].mxu0 }
 0x23c   : > { %v4840_v43 = vpop.f32.mrb[64].mxu1  ;;  %v4777_v44 = vpop.f32.mrb[65].mxu0 }
 0x23d   : > { %v4778_v1 = vadd.f32 %v4777_v44, %v4776_v42  ;;  %v4841_v46 = vpop.f32.mrb[65].mxu1  ;;  %v4779_v47 = vpop.f32.mrb[66].mxu0 }
 0x23e   : > { %v4842_v48 = vadd.f32 %v4841_v46, %v4840_v43  ;;  %v4843_v56 = vpop.f32.mrb[66].mxu1  ;;  %v4780_v51 = vpop.f32.mrb[67].mxu0 }
 0x23f   : > { %v3503_v10 = vadd.f32 %v4778_v1, %v6399_v30  ;;  %v4781_v53 = vadd.f32 %v4780_v51, %v4779_v47  ;;  %v4844_v54 = vpop.f32.mrb[67].mxu1 }
 0x240   : > { %v4845_v57 = vadd.f32 %v4844_v54, %v4843_v56 }
 0x241   : > { %v6447_v59 = vadd.f32 %v4842_v48, %v3503_v10  ;;  %v3506_v13 = vadd.f32 %v4781_v53, %v6402_v31 }
 0x243   : > { %v6450_v19 = vadd.f32 %v4845_v57, %v3506_v13  ;;  %v4782_v60 = vpop.f32.mrb[68].mxu0 }
 0x244   : > { %v4846_v61 = vpop.f32.mrb[68].mxu1  ;;  %v4783_v62 = vpop.f32.mrb[69].mxu0 }
 0x245   : > { %v4784_v21 = vadd.f32 %v4783_v62, %v4782_v60  ;;  %v4847_v2 = vpop.f32.mrb[69].mxu1  ;;  %v4785_v3 = vpop.f32.mrb[70].mxu0 }
 0x246   : > { %v4848_v4 = vadd.f32 %v4847_v2, %v4846_v61  ;;  %v4849_v16 = vpop.f32.mrb[70].mxu1  ;;  %v4786_v7 = vpop.f32.mrb[71].mxu0 }
 0x247   : > { %v3511_v30 = vadd.f32 %v4784_v21, %v6405_v49  ;;  %v4787_v8 = vadd.f32 %v4786_v7, %v4785_v3  ;;  %v4850_v9 = vpop.f32.mrb[71].mxu1 }
 0x248   : > { %v4851_v11 = vadd.f32 %v4850_v9, %v4849_v16 }
 0x249   : > { %v6453_v14 = vadd.f32 %v4848_v4, %v3511_v30  ;;  %v3514_v31 = vadd.f32 %v4787_v8, %v6408_v50 }
 0x24b   : > { %v6456_v35 = vadd.f32 %v4851_v11, %v3514_v31  ;;  %v4788_v15 = vpop.f32.mrb[72].mxu0 }
 0x24c   : > { %v4852_v17 = vpop.f32.mrb[72].mxu1  ;;  %v4789_v18 = vpop.f32.mrb[73].mxu0 }
 0x24d   : > { %v4790_v39 = vadd.f32 %v4789_v18, %v4788_v15  ;;  %v4853_v22 = vpop.f32.mrb[73].mxu1  ;;  %v4791_v23 = vpop.f32.mrb[74].mxu0 }
 0x24e   : > { %v4854_v24 = vadd.f32 %v4853_v22, %v4852_v17  ;;  %v4855_v41 = vpop.f32.mrb[74].mxu1  ;;  %v4792_v27 = vpop.f32.mrb[75].mxu0 }
 0x24f   : > { %v3519_v49 = vadd.f32 %v4790_v39, %v6411_v5  ;;  %v4793_v28 = vadd.f32 %v4792_v27, %v4791_v23  ;;  %v4856_v29 = vpop.f32.mrb[75].mxu1 }
 0x250   : > { %v4857_v36 = vadd.f32 %v4856_v29, %v4855_v41 }
 0x251   : > { %v6459_v32 = vadd.f32 %v4854_v24, %v3519_v49  ;;  %v3522_v50 = vadd.f32 %v4793_v28, %v6414_v6 }
 0x253   : > { %v6462_v55 = vadd.f32 %v4857_v36, %v3522_v50  ;;  %v4794_v33 = vpop.f32.mrb[76].mxu0 }
 0x254   : > { %v4858_v34 = vpop.f32.mrb[76].mxu1  ;;  %v4795_v38 = vpop.f32.mrb[77].mxu0 }
 0x255   : > { %v4796_v58 = vadd.f32 %v4795_v38, %v4794_v33  ;;  %v4859_v42 = vpop.f32.mrb[77].mxu1  ;;  %v4797_v43 = vpop.f32.mrb[78].mxu0 }
 0x256   : > { %v4860_v44 = vadd.f32 %v4859_v42, %v4858_v34  ;;  %v4861_v1 = vpop.f32.mrb[78].mxu1  ;;  %v4798_v46 = vpop.f32.mrb[79].mxu0 }
 0x257   : > { %v3527_v5 = vadd.f32 %v4796_v58, %v6417_v25  ;;  %v4799_v47 = vadd.f32 %v4798_v46, %v4797_v43  ;;  %v4862_v48 = vpop.f32.mrb[79].mxu1 }
 0x258   : > { %v4863_v56 = vadd.f32 %v4862_v48, %v4861_v1 }
 0x259   : > { %v6465_v51 = vadd.f32 %v4860_v44, %v3527_v5  ;;  %v3530_v6 = vadd.f32 %v4799_v47, %v6420_v26 }
 0x25b   : > { %v6468_v10 = vadd.f32 %v4863_v56, %v3530_v6  ;;  %v4800_v53 = vpop.f32.mrb[80].mxu0 }
 0x25c   : > { %v4864_v54 = vpop.f32.mrb[80].mxu1  ;;  %v4801_v57 = vpop.f32.mrb[81].mxu0 }
 0x25d   : > { %v4802_v13 = vadd.f32 %v4801_v57, %v4800_v53  ;;  %v4865_v60 = vpop.f32.mrb[81].mxu1  ;;  %v4803_v61 = vpop.f32.mrb[82].mxu0 }
 0x25e   : > { %v4866_v62 = vadd.f32 %v4865_v60, %v4864_v54  ;;  %v4867_v21 = vpop.f32.mrb[82].mxu1  ;;  %v4804_v2 = vpop.f32.mrb[83].mxu0 }
 0x25f   : > { %v3535_v25 = vadd.f32 %v4802_v13, %v6423_v45  ;;  %v4805_v3 = vadd.f32 %v4804_v2, %v4803_v61  ;;  %v4868_v4 = vpop.f32.mrb[83].mxu1 }
 0x260   : > { %v4869_v16 = vadd.f32 %v4868_v4, %v4867_v21 }
 0x261   : > { %v6471_v7 = vadd.f32 %v4866_v62, %v3535_v25  ;;  %v3538_v26 = vadd.f32 %v4805_v3, %v6426_v52 }
 0x263   : > { %v6474_v30 = vadd.f32 %v4869_v16, %v3538_v26  ;;  %v4806_v8 = vpop.f32.mrb[84].mxu0 }
 0x264   : > { %v4870_v9 = vpop.f32.mrb[84].mxu1  ;;  %v4807_v11 = vpop.f32.mrb[85].mxu0 }
 0x265   : > { %v4808_v31 = vadd.f32 %v4807_v11, %v4806_v8  ;;  %v4871_v15 = vpop.f32.mrb[85].mxu1  ;;  %v4809_v17 = vpop.f32.mrb[86].mxu0 }
 0x266   : > { %v4872_v18 = vadd.f32 %v4871_v15, %v4870_v9  ;;  %v4873_v39 = vpop.f32.mrb[86].mxu1  ;;  %v4810_v22 = vpop.f32.mrb[87].mxu0 }
 0x267   : > { %v3543_v45 = vadd.f32 %v4808_v31, %v6429_v0  ;;  %v4811_v23 = vadd.f32 %v4810_v22, %v4809_v17  ;;  %v4874_v24 = vpop.f32.mrb[87].mxu1 }
 0x268   : > { %v4875_v41 = vadd.f32 %v4874_v24, %v4873_v39 }
 0x269   : > { %v6477_v27 = vadd.f32 %v4872_v18, %v3543_v45  ;;  %v3546_v52 = vadd.f32 %v4811_v23, %v6432_v12 }
 0x26b   : > { %v6480_v49 = vadd.f32 %v4875_v41, %v3546_v52  ;;  %v4812_v28 = vpop.f32.mrb[88].mxu0 }
 0x26c   : > { %v4876_v29 = vpop.f32.mrb[88].mxu1  ;;  %v4813_v36 = vpop.f32.mrb[89].mxu0 }
 0x26d   : > { %v4814_v50 = vadd.f32 %v4813_v36, %v4812_v28  ;;  %v4877_v33 = vpop.f32.mrb[89].mxu1  ;;  %v4815_v34 = vpop.f32.mrb[90].mxu0 }
 0x26e   : > { %v4878_v38 = vadd.f32 %v4877_v33, %v4876_v29  ;;  %v4879_v58 = vpop.f32.mrb[90].mxu1  ;;  %v4816_v42 = vpop.f32.mrb[91].mxu0 }
 0x26f   : > { %v3551_v0 = vadd.f32 %v4814_v50, %v6435_v20  ;;  %v4817_v43 = vadd.f32 %v4816_v42, %v4815_v34  ;;  %v4880_v44 = vpop.f32.mrb[91].mxu1 }
 0x270   : > { %v4881_v1 = vadd.f32 %v4880_v44, %v4879_v58 }
 0x271   : > { %v6483_v46 = vadd.f32 %v4878_v38, %v3551_v0  ;;  %v3554_v12 = vadd.f32 %v4817_v43, %v6438_v37 }
 0x273   : > { %v6486_v5 = vadd.f32 %v4881_v1, %v3554_v12  ;;  %v4818_v47 = vpop.f32.mrb[92].mxu0 }
 0x274   : > { %v4882_v48 = vpop.f32.mrb[92].mxu1  ;;  %v4819_v56 = vpop.f32.mrb[93].mxu0 }
 0x275   : > { %v4820_v6 = vadd.f32 %v4819_v56, %v4818_v47  ;;  %v4883_v53 = vpop.f32.mrb[93].mxu1  ;;  %v4821_v54 = vpop.f32.mrb[94].mxu0 }
 0x276   : > { %v4884_v57 = vadd.f32 %v4883_v53, %v4882_v48  ;;  %v4885_v13 = vpop.f32.mrb[94].mxu1  ;;  %v4822_v60 = vpop.f32.mrb[95].mxu0 }
 0x277   : > { %v3559_v20 = vadd.f32 %v4820_v6, %v6441_v40  ;;  %v4823_v61 = vadd.f32 %v4822_v60, %v4821_v54  ;;  %v4886_v62 = vpop.f32.mrb[95].mxu1 }
 0x278   : > { %v4887_v21 = vadd.f32 %v4886_v62, %v4885_v13 }
 0x279   : > { %v6489_v2 = vadd.f32 %v4884_v57, %v3559_v20  ;;  %v3562_v37 = vadd.f32 %v4823_v61, %v6444_v63 }
 0x27b   : > { %v6492_v25 = vadd.f32 %v4887_v21, %v3562_v37  ;;  %v4904_v3 = vpop.f32.mrb[96].mxu0 }
 0x27c   : > { %v4968_v4 = vpop.f32.mrb[96].mxu1  ;;  %v4905_v16 = vpop.f32.mrb[97].mxu0 }
 0x27d   : > { %v4906_v26 = vadd.f32 %v4905_v16, %v4904_v3  ;;  %v4969_v8 = vpop.f32.mrb[97].mxu1  ;;  %v4907_v9 = vpop.f32.mrb[98].mxu0 }
 0x27e   : > { %v4970_v11 = vadd.f32 %v4969_v8, %v4968_v4  ;;  %v4971_v31 = vpop.f32.mrb[98].mxu1  ;;  %v4908_v15 = vpop.f32.mrb[99].mxu0 }
 0x27f   : > { %v3697_v40 = vadd.f32 %v4906_v26, %v6447_v59  ;;  %v4909_v17 = vadd.f32 %v4908_v15, %v4907_v9  ;;  %v4972_v18 = vpop.f32.mrb[99].mxu1 }
 0x280   : > { %v4973_v39 = vadd.f32 %v4972_v18, %v4971_v31 }
 0x281   : > { %v3794_v22 = vadd.f32 %v4970_v11, %v3697_v40  ;;  %v3700_v63 = vadd.f32 %v4909_v17, %v6450_v19 }
 0x283   : > { %v3797_v45 = vadd.f32 %v4973_v39, %v3700_v63  ;;  %v4910_v23 = vpop.f32.mrb[100].mxu0  ;;  %v3856_v52 = vmax.f32 %v3794_v22, 0.0 }
 0x284   : > { %v4974_v24 = vpop.f32.mrb[100].mxu1  ;;  %v4911_v41 = vpop.f32.mrb[101].mxu0 }
 0x285   : > { %v3857_v28 = vmax.f32 %v3797_v45, 0.0  ;;  %v4912_v29 = vadd.f32 %v4911_v41, %v4910_v23  ;;  %v4975_v36 = vpop.f32.mrb[101].mxu1  ;;  %v4913_v50 = vpop.f32.mrb[102].mxu0 }
 0x286   : > { %v4976_v33 = vadd.f32 %v4975_v36, %v4974_v24  ;;  %v4977_v34 = vpop.f32.mrb[102].mxu1  ;;  %v4914_v59 = vpop.f32.mrb[103].mxu0 }
 0x287   : > { %v4460_v38 = vpack.c.bf16 %v3857_v28, %v3856_v52  ;;  %v3705_v58 = vadd.f32 %v4912_v29, %v6453_v14  ;;  %v4915_v42 = vadd.f32 %v4914_v59, %v4913_v50  ;;  %v4978_v0 = vpop.f32.mrb[103].mxu1 }
 0x288   : > { %v4979_v19 = vadd.f32 %v4978_v0, %v4977_v34 }
 0x289   : > { %4461 = vst [vmem:[%s6499_s12] sm:$0xff] %v4460_v38   ;;  %v3802_v43 = vadd.f32 %v4976_v33, %v3705_v58  ;;  %v3708_v44 = vadd.f32 %v4915_v42, %v6456_v35 }
 0x28b   : > { %v3805_v1 = vadd.f32 %v4979_v19, %v3708_v44  ;;  %v4916_v12 = vpop.f32.mrb[104].mxu0  ;;  %v3858_v56 = vmax.f32 %v3802_v43, 0.0 }
 0x28c   : > { %v4980_v47 = vpop.f32.mrb[104].mxu1  ;;  %v4917_v48 = vpop.f32.mrb[105].mxu0 }
 0x28d   : > { %v3859_v6 = vmax.f32 %v3805_v1, 0.0  ;;  %v4918_v53 = vadd.f32 %v4917_v48, %v4916_v12  ;;  %v4981_v54 = vpop.f32.mrb[105].mxu1  ;;  %v4919_v14 = vpop.f32.mrb[106].mxu0 }
 0x28e   : > { %v4982_v57 = vadd.f32 %v4981_v54, %v4980_v47  ;;  %v4983_v13 = vpop.f32.mrb[106].mxu1  ;;  %v4920_v60 = vpop.f32.mrb[107].mxu0 }
 0x28f   : > { %v4465_v20 = vpack.c.bf16 %v3859_v6, %v3858_v56  ;;  %v3713_v61 = vadd.f32 %v4918_v53, %v6459_v32  ;;  %v4921_v62 = vadd.f32 %v4920_v60, %v4919_v14  ;;  %v4984_v21 = vpop.f32.mrb[107].mxu1 }
 0x290   : > { %v4985_v37 = vadd.f32 %v4984_v21, %v4983_v13 }
 0x291   : > { %4497 = vst [vmem:[%s6499_s12 + $0x8] sm:$0xff] %v4465_v20   ;;  %v3810_v35 = vadd.f32 %v4982_v57, %v3713_v61  ;;  %v3716_v3 = vadd.f32 %v4921_v62, %v6462_v55 }
 0x293   : > { %v3813_v4 = vadd.f32 %v4985_v37, %v3716_v3  ;;  %v4922_v16 = vpop.f32.mrb[108].mxu0  ;;  %v3860_v9 = vmax.f32 %v3810_v35, 0.0 }
 0x294   : > { %v4986_v26 = vpop.f32.mrb[108].mxu1  ;;  %v4923_v8 = vpop.f32.mrb[109].mxu0 }
 0x295   : > { %v3861_v11 = vmax.f32 %v3813_v4, 0.0  ;;  %v4924_v31 = vadd.f32 %v4923_v8, %v4922_v16  ;;  %v4987_v15 = vpop.f32.mrb[109].mxu1  ;;  %v4925_v40 = vpop.f32.mrb[110].mxu0 }
 0x296   : > { %v4988_v17 = vadd.f32 %v4987_v15, %v4986_v26  ;;  %v4989_v18 = vpop.f32.mrb[110].mxu1  ;;  %v4926_v32 = vpop.f32.mrb[111].mxu0 }
 0x297   : > { %v4470_v39 = vpack.c.bf16 %v3861_v11, %v3860_v9  ;;  %v3721_v22 = vadd.f32 %v4924_v31, %v6465_v51  ;;  %v4927_v63 = vadd.f32 %v4926_v32, %v4925_v40  ;;  %v4990_v45 = vpop.f32.mrb[111].mxu1 }
 0x298   : > { %v4991_v23 = vadd.f32 %v4990_v45, %v4989_v18 }
 0x299   : > { %4498 = vst [vmem:[%s6499_s12 + $0x10] sm:$0xff] %v4470_v39   ;;  %v3818_v55 = vadd.f32 %v4988_v17, %v3721_v22  ;;  %v3724_v24 = vadd.f32 %v4927_v63, %v6468_v10 }
 0x29b   : > { %v3821_v41 = vadd.f32 %v4991_v23, %v3724_v24  ;;  %v4928_v52 = vpop.f32.mrb[112].mxu0  ;;  %v3862_v36 = vmax.f32 %v3818_v55, 0.0 }
 0x29c   : > { %v4992_v28 = vpop.f32.mrb[112].mxu1  ;;  %v4929_v29 = vpop.f32.mrb[113].mxu0 }
 0x29d   : > { %v3863_v50 = vmax.f32 %v3821_v41, 0.0  ;;  %v4930_v33 = vadd.f32 %v4929_v29, %v4928_v52  ;;  %v4993_v34 = vpop.f32.mrb[113].mxu1  ;;  %v4931_v59 = vpop.f32.mrb[114].mxu0 }
 0x29e   : > { %v4994_v38 = vadd.f32 %v4993_v34, %v4992_v28  ;;  %v4995_v58 = vpop.f32.mrb[114].mxu1  ;;  %v4932_v51 = vpop.f32.mrb[115].mxu0 }
 0x29f   : > { %v4475_v42 = vpack.c.bf16 %v3863_v50, %v3862_v36  ;;  %v3729_v0 = vadd.f32 %v4930_v33, %v6471_v7  ;;  %v4933_v19 = vadd.f32 %v4932_v51, %v4931_v59  ;;  %v4996_v43 = vpop.f32.mrb[115].mxu1 }
 0x2a0   : > { %v4997_v44 = vadd.f32 %v4996_v43, %v4995_v58 }
 0x2a1   : > { %4499 = vst [vmem:[%s6499_s12 + $0x18] sm:$0xff] %v4475_v42   ;;  %v3826_v10 = vadd.f32 %v4994_v38, %v3729_v0  ;;  %v3732_v1 = vadd.f32 %v4933_v19, %v6474_v30 }
 0x2a3   : > { %v3829_v12 = vadd.f32 %v4997_v44, %v3732_v1  ;;  %v4934_v47 = vpop.f32.mrb[116].mxu0  ;;  %v3864_v6 = vmax.f32 %v3826_v10, 0.0  ;;  %v3983_v1 = vld [vmem:[%s6499_s12 + $0x8] sm:$0xf] (%p5279_p6) }
 0x2a4   : > { %v4998_v48 = vpop.f32.mrb[116].mxu1  ;;  %v4935_v56 = vpop.f32.mrb[117].mxu0  ;;  %3984 = vst [vmem:[%s3963_s8 + $0x10] sm:$0xf] (%p5279_p6), %v3983_v1 }
 0x2a5   : > { %v3865_v53 = vmax.f32 %v3829_v12, 0.0  ;;  %v4936_v54 = vadd.f32 %v4935_v56, %v4934_v47  ;;  %v4999_v14 = vpop.f32.mrb[117].mxu1  ;;  %v4937_v57 = vpop.f32.mrb[118].mxu0  ;;  %v3985_v12 = vld [vmem:[%s6499_s12 + $0xc] sm:$0xf] (%p5279_p6) }
 0x2a6   : > { %v5000_v13 = vadd.f32 %v4999_v14, %v4998_v48  ;;  %v5001_v60 = vpop.f32.mrb[118].mxu1  ;;  %v4938_v7 = vpop.f32.mrb[119].mxu0  ;;  %v3987_v47 = vld [vmem:[%s6499_s12 + $0x10] sm:$0xf] (%p5279_p6)  ;;  %3986 = vst [vmem:[%s3963_s8 + $0x18] sm:$0xf] (%p5279_p6), %v3985_v12 }
 0x2a7   : > { %v4480_v20 = vpack.c.bf16 %v3865_v53, %v3864_v6  ;;  %v3737_v61 = vadd.f32 %v4936_v54, %v6477_v27  ;;  %v4939_v62 = vadd.f32 %v4938_v7, %v4937_v57  ;;  %v5002_v21 = vpop.f32.mrb[119].mxu1  ;;  %3988 = vst [vmem:[%s3963_s8 + $0x20] sm:$0xf] (%p5279_p6), %v3987_v47  ;;  %v3989_v48 = vld [vmem:[%s6499_s12 + $0x14] sm:$0xf] (%p5279_p6) }
 0x2a8   : > { %v5003_v37 = vadd.f32 %v5002_v21, %v5001_v60  ;;  %v3991_v56 = vld [vmem:[%s6499_s12 + $0x18] sm:$0xf] (%p5279_p6)  ;;  %v3993_v6 = vld [vmem:[%s6499_s12 + $0x1c] sm:$0xf] (%p5279_p6)  ;;  %3990 = vst [vmem:[%s3963_s8 + $0x28] sm:$0xf] (%p5279_p6), %v3989_v48 }
 0x2a9   : > { %4500 = vst [vmem:[%s6499_s12 + $0x20] sm:$0xff] %v4480_v20   ;;  %v3834_v30 = vadd.f32 %v5000_v13, %v3737_v61  ;;  %v3740_v35 = vadd.f32 %v4939_v62, %v6480_v49  ;;  %3992 = vst [vmem:[%s3963_s8 + $0x30] sm:$0xf] (%p5279_p6), %v3991_v56 }
 0x2aa   : > { %3994 = vst [vmem:[%s3963_s8 + $0x38] sm:$0xf] (%p5279_p6), %v3993_v6 }
 0x2ab   : > { %v3837_v3 = vadd.f32 %v5003_v37, %v3740_v35  ;;  %v4940_v4 = vpop.f32.mrb[120].mxu0  ;;  %v3866_v8 = vmax.f32 %v3834_v30, 0.0 }
 0x2ac   : > { %v5004_v16 = vpop.f32.mrb[120].mxu1  ;;  %v4941_v26 = vpop.f32.mrb[121].mxu0 }
 0x2ad   : > { %v3867_v9 = vmax.f32 %v3837_v3, 0.0  ;;  %v4942_v11 = vadd.f32 %v4941_v26, %v4940_v4  ;;  %v5005_v31 = vpop.f32.mrb[121].mxu1  ;;  %v4943_v15 = vpop.f32.mrb[122].mxu0 }
 0x2ae   : > { %v5006_v40 = vadd.f32 %v5005_v31, %v5004_v16  ;;  %v5007_v17 = vpop.f32.mrb[122].mxu1  ;;  %v4944_v27 = vpop.f32.mrb[123].mxu0 }
 0x2af   : > { %v4485_v18 = vpack.c.bf16 %v3867_v9, %v3866_v8  ;;  %v3745_v32 = vadd.f32 %v4942_v11, %v6483_v46  ;;  %v4945_v39 = vadd.f32 %v4944_v27, %v4943_v15  ;;  %v5008_v22 = vpop.f32.mrb[123].mxu1 }
 0x2b0   : > { %v5009_v63 = vadd.f32 %v5008_v22, %v5007_v17  ;;  %v3995_v53 = vld [vmem:[%s6499_s12 + $0x20] sm:$0xf] (%p5279_p6)  ;;  %v3997_v54 = vld [vmem:[%s6499_s12 + $0x24] sm:$0xf] (%p5279_p6) }
 0x2b1   : > { %4501 = vst [vmem:[%s6499_s12 + $0x28] sm:$0xff] %v4485_v18   ;;  %v3842_v49 = vadd.f32 %v5006_v40, %v3745_v32  ;;  %v3748_v45 = vadd.f32 %v4945_v39, %v6486_v5  ;;  %3996 = vst [vmem:[%s3963_s8 + $0x40] sm:$0xf] (%p5279_p6), %v3995_v53 }
 0x2b2   : > { %3998 = vst [vmem:[%s3963_s8 + $0x48] sm:$0xf] (%p5279_p6), %v3997_v54 }
 0x2b3   : > { %v3845_v23 = vadd.f32 %v5009_v63, %v3748_v45  ;;  %v4946_v55 = vpop.f32.mrb[124].mxu0  ;;  %v3868_v52 = vmax.f32 %v3842_v49, 0.0 }
 0x2b4   : > { %v5010_v24 = vpop.f32.mrb[124].mxu1  ;;  %v4947_v41 = vpop.f32.mrb[125].mxu0 }
 0x2b5   : > { %v3869_v28 = vmax.f32 %v3845_v23, 0.0  ;;  %v4948_v29 = vadd.f32 %v4947_v41, %v4946_v55  ;;  %v5011_v36 = vpop.f32.mrb[125].mxu1  ;;  %v4949_v50 = vpop.f32.mrb[126].mxu0 }
 0x2b6   : > { %v5012_v33 = vadd.f32 %v5011_v36, %v5010_v24  ;;  %v5013_v46 = vpop.f32.mrb[126].mxu1  ;;  %v4950_v34 = vpop.f32.mrb[127].mxu0 }
 0x2b7   : > { %v4490_v59 = vpack.c.bf16 %v3869_v28, %v3868_v52  ;;  %v3753_v38 = vadd.f32 %v4948_v29, %v6489_v2  ;;  %v4951_v58 = vadd.f32 %v4950_v34, %v4949_v50  ;;  %v5014_v51 = vpop.f32.mrb[127].mxu1  ;;  %v3979_v2 = vld [vmem:[%s6499_s12] sm:$0xf] (%p5279_p6) }
 0x2b8   : > { %v5015_v5 = vadd.f32 %v5014_v51, %v5013_v46  ;;  %3980 = vst [vmem:[%s3963_s8] sm:$0xf] (%p5279_p6), %v3979_v2  ;;  %v3999_v14 = vld [vmem:[%s6499_s12 + $0x28] sm:$0xf] (%p5279_p6)  ;;  %v4001_v57 = vld [vmem:[%s6499_s12 + $0x2c] sm:$0xf] (%p5279_p6) }
 0x2b9   : > { %4502 = vst [vmem:[%s6499_s12 + $0x30] sm:$0xff] %v4490_v59   ;;  %v3850_v42 = vadd.f32 %v5012_v33, %v3753_v38  ;;  %v3756_v0 = vadd.f32 %v4951_v58, %v6492_v25  ;;  %v3981_v25 = vld [vmem:[%s6499_s12 + $0x4] sm:$0xf] (%p5279_p6)  ;;  %4000 = vst [vmem:[%s3963_s8 + $0x50] sm:$0xf] (%p5279_p6), %v3999_v14 }
 0x2ba   : > { %3982 = vst [vmem:[%s3963_s8 + $0x8] sm:$0xf] (%p5279_p6), %v3981_v25  ;;  %4002 = vst [vmem:[%s3963_s8 + $0x58] sm:$0xf] (%p5279_p6), %v4001_v57 }
 0x2bb   : > { %v3853_v19 = vadd.f32 %v5015_v5, %v3756_v0  ;;  %v3870_v43 = vmax.f32 %v3850_v42, 0.0  ;;  %3958 = sbr.rel (!%p5279_p6) target bundleno = 714 (0x2ca), region = 77 }
 0x2bd   : > { %v3871_v44 = vmax.f32 %v3853_v19, 0.0 }
 0x2bf   : > { %v4495_v10 = vpack.c.bf16 %v3871_v44, %v3870_v43 }
 0x2c0   : > { %v4003_v13 = vld [vmem:[%s6499_s12 + $0x30] sm:$0xf] (%p5279_p6)  ;;  %v4005_v60 = vld [vmem:[%s6499_s12 + $0x34] sm:$0xf] (%p5279_p6) }
 0x2c1   : > { %4503 = vst [vmem:[%s6499_s12 + $0x38] sm:$0xff] %v4495_v10   ;;  %4004 = vst [vmem:[%s3963_s8 + $0x60] sm:$0xf] (%p5279_p6), %v4003_v13 }
 0x2c2   : > { %4006 = vst [vmem:[%s3963_s8 + $0x68] sm:$0xf] %v4005_v60 }
 0x2c8   : > { %v4007_v7 = vld [vmem:[%s6499_s12 + $0x38] sm:$0xf]  ;;  %v4009_v20 = vld [vmem:[%s6499_s12 + $0x3c] sm:$0xf] }
 0x2c9   : > { %4008 = vst [vmem:[%s3963_s8 + $0x70] sm:$0xf] %v4007_v7  ;;  %4010 = vst [vmem:[%s3963_s8 + $0x78] sm:$0xf] %v4009_v20 }
 0x2ca PF: > { %s13_s16 = sadd.s32 1, %s5222_s16   ;;  %s6564_s12 = smov %s5210_s13 }
 0x2cb   : > { %p10_p12 = scmp.ge.s32.totalorder %s13_s16, 4   ;;  %s6565_s13 = smov %s5284_s22 }
 0x2cc   : > { %s6566_s14 = smov %s5218_s15  ;;  %s6567_s15 = smov %s6569_s17 }
 0x2cd   :  { %12 = sbr.rel (!%p10_p12) target bundleno = 3 (0x3), region = 155 }

// kernel: discriminator_forward.7
= control target key start
LH: loop header
LB: loop body
LE: loop exit
PB: predicated region body
PF: predicated region fallthrough
CT: control target
= control target key end

     0   :  { %vm8342_vm0 = vcmask 130112   ;;  %vm8353_vm1 = vcmask 1041409   ;;  %vm8356_vm2 = vcmask 123904   ;;  %vm8369_vm3 = vcmask 1024   ;;  %s14717_s1 = inlined_call_operand.vmem [shape: bf16[4096,512], index: 1, kind: input, shape index: {}]   ;;  %s14718_s0 = inlined_call_operand.vmem [shape: bf16[32,4096], index: 0, kind: input, shape index: {}]   ;;  %s14719_s2 = inlined_call_operand.vmem [shape: f32[1,512], index: 2, kind: input, shape index: {}]   ;;  %s14720_s3 = inlined_call_operand.vmem [shape: f32[16,512], index: 3, kind: input, shape index: {}]   ;;  %s14721_s4 = inlined_call_operand.<no memory space> [shape: f32[1,1], index: 4, kind: input, shape index: {}]   ;;  %s14722_s5 = inlined_call_operand.vmem [shape: f32[2,1], index: 5, kind: output, shape index: {}]  }
   0x1   :  { %v9720_v0 = vld [vmem:[%s14717_s1 + $0x4] ss:$16 sps:$4 sm:$0xff]   ;;  %v9722_v1 = vld [vmem:[%s14717_s1 + $0xc] ss:$16 sps:$4 sm:$0xff]   ;;  %v9724_v2 = vld [vmem:[%s14717_s1] ss:$16 sps:$4 sm:$0xff]  }
   0x2   :  { %6571 = vmatprep.subr.bf16.mxu0 %v9720_v0  ;;  %v9725_v3 = vld [vmem:[%s14717_s1 + $0x8] ss:$16 sps:$4 sm:$0xff]   ;;  %7419 = vmatprep.subr.bf16.mxu1 %v9722_v1  ;;  %v9726_v4 = vld [vmem:[%s14717_s1 + $0x24] ss:$16 sps:$4 sm:$0xff]   ;;  %v9728_v5 = vld [vmem:[%s14717_s1 + $0x2c] ss:$16 sps:$4 sm:$0xff]  }
   0x3   :  { %6572 = vmatpush1.bf16.msra.mxu0 %v9724_v2  ;;  %7420 = vmatpush1.bf16.msra.mxu1 %v9725_v3  ;;  %v9730_v6 = vld [vmem:[%s14717_s1 + $0x20] ss:$16 sps:$4 sm:$0xff]   ;;  %v9731_v7 = vld [vmem:[%s14717_s1 + $0x28] ss:$16 sps:$4 sm:$0xff]   ;;  %v9732_v8 = vld [vmem:[%s14717_s1 + $0x44] ss:$16 sps:$4 sm:$0xff]  }
   0x4   :  { %6573 = vmatprep.subr.bf16.mxu0 %v9726_v4  ;;  %7421 = vmatprep.subr.bf16.mxu1 %v9728_v5  ;;  %v9734_v9 = vld [vmem:[%s14717_s1 + $0x4c] ss:$16 sps:$4 sm:$0xff]   ;;  %v9736_v10 = vld [vmem:[%s14717_s1 + $0x40] ss:$16 sps:$4 sm:$0xff]   ;;  %v9737_v11 = vld [vmem:[%s14717_s1 + $0x48] ss:$16 sps:$4 sm:$0xff]  }
   0x5   :  { %v9738_v12 = vld [vmem:[%s14717_s1 + $0x64] ss:$16 sps:$4 sm:$0xff]   ;;  %v9740_v13 = vld [vmem:[%s14717_s1 + $0x6c] ss:$16 sps:$4 sm:$0xff]   ;;  %v9742_v14 = vld [vmem:[%s14717_s1 + $0x60] ss:$16 sps:$4 sm:$0xff]  }
   0x6   :  { %v9743_v15 = vld [vmem:[%s14717_s1 + $0x68] ss:$16 sps:$4 sm:$0xff]   ;;  %v9744_v16 = vld [vmem:[%s14717_s1 + $0x84] ss:$16 sps:$4 sm:$0xff]   ;;  %v9746_v17 = vld [vmem:[%s14717_s1 + $0x8c] ss:$16 sps:$4 sm:$0xff]  }
   0x7   :  { %6574 = vmatpush1.bf16.msra.mxu0 %v9730_v6  ;;  %7422 = vmatpush1.bf16.msra.mxu1 %v9731_v7  ;;  %v9748_v18 = vld [vmem:[%s14717_s1 + $0x80] ss:$16 sps:$4 sm:$0xff]   ;;  %v9749_v19 = vld [vmem:[%s14717_s1 + $0x88] ss:$16 sps:$4 sm:$0xff]   ;;  %v9750_v20 = vld [vmem:[%s14717_s1 + $0xa4] ss:$16 sps:$4 sm:$0xff]  }
   0x8   :  { %6575 = vmatprep.subr.bf16.mxu0 %v9732_v8  ;;  %7423 = vmatprep.subr.bf16.mxu1 %v9734_v9  ;;  %v9752_v21 = vld [vmem:[%s14717_s1 + $0xac] ss:$16 sps:$4 sm:$0xff]   ;;  %v9754_v22 = vld [vmem:[%s14717_s1 + $0xa0] ss:$16 sps:$4 sm:$0xff]   ;;  %v9755_v23 = vld [vmem:[%s14717_s1 + $0xa8] ss:$16 sps:$4 sm:$0xff]  }
   0x9   :  { %v9756_v24 = vld [vmem:[%s14717_s1 + $0xc4] ss:$16 sps:$4 sm:$0xff]   ;;  %v9758_v25 = vld [vmem:[%s14717_s1 + $0xcc] ss:$16 sps:$4 sm:$0xff]   ;;  %v9760_v26 = vld [vmem:[%s14717_s1 + $0xc0] ss:$16 sps:$4 sm:$0xff]  }
   0xa   :  { %v9761_v27 = vld [vmem:[%s14717_s1 + $0xc8] ss:$16 sps:$4 sm:$0xff]   ;;  %v9762_v28 = vld [vmem:[%s14717_s1 + $0xe4] ss:$16 sps:$4 sm:$0xff]   ;;  %v9764_v29 = vld [vmem:[%s14717_s1 + $0xec] ss:$16 sps:$4 sm:$0xff]  }
   0xb   :  { %6576 = vmatpush1.bf16.msra.mxu0 %v9736_v10  ;;  %7424 = vmatpush1.bf16.msra.mxu1 %v9737_v11  ;;  %v9766_v30 = vld [vmem:[%s14717_s1 + $0xe0] ss:$16 sps:$4 sm:$0xff]   ;;  %v9767_v31 = vld [vmem:[%s14717_s1 + $0xe8] ss:$16 sps:$4 sm:$0xff]   ;;  %v9768_v32 = vld [vmem:[%s14717_s1 + $0x104] ss:$16 sps:$4 sm:$0xff]  }
   0xc   :  { %6577 = vmatprep.subr.bf16.mxu0 %v9738_v12  ;;  %7425 = vmatprep.subr.bf16.mxu1 %v9740_v13  ;;  %v9770_v33 = vld [vmem:[%s14717_s1 + $0x10c] ss:$16 sps:$4 sm:$0xff]   ;;  %v9772_v34 = vld [vmem:[%s14717_s1 + $0x100] ss:$16 sps:$4 sm:$0xff]   ;;  %v9773_v35 = vld [vmem:[%s14717_s1 + $0x108] ss:$16 sps:$4 sm:$0xff]  }
   0xd   :  { %v9774_v36 = vld [vmem:[%s14717_s1 + $0x124] ss:$16 sps:$4 sm:$0xff]   ;;  %v9776_v37 = vld [vmem:[%s14717_s1 + $0x12c] ss:$16 sps:$4 sm:$0xff]   ;;  %v9778_v38 = vld [vmem:[%s14717_s1 + $0x120] ss:$16 sps:$4 sm:$0xff]  }
   0xe   :  { %v9779_v39 = vld [vmem:[%s14717_s1 + $0x128] ss:$16 sps:$4 sm:$0xff]   ;;  %v9780_v40 = vld [vmem:[%s14717_s1 + $0x144] ss:$16 sps:$4 sm:$0xff]   ;;  %v9782_v41 = vld [vmem:[%s14717_s1 + $0x14c] ss:$16 sps:$4 sm:$0xff]  }
   0xf   :  { %6578 = vmatpush1.bf16.msra.mxu0 %v9742_v14  ;;  %7426 = vmatpush1.bf16.msra.mxu1 %v9743_v15  ;;  %v9784_v42 = vld [vmem:[%s14717_s1 + $0x140] ss:$16 sps:$4 sm:$0xff]   ;;  %v9785_v43 = vld [vmem:[%s14717_s1 + $0x148] ss:$16 sps:$4 sm:$0xff]   ;;  %v9786_v44 = vld [vmem:[%s14717_s1 + $0x164] ss:$16 sps:$4 sm:$0xff]  }
  0x10   :  { %6579 = vmatprep.subr.bf16.mxu0 %v9744_v16  ;;  %7427 = vmatprep.subr.bf16.mxu1 %v9746_v17  ;;  %v9788_v45 = vld [vmem:[%s14717_s1 + $0x16c] ss:$16 sps:$4 sm:$0xff]   ;;  %v21_v46 = vld [vmem:[%s14718_s0] sm:$0xff]  ;;  %v9791_v49 = vld [vmem:[%s14717_s1 + $0x168] ss:$16 sps:$4 sm:$0xff]  }
  0x11   :  { %v37_v47 = vld [vmem:[%s14718_s0 + $0x80] sm:$0xff]  ;;  %v9794_v52 = vld [vmem:[%s14717_s1 + $0x18c] ss:$16 sps:$4 sm:$0xff]   ;;  %v9797_v54 = vld [vmem:[%s14717_s1 + $0x188] ss:$16 sps:$4 sm:$0xff]  }
  0x12   :  { %v9790_v48 = vld [vmem:[%s14717_s1 + $0x160] ss:$16 sps:$4 sm:$0xff]   ;;  %v8376_v50 = vcombine.high %v21_v46, %v37_v47  ;;  %v9792_v51 = vld [vmem:[%s14717_s1 + $0x184] ss:$16 sps:$4 sm:$0xff]   ;;  %v9800_v56 = vld [vmem:[%s14717_s1 + $0x1ac] ss:$16 sps:$4 sm:$0xff]   ;;  %v8375_v5 = vcombine.low %v21_v46, %v37_v47 }
  0x13   :  { %6580 = vmatpush1.bf16.msra.mxu0 %v9748_v18  ;;  %7428 = vmatpush1.bf16.msra.mxu1 %v9749_v19  ;;  %v9796_v53 = vld [vmem:[%s14717_s1 + $0x180] ss:$16 sps:$4 sm:$0xff]   ;;  %v9798_v55 = vld [vmem:[%s14717_s1 + $0x1a4] ss:$16 sps:$4 sm:$0xff]   ;;  %v9803_v58 = vld [vmem:[%s14717_s1 + $0x1a8] ss:$16 sps:$4 sm:$0xff]  }
  0x14   :  { %6581 = vmatprep.subr.bf16.mxu0 %v9750_v20  ;;  %7429 = vmatprep.subr.bf16.mxu1 %v9752_v21  ;;  %v9802_v57 = vld [vmem:[%s14717_s1 + $0x1a0] ss:$16 sps:$4 sm:$0xff]   ;;  %v9804_v59 = vld [vmem:[%s14717_s1 + $0x1c4] ss:$16 sps:$4 sm:$0xff]   ;;  %v9806_v60 = vld [vmem:[%s14717_s1 + $0x1cc] ss:$16 sps:$4 sm:$0xff]  }
  0x15   :  { %6603 = vmatprep.mubr.bf16.mxu0 %v8376_v50  ;;  %7451 = vmatprep.mubr.bf16.mxu1 %v8376_v50  ;;  %v9808_v61 = vld [vmem:[%s14717_s1 + $0x1c0] ss:$16 sps:$4 sm:$0xff]   ;;  %v9809_v62 = vld [vmem:[%s14717_s1 + $0x1c8] ss:$16 sps:$4 sm:$0xff]   ;;  %v9810_v63 = vld [vmem:[%s14717_s1 + $0x1e4] ss:$16 sps:$4 sm:$0xff]  }
  0x16   :  { %v9812_v0 = vld [vmem:[%s14717_s1 + $0x1ec] ss:$16 sps:$4 sm:$0xff]   ;;  %v9814_v1 = vld [vmem:[%s14717_s1 + $0x1e0] ss:$16 sps:$4 sm:$0xff]   ;;  %v9815_v2 = vld [vmem:[%s14717_s1 + $0x1e8] ss:$16 sps:$4 sm:$0xff]  }
  0x17   :  { %6582 = vmatpush1.bf16.msra.mxu0 %v9754_v22  ;;  %7430 = vmatpush1.bf16.msra.mxu1 %v9755_v23  ;;  %v9818_v3 = vld [vmem:[%s14717_s1 + $0x204] ss:$16 sps:$4 sm:$0xff]   ;;  %v9821_v4 = vld [vmem:[%s14717_s1 + $0x20c] ss:$16 sps:$4 sm:$0xff]   ;;  %v9816_v6 = vld [vmem:[%s14717_s1 + $0x200] ss:$16 sps:$4 sm:$0xff]  }
  0x18   :  { %6583 = vmatprep.subr.bf16.mxu0 %v9756_v24  ;;  %7431 = vmatprep.subr.bf16.mxu1 %v9758_v25  ;;  %v9819_v7 = vld [vmem:[%s14717_s1 + $0x208] ss:$16 sps:$4 sm:$0xff]   ;;  %v9824_v8 = vld [vmem:[%s14717_s1 + $0x224] ss:$16 sps:$4 sm:$0xff]   ;;  %v9827_v9 = vld [vmem:[%s14717_s1 + $0x22c] ss:$16 sps:$4 sm:$0xff]  }
  0x19   :  { %v9822_v10 = vld [vmem:[%s14717_s1 + $0x220] ss:$16 sps:$4 sm:$0xff]   ;;  %v9825_v11 = vld [vmem:[%s14717_s1 + $0x228] ss:$16 sps:$4 sm:$0xff]   ;;  %v9830_v12 = vld [vmem:[%s14717_s1 + $0x244] ss:$16 sps:$4 sm:$0xff]  }
  0x1a   :  { %v9833_v13 = vld [vmem:[%s14717_s1 + $0x24c] ss:$16 sps:$4 sm:$0xff]   ;;  %v9828_v14 = vld [vmem:[%s14717_s1 + $0x240] ss:$16 sps:$4 sm:$0xff]   ;;  %v9831_v15 = vld [vmem:[%s14717_s1 + $0x248] ss:$16 sps:$4 sm:$0xff]  }
  0x1b   :  { %6584 = vmatpush1.bf16.msra.mxu0 %v9760_v26  ;;  %7432 = vmatpush1.bf16.msra.mxu1 %v9761_v27  ;;  %v9836_v16 = vld [vmem:[%s14717_s1 + $0x264] ss:$16 sps:$4 sm:$0xff]   ;;  %v9839_v17 = vld [vmem:[%s14717_s1 + $0x26c] ss:$16 sps:$4 sm:$0xff]   ;;  %v9834_v18 = vld [vmem:[%s14717_s1 + $0x260] ss:$16 sps:$4 sm:$0xff]  }
  0x1c   :  { %6585 = vmatprep.subr.bf16.mxu0 %v9762_v28  ;;  %7433 = vmatprep.subr.bf16.mxu1 %v9764_v29  ;;  %v9837_v19 = vld [vmem:[%s14717_s1 + $0x268] ss:$16 sps:$4 sm:$0xff]   ;;  %v9842_v20 = vld [vmem:[%s14717_s1 + $0x284] ss:$16 sps:$4 sm:$0xff]   ;;  %v9845_v21 = vld [vmem:[%s14717_s1 + $0x28c] ss:$16 sps:$4 sm:$0xff]  }
  0x1d   :  { %v9840_v22 = vld [vmem:[%s14717_s1 + $0x280] ss:$16 sps:$4 sm:$0xff]   ;;  %v9843_v23 = vld [vmem:[%s14717_s1 + $0x288] ss:$16 sps:$4 sm:$0xff]   ;;  %v9848_v24 = vld [vmem:[%s14717_s1 + $0x2a4] ss:$16 sps:$4 sm:$0xff]  }
  0x1e   :  { %v9851_v25 = vld [vmem:[%s14717_s1 + $0x2ac] ss:$16 sps:$4 sm:$0xff]   ;;  %v53_v26 = vld [vmem:[%s14718_s0 + $0x100] sm:$0xff]  ;;  %v9867_v46 = vld [vmem:[%s14717_s1 + $0x308] ss:$16 sps:$4 sm:$0xff]  }
  0x1f   :  { %6586 = vmatpush1.bf16.msra.mxu0 %v9766_v30  ;;  %7434 = vmatpush1.bf16.msra.mxu1 %v9767_v31  ;;  %v69_v27 = vld [vmem:[%s14718_s0 + $0x180] sm:$0xff]  ;;  %v9849_v30 = vld [vmem:[%s14717_s1 + $0x2a8] ss:$16 sps:$4 sm:$0xff]  }
  0x20   :  { %6587 = vmatprep.subr.bf16.mxu0 %v9768_v32  ;;  %7435 = vmatprep.subr.bf16.mxu1 %v9770_v33  ;;  %v8408_v28 = vcombine.high %v53_v26, %v69_v27  ;;  %v9846_v29 = vld [vmem:[%s14717_s1 + $0x2a0] ss:$16 sps:$4 sm:$0xff]   ;;  %v8407_v31 = vcombine.low %v53_v26, %v69_v27  ;;  %v9854_v32 = vld [vmem:[%s14717_s1 + $0x2c4] ss:$16 sps:$4 sm:$0xff]   ;;  %v9857_v33 = vld [vmem:[%s14717_s1 + $0x2cc] ss:$16 sps:$4 sm:$0xff]  }
  0x21   :  { %v9872_v47 = vld [vmem:[%s14717_s1 + $0x324] ss:$16 sps:$4 sm:$0xff]   ;;  %v9873_v50 = vld [vmem:[%s14717_s1 + $0x328] ss:$16 sps:$4 sm:$0xff]  }
  0x22   :  { %v11744_v27 = vld [vmem:[%s14718_s0 + $0x90] sm:$0xff] }
  0x23   :  { %6588 = vmatpush1.bf16.msra.mxu0 %v9772_v34  ;;  %7436 = vmatpush1.bf16.msra.mxu1 %v9773_v35  ;;  %v11575_v34 = vld [vmem:[%s14718_s0 + $0x8] sm:$0xff] }
  0x24   :  { %6589 = vmatprep.subr.bf16.mxu0 %v9774_v36  ;;  %7437 = vmatprep.subr.bf16.mxu1 %v9776_v37  ;;  %v11580_v35 = vld [vmem:[%s14718_s0 + $0x88] sm:$0xff]  ;;  %v9852_v36 = vld [vmem:[%s14717_s1 + $0x2c0] ss:$16 sps:$4 sm:$0xff]  }
  0x25   :  { %v9855_v37 = vld [vmem:[%s14717_s1 + $0x2c8] ss:$16 sps:$4 sm:$0xff]  }
  0x27   :  { %6590 = vmatpush1.bf16.msra.mxu0 %v9778_v38  ;;  %7438 = vmatpush1.bf16.msra.mxu1 %v9779_v39  ;;  %v8378_v38 = vcombine.high %v11575_v34, %v11580_v35  ;;  %v9860_v39 = vld [vmem:[%s14717_s1 + $0x2e4] ss:$16 sps:$4 sm:$0xff]  }
  0x28   :  { %6591 = vmatprep.subr.bf16.mxu0 %v9780_v40  ;;  %7439 = vmatprep.subr.bf16.mxu1 %v9782_v41  ;;  %v9863_v40 = vld [vmem:[%s14717_s1 + $0x2ec] ss:$16 sps:$4 sm:$0xff]   ;;  %v9858_v41 = vld [vmem:[%s14717_s1 + $0x2e0] ss:$16 sps:$4 sm:$0xff]  }
  0x2b   :  { %6592 = vmatpush1.bf16.msra.mxu0 %v9784_v42  ;;  %7440 = vmatpush1.bf16.msra.mxu1 %v9785_v43  ;;  %v9861_v42 = vld [vmem:[%s14717_s1 + $0x2e8] ss:$16 sps:$4 sm:$0xff]   ;;  %v9866_v43 = vld [vmem:[%s14717_s1 + $0x304] ss:$16 sps:$4 sm:$0xff]  }
  0x2c   :  { %6593 = vmatprep.subr.bf16.mxu0 %v9786_v44  ;;  %7441 = vmatprep.subr.bf16.mxu1 %v9788_v45  ;;  %v9869_v44 = vld [vmem:[%s14717_s1 + $0x30c] ss:$16 sps:$4 sm:$0xff]   ;;  %v9864_v45 = vld [vmem:[%s14717_s1 + $0x300] ss:$16 sps:$4 sm:$0xff]  }
  0x2f   :  { %6594 = vmatpush1.bf16.msra.mxu0 %v9790_v48  ;;  %7442 = vmatpush1.bf16.msra.mxu1 %v9791_v49  ;;  %v9875_v48 = vld [vmem:[%s14717_s1 + $0x32c] ss:$16 sps:$4 sm:$0xff]   ;;  %v9870_v49 = vld [vmem:[%s14717_s1 + $0x320] ss:$16 sps:$4 sm:$0xff]  }
  0x30   :  { %6595 = vmatprep.subr.bf16.mxu0 %v9792_v51  ;;  %7443 = vmatprep.subr.bf16.mxu1 %v9794_v52  ;;  %v9878_v51 = vld [vmem:[%s14717_s1 + $0x344] ss:$16 sps:$4 sm:$0xff]   ;;  %v9881_v52 = vld [vmem:[%s14717_s1 + $0x34c] ss:$16 sps:$4 sm:$0xff]  }
  0x33   :  { %6596 = vmatpush1.bf16.msra.mxu0 %v9796_v53  ;;  %7444 = vmatpush1.bf16.msra.mxu1 %v9797_v54  ;;  %v9876_v53 = vld [vmem:[%s14717_s1 + $0x340] ss:$16 sps:$4 sm:$0xff]   ;;  %v9879_v54 = vld [vmem:[%s14717_s1 + $0x348] ss:$16 sps:$4 sm:$0xff]  }
  0x34   :  { %6597 = vmatprep.subr.bf16.mxu0 %v9798_v55  ;;  %7445 = vmatprep.subr.bf16.mxu1 %v9800_v56  ;;  %v9884_v55 = vld [vmem:[%s14717_s1 + $0x364] ss:$16 sps:$4 sm:$0xff]   ;;  %v9887_v56 = vld [vmem:[%s14717_s1 + $0x36c] ss:$16 sps:$4 sm:$0xff]  }
  0x37   :  { %6598 = vmatpush1.bf16.msra.mxu0 %v9802_v57  ;;  %7446 = vmatpush1.bf16.msra.mxu1 %v9803_v58  ;;  %v9882_v57 = vld [vmem:[%s14717_s1 + $0x360] ss:$16 sps:$4 sm:$0xff]   ;;  %v9885_v58 = vld [vmem:[%s14717_s1 + $0x368] ss:$16 sps:$4 sm:$0xff]  }
  0x38   :  { %6599 = vmatprep.subr.bf16.mxu0 %v9804_v59  ;;  %7447 = vmatprep.subr.bf16.mxu1 %v9806_v60  ;;  %v9890_v59 = vld [vmem:[%s14717_s1 + $0x384] ss:$16 sps:$4 sm:$0xff]   ;;  %v9893_v60 = vld [vmem:[%s14717_s1 + $0x38c] ss:$16 sps:$4 sm:$0xff]  }
  0x3b   :  { %6600 = vmatpush1.bf16.msra.mxu0 %v9808_v61  ;;  %7448 = vmatpush1.bf16.msra.mxu1 %v9809_v62  ;;  %v9888_v61 = vld [vmem:[%s14717_s1 + $0x380] ss:$16 sps:$4 sm:$0xff]   ;;  %v9891_v62 = vld [vmem:[%s14717_s1 + $0x388] ss:$16 sps:$4 sm:$0xff]  }
  0x3c   :  { %6601 = vmatprep.subr.bf16.mxu0 %v9810_v63  ;;  %7449 = vmatprep.subr.bf16.mxu1 %v9812_v0  ;;  %v9896_v63 = vld [vmem:[%s14717_s1 + $0x3a4] ss:$16 sps:$4 sm:$0xff]   ;;  %v9899_v0 = vld [vmem:[%s14717_s1 + $0x3ac] ss:$16 sps:$4 sm:$0xff]  }
  0x3f   :  { %6602 = vmatpush1.bf16.msra.mxu0 %v9814_v1  ;;  %7450 = vmatpush1.bf16.msra.mxu1 %v9815_v2  ;;  %v9894_v1 = vld [vmem:[%s14717_s1 + $0x3a0] ss:$16 sps:$4 sm:$0xff]   ;;  %v9897_v2 = vld [vmem:[%s14717_s1 + $0x3a8] ss:$16 sps:$4 sm:$0xff]  }
  0x40   :  { %6624 = vmatprep.subr.bf16.mxu0 %v9818_v3  ;;  %7472 = vmatprep.subr.bf16.mxu1 %v9821_v4  ;;  %v9902_v3 = vld [vmem:[%s14717_s1 + $0x3c4] ss:$16 sps:$4 sm:$0xff]   ;;  %v9905_v4 = vld [vmem:[%s14717_s1 + $0x3cc] ss:$16 sps:$4 sm:$0xff]  }
  0x42   :  { %6604 = vmatmul.mubr.bf16.vlgmr.msra.gmra.mrb[0].mxu0 %v8375_v5  ;;  %7452 = vmatmul.mubr.bf16.vlgmr.msra.gmra.mrb[0].mxu1 %v8375_v5  ;;  %v9900_v5 = vld [vmem:[%s14717_s1 + $0x3c0] ss:$16 sps:$4 sm:$0xff]  }
  0x43   :  { %6625 = vmatpush1.bf16.msra.mxu0 %v9816_v6  ;;  %7473 = vmatpush1.bf16.msra.mxu1 %v9819_v7  ;;  %v9903_v6 = vld [vmem:[%s14717_s1 + $0x3c8] ss:$16 sps:$4 sm:$0xff]   ;;  %v9908_v7 = vld [vmem:[%s14717_s1 + $0x3e4] ss:$16 sps:$4 sm:$0xff]  }
  0x44   :  { %6626 = vmatprep.subr.bf16.mxu0 %v9824_v8  ;;  %7474 = vmatprep.subr.bf16.mxu1 %v9827_v9  ;;  %v9911_v8 = vld [vmem:[%s14717_s1 + $0x3ec] ss:$16 sps:$4 sm:$0xff]   ;;  %v9906_v9 = vld [vmem:[%s14717_s1 + $0x3e0] ss:$16 sps:$4 sm:$0xff]  }
  0x45   :  { %6613 = vmatprep.mubr.bf16.mxu0 %v8408_v28  ;;  %7461 = vmatprep.mubr.bf16.mxu1 %v8408_v28  ;;  %v9924_v28 = vld [vmem:[%s14717_s1 + $0x440] ss:$16 sps:$4 sm:$0xff]  }
  0x47   :  { %6627 = vmatpush1.bf16.msra.mxu0 %v9822_v10  ;;  %7475 = vmatpush1.bf16.msra.mxu1 %v9825_v11  ;;  %v9909_v10 = vld [vmem:[%s14717_s1 + $0x3e8] ss:$16 sps:$4 sm:$0xff]   ;;  %v9914_v11 = vld [vmem:[%s14717_s1 + $0x404] ss:$16 sps:$4 sm:$0xff]  }
  0x48   :  { %6628 = vmatprep.subr.bf16.mxu0 %v9830_v12  ;;  %7476 = vmatprep.subr.bf16.mxu1 %v9833_v13  ;;  %v9917_v12 = vld [vmem:[%s14717_s1 + $0x40c] ss:$16 sps:$4 sm:$0xff]   ;;  %v9912_v13 = vld [vmem:[%s14717_s1 + $0x400] ss:$16 sps:$4 sm:$0xff]  }
  0x4a   :  { %6614 = vmatmul.mubr.bf16.gmra.mrb[4].mxu0 %v8407_v31  ;;  %7462 = vmatmul.mubr.bf16.gmra.mrb[4].mxu1 %v8407_v31  ;;  %v9935_v31 = vld [vmem:[%s14717_s1 + $0x46c] ss:$16 sps:$4 sm:$0xff]  }
  0x4b   :  { %6629 = vmatpush1.bf16.msra.mxu0 %v9828_v14  ;;  %7477 = vmatpush1.bf16.msra.mxu1 %v9831_v15  ;;  %v9915_v14 = vld [vmem:[%s14717_s1 + $0x408] ss:$16 sps:$4 sm:$0xff]   ;;  %v8377_v15 = vcombine.low %v11575_v34, %v11580_v35  ;;  %v9938_v35 = vld [vmem:[%s14717_s1 + $0x484] ss:$16 sps:$4 sm:$0xff]  }
  0x4c   :  { %6630 = vmatprep.subr.bf16.mxu0 %v9836_v16  ;;  %7478 = vmatprep.subr.bf16.mxu1 %v9839_v17  ;;  %v54_v16 = vld [vmem:[%s14718_s0 + $0x108] sm:$0xff] }
  0x4d   :  { %6656 = vmatprep.mubr.bf16.mxu0 %v8378_v38  ;;  %7504 = vmatprep.mubr.bf16.mxu1 %v8378_v38  ;;  %v70_v17 = vld [vmem:[%s14718_s0 + $0x188] sm:$0xff] }
  0x4e   :  { %v8409_v26 = vcombine.low %v54_v16, %v70_v17  ;;  %v9933_v34 = vld [vmem:[%s14717_s1 + $0x468] ss:$16 sps:$4 sm:$0xff]  }
  0x4f   :  { %6631 = vmatpush1.bf16.msra.mxu0 %v9834_v18  ;;  %7479 = vmatpush1.bf16.msra.mxu1 %v9837_v19  ;;  %v9920_v18 = vld [vmem:[%s14717_s1 + $0x424] ss:$16 sps:$4 sm:$0xff]   ;;  %v9923_v19 = vld [vmem:[%s14717_s1 + $0x42c] ss:$16 sps:$4 sm:$0xff]   ;;  %v9939_v38 = vld [vmem:[%s14717_s1 + $0x488] ss:$16 sps:$4 sm:$0xff]  }
  0x50   :  { %6632 = vmatprep.subr.bf16.mxu0 %v9842_v20  ;;  %7480 = vmatprep.subr.bf16.mxu1 %v9845_v21  ;;  %v8410_v20 = vcombine.high %v54_v16, %v70_v17  ;;  %v9918_v21 = vld [vmem:[%s14717_s1 + $0x420] ss:$16 sps:$4 sm:$0xff]   ;;  %v10007_v16 = vld [vmem:[%s14717_s1 + $0x5ec] ss:$16 sps:$4 sm:$0xff]  }
  0x51   :  { %v10002_v17 = vld [vmem:[%s14717_s1 + $0x5e0] ss:$16 sps:$4 sm:$0xff]  }
  0x53   :  { %6633 = vmatpush1.bf16.msra.mxu0 %v9840_v22  ;;  %7481 = vmatpush1.bf16.msra.mxu1 %v9843_v23  ;;  %v9921_v22 = vld [vmem:[%s14717_s1 + $0x428] ss:$16 sps:$4 sm:$0xff]   ;;  %v9926_v23 = vld [vmem:[%s14717_s1 + $0x444] ss:$16 sps:$4 sm:$0xff]  }
  0x54   :  { %6634 = vmatprep.subr.bf16.mxu0 %v9848_v24  ;;  %7482 = vmatprep.subr.bf16.mxu1 %v9851_v25  ;;  %v9929_v24 = vld [vmem:[%s14717_s1 + $0x44c] ss:$16 sps:$4 sm:$0xff]   ;;  %v11739_v25 = vld [vmem:[%s14718_s0 + $0x10] sm:$0xff] }
  0x57   :  { %6635 = vmatpush1.bf16.msra.mxu0 %v9846_v29  ;;  %7483 = vmatpush1.bf16.msra.mxu1 %v9849_v30  ;;  %v9927_v29 = vld [vmem:[%s14717_s1 + $0x448] ss:$16 sps:$4 sm:$0xff]   ;;  %v9932_v30 = vld [vmem:[%s14717_s1 + $0x464] ss:$16 sps:$4 sm:$0xff]  }
  0x58   :  { %6636 = vmatprep.subr.bf16.mxu0 %v9854_v32  ;;  %7484 = vmatprep.subr.bf16.mxu1 %v9857_v33  ;;  %v8380_v32 = vcombine.high %v11739_v25, %v11744_v27  ;;  %v9930_v33 = vld [vmem:[%s14717_s1 + $0x460] ss:$16 sps:$4 sm:$0xff]  }
  0x5b   :  { %6637 = vmatpush1.bf16.msra.mxu0 %v9852_v36  ;;  %7485 = vmatpush1.bf16.msra.mxu1 %v9855_v37  ;;  %v9941_v36 = vld [vmem:[%s14717_s1 + $0x48c] ss:$16 sps:$4 sm:$0xff]   ;;  %v9936_v37 = vld [vmem:[%s14717_s1 + $0x480] ss:$16 sps:$4 sm:$0xff]  }
  0x5c   :  { %6638 = vmatprep.subr.bf16.mxu0 %v9860_v39  ;;  %7486 = vmatprep.subr.bf16.mxu1 %v9863_v40  ;;  %v9944_v39 = vld [vmem:[%s14717_s1 + $0x4a4] ss:$16 sps:$4 sm:$0xff]   ;;  %v9947_v40 = vld [vmem:[%s14717_s1 + $0x4ac] ss:$16 sps:$4 sm:$0xff]  }
  0x5f   :  { %6639 = vmatpush1.bf16.msra.mxu0 %v9858_v41  ;;  %7487 = vmatpush1.bf16.msra.mxu1 %v9861_v42  ;;  %v9942_v41 = vld [vmem:[%s14717_s1 + $0x4a0] ss:$16 sps:$4 sm:$0xff]   ;;  %v9945_v42 = vld [vmem:[%s14717_s1 + $0x4a8] ss:$16 sps:$4 sm:$0xff]  }
  0x60   :  { %6640 = vmatprep.subr.bf16.mxu0 %v9866_v43  ;;  %7488 = vmatprep.subr.bf16.mxu1 %v9869_v44  ;;  %v9950_v43 = vld [vmem:[%s14717_s1 + $0x4c4] ss:$16 sps:$4 sm:$0xff]   ;;  %v9953_v44 = vld [vmem:[%s14717_s1 + $0x4cc] ss:$16 sps:$4 sm:$0xff]  }
  0x63   :  { %6641 = vmatpush1.bf16.msra.mxu0 %v9864_v45  ;;  %7489 = vmatpush1.bf16.msra.mxu1 %v9867_v46  ;;  %v9948_v45 = vld [vmem:[%s14717_s1 + $0x4c0] ss:$16 sps:$4 sm:$0xff]   ;;  %v9951_v46 = vld [vmem:[%s14717_s1 + $0x4c8] ss:$16 sps:$4 sm:$0xff]  }
  0x64   :  { %6642 = vmatprep.subr.bf16.mxu0 %v9872_v47  ;;  %7490 = vmatprep.subr.bf16.mxu1 %v9875_v48  ;;  %v9956_v47 = vld [vmem:[%s14717_s1 + $0x4e4] ss:$16 sps:$4 sm:$0xff]   ;;  %v9959_v48 = vld [vmem:[%s14717_s1 + $0x4ec] ss:$16 sps:$4 sm:$0xff]  }
  0x67   :  { %6643 = vmatpush1.bf16.msra.mxu0 %v9870_v49  ;;  %7491 = vmatpush1.bf16.msra.mxu1 %v9873_v50  ;;  %v9954_v49 = vld [vmem:[%s14717_s1 + $0x4e0] ss:$16 sps:$4 sm:$0xff]   ;;  %v9957_v50 = vld [vmem:[%s14717_s1 + $0x4e8] ss:$16 sps:$4 sm:$0xff]  }
  0x68   :  { %6644 = vmatprep.subr.bf16.mxu0 %v9878_v51  ;;  %7492 = vmatprep.subr.bf16.mxu1 %v9881_v52  ;;  %v9962_v51 = vld [vmem:[%s14717_s1 + $0x504] ss:$16 sps:$4 sm:$0xff]   ;;  %v9965_v52 = vld [vmem:[%s14717_s1 + $0x50c] ss:$16 sps:$4 sm:$0xff]  }
  0x6b   :  { %6645 = vmatpush1.bf16.msra.mxu0 %v9876_v53  ;;  %7493 = vmatpush1.bf16.msra.mxu1 %v9879_v54  ;;  %v9960_v53 = vld [vmem:[%s14717_s1 + $0x500] ss:$16 sps:$4 sm:$0xff]   ;;  %v9963_v54 = vld [vmem:[%s14717_s1 + $0x508] ss:$16 sps:$4 sm:$0xff]  }
  0x6c   :  { %6646 = vmatprep.subr.bf16.mxu0 %v9884_v55  ;;  %7494 = vmatprep.subr.bf16.mxu1 %v9887_v56  ;;  %v9968_v55 = vld [vmem:[%s14717_s1 + $0x524] ss:$16 sps:$4 sm:$0xff]   ;;  %v9971_v56 = vld [vmem:[%s14717_s1 + $0x52c] ss:$16 sps:$4 sm:$0xff]  }
  0x6f   :  { %6647 = vmatpush1.bf16.msra.mxu0 %v9882_v57  ;;  %7495 = vmatpush1.bf16.msra.mxu1 %v9885_v58  ;;  %v9966_v57 = vld [vmem:[%s14717_s1 + $0x520] ss:$16 sps:$4 sm:$0xff]   ;;  %v9969_v58 = vld [vmem:[%s14717_s1 + $0x528] ss:$16 sps:$4 sm:$0xff]  }
  0x70   :  { %6648 = vmatprep.subr.bf16.mxu0 %v9890_v59  ;;  %7496 = vmatprep.subr.bf16.mxu1 %v9893_v60  ;;  %v9974_v59 = vld [vmem:[%s14717_s1 + $0x544] ss:$16 sps:$4 sm:$0xff]   ;;  %v9977_v60 = vld [vmem:[%s14717_s1 + $0x54c] ss:$16 sps:$4 sm:$0xff]  }
  0x73   :  { %6649 = vmatpush1.bf16.msra.mxu0 %v9888_v61  ;;  %7497 = vmatpush1.bf16.msra.mxu1 %v9891_v62  ;;  %v9972_v61 = vld [vmem:[%s14717_s1 + $0x540] ss:$16 sps:$4 sm:$0xff]   ;;  %v9975_v62 = vld [vmem:[%s14717_s1 + $0x548] ss:$16 sps:$4 sm:$0xff]  }
  0x74   :  { %6650 = vmatprep.subr.bf16.mxu0 %v9896_v63  ;;  %7498 = vmatprep.subr.bf16.mxu1 %v9899_v0  ;;  %v9980_v63 = vld [vmem:[%s14717_s1 + $0x564] ss:$16 sps:$4 sm:$0xff]   ;;  %v9983_v0 = vld [vmem:[%s14717_s1 + $0x56c] ss:$16 sps:$4 sm:$0xff]  }
  0x77   :  { %6651 = vmatpush1.bf16.msra.mxu0 %v9894_v1  ;;  %7499 = vmatpush1.bf16.msra.mxu1 %v9897_v2  ;;  %v9978_v1 = vld [vmem:[%s14717_s1 + $0x560] ss:$16 sps:$4 sm:$0xff]   ;;  %v9981_v2 = vld [vmem:[%s14717_s1 + $0x568] ss:$16 sps:$4 sm:$0xff]  }
  0x78   :  { %6652 = vmatprep.subr.bf16.mxu0 %v9902_v3  ;;  %7500 = vmatprep.subr.bf16.mxu1 %v9905_v4  ;;  %v9986_v3 = vld [vmem:[%s14717_s1 + $0x584] ss:$16 sps:$4 sm:$0xff]   ;;  %v9989_v4 = vld [vmem:[%s14717_s1 + $0x58c] ss:$16 sps:$4 sm:$0xff]  }
  0x7b   :  { %6653 = vmatpush1.bf16.msra.mxu0 %v9900_v5  ;;  %7501 = vmatpush1.bf16.msra.mxu1 %v9903_v6  ;;  %v9984_v5 = vld [vmem:[%s14717_s1 + $0x580] ss:$16 sps:$4 sm:$0xff]   ;;  %v9987_v6 = vld [vmem:[%s14717_s1 + $0x588] ss:$16 sps:$4 sm:$0xff]  }
  0x7c   :  { %6654 = vmatprep.subr.bf16.mxu0 %v9908_v7  ;;  %7502 = vmatprep.subr.bf16.mxu1 %v9911_v8  ;;  %v9992_v7 = vld [vmem:[%s14717_s1 + $0x5a4] ss:$16 sps:$4 sm:$0xff]   ;;  %v9995_v8 = vld [vmem:[%s14717_s1 + $0x5ac] ss:$16 sps:$4 sm:$0xff]  }
  0x7f   :  { %6655 = vmatpush1.bf16.msra.mxu0 %v9906_v9  ;;  %7503 = vmatpush1.bf16.msra.mxu1 %v9909_v10  ;;  %v9990_v9 = vld [vmem:[%s14717_s1 + $0x5a0] ss:$16 sps:$4 sm:$0xff]   ;;  %v9993_v10 = vld [vmem:[%s14717_s1 + $0x5a8] ss:$16 sps:$4 sm:$0xff]  }
  0x80   :  { %6677 = vmatprep.subr.bf16.mxu0 %v9914_v11  ;;  %7525 = vmatprep.subr.bf16.mxu1 %v9917_v12  ;;  %v9998_v11 = vld [vmem:[%s14717_s1 + $0x5c4] ss:$16 sps:$4 sm:$0xff]   ;;  %v10001_v12 = vld [vmem:[%s14717_s1 + $0x5cc] ss:$16 sps:$4 sm:$0xff]  }
  0x82   :  { %6657 = vmatmul.mubr.bf16.vlgmr.msra.gmra.mrb[0].mxu0 %v8377_v15  ;;  %7505 = vmatmul.mubr.bf16.vlgmr.msra.gmra.mrb[0].mxu1 %v8377_v15  ;;  %v10004_v15 = vld [vmem:[%s14717_s1 + $0x5e4] ss:$16 sps:$4 sm:$0xff]  }
  0x83   :  { %6678 = vmatpush1.bf16.msra.mxu0 %v9912_v13  ;;  %7526 = vmatpush1.bf16.msra.mxu1 %v9915_v14  ;;  %v9996_v13 = vld [vmem:[%s14717_s1 + $0x5c0] ss:$16 sps:$4 sm:$0xff]   ;;  %v9999_v14 = vld [vmem:[%s14717_s1 + $0x5c8] ss:$16 sps:$4 sm:$0xff]  }
  0x84   :  { %6679 = vmatprep.subr.bf16.mxu0 %v9920_v18  ;;  %7527 = vmatprep.subr.bf16.mxu1 %v9923_v19  ;;  %v10005_v18 = vld [vmem:[%s14717_s1 + $0x5e8] ss:$16 sps:$4 sm:$0xff]   ;;  %v10010_v19 = vld [vmem:[%s14717_s1 + $0x604] ss:$16 sps:$4 sm:$0xff]  }
  0x85   :  { %6666 = vmatprep.mubr.bf16.mxu0 %v8410_v20  ;;  %7514 = vmatprep.mubr.bf16.mxu1 %v8410_v20  ;;  %v10013_v20 = vld [vmem:[%s14717_s1 + $0x60c] ss:$16 sps:$4 sm:$0xff]  }
  0x87   :  { %6680 = vmatpush1.bf16.msra.mxu0 %v9918_v21  ;;  %7528 = vmatpush1.bf16.msra.mxu1 %v9921_v22  ;;  %v55_v21 = vld [vmem:[%s14718_s0 + $0x110] sm:$0xff]  ;;  %v8379_v22 = vcombine.low %v11739_v25, %v11744_v27  ;;  %v10019_v27 = vld [vmem:[%s14717_s1 + $0x62c] ss:$16 sps:$4 sm:$0xff]  }
  0x88   :  { %6681 = vmatprep.subr.bf16.mxu0 %v9926_v23  ;;  %7529 = vmatprep.subr.bf16.mxu1 %v9929_v24  ;;  %v71_v23 = vld [vmem:[%s14718_s0 + $0x190] sm:$0xff] }
  0x89   :  { %v10008_v24 = vld [vmem:[%s14717_s1 + $0x600] ss:$16 sps:$4 sm:$0xff]   ;;  %v10016_v25 = vld [vmem:[%s14717_s1 + $0x624] ss:$16 sps:$4 sm:$0xff]  }
  0x8a   :  { %6667 = vmatmul.mubr.bf16.gmra.mrb[4].mxu0 %v8409_v26  ;;  %7515 = vmatmul.mubr.bf16.gmra.mrb[4].mxu1 %v8409_v26  ;;  %v10011_v26 = vld [vmem:[%s14717_s1 + $0x608] ss:$16 sps:$4 sm:$0xff]  }
  0x8b   :  { %6682 = vmatpush1.bf16.msra.mxu0 %v9924_v28  ;;  %7530 = vmatpush1.bf16.msra.mxu1 %v9927_v29  ;;  %v8412_v28 = vcombine.high %v55_v21, %v71_v23  ;;  %v10014_v29 = vld [vmem:[%s14717_s1 + $0x620] ss:$16 sps:$4 sm:$0xff]  }
  0x8c   :  { %6683 = vmatprep.subr.bf16.mxu0 %v9932_v30  ;;  %7531 = vmatprep.subr.bf16.mxu1 %v9935_v31  ;;  %v10017_v30 = vld [vmem:[%s14717_s1 + $0x628] ss:$16 sps:$4 sm:$0xff]   ;;  %v10022_v31 = vld [vmem:[%s14717_s1 + $0x644] ss:$16 sps:$4 sm:$0xff]  }
  0x8d   :  { %6709 = vmatprep.mubr.bf16.mxu0 %v8380_v32  ;;  %7557 = vmatprep.mubr.bf16.mxu1 %v8380_v32  ;;  %v10025_v32 = vld [vmem:[%s14717_s1 + $0x64c] ss:$16 sps:$4 sm:$0xff]  }
  0x8f   :  { %6684 = vmatpush1.bf16.msra.mxu0 %v9930_v33  ;;  %7532 = vmatpush1.bf16.msra.mxu1 %v9933_v34  ;;  %v11951_v33 = vld [vmem:[%s14718_s0 + $0x18] sm:$0xff]  ;;  %v8411_v34 = vcombine.low %v55_v21, %v71_v23  ;;  %v10092_v21 = vld [vmem:[%s14717_s1 + $0x7c0] ss:$16 sps:$4 sm:$0xff]   ;;  %v10100_v23 = vld [vmem:[%s14717_s1 + $0x7e4] ss:$16 sps:$4 sm:$0xff]  }
  0x90   :  { %6685 = vmatprep.subr.bf16.mxu0 %v9938_v35  ;;  %7533 = vmatprep.subr.bf16.mxu1 %v9941_v36  ;;  %v11956_v35 = vld [vmem:[%s14718_s0 + $0x98] sm:$0xff]  ;;  %v10020_v36 = vld [vmem:[%s14717_s1 + $0x640] ss:$16 sps:$4 sm:$0xff]  }
  0x93   :  { %6686 = vmatpush1.bf16.msra.mxu0 %v9936_v37  ;;  %7534 = vmatpush1.bf16.msra.mxu1 %v9939_v38  ;;  %v10023_v37 = vld [vmem:[%s14717_s1 + $0x648] ss:$16 sps:$4 sm:$0xff]   ;;  %v10028_v38 = vld [vmem:[%s14717_s1 + $0x664] ss:$16 sps:$4 sm:$0xff]  }
  0x94   :  { %6687 = vmatprep.subr.bf16.mxu0 %v9944_v39  ;;  %7535 = vmatprep.subr.bf16.mxu1 %v9947_v40  ;;  %v10031_v39 = vld [vmem:[%s14717_s1 + $0x66c] ss:$16 sps:$4 sm:$0xff]   ;;  %v8382_v40 = vcombine.high %v11951_v33, %v11956_v35 }
  0x97   :  { %6688 = vmatpush1.bf16.msra.mxu0 %v9942_v41  ;;  %7536 = vmatpush1.bf16.msra.mxu1 %v9945_v42  ;;  %v10026_v41 = vld [vmem:[%s14717_s1 + $0x660] ss:$16 sps:$4 sm:$0xff]   ;;  %v10029_v42 = vld [vmem:[%s14717_s1 + $0x668] ss:$16 sps:$4 sm:$0xff]  }
  0x98   :  { %6689 = vmatprep.subr.bf16.mxu0 %v9950_v43  ;;  %7537 = vmatprep.subr.bf16.mxu1 %v9953_v44  ;;  %v10034_v43 = vld [vmem:[%s14717_s1 + $0x684] ss:$16 sps:$4 sm:$0xff]   ;;  %v10037_v44 = vld [vmem:[%s14717_s1 + $0x68c] ss:$16 sps:$4 sm:$0xff]  }
  0x9b   :  { %6690 = vmatpush1.bf16.msra.mxu0 %v9948_v45  ;;  %7538 = vmatpush1.bf16.msra.mxu1 %v9951_v46  ;;  %v10032_v45 = vld [vmem:[%s14717_s1 + $0x680] ss:$16 sps:$4 sm:$0xff]   ;;  %v10035_v46 = vld [vmem:[%s14717_s1 + $0x688] ss:$16 sps:$4 sm:$0xff]  }
  0x9c   :  { %6691 = vmatprep.subr.bf16.mxu0 %v9956_v47  ;;  %7539 = vmatprep.subr.bf16.mxu1 %v9959_v48  ;;  %v10040_v47 = vld [vmem:[%s14717_s1 + $0x6a4] ss:$16 sps:$4 sm:$0xff]   ;;  %v10043_v48 = vld [vmem:[%s14717_s1 + $0x6ac] ss:$16 sps:$4 sm:$0xff]  }
  0x9f   :  { %6692 = vmatpush1.bf16.msra.mxu0 %v9954_v49  ;;  %7540 = vmatpush1.bf16.msra.mxu1 %v9957_v50  ;;  %v10038_v49 = vld [vmem:[%s14717_s1 + $0x6a0] ss:$16 sps:$4 sm:$0xff]   ;;  %v10041_v50 = vld [vmem:[%s14717_s1 + $0x6a8] ss:$16 sps:$4 sm:$0xff]  }
  0xa0   :  { %6693 = vmatprep.subr.bf16.mxu0 %v9962_v51  ;;  %7541 = vmatprep.subr.bf16.mxu1 %v9965_v52  ;;  %v10046_v51 = vld [vmem:[%s14717_s1 + $0x6c4] ss:$16 sps:$4 sm:$0xff]   ;;  %v10049_v52 = vld [vmem:[%s14717_s1 + $0x6cc] ss:$16 sps:$4 sm:$0xff]  }
  0xa3   :  { %6694 = vmatpush1.bf16.msra.mxu0 %v9960_v53  ;;  %7542 = vmatpush1.bf16.msra.mxu1 %v9963_v54  ;;  %v10044_v53 = vld [vmem:[%s14717_s1 + $0x6c0] ss:$16 sps:$4 sm:$0xff]   ;;  %v10047_v54 = vld [vmem:[%s14717_s1 + $0x6c8] ss:$16 sps:$4 sm:$0xff]  }
  0xa4   :  { %6695 = vmatprep.subr.bf16.mxu0 %v9968_v55  ;;  %7543 = vmatprep.subr.bf16.mxu1 %v9971_v56  ;;  %v10052_v55 = vld [vmem:[%s14717_s1 + $0x6e4] ss:$16 sps:$4 sm:$0xff]   ;;  %v10055_v56 = vld [vmem:[%s14717_s1 + $0x6ec] ss:$16 sps:$4 sm:$0xff]  }
  0xa7   :  { %6696 = vmatpush1.bf16.msra.mxu0 %v9966_v57  ;;  %7544 = vmatpush1.bf16.msra.mxu1 %v9969_v58  ;;  %v10050_v57 = vld [vmem:[%s14717_s1 + $0x6e0] ss:$16 sps:$4 sm:$0xff]   ;;  %v10053_v58 = vld [vmem:[%s14717_s1 + $0x6e8] ss:$16 sps:$4 sm:$0xff]  }
  0xa8   :  { %6697 = vmatprep.subr.bf16.mxu0 %v9974_v59  ;;  %7545 = vmatprep.subr.bf16.mxu1 %v9977_v60  ;;  %v10058_v59 = vld [vmem:[%s14717_s1 + $0x704] ss:$16 sps:$4 sm:$0xff]   ;;  %v10061_v60 = vld [vmem:[%s14717_s1 + $0x70c] ss:$16 sps:$4 sm:$0xff]  }
  0xab   :  { %6698 = vmatpush1.bf16.msra.mxu0 %v9972_v61  ;;  %7546 = vmatpush1.bf16.msra.mxu1 %v9975_v62  ;;  %v10056_v61 = vld [vmem:[%s14717_s1 + $0x700] ss:$16 sps:$4 sm:$0xff]   ;;  %v10059_v62 = vld [vmem:[%s14717_s1 + $0x708] ss:$16 sps:$4 sm:$0xff]  }
  0xac   :  { %6699 = vmatprep.subr.bf16.mxu0 %v9980_v63  ;;  %7547 = vmatprep.subr.bf16.mxu1 %v9983_v0  ;;  %v10064_v63 = vld [vmem:[%s14717_s1 + $0x724] ss:$16 sps:$4 sm:$0xff]   ;;  %v10067_v0 = vld [vmem:[%s14717_s1 + $0x72c] ss:$16 sps:$4 sm:$0xff]  }
  0xaf   :  { %6700 = vmatpush1.bf16.msra.mxu0 %v9978_v1  ;;  %7548 = vmatpush1.bf16.msra.mxu1 %v9981_v2  ;;  %v10062_v1 = vld [vmem:[%s14717_s1 + $0x720] ss:$16 sps:$4 sm:$0xff]   ;;  %v10065_v2 = vld [vmem:[%s14717_s1 + $0x728] ss:$16 sps:$4 sm:$0xff]  }
  0xb0   :  { %6701 = vmatprep.subr.bf16.mxu0 %v9986_v3  ;;  %7549 = vmatprep.subr.bf16.mxu1 %v9989_v4  ;;  %v10070_v3 = vld [vmem:[%s14717_s1 + $0x744] ss:$16 sps:$4 sm:$0xff]   ;;  %v10073_v4 = vld [vmem:[%s14717_s1 + $0x74c] ss:$16 sps:$4 sm:$0xff]  }
  0xb3   :  { %6702 = vmatpush1.bf16.msra.mxu0 %v9984_v5  ;;  %7550 = vmatpush1.bf16.msra.mxu1 %v9987_v6  ;;  %v10068_v5 = vld [vmem:[%s14717_s1 + $0x740] ss:$16 sps:$4 sm:$0xff]   ;;  %v10071_v6 = vld [vmem:[%s14717_s1 + $0x748] ss:$16 sps:$4 sm:$0xff]  }
  0xb4   :  { %6703 = vmatprep.subr.bf16.mxu0 %v9992_v7  ;;  %7551 = vmatprep.subr.bf16.mxu1 %v9995_v8  ;;  %v10076_v7 = vld [vmem:[%s14717_s1 + $0x764] ss:$16 sps:$4 sm:$0xff]   ;;  %v10079_v8 = vld [vmem:[%s14717_s1 + $0x76c] ss:$16 sps:$4 sm:$0xff]  }
  0xb7   :  { %6704 = vmatpush1.bf16.msra.mxu0 %v9990_v9  ;;  %7552 = vmatpush1.bf16.msra.mxu1 %v9993_v10  ;;  %v10074_v9 = vld [vmem:[%s14717_s1 + $0x760] ss:$16 sps:$4 sm:$0xff]   ;;  %v10077_v10 = vld [vmem:[%s14717_s1 + $0x768] ss:$16 sps:$4 sm:$0xff]  }
  0xb8   :  { %6705 = vmatprep.subr.bf16.mxu0 %v9998_v11  ;;  %7553 = vmatprep.subr.bf16.mxu1 %v10001_v12  ;;  %v10082_v11 = vld [vmem:[%s14717_s1 + $0x784] ss:$16 sps:$4 sm:$0xff]   ;;  %v10085_v12 = vld [vmem:[%s14717_s1 + $0x78c] ss:$16 sps:$4 sm:$0xff]  }
  0xbb   :  { %6706 = vmatpush1.bf16.msra.mxu0 %v9996_v13  ;;  %7554 = vmatpush1.bf16.msra.mxu1 %v9999_v14  ;;  %v10080_v13 = vld [vmem:[%s14717_s1 + $0x780] ss:$16 sps:$4 sm:$0xff]   ;;  %v10083_v14 = vld [vmem:[%s14717_s1 + $0x788] ss:$16 sps:$4 sm:$0xff]  }
  0xbc   :  { %6707 = vmatprep.subr.bf16.mxu0 %v10004_v15  ;;  %7555 = vmatprep.subr.bf16.mxu1 %v10007_v16  ;;  %v10088_v15 = vld [vmem:[%s14717_s1 + $0x7a4] ss:$16 sps:$4 sm:$0xff]   ;;  %v10091_v16 = vld [vmem:[%s14717_s1 + $0x7ac] ss:$16 sps:$4 sm:$0xff]  }
  0xbf   :  { %6708 = vmatpush1.bf16.msra.mxu0 %v10002_v17  ;;  %7556 = vmatpush1.bf16.msra.mxu1 %v10005_v18  ;;  %v10086_v17 = vld [vmem:[%s14717_s1 + $0x7a0] ss:$16 sps:$4 sm:$0xff]   ;;  %v10089_v18 = vld [vmem:[%s14717_s1 + $0x7a8] ss:$16 sps:$4 sm:$0xff]  }
  0xc0   :  { %6730 = vmatprep.subr.bf16.mxu0 %v10010_v19  ;;  %7578 = vmatprep.subr.bf16.mxu1 %v10013_v20  ;;  %v10094_v19 = vld [vmem:[%s14717_s1 + $0x7c4] ss:$16 sps:$4 sm:$0xff]   ;;  %v10097_v20 = vld [vmem:[%s14717_s1 + $0x7cc] ss:$16 sps:$4 sm:$0xff]  }
  0xc2   :  { %6710 = vmatmul.mubr.bf16.vlgmr.msra.gmra.mrb[0].mxu0 %v8379_v22  ;;  %7558 = vmatmul.mubr.bf16.vlgmr.msra.gmra.mrb[0].mxu1 %v8379_v22  ;;  %v10095_v22 = vld [vmem:[%s14717_s1 + $0x7c8] ss:$16 sps:$4 sm:$0xff]  }
  0xc3   :  { %6731 = vmatpush1.bf16.msra.mxu0 %v10008_v24  ;;  %7579 = vmatpush1.bf16.msra.mxu1 %v10011_v26  ;;  %v10103_v24 = vld [vmem:[%s14717_s1 + $0x7ec] ss:$16 sps:$4 sm:$0xff]   ;;  %v10098_v26 = vld [vmem:[%s14717_s1 + $0x7e0] ss:$16 sps:$4 sm:$0xff]  }
  0xc4   :  { %6732 = vmatprep.subr.bf16.mxu0 %v10016_v25  ;;  %7580 = vmatprep.subr.bf16.mxu1 %v10019_v27  ;;  %v10101_v25 = vld [vmem:[%s14717_s1 + $0x7e8] ss:$16 sps:$4 sm:$0xff]   ;;  %v10106_v27 = vld [vmem:[%s14717_s1 + $0x804] ss:$16 sps:$4 sm:$0xff]  }
  0xc5   :  { %6719 = vmatprep.mubr.bf16.mxu0 %v8412_v28  ;;  %7567 = vmatprep.mubr.bf16.mxu1 %v8412_v28  ;;  %v10109_v28 = vld [vmem:[%s14717_s1 + $0x80c] ss:$16 sps:$4 sm:$0xff]  }
  0xc7   :  { %6733 = vmatpush1.bf16.msra.mxu0 %v10014_v29  ;;  %7581 = vmatpush1.bf16.msra.mxu1 %v10017_v30  ;;  %v56_v29 = vld [vmem:[%s14718_s0 + $0x118] sm:$0xff]  ;;  %v8381_v30 = vcombine.low %v11951_v33, %v11956_v35 }
  0xc8   :  { %6734 = vmatprep.subr.bf16.mxu0 %v10022_v31  ;;  %7582 = vmatprep.subr.bf16.mxu1 %v10025_v32  ;;  %v72_v31 = vld [vmem:[%s14718_s0 + $0x198] sm:$0xff]  ;;  %v10104_v32 = vld [vmem:[%s14717_s1 + $0x800] ss:$16 sps:$4 sm:$0xff]  }
  0xc9   :  { %v10115_v33 = vld [vmem:[%s14717_s1 + $0x82c] ss:$16 sps:$4 sm:$0xff]   ;;  %v8414_v35 = vcombine.high %v56_v29, %v72_v31 }
  0xca   :  { %6720 = vmatmul.mubr.bf16.gmra.mrb[4].mxu0 %v8411_v34  ;;  %7568 = vmatmul.mubr.bf16.gmra.mrb[4].mxu1 %v8411_v34  ;;  %v10107_v34 = vld [vmem:[%s14717_s1 + $0x808] ss:$16 sps:$4 sm:$0xff]  }
  0xcb   :  { %6735 = vmatpush1.bf16.msra.mxu0 %v10020_v36  ;;  %7583 = vmatpush1.bf16.msra.mxu1 %v10023_v37  ;;  %v10112_v36 = vld [vmem:[%s14717_s1 + $0x824] ss:$16 sps:$4 sm:$0xff]   ;;  %v10110_v37 = vld [vmem:[%s14717_s1 + $0x820] ss:$16 sps:$4 sm:$0xff]  }
  0xcc   :  { %6736 = vmatprep.subr.bf16.mxu0 %v10028_v38  ;;  %7584 = vmatprep.subr.bf16.mxu1 %v10031_v39  ;;  %v10113_v38 = vld [vmem:[%s14717_s1 + $0x828] ss:$16 sps:$4 sm:$0xff]   ;;  %v10118_v39 = vld [vmem:[%s14717_s1 + $0x844] ss:$16 sps:$4 sm:$0xff]  }
  0xcd   :  { %6762 = vmatprep.mubr.bf16.mxu0 %v8382_v40  ;;  %7610 = vmatprep.mubr.bf16.mxu1 %v8382_v40  ;;  %v10121_v40 = vld [vmem:[%s14717_s1 + $0x84c] ss:$16 sps:$4 sm:$0xff]  }
  0xcf   :  { %6737 = vmatpush1.bf16.msra.mxu0 %v10026_v41  ;;  %7585 = vmatpush1.bf16.msra.mxu1 %v10029_v42  ;;  %v12163_v41 = vld [vmem:[%s14718_s0 + $0x20] sm:$0xff]  ;;  %v8413_v42 = vcombine.low %v56_v29, %v72_v31 }
  0xd0   :  { %6738 = vmatprep.subr.bf16.mxu0 %v10034_v43  ;;  %7586 = vmatprep.subr.bf16.mxu1 %v10037_v44  ;;  %v12168_v43 = vld [vmem:[%s14718_s0 + $0xa0] sm:$0xff] }
  0xd1   :  { %v10116_v44 = vld [vmem:[%s14717_s1 + $0x840] ss:$16 sps:$4 sm:$0xff]   ;;  %v10196_v31 = vld [vmem:[%s14717_s1 + $0x9e4] ss:$16 sps:$4 sm:$0xff]  }
  0xd2   :  { %v10188_v29 = vld [vmem:[%s14717_s1 + $0x9c0] ss:$16 sps:$4 sm:$0xff]  }
  0xd3   :  { %6739 = vmatpush1.bf16.msra.mxu0 %v10032_v45  ;;  %7587 = vmatpush1.bf16.msra.mxu1 %v10035_v46  ;;  %v10119_v45 = vld [vmem:[%s14717_s1 + $0x848] ss:$16 sps:$4 sm:$0xff]   ;;  %v10124_v46 = vld [vmem:[%s14717_s1 + $0x864] ss:$16 sps:$4 sm:$0xff]  }
  0xd4   :  { %6740 = vmatprep.subr.bf16.mxu0 %v10040_v47  ;;  %7588 = vmatprep.subr.bf16.mxu1 %v10043_v48  ;;  %v10127_v47 = vld [vmem:[%s14717_s1 + $0x86c] ss:$16 sps:$4 sm:$0xff]   ;;  %v8384_v48 = vcombine.high %v12163_v41, %v12168_v43 }
  0xd7   :  { %6741 = vmatpush1.bf16.msra.mxu0 %v10038_v49  ;;  %7589 = vmatpush1.bf16.msra.mxu1 %v10041_v50  ;;  %v10122_v49 = vld [vmem:[%s14717_s1 + $0x860] ss:$16 sps:$4 sm:$0xff]   ;;  %v10125_v50 = vld [vmem:[%s14717_s1 + $0x868] ss:$16 sps:$4 sm:$0xff]  }
  0xd8   :  { %6742 = vmatprep.subr.bf16.mxu0 %v10046_v51  ;;  %7590 = vmatprep.subr.bf16.mxu1 %v10049_v52  ;;  %v10130_v51 = vld [vmem:[%s14717_s1 + $0x884] ss:$16 sps:$4 sm:$0xff]   ;;  %v10133_v52 = vld [vmem:[%s14717_s1 + $0x88c] ss:$16 sps:$4 sm:$0xff]  }
  0xdb   :  { %6743 = vmatpush1.bf16.msra.mxu0 %v10044_v53  ;;  %7591 = vmatpush1.bf16.msra.mxu1 %v10047_v54  ;;  %v10128_v53 = vld [vmem:[%s14717_s1 + $0x880] ss:$16 sps:$4 sm:$0xff]   ;;  %v10131_v54 = vld [vmem:[%s14717_s1 + $0x888] ss:$16 sps:$4 sm:$0xff]  }
  0xdc   :  { %6744 = vmatprep.subr.bf16.mxu0 %v10052_v55  ;;  %7592 = vmatprep.subr.bf16.mxu1 %v10055_v56  ;;  %v10136_v55 = vld [vmem:[%s14717_s1 + $0x8a4] ss:$16 sps:$4 sm:$0xff]   ;;  %v10139_v56 = vld [vmem:[%s14717_s1 + $0x8ac] ss:$16 sps:$4 sm:$0xff]  }
  0xdf   :  { %6745 = vmatpush1.bf16.msra.mxu0 %v10050_v57  ;;  %7593 = vmatpush1.bf16.msra.mxu1 %v10053_v58  ;;  %v10134_v57 = vld [vmem:[%s14717_s1 + $0x8a0] ss:$16 sps:$4 sm:$0xff]   ;;  %v10137_v58 = vld [vmem:[%s14717_s1 + $0x8a8] ss:$16 sps:$4 sm:$0xff]  }
  0xe0   :  { %6746 = vmatprep.subr.bf16.mxu0 %v10058_v59  ;;  %7594 = vmatprep.subr.bf16.mxu1 %v10061_v60  ;;  %v10142_v59 = vld [vmem:[%s14717_s1 + $0x8c4] ss:$16 sps:$4 sm:$0xff]   ;;  %v10145_v60 = vld [vmem:[%s14717_s1 + $0x8cc] ss:$16 sps:$4 sm:$0xff]  }
  0xe3   :  { %6747 = vmatpush1.bf16.msra.mxu0 %v10056_v61  ;;  %7595 = vmatpush1.bf16.msra.mxu1 %v10059_v62  ;;  %v10140_v61 = vld [vmem:[%s14717_s1 + $0x8c0] ss:$16 sps:$4 sm:$0xff]   ;;  %v10143_v62 = vld [vmem:[%s14717_s1 + $0x8c8] ss:$16 sps:$4 sm:$0xff]  }
  0xe4   :  { %6748 = vmatprep.subr.bf16.mxu0 %v10064_v63  ;;  %7596 = vmatprep.subr.bf16.mxu1 %v10067_v0  ;;  %v10148_v63 = vld [vmem:[%s14717_s1 + $0x8e4] ss:$16 sps:$4 sm:$0xff]   ;;  %v10151_v0 = vld [vmem:[%s14717_s1 + $0x8ec] ss:$16 sps:$4 sm:$0xff]  }
  0xe7   :  { %6749 = vmatpush1.bf16.msra.mxu0 %v10062_v1  ;;  %7597 = vmatpush1.bf16.msra.mxu1 %v10065_v2  ;;  %v10146_v1 = vld [vmem:[%s14717_s1 + $0x8e0] ss:$16 sps:$4 sm:$0xff]   ;;  %v10149_v2 = vld [vmem:[%s14717_s1 + $0x8e8] ss:$16 sps:$4 sm:$0xff]  }
  0xe8   :  { %6750 = vmatprep.subr.bf16.mxu0 %v10070_v3  ;;  %7598 = vmatprep.subr.bf16.mxu1 %v10073_v4  ;;  %v10154_v3 = vld [vmem:[%s14717_s1 + $0x904] ss:$16 sps:$4 sm:$0xff]   ;;  %v10157_v4 = vld [vmem:[%s14717_s1 + $0x90c] ss:$16 sps:$4 sm:$0xff]  }
  0xeb   :  { %6751 = vmatpush1.bf16.msra.mxu0 %v10068_v5  ;;  %7599 = vmatpush1.bf16.msra.mxu1 %v10071_v6  ;;  %v10152_v5 = vld [vmem:[%s14717_s1 + $0x900] ss:$16 sps:$4 sm:$0xff]   ;;  %v10155_v6 = vld [vmem:[%s14717_s1 + $0x908] ss:$16 sps:$4 sm:$0xff]  }
  0xec   :  { %6752 = vmatprep.subr.bf16.mxu0 %v10076_v7  ;;  %7600 = vmatprep.subr.bf16.mxu1 %v10079_v8  ;;  %v10160_v7 = vld [vmem:[%s14717_s1 + $0x924] ss:$16 sps:$4 sm:$0xff]   ;;  %v10163_v8 = vld [vmem:[%s14717_s1 + $0x92c] ss:$16 sps:$4 sm:$0xff]  }
  0xef   :  { %6753 = vmatpush1.bf16.msra.mxu0 %v10074_v9  ;;  %7601 = vmatpush1.bf16.msra.mxu1 %v10077_v10  ;;  %v10158_v9 = vld [vmem:[%s14717_s1 + $0x920] ss:$16 sps:$4 sm:$0xff]   ;;  %v10161_v10 = vld [vmem:[%s14717_s1 + $0x928] ss:$16 sps:$4 sm:$0xff]  }
  0xf0   :  { %6754 = vmatprep.subr.bf16.mxu0 %v10082_v11  ;;  %7602 = vmatprep.subr.bf16.mxu1 %v10085_v12  ;;  %v10166_v11 = vld [vmem:[%s14717_s1 + $0x944] ss:$16 sps:$4 sm:$0xff]   ;;  %v10169_v12 = vld [vmem:[%s14717_s1 + $0x94c] ss:$16 sps:$4 sm:$0xff]  }
  0xf3   :  { %6755 = vmatpush1.bf16.msra.mxu0 %v10080_v13  ;;  %7603 = vmatpush1.bf16.msra.mxu1 %v10083_v14  ;;  %v10164_v13 = vld [vmem:[%s14717_s1 + $0x940] ss:$16 sps:$4 sm:$0xff]   ;;  %v10167_v14 = vld [vmem:[%s14717_s1 + $0x948] ss:$16 sps:$4 sm:$0xff]  }
  0xf4   :  { %6756 = vmatprep.subr.bf16.mxu0 %v10088_v15  ;;  %7604 = vmatprep.subr.bf16.mxu1 %v10091_v16  ;;  %v10172_v15 = vld [vmem:[%s14717_s1 + $0x964] ss:$16 sps:$4 sm:$0xff]   ;;  %v10175_v16 = vld [vmem:[%s14717_s1 + $0x96c] ss:$16 sps:$4 sm:$0xff]  }
  0xf7   :  { %6757 = vmatpush1.bf16.msra.mxu0 %v10086_v17  ;;  %7605 = vmatpush1.bf16.msra.mxu1 %v10089_v18  ;;  %v10170_v17 = vld [vmem:[%s14717_s1 + $0x960] ss:$16 sps:$4 sm:$0xff]   ;;  %v10173_v18 = vld [vmem:[%s14717_s1 + $0x968] ss:$16 sps:$4 sm:$0xff]  }
  0xf8   :  { %6758 = vmatprep.subr.bf16.mxu0 %v10094_v19  ;;  %7606 = vmatprep.subr.bf16.mxu1 %v10097_v20  ;;  %v10178_v19 = vld [vmem:[%s14717_s1 + $0x984] ss:$16 sps:$4 sm:$0xff]   ;;  %v10181_v20 = vld [vmem:[%s14717_s1 + $0x98c] ss:$16 sps:$4 sm:$0xff]  }
  0xfb   :  { %6759 = vmatpush1.bf16.msra.mxu0 %v10092_v21  ;;  %7607 = vmatpush1.bf16.msra.mxu1 %v10095_v22  ;;  %v10176_v21 = vld [vmem:[%s14717_s1 + $0x980] ss:$16 sps:$4 sm:$0xff]   ;;  %v10179_v22 = vld [vmem:[%s14717_s1 + $0x988] ss:$16 sps:$4 sm:$0xff]  }
  0xfc   :  { %6760 = vmatprep.subr.bf16.mxu0 %v10100_v23  ;;  %7608 = vmatprep.subr.bf16.mxu1 %v10103_v24  ;;  %v10184_v23 = vld [vmem:[%s14717_s1 + $0x9a4] ss:$16 sps:$4 sm:$0xff]   ;;  %v10187_v24 = vld [vmem:[%s14717_s1 + $0x9ac] ss:$16 sps:$4 sm:$0xff]  }
  0xff   :  { %6761 = vmatpush1.bf16.msra.mxu0 %v10098_v26  ;;  %7609 = vmatpush1.bf16.msra.mxu1 %v10101_v25  ;;  %v10182_v26 = vld [vmem:[%s14717_s1 + $0x9a0] ss:$16 sps:$4 sm:$0xff]   ;;  %v10185_v25 = vld [vmem:[%s14717_s1 + $0x9a8] ss:$16 sps:$4 sm:$0xff]  }
 0x100   :  { %6783 = vmatprep.subr.bf16.mxu0 %v10106_v27  ;;  %7631 = vmatprep.subr.bf16.mxu1 %v10109_v28  ;;  %v10190_v27 = vld [vmem:[%s14717_s1 + $0x9c4] ss:$16 sps:$4 sm:$0xff]   ;;  %v10193_v28 = vld [vmem:[%s14717_s1 + $0x9cc] ss:$16 sps:$4 sm:$0xff]  }
 0x102   :  { %6763 = vmatmul.mubr.bf16.vlgmr.msra.gmra.mrb[0].mxu0 %v8381_v30  ;;  %7611 = vmatmul.mubr.bf16.vlgmr.msra.gmra.mrb[0].mxu1 %v8381_v30  ;;  %v10191_v30 = vld [vmem:[%s14717_s1 + $0x9c8] ss:$16 sps:$4 sm:$0xff]  }
 0x103   :  { %6784 = vmatpush1.bf16.msra.mxu0 %v10104_v32  ;;  %7632 = vmatpush1.bf16.msra.mxu1 %v10107_v34  ;;  %v10199_v32 = vld [vmem:[%s14717_s1 + $0x9ec] ss:$16 sps:$4 sm:$0xff]   ;;  %v10194_v34 = vld [vmem:[%s14717_s1 + $0x9e0] ss:$16 sps:$4 sm:$0xff]  }
 0x104   :  { %6785 = vmatprep.subr.bf16.mxu0 %v10112_v36  ;;  %7633 = vmatprep.subr.bf16.mxu1 %v10115_v33  ;;  %v10197_v36 = vld [vmem:[%s14717_s1 + $0x9e8] ss:$16 sps:$4 sm:$0xff]   ;;  %v10202_v33 = vld [vmem:[%s14717_s1 + $0xa04] ss:$16 sps:$4 sm:$0xff]  }
 0x105   :  { %6772 = vmatprep.mubr.bf16.mxu0 %v8414_v35  ;;  %7620 = vmatprep.mubr.bf16.mxu1 %v8414_v35  ;;  %v10205_v35 = vld [vmem:[%s14717_s1 + $0xa0c] ss:$16 sps:$4 sm:$0xff]  }
 0x107   :  { %6786 = vmatpush1.bf16.msra.mxu0 %v10110_v37  ;;  %7634 = vmatpush1.bf16.msra.mxu1 %v10113_v38  ;;  %v57_v37 = vld [vmem:[%s14718_s0 + $0x120] sm:$0xff] }
 0x108   :  { %6787 = vmatprep.subr.bf16.mxu0 %v10118_v39  ;;  %7635 = vmatprep.subr.bf16.mxu1 %v10121_v40  ;;  %v73_v38 = vld [vmem:[%s14718_s0 + $0x1a0] sm:$0xff]  ;;  %v8383_v39 = vcombine.low %v12163_v41, %v12168_v43  ;;  %v10211_v41 = vld [vmem:[%s14717_s1 + $0xa2c] ss:$16 sps:$4 sm:$0xff]  }
 0x109   :  { %v10200_v40 = vld [vmem:[%s14717_s1 + $0xa00] ss:$16 sps:$4 sm:$0xff]  }
 0x10a   :  { %6773 = vmatmul.mubr.bf16.gmra.mrb[4].mxu0 %v8413_v42  ;;  %7621 = vmatmul.mubr.bf16.gmra.mrb[4].mxu1 %v8413_v42  ;;  %v10203_v42 = vld [vmem:[%s14717_s1 + $0xa08] ss:$16 sps:$4 sm:$0xff]   ;;  %v10206_v43 = vld [vmem:[%s14717_s1 + $0xa20] ss:$16 sps:$4 sm:$0xff]  }
 0x10b   :  { %6788 = vmatpush1.bf16.msra.mxu0 %v10116_v44  ;;  %7636 = vmatpush1.bf16.msra.mxu1 %v10119_v45  ;;  %v10208_v44 = vld [vmem:[%s14717_s1 + $0xa24] ss:$16 sps:$4 sm:$0xff]   ;;  %v10209_v45 = vld [vmem:[%s14717_s1 + $0xa28] ss:$16 sps:$4 sm:$0xff]  }
 0x10c   :  { %6789 = vmatprep.subr.bf16.mxu0 %v10124_v46  ;;  %7637 = vmatprep.subr.bf16.mxu1 %v10127_v47  ;;  %v8416_v46 = vcombine.high %v57_v37, %v73_v38  ;;  %v10214_v47 = vld [vmem:[%s14717_s1 + $0xa44] ss:$16 sps:$4 sm:$0xff]  }
 0x10d   :  { %6815 = vmatprep.mubr.bf16.mxu0 %v8384_v48  ;;  %7663 = vmatprep.mubr.bf16.mxu1 %v8384_v48  ;;  %v10217_v48 = vld [vmem:[%s14717_s1 + $0xa4c] ss:$16 sps:$4 sm:$0xff]  }
 0x10f   :  { %6790 = vmatpush1.bf16.msra.mxu0 %v10122_v49  ;;  %7638 = vmatpush1.bf16.msra.mxu1 %v10125_v50  ;;  %v12375_v49 = vld [vmem:[%s14718_s0 + $0x28] sm:$0xff] }
 0x110   :  { %6791 = vmatprep.subr.bf16.mxu0 %v10130_v51  ;;  %7639 = vmatprep.subr.bf16.mxu1 %v10133_v52  ;;  %v12380_v50 = vld [vmem:[%s14718_s0 + $0xa8] sm:$0xff]  ;;  %v8415_v51 = vcombine.low %v57_v37, %v73_v38  ;;  %v10212_v52 = vld [vmem:[%s14717_s1 + $0xa40] ss:$16 sps:$4 sm:$0xff]  }
 0x111   :  { %v10284_v37 = vld [vmem:[%s14717_s1 + $0xbc0] ss:$16 sps:$4 sm:$0xff]   ;;  %v10287_v38 = vld [vmem:[%s14717_s1 + $0xbc8] ss:$16 sps:$4 sm:$0xff]  }
 0x113   :  { %6792 = vmatpush1.bf16.msra.mxu0 %v10128_v53  ;;  %7640 = vmatpush1.bf16.msra.mxu1 %v10131_v54  ;;  %v10215_v53 = vld [vmem:[%s14717_s1 + $0xa48] ss:$16 sps:$4 sm:$0xff]   ;;  %v10220_v54 = vld [vmem:[%s14717_s1 + $0xa64] ss:$16 sps:$4 sm:$0xff]  }
 0x114   :  { %6793 = vmatprep.subr.bf16.mxu0 %v10136_v55  ;;  %7641 = vmatprep.subr.bf16.mxu1 %v10139_v56  ;;  %v10223_v55 = vld [vmem:[%s14717_s1 + $0xa6c] ss:$16 sps:$4 sm:$0xff]   ;;  %v8386_v56 = vcombine.high %v12375_v49, %v12380_v50 }
 0x117   :  { %6794 = vmatpush1.bf16.msra.mxu0 %v10134_v57  ;;  %7642 = vmatpush1.bf16.msra.mxu1 %v10137_v58  ;;  %v10218_v57 = vld [vmem:[%s14717_s1 + $0xa60] ss:$16 sps:$4 sm:$0xff]   ;;  %v10221_v58 = vld [vmem:[%s14717_s1 + $0xa68] ss:$16 sps:$4 sm:$0xff]  }
 0x118   :  { %6795 = vmatprep.subr.bf16.mxu0 %v10142_v59  ;;  %7643 = vmatprep.subr.bf16.mxu1 %v10145_v60  ;;  %v10226_v59 = vld [vmem:[%s14717_s1 + $0xa84] ss:$16 sps:$4 sm:$0xff]   ;;  %v10229_v60 = vld [vmem:[%s14717_s1 + $0xa8c] ss:$16 sps:$4 sm:$0xff]  }
 0x11b   :  { %6796 = vmatpush1.bf16.msra.mxu0 %v10140_v61  ;;  %7644 = vmatpush1.bf16.msra.mxu1 %v10143_v62  ;;  %v10224_v61 = vld [vmem:[%s14717_s1 + $0xa80] ss:$16 sps:$4 sm:$0xff]   ;;  %v10227_v62 = vld [vmem:[%s14717_s1 + $0xa88] ss:$16 sps:$4 sm:$0xff]  }
 0x11c   :  { %6797 = vmatprep.subr.bf16.mxu0 %v10148_v63  ;;  %7645 = vmatprep.subr.bf16.mxu1 %v10151_v0  ;;  %v10232_v63 = vld [vmem:[%s14717_s1 + $0xaa4] ss:$16 sps:$4 sm:$0xff]   ;;  %v10235_v0 = vld [vmem:[%s14717_s1 + $0xaac] ss:$16 sps:$4 sm:$0xff]  }
 0x11f   :  { %6798 = vmatpush1.bf16.msra.mxu0 %v10146_v1  ;;  %7646 = vmatpush1.bf16.msra.mxu1 %v10149_v2  ;;  %v10230_v1 = vld [vmem:[%s14717_s1 + $0xaa0] ss:$16 sps:$4 sm:$0xff]   ;;  %v10233_v2 = vld [vmem:[%s14717_s1 + $0xaa8] ss:$16 sps:$4 sm:$0xff]  }
 0x120   :  { %6799 = vmatprep.subr.bf16.mxu0 %v10154_v3  ;;  %7647 = vmatprep.subr.bf16.mxu1 %v10157_v4  ;;  %v10238_v3 = vld [vmem:[%s14717_s1 + $0xac4] ss:$16 sps:$4 sm:$0xff]   ;;  %v10241_v4 = vld [vmem:[%s14717_s1 + $0xacc] ss:$16 sps:$4 sm:$0xff]  }
 0x123   :  { %6800 = vmatpush1.bf16.msra.mxu0 %v10152_v5  ;;  %7648 = vmatpush1.bf16.msra.mxu1 %v10155_v6  ;;  %v10236_v5 = vld [vmem:[%s14717_s1 + $0xac0] ss:$16 sps:$4 sm:$0xff]   ;;  %v10239_v6 = vld [vmem:[%s14717_s1 + $0xac8] ss:$16 sps:$4 sm:$0xff]  }
 0x124   :  { %6801 = vmatprep.subr.bf16.mxu0 %v10160_v7  ;;  %7649 = vmatprep.subr.bf16.mxu1 %v10163_v8  ;;  %v10244_v7 = vld [vmem:[%s14717_s1 + $0xae4] ss:$16 sps:$4 sm:$0xff]   ;;  %v10247_v8 = vld [vmem:[%s14717_s1 + $0xaec] ss:$16 sps:$4 sm:$0xff]  }
 0x127   :  { %6802 = vmatpush1.bf16.msra.mxu0 %v10158_v9  ;;  %7650 = vmatpush1.bf16.msra.mxu1 %v10161_v10  ;;  %v10242_v9 = vld [vmem:[%s14717_s1 + $0xae0] ss:$16 sps:$4 sm:$0xff]   ;;  %v10245_v10 = vld [vmem:[%s14717_s1 + $0xae8] ss:$16 sps:$4 sm:$0xff]  }
 0x128   :  { %6803 = vmatprep.subr.bf16.mxu0 %v10166_v11  ;;  %7651 = vmatprep.subr.bf16.mxu1 %v10169_v12  ;;  %v10250_v11 = vld [vmem:[%s14717_s1 + $0xb04] ss:$16 sps:$4 sm:$0xff]   ;;  %v10253_v12 = vld [vmem:[%s14717_s1 + $0xb0c] ss:$16 sps:$4 sm:$0xff]  }
 0x12b   :  { %6804 = vmatpush1.bf16.msra.mxu0 %v10164_v13  ;;  %7652 = vmatpush1.bf16.msra.mxu1 %v10167_v14  ;;  %v10248_v13 = vld [vmem:[%s14717_s1 + $0xb00] ss:$16 sps:$4 sm:$0xff]   ;;  %v10251_v14 = vld [vmem:[%s14717_s1 + $0xb08] ss:$16 sps:$4 sm:$0xff]  }
 0x12c   :  { %6805 = vmatprep.subr.bf16.mxu0 %v10172_v15  ;;  %7653 = vmatprep.subr.bf16.mxu1 %v10175_v16  ;;  %v10256_v15 = vld [vmem:[%s14717_s1 + $0xb24] ss:$16 sps:$4 sm:$0xff]   ;;  %v10259_v16 = vld [vmem:[%s14717_s1 + $0xb2c] ss:$16 sps:$4 sm:$0xff]  }
 0x12f   :  { %6806 = vmatpush1.bf16.msra.mxu0 %v10170_v17  ;;  %7654 = vmatpush1.bf16.msra.mxu1 %v10173_v18  ;;  %v10254_v17 = vld [vmem:[%s14717_s1 + $0xb20] ss:$16 sps:$4 sm:$0xff]   ;;  %v10257_v18 = vld [vmem:[%s14717_s1 + $0xb28] ss:$16 sps:$4 sm:$0xff]  }
 0x130   :  { %6807 = vmatprep.subr.bf16.mxu0 %v10178_v19  ;;  %7655 = vmatprep.subr.bf16.mxu1 %v10181_v20  ;;  %v10262_v19 = vld [vmem:[%s14717_s1 + $0xb44] ss:$16 sps:$4 sm:$0xff]   ;;  %v10265_v20 = vld [vmem:[%s14717_s1 + $0xb4c] ss:$16 sps:$4 sm:$0xff]  }
 0x133   :  { %6808 = vmatpush1.bf16.msra.mxu0 %v10176_v21  ;;  %7656 = vmatpush1.bf16.msra.mxu1 %v10179_v22  ;;  %v10260_v21 = vld [vmem:[%s14717_s1 + $0xb40] ss:$16 sps:$4 sm:$0xff]   ;;  %v10263_v22 = vld [vmem:[%s14717_s1 + $0xb48] ss:$16 sps:$4 sm:$0xff]  }
 0x134   :  { %6809 = vmatprep.subr.bf16.mxu0 %v10184_v23  ;;  %7657 = vmatprep.subr.bf16.mxu1 %v10187_v24  ;;  %v10268_v23 = vld [vmem:[%s14717_s1 + $0xb64] ss:$16 sps:$4 sm:$0xff]   ;;  %v10271_v24 = vld [vmem:[%s14717_s1 + $0xb6c] ss:$16 sps:$4 sm:$0xff]  }
 0x137   :  { %6810 = vmatpush1.bf16.msra.mxu0 %v10182_v26  ;;  %7658 = vmatpush1.bf16.msra.mxu1 %v10185_v25  ;;  %v10266_v26 = vld [vmem:[%s14717_s1 + $0xb60] ss:$16 sps:$4 sm:$0xff]   ;;  %v10269_v25 = vld [vmem:[%s14717_s1 + $0xb68] ss:$16 sps:$4 sm:$0xff]  }
 0x138   :  { %6811 = vmatprep.subr.bf16.mxu0 %v10190_v27  ;;  %7659 = vmatprep.subr.bf16.mxu1 %v10193_v28  ;;  %v10274_v27 = vld [vmem:[%s14717_s1 + $0xb84] ss:$16 sps:$4 sm:$0xff]   ;;  %v10277_v28 = vld [vmem:[%s14717_s1 + $0xb8c] ss:$16 sps:$4 sm:$0xff]  }
 0x13b   :  { %6812 = vmatpush1.bf16.msra.mxu0 %v10188_v29  ;;  %7660 = vmatpush1.bf16.msra.mxu1 %v10191_v30  ;;  %v10272_v29 = vld [vmem:[%s14717_s1 + $0xb80] ss:$16 sps:$4 sm:$0xff]   ;;  %v10275_v30 = vld [vmem:[%s14717_s1 + $0xb88] ss:$16 sps:$4 sm:$0xff]  }
 0x13c   :  { %6813 = vmatprep.subr.bf16.mxu0 %v10196_v31  ;;  %7661 = vmatprep.subr.bf16.mxu1 %v10199_v32  ;;  %v10280_v31 = vld [vmem:[%s14717_s1 + $0xba4] ss:$16 sps:$4 sm:$0xff]   ;;  %v10283_v32 = vld [vmem:[%s14717_s1 + $0xbac] ss:$16 sps:$4 sm:$0xff]  }
 0x13f   :  { %6814 = vmatpush1.bf16.msra.mxu0 %v10194_v34  ;;  %7662 = vmatpush1.bf16.msra.mxu1 %v10197_v36  ;;  %v10278_v34 = vld [vmem:[%s14717_s1 + $0xba0] ss:$16 sps:$4 sm:$0xff]   ;;  %v10281_v36 = vld [vmem:[%s14717_s1 + $0xba8] ss:$16 sps:$4 sm:$0xff]  }
 0x140   :  { %6836 = vmatprep.subr.bf16.mxu0 %v10202_v33  ;;  %7684 = vmatprep.subr.bf16.mxu1 %v10205_v35  ;;  %v10286_v33 = vld [vmem:[%s14717_s1 + $0xbc4] ss:$16 sps:$4 sm:$0xff]   ;;  %v10289_v35 = vld [vmem:[%s14717_s1 + $0xbcc] ss:$16 sps:$4 sm:$0xff]  }
 0x142   :  { %6816 = vmatmul.mubr.bf16.vlgmr.msra.gmra.mrb[0].mxu0 %v8383_v39  ;;  %7664 = vmatmul.mubr.bf16.vlgmr.msra.gmra.mrb[0].mxu1 %v8383_v39  ;;  %v10292_v39 = vld [vmem:[%s14717_s1 + $0xbe4] ss:$16 sps:$4 sm:$0xff]  }
 0x143   :  { %6837 = vmatpush1.bf16.msra.mxu0 %v10200_v40  ;;  %7685 = vmatpush1.bf16.msra.mxu1 %v10203_v42  ;;  %v10295_v40 = vld [vmem:[%s14717_s1 + $0xbec] ss:$16 sps:$4 sm:$0xff]   ;;  %v10290_v42 = vld [vmem:[%s14717_s1 + $0xbe0] ss:$16 sps:$4 sm:$0xff]  }
 0x144   :  { %6838 = vmatprep.subr.bf16.mxu0 %v10208_v44  ;;  %7686 = vmatprep.subr.bf16.mxu1 %v10211_v41  ;;  %v10293_v44 = vld [vmem:[%s14717_s1 + $0xbe8] ss:$16 sps:$4 sm:$0xff]   ;;  %v10298_v41 = vld [vmem:[%s14717_s1 + $0xc04] ss:$16 sps:$4 sm:$0xff]  }
 0x145   :  { %6825 = vmatprep.mubr.bf16.mxu0 %v8416_v46  ;;  %7673 = vmatprep.mubr.bf16.mxu1 %v8416_v46  ;;  %v74_v46 = vld [vmem:[%s14718_s0 + $0x1a8] sm:$0xff] }
 0x147   :  { %6839 = vmatpush1.bf16.msra.mxu0 %v10206_v43  ;;  %7687 = vmatpush1.bf16.msra.mxu1 %v10209_v45  ;;  %v10301_v43 = vld [vmem:[%s14717_s1 + $0xc0c] ss:$16 sps:$4 sm:$0xff]  }
 0x148   :  { %6840 = vmatprep.subr.bf16.mxu0 %v10214_v47  ;;  %7688 = vmatprep.subr.bf16.mxu1 %v10217_v48  ;;  %v58_v45 = vld [vmem:[%s14718_s0 + $0x128] sm:$0xff]  ;;  %v8385_v47 = vcombine.low %v12375_v49, %v12380_v50  ;;  %v10296_v48 = vld [vmem:[%s14717_s1 + $0xc00] ss:$16 sps:$4 sm:$0xff]  }
 0x149   :  { %v10307_v49 = vld [vmem:[%s14717_s1 + $0xc2c] ss:$16 sps:$4 sm:$0xff]   ;;  %v10302_v50 = vld [vmem:[%s14717_s1 + $0xc20] ss:$16 sps:$4 sm:$0xff]  }
 0x14a   :  { %6826 = vmatmul.mubr.bf16.gmra.mrb[4].mxu0 %v8415_v51  ;;  %7674 = vmatmul.mubr.bf16.gmra.mrb[4].mxu1 %v8415_v51  ;;  %v10299_v51 = vld [vmem:[%s14717_s1 + $0xc08] ss:$16 sps:$4 sm:$0xff]  }
 0x14b   :  { %6841 = vmatpush1.bf16.msra.mxu0 %v10212_v52  ;;  %7689 = vmatpush1.bf16.msra.mxu1 %v10215_v53  ;;  %v10304_v52 = vld [vmem:[%s14717_s1 + $0xc24] ss:$16 sps:$4 sm:$0xff]   ;;  %v10305_v53 = vld [vmem:[%s14717_s1 + $0xc28] ss:$16 sps:$4 sm:$0xff]  }
 0x14c   :  { %6842 = vmatprep.subr.bf16.mxu0 %v10220_v54  ;;  %7690 = vmatprep.subr.bf16.mxu1 %v10223_v55  ;;  %v8418_v54 = vcombine.high %v58_v45, %v74_v46  ;;  %v10310_v55 = vld [vmem:[%s14717_s1 + $0xc44] ss:$16 sps:$4 sm:$0xff]  }
 0x14d   :  { %6868 = vmatprep.mubr.bf16.mxu0 %v8386_v56  ;;  %7716 = vmatprep.mubr.bf16.mxu1 %v8386_v56  ;;  %v10313_v56 = vld [vmem:[%s14717_s1 + $0xc4c] ss:$16 sps:$4 sm:$0xff]  }
 0x14f   :  { %6843 = vmatpush1.bf16.msra.mxu0 %v10218_v57  ;;  %7691 = vmatpush1.bf16.msra.mxu1 %v10221_v58  ;;  %v12587_v57 = vld [vmem:[%s14718_s0 + $0x30] sm:$0xff] }
 0x150   :  { %6844 = vmatprep.subr.bf16.mxu0 %v10226_v59  ;;  %7692 = vmatprep.subr.bf16.mxu1 %v10229_v60  ;;  %v12592_v58 = vld [vmem:[%s14718_s0 + $0xb0] sm:$0xff]  ;;  %v8417_v59 = vcombine.low %v58_v45, %v74_v46  ;;  %v10383_v46 = vld [vmem:[%s14717_s1 + $0xdc8] ss:$16 sps:$4 sm:$0xff]  }
 0x151   :  { %v10308_v60 = vld [vmem:[%s14717_s1 + $0xc40] ss:$16 sps:$4 sm:$0xff]  }
 0x152   :  { %v10380_v45 = vld [vmem:[%s14717_s1 + $0xdc0] ss:$16 sps:$4 sm:$0xff]  }
 0x153   :  { %6845 = vmatpush1.bf16.msra.mxu0 %v10224_v61  ;;  %7693 = vmatpush1.bf16.msra.mxu1 %v10227_v62  ;;  %v10311_v61 = vld [vmem:[%s14717_s1 + $0xc48] ss:$16 sps:$4 sm:$0xff]   ;;  %v10316_v62 = vld [vmem:[%s14717_s1 + $0xc64] ss:$16 sps:$4 sm:$0xff]  }
 0x154   :  { %6846 = vmatprep.subr.bf16.mxu0 %v10232_v63  ;;  %7694 = vmatprep.subr.bf16.mxu1 %v10235_v0  ;;  %v10319_v63 = vld [vmem:[%s14717_s1 + $0xc6c] ss:$16 sps:$4 sm:$0xff]   ;;  %v8388_v0 = vcombine.high %v12587_v57, %v12592_v58 }
 0x157   :  { %6847 = vmatpush1.bf16.msra.mxu0 %v10230_v1  ;;  %7695 = vmatpush1.bf16.msra.mxu1 %v10233_v2  ;;  %v10314_v1 = vld [vmem:[%s14717_s1 + $0xc60] ss:$16 sps:$4 sm:$0xff]   ;;  %v10317_v2 = vld [vmem:[%s14717_s1 + $0xc68] ss:$16 sps:$4 sm:$0xff]  }
 0x158   :  { %6848 = vmatprep.subr.bf16.mxu0 %v10238_v3  ;;  %7696 = vmatprep.subr.bf16.mxu1 %v10241_v4  ;;  %v10322_v3 = vld [vmem:[%s14717_s1 + $0xc84] ss:$16 sps:$4 sm:$0xff]   ;;  %v10325_v4 = vld [vmem:[%s14717_s1 + $0xc8c] ss:$16 sps:$4 sm:$0xff]  }
 0x15b   :  { %6849 = vmatpush1.bf16.msra.mxu0 %v10236_v5  ;;  %7697 = vmatpush1.bf16.msra.mxu1 %v10239_v6  ;;  %v10320_v5 = vld [vmem:[%s14717_s1 + $0xc80] ss:$16 sps:$4 sm:$0xff]   ;;  %v10323_v6 = vld [vmem:[%s14717_s1 + $0xc88] ss:$16 sps:$4 sm:$0xff]  }
 0x15c   :  { %6850 = vmatprep.subr.bf16.mxu0 %v10244_v7  ;;  %7698 = vmatprep.subr.bf16.mxu1 %v10247_v8  ;;  %v10328_v7 = vld [vmem:[%s14717_s1 + $0xca4] ss:$16 sps:$4 sm:$0xff]   ;;  %v10331_v8 = vld [vmem:[%s14717_s1 + $0xcac] ss:$16 sps:$4 sm:$0xff]  }
 0x15f   :  { %6851 = vmatpush1.bf16.msra.mxu0 %v10242_v9  ;;  %7699 = vmatpush1.bf16.msra.mxu1 %v10245_v10  ;;  %v10326_v9 = vld [vmem:[%s14717_s1 + $0xca0] ss:$16 sps:$4 sm:$0xff]   ;;  %v10329_v10 = vld [vmem:[%s14717_s1 + $0xca8] ss:$16 sps:$4 sm:$0xff]  }
 0x160   :  { %6852 = vmatprep.subr.bf16.mxu0 %v10250_v11  ;;  %7700 = vmatprep.subr.bf16.mxu1 %v10253_v12  ;;  %v10334_v11 = vld [vmem:[%s14717_s1 + $0xcc4] ss:$16 sps:$4 sm:$0xff]   ;;  %v10337_v12 = vld [vmem:[%s14717_s1 + $0xccc] ss:$16 sps:$4 sm:$0xff]  }
 0x163   :  { %6853 = vmatpush1.bf16.msra.mxu0 %v10248_v13  ;;  %7701 = vmatpush1.bf16.msra.mxu1 %v10251_v14  ;;  %v10332_v13 = vld [vmem:[%s14717_s1 + $0xcc0] ss:$16 sps:$4 sm:$0xff]   ;;  %v10335_v14 = vld [vmem:[%s14717_s1 + $0xcc8] ss:$16 sps:$4 sm:$0xff]  }
 0x164   :  { %6854 = vmatprep.subr.bf16.mxu0 %v10256_v15  ;;  %7702 = vmatprep.subr.bf16.mxu1 %v10259_v16  ;;  %v10340_v15 = vld [vmem:[%s14717_s1 + $0xce4] ss:$16 sps:$4 sm:$0xff]   ;;  %v10343_v16 = vld [vmem:[%s14717_s1 + $0xcec] ss:$16 sps:$4 sm:$0xff]  }
 0x167   :  { %6855 = vmatpush1.bf16.msra.mxu0 %v10254_v17  ;;  %7703 = vmatpush1.bf16.msra.mxu1 %v10257_v18  ;;  %v10338_v17 = vld [vmem:[%s14717_s1 + $0xce0] ss:$16 sps:$4 sm:$0xff]   ;;  %v10341_v18 = vld [vmem:[%s14717_s1 + $0xce8] ss:$16 sps:$4 sm:$0xff]  }
 0x168   :  { %6856 = vmatprep.subr.bf16.mxu0 %v10262_v19  ;;  %7704 = vmatprep.subr.bf16.mxu1 %v10265_v20  ;;  %v10346_v19 = vld [vmem:[%s14717_s1 + $0xd04] ss:$16 sps:$4 sm:$0xff]   ;;  %v10349_v20 = vld [vmem:[%s14717_s1 + $0xd0c] ss:$16 sps:$4 sm:$0xff]  }
 0x16b   :  { %6857 = vmatpush1.bf16.msra.mxu0 %v10260_v21  ;;  %7705 = vmatpush1.bf16.msra.mxu1 %v10263_v22  ;;  %v10344_v21 = vld [vmem:[%s14717_s1 + $0xd00] ss:$16 sps:$4 sm:$0xff]   ;;  %v10347_v22 = vld [vmem:[%s14717_s1 + $0xd08] ss:$16 sps:$4 sm:$0xff]  }
 0x16c   :  { %6858 = vmatprep.subr.bf16.mxu0 %v10268_v23  ;;  %7706 = vmatprep.subr.bf16.mxu1 %v10271_v24  ;;  %v10352_v23 = vld [vmem:[%s14717_s1 + $0xd24] ss:$16 sps:$4 sm:$0xff]   ;;  %v10355_v24 = vld [vmem:[%s14717_s1 + $0xd2c] ss:$16 sps:$4 sm:$0xff]  }
 0x16f   :  { %6859 = vmatpush1.bf16.msra.mxu0 %v10266_v26  ;;  %7707 = vmatpush1.bf16.msra.mxu1 %v10269_v25  ;;  %v10350_v26 = vld [vmem:[%s14717_s1 + $0xd20] ss:$16 sps:$4 sm:$0xff]   ;;  %v10353_v25 = vld [vmem:[%s14717_s1 + $0xd28] ss:$16 sps:$4 sm:$0xff]  }
 0x170   :  { %6860 = vmatprep.subr.bf16.mxu0 %v10274_v27  ;;  %7708 = vmatprep.subr.bf16.mxu1 %v10277_v28  ;;  %v10358_v27 = vld [vmem:[%s14717_s1 + $0xd44] ss:$16 sps:$4 sm:$0xff]   ;;  %v10361_v28 = vld [vmem:[%s14717_s1 + $0xd4c] ss:$16 sps:$4 sm:$0xff]  }
 0x173   :  { %6861 = vmatpush1.bf16.msra.mxu0 %v10272_v29  ;;  %7709 = vmatpush1.bf16.msra.mxu1 %v10275_v30  ;;  %v10356_v29 = vld [vmem:[%s14717_s1 + $0xd40] ss:$16 sps:$4 sm:$0xff]   ;;  %v10359_v30 = vld [vmem:[%s14717_s1 + $0xd48] ss:$16 sps:$4 sm:$0xff]  }
 0x174   :  { %6862 = vmatprep.subr.bf16.mxu0 %v10280_v31  ;;  %7710 = vmatprep.subr.bf16.mxu1 %v10283_v32  ;;  %v10364_v31 = vld [vmem:[%s14717_s1 + $0xd64] ss:$16 sps:$4 sm:$0xff]   ;;  %v10367_v32 = vld [vmem:[%s14717_s1 + $0xd6c] ss:$16 sps:$4 sm:$0xff]  }
 0x177   :  { %6863 = vmatpush1.bf16.msra.mxu0 %v10278_v34  ;;  %7711 = vmatpush1.bf16.msra.mxu1 %v10281_v36  ;;  %v10362_v34 = vld [vmem:[%s14717_s1 + $0xd60] ss:$16 sps:$4 sm:$0xff]   ;;  %v10365_v36 = vld [vmem:[%s14717_s1 + $0xd68] ss:$16 sps:$4 sm:$0xff]  }
 0x178   :  { %6864 = vmatprep.subr.bf16.mxu0 %v10286_v33  ;;  %7712 = vmatprep.subr.bf16.mxu1 %v10289_v35  ;;  %v10370_v33 = vld [vmem:[%s14717_s1 + $0xd84] ss:$16 sps:$4 sm:$0xff]   ;;  %v10373_v35 = vld [vmem:[%s14717_s1 + $0xd8c] ss:$16 sps:$4 sm:$0xff]  }
 0x17b   :  { %6865 = vmatpush1.bf16.msra.mxu0 %v10284_v37  ;;  %7713 = vmatpush1.bf16.msra.mxu1 %v10287_v38  ;;  %v10368_v37 = vld [vmem:[%s14717_s1 + $0xd80] ss:$16 sps:$4 sm:$0xff]   ;;  %v10371_v38 = vld [vmem:[%s14717_s1 + $0xd88] ss:$16 sps:$4 sm:$0xff]  }
 0x17c   :  { %6866 = vmatprep.subr.bf16.mxu0 %v10292_v39  ;;  %7714 = vmatprep.subr.bf16.mxu1 %v10295_v40  ;;  %v10376_v39 = vld [vmem:[%s14717_s1 + $0xda4] ss:$16 sps:$4 sm:$0xff]   ;;  %v10379_v40 = vld [vmem:[%s14717_s1 + $0xdac] ss:$16 sps:$4 sm:$0xff]  }
 0x17f   :  { %6867 = vmatpush1.bf16.msra.mxu0 %v10290_v42  ;;  %7715 = vmatpush1.bf16.msra.mxu1 %v10293_v44  ;;  %v10374_v42 = vld [vmem:[%s14717_s1 + $0xda0] ss:$16 sps:$4 sm:$0xff]   ;;  %v10377_v44 = vld [vmem:[%s14717_s1 + $0xda8] ss:$16 sps:$4 sm:$0xff]  }
 0x180   :  { %6889 = vmatprep.subr.bf16.mxu0 %v10298_v41  ;;  %7737 = vmatprep.subr.bf16.mxu1 %v10301_v43  ;;  %v10382_v41 = vld [vmem:[%s14717_s1 + $0xdc4] ss:$16 sps:$4 sm:$0xff]   ;;  %v10385_v43 = vld [vmem:[%s14717_s1 + $0xdcc] ss:$16 sps:$4 sm:$0xff]  }
 0x182   :  { %6869 = vmatmul.mubr.bf16.vlgmr.msra.gmra.mrb[0].mxu0 %v8385_v47  ;;  %7717 = vmatmul.mubr.bf16.vlgmr.msra.gmra.mrb[0].mxu1 %v8385_v47  ;;  %v10388_v47 = vld [vmem:[%s14717_s1 + $0xde4] ss:$16 sps:$4 sm:$0xff]  }
 0x183   :  { %6890 = vmatpush1.bf16.msra.mxu0 %v10296_v48  ;;  %7738 = vmatpush1.bf16.msra.mxu1 %v10299_v51  ;;  %v10391_v48 = vld [vmem:[%s14717_s1 + $0xdec] ss:$16 sps:$4 sm:$0xff]   ;;  %v10386_v51 = vld [vmem:[%s14717_s1 + $0xde0] ss:$16 sps:$4 sm:$0xff]  }
 0x184   :  { %6891 = vmatprep.subr.bf16.mxu0 %v10304_v52  ;;  %7739 = vmatprep.subr.bf16.mxu1 %v10307_v49  ;;  %v10389_v52 = vld [vmem:[%s14717_s1 + $0xde8] ss:$16 sps:$4 sm:$0xff]   ;;  %v10394_v49 = vld [vmem:[%s14717_s1 + $0xe04] ss:$16 sps:$4 sm:$0xff]  }
 0x185   :  { %6878 = vmatprep.mubr.bf16.mxu0 %v8418_v54  ;;  %7726 = vmatprep.mubr.bf16.mxu1 %v8418_v54  ;;  %v75_v54 = vld [vmem:[%s14718_s0 + $0x1b0] sm:$0xff] }
 0x187   :  { %6892 = vmatpush1.bf16.msra.mxu0 %v10302_v50  ;;  %7740 = vmatpush1.bf16.msra.mxu1 %v10305_v53  ;;  %v10397_v50 = vld [vmem:[%s14717_s1 + $0xe0c] ss:$16 sps:$4 sm:$0xff]   ;;  %v59_v53 = vld [vmem:[%s14718_s0 + $0x130] sm:$0xff] }
 0x188   :  { %6893 = vmatprep.subr.bf16.mxu0 %v10310_v55  ;;  %7741 = vmatprep.subr.bf16.mxu1 %v10313_v56  ;;  %v8387_v55 = vcombine.low %v12587_v57, %v12592_v58  ;;  %v10392_v56 = vld [vmem:[%s14717_s1 + $0xe00] ss:$16 sps:$4 sm:$0xff]   ;;  %v10403_v57 = vld [vmem:[%s14717_s1 + $0xe2c] ss:$16 sps:$4 sm:$0xff]  }
 0x189   :  { %v10398_v58 = vld [vmem:[%s14717_s1 + $0xe20] ss:$16 sps:$4 sm:$0xff]  }
 0x18a   :  { %6879 = vmatmul.mubr.bf16.gmra.mrb[4].mxu0 %v8417_v59  ;;  %7727 = vmatmul.mubr.bf16.gmra.mrb[4].mxu1 %v8417_v59  ;;  %v10395_v59 = vld [vmem:[%s14717_s1 + $0xe08] ss:$16 sps:$4 sm:$0xff]  }
 0x18b   :  { %6894 = vmatpush1.bf16.msra.mxu0 %v10308_v60  ;;  %7742 = vmatpush1.bf16.msra.mxu1 %v10311_v61  ;;  %v10400_v60 = vld [vmem:[%s14717_s1 + $0xe24] ss:$16 sps:$4 sm:$0xff]   ;;  %v10401_v61 = vld [vmem:[%s14717_s1 + $0xe28] ss:$16 sps:$4 sm:$0xff]  }
 0x18c   :  { %6895 = vmatprep.subr.bf16.mxu0 %v10316_v62  ;;  %7743 = vmatprep.subr.bf16.mxu1 %v10319_v63  ;;  %v8420_v62 = vcombine.high %v59_v53, %v75_v54  ;;  %v10406_v63 = vld [vmem:[%s14717_s1 + $0xe44] ss:$16 sps:$4 sm:$0xff]  }
 0x18d   :  { %6921 = vmatprep.mubr.bf16.mxu0 %v8388_v0  ;;  %7769 = vmatprep.mubr.bf16.mxu1 %v8388_v0  ;;  %v10409_v0 = vld [vmem:[%s14717_s1 + $0xe4c] ss:$16 sps:$4 sm:$0xff]  }
 0x18f   :  { %6896 = vmatpush1.bf16.msra.mxu0 %v10314_v1  ;;  %7744 = vmatpush1.bf16.msra.mxu1 %v10317_v2  ;;  %v12799_v1 = vld [vmem:[%s14718_s0 + $0x38] sm:$0xff] }
 0x190   :  { %6897 = vmatprep.subr.bf16.mxu0 %v10322_v3  ;;  %7745 = vmatprep.subr.bf16.mxu1 %v10325_v4  ;;  %v12804_v2 = vld [vmem:[%s14718_s0 + $0xb8] sm:$0xff]  ;;  %v8419_v3 = vcombine.low %v59_v53, %v75_v54  ;;  %v10404_v4 = vld [vmem:[%s14717_s1 + $0xe40] ss:$16 sps:$4 sm:$0xff]  }
 0x191   :  { %v10476_v53 = vld [vmem:[%s14717_s1 + $0xfc0] ss:$16 sps:$4 sm:$0xff]   ;;  %v10479_v54 = vld [vmem:[%s14717_s1 + $0xfc8] ss:$16 sps:$4 sm:$0xff]  }
 0x193   :  { %6898 = vmatpush1.bf16.msra.mxu0 %v10320_v5  ;;  %7746 = vmatpush1.bf16.msra.mxu1 %v10323_v6  ;;  %v10407_v5 = vld [vmem:[%s14717_s1 + $0xe48] ss:$16 sps:$4 sm:$0xff]   ;;  %v10412_v6 = vld [vmem:[%s14717_s1 + $0xe64] ss:$16 sps:$4 sm:$0xff]  }
 0x194   :  { %6899 = vmatprep.subr.bf16.mxu0 %v10328_v7  ;;  %7747 = vmatprep.subr.bf16.mxu1 %v10331_v8  ;;  %v10415_v7 = vld [vmem:[%s14717_s1 + $0xe6c] ss:$16 sps:$4 sm:$0xff]   ;;  %v8390_v8 = vcombine.high %v12799_v1, %v12804_v2 }
 0x197   :  { %6900 = vmatpush1.bf16.msra.mxu0 %v10326_v9  ;;  %7748 = vmatpush1.bf16.msra.mxu1 %v10329_v10  ;;  %v10410_v9 = vld [vmem:[%s14717_s1 + $0xe60] ss:$16 sps:$4 sm:$0xff]   ;;  %v10413_v10 = vld [vmem:[%s14717_s1 + $0xe68] ss:$16 sps:$4 sm:$0xff]  }
 0x198   :  { %6901 = vmatprep.subr.bf16.mxu0 %v10334_v11  ;;  %7749 = vmatprep.subr.bf16.mxu1 %v10337_v12  ;;  %v10418_v11 = vld [vmem:[%s14717_s1 + $0xe84] ss:$16 sps:$4 sm:$0xff]   ;;  %v10421_v12 = vld [vmem:[%s14717_s1 + $0xe8c] ss:$16 sps:$4 sm:$0xff]  }
 0x19b   :  { %6902 = vmatpush1.bf16.msra.mxu0 %v10332_v13  ;;  %7750 = vmatpush1.bf16.msra.mxu1 %v10335_v14  ;;  %v10416_v13 = vld [vmem:[%s14717_s1 + $0xe80] ss:$16 sps:$4 sm:$0xff]   ;;  %v10419_v14 = vld [vmem:[%s14717_s1 + $0xe88] ss:$16 sps:$4 sm:$0xff]  }
 0x19c   :  { %6903 = vmatprep.subr.bf16.mxu0 %v10340_v15  ;;  %7751 = vmatprep.subr.bf16.mxu1 %v10343_v16  ;;  %v10424_v15 = vld [vmem:[%s14717_s1 + $0xea4] ss:$16 sps:$4 sm:$0xff]   ;;  %v10427_v16 = vld [vmem:[%s14717_s1 + $0xeac] ss:$16 sps:$4 sm:$0xff]  }
 0x19f   :  { %6904 = vmatpush1.bf16.msra.mxu0 %v10338_v17  ;;  %7752 = vmatpush1.bf16.msra.mxu1 %v10341_v18  ;;  %v10422_v17 = vld [vmem:[%s14717_s1 + $0xea0] ss:$16 sps:$4 sm:$0xff]   ;;  %v10425_v18 = vld [vmem:[%s14717_s1 + $0xea8] ss:$16 sps:$4 sm:$0xff]  }
 0x1a0   :  { %6905 = vmatprep.subr.bf16.mxu0 %v10346_v19  ;;  %7753 = vmatprep.subr.bf16.mxu1 %v10349_v20  ;;  %v10430_v19 = vld [vmem:[%s14717_s1 + $0xec4] ss:$16 sps:$4 sm:$0xff]   ;;  %v10433_v20 = vld [vmem:[%s14717_s1 + $0xecc] ss:$16 sps:$4 sm:$0xff]  }
 0x1a3   :  { %6906 = vmatpush1.bf16.msra.mxu0 %v10344_v21  ;;  %7754 = vmatpush1.bf16.msra.mxu1 %v10347_v22  ;;  %v10428_v21 = vld [vmem:[%s14717_s1 + $0xec0] ss:$16 sps:$4 sm:$0xff]   ;;  %v10431_v22 = vld [vmem:[%s14717_s1 + $0xec8] ss:$16 sps:$4 sm:$0xff]  }
 0x1a4   :  { %6907 = vmatprep.subr.bf16.mxu0 %v10352_v23  ;;  %7755 = vmatprep.subr.bf16.mxu1 %v10355_v24  ;;  %v10436_v23 = vld [vmem:[%s14717_s1 + $0xee4] ss:$16 sps:$4 sm:$0xff]   ;;  %v10439_v24 = vld [vmem:[%s14717_s1 + $0xeec] ss:$16 sps:$4 sm:$0xff]  }
 0x1a7   :  { %6908 = vmatpush1.bf16.msra.mxu0 %v10350_v26  ;;  %7756 = vmatpush1.bf16.msra.mxu1 %v10353_v25  ;;  %v10434_v26 = vld [vmem:[%s14717_s1 + $0xee0] ss:$16 sps:$4 sm:$0xff]   ;;  %v10437_v25 = vld [vmem:[%s14717_s1 + $0xee8] ss:$16 sps:$4 sm:$0xff]  }
 0x1a8   :  { %6909 = vmatprep.subr.bf16.mxu0 %v10358_v27  ;;  %7757 = vmatprep.subr.bf16.mxu1 %v10361_v28  ;;  %v10442_v27 = vld [vmem:[%s14717_s1 + $0xf04] ss:$16 sps:$4 sm:$0xff]   ;;  %v10445_v28 = vld [vmem:[%s14717_s1 + $0xf0c] ss:$16 sps:$4 sm:$0xff]  }
 0x1ab   :  { %6910 = vmatpush1.bf16.msra.mxu0 %v10356_v29  ;;  %7758 = vmatpush1.bf16.msra.mxu1 %v10359_v30  ;;  %v10440_v29 = vld [vmem:[%s14717_s1 + $0xf00] ss:$16 sps:$4 sm:$0xff]   ;;  %v10443_v30 = vld [vmem:[%s14717_s1 + $0xf08] ss:$16 sps:$4 sm:$0xff]  }
 0x1ac   :  { %6911 = vmatprep.subr.bf16.mxu0 %v10364_v31  ;;  %7759 = vmatprep.subr.bf16.mxu1 %v10367_v32  ;;  %v10448_v31 = vld [vmem:[%s14717_s1 + $0xf24] ss:$16 sps:$4 sm:$0xff]   ;;  %v10451_v32 = vld [vmem:[%s14717_s1 + $0xf2c] ss:$16 sps:$4 sm:$0xff]  }
 0x1af   :  { %6912 = vmatpush1.bf16.msra.mxu0 %v10362_v34  ;;  %7760 = vmatpush1.bf16.msra.mxu1 %v10365_v36  ;;  %v10446_v34 = vld [vmem:[%s14717_s1 + $0xf20] ss:$16 sps:$4 sm:$0xff]   ;;  %v10449_v36 = vld [vmem:[%s14717_s1 + $0xf28] ss:$16 sps:$4 sm:$0xff]  }
 0x1b0   :  { %6913 = vmatprep.subr.bf16.mxu0 %v10370_v33  ;;  %7761 = vmatprep.subr.bf16.mxu1 %v10373_v35  ;;  %v10454_v33 = vld [vmem:[%s14717_s1 + $0xf44] ss:$16 sps:$4 sm:$0xff]   ;;  %v10457_v35 = vld [vmem:[%s14717_s1 + $0xf4c] ss:$16 sps:$4 sm:$0xff]  }
 0x1b3   :  { %6914 = vmatpush1.bf16.msra.mxu0 %v10368_v37  ;;  %7762 = vmatpush1.bf16.msra.mxu1 %v10371_v38  ;;  %v10452_v37 = vld [vmem:[%s14717_s1 + $0xf40] ss:$16 sps:$4 sm:$0xff]   ;;  %v10455_v38 = vld [vmem:[%s14717_s1 + $0xf48] ss:$16 sps:$4 sm:$0xff]  }
 0x1b4   :  { %6915 = vmatprep.subr.bf16.mxu0 %v10376_v39  ;;  %7763 = vmatprep.subr.bf16.mxu1 %v10379_v40  ;;  %v10460_v39 = vld [vmem:[%s14717_s1 + $0xf64] ss:$16 sps:$4 sm:$0xff]   ;;  %v10463_v40 = vld [vmem:[%s14717_s1 + $0xf6c] ss:$16 sps:$4 sm:$0xff]  }
 0x1b7   :  { %6916 = vmatpush1.bf16.msra.mxu0 %v10374_v42  ;;  %7764 = vmatpush1.bf16.msra.mxu1 %v10377_v44  ;;  %v10458_v42 = vld [vmem:[%s14717_s1 + $0xf60] ss:$16 sps:$4 sm:$0xff]   ;;  %v10461_v44 = vld [vmem:[%s14717_s1 + $0xf68] ss:$16 sps:$4 sm:$0xff]  }
 0x1b8   :  { %6917 = vmatprep.subr.bf16.mxu0 %v10382_v41  ;;  %7765 = vmatprep.subr.bf16.mxu1 %v10385_v43  ;;  %v10466_v41 = vld [vmem:[%s14717_s1 + $0xf84] ss:$16 sps:$4 sm:$0xff]   ;;  %v10469_v43 = vld [vmem:[%s14717_s1 + $0xf8c] ss:$16 sps:$4 sm:$0xff]  }
 0x1bb   :  { %6918 = vmatpush1.bf16.msra.mxu0 %v10380_v45  ;;  %7766 = vmatpush1.bf16.msra.mxu1 %v10383_v46  ;;  %v10464_v45 = vld [vmem:[%s14717_s1 + $0xf80] ss:$16 sps:$4 sm:$0xff]   ;;  %v10467_v46 = vld [vmem:[%s14717_s1 + $0xf88] ss:$16 sps:$4 sm:$0xff]  }
 0x1bc   :  { %6919 = vmatprep.subr.bf16.mxu0 %v10388_v47  ;;  %7767 = vmatprep.subr.bf16.mxu1 %v10391_v48  ;;  %v10472_v47 = vld [vmem:[%s14717_s1 + $0xfa4] ss:$16 sps:$4 sm:$0xff]   ;;  %v10475_v48 = vld [vmem:[%s14717_s1 + $0xfac] ss:$16 sps:$4 sm:$0xff]  }
 0x1bf   :  { %6920 = vmatpush1.bf16.msra.mxu0 %v10386_v51  ;;  %7768 = vmatpush1.bf16.msra.mxu1 %v10389_v52  ;;  %v10470_v51 = vld [vmem:[%s14717_s1 + $0xfa0] ss:$16 sps:$4 sm:$0xff]   ;;  %v10473_v52 = vld [vmem:[%s14717_s1 + $0xfa8] ss:$16 sps:$4 sm:$0xff]  }
 0x1c0   :  { %6942 = vmatprep.subr.bf16.mxu0 %v10394_v49  ;;  %7790 = vmatprep.subr.bf16.mxu1 %v10397_v50  ;;  %v10478_v49 = vld [vmem:[%s14717_s1 + $0xfc4] ss:$16 sps:$4 sm:$0xff]   ;;  %v10481_v50 = vld [vmem:[%s14717_s1 + $0xfcc] ss:$16 sps:$4 sm:$0xff]  }
 0x1c2   :  { %6922 = vmatmul.mubr.bf16.vlgmr.msra.gmra.mrb[0].mxu0 %v8387_v55  ;;  %7770 = vmatmul.mubr.bf16.vlgmr.msra.gmra.mrb[0].mxu1 %v8387_v55  ;;  %v10484_v55 = vld [vmem:[%s14717_s1 + $0xfe4] ss:$16 sps:$4 sm:$0xff]  }
 0x1c3   :  { %6943 = vmatpush1.bf16.msra.mxu0 %v10392_v56  ;;  %7791 = vmatpush1.bf16.msra.mxu1 %v10395_v59  ;;  %v10487_v56 = vld [vmem:[%s14717_s1 + $0xfec] ss:$16 sps:$4 sm:$0xff]   ;;  %v10482_v59 = vld [vmem:[%s14717_s1 + $0xfe0] ss:$16 sps:$4 sm:$0xff]  }
 0x1c4   :  { %6944 = vmatprep.subr.bf16.mxu0 %v10400_v60  ;;  %7792 = vmatprep.subr.bf16.mxu1 %v10403_v57  ;;  %v10485_v60 = vld [vmem:[%s14717_s1 + $0xfe8] ss:$16 sps:$4 sm:$0xff]   ;;  %v10490_v57 = vld [vmem:[%s14717_s1 + $0x1004] ss:$16 sps:$4 sm:$0xff]  }
 0x1c5   :  { %6931 = vmatprep.mubr.bf16.mxu0 %v8420_v62  ;;  %7779 = vmatprep.mubr.bf16.mxu1 %v8420_v62  ;;  %v76_v62 = vld [vmem:[%s14718_s0 + $0x1b8] sm:$0xff] }
 0x1c7   :  { %6945 = vmatpush1.bf16.msra.mxu0 %v10398_v58  ;;  %7793 = vmatpush1.bf16.msra.mxu1 %v10401_v61  ;;  %v10493_v58 = vld [vmem:[%s14717_s1 + $0x100c] ss:$16 sps:$4 sm:$0xff]  }
 0x1c8   :  { %6946 = vmatprep.subr.bf16.mxu0 %v10406_v63  ;;  %7794 = vmatprep.subr.bf16.mxu1 %v10409_v0  ;;  %v60_v61 = vld [vmem:[%s14718_s0 + $0x138] sm:$0xff]  ;;  %v8389_v63 = vcombine.low %v12799_v1, %v12804_v2  ;;  %v10488_v0 = vld [vmem:[%s14717_s1 + $0x1000] ss:$16 sps:$4 sm:$0xff]  }
 0x1c9   :  { %v10499_v1 = vld [vmem:[%s14717_s1 + $0x102c] ss:$16 sps:$4 sm:$0xff]   ;;  %v10494_v2 = vld [vmem:[%s14717_s1 + $0x1020] ss:$16 sps:$4 sm:$0xff]  }
 0x1ca   :  { %6932 = vmatmul.mubr.bf16.gmra.mrb[4].mxu0 %v8419_v3  ;;  %7780 = vmatmul.mubr.bf16.gmra.mrb[4].mxu1 %v8419_v3  ;;  %v10491_v3 = vld [vmem:[%s14717_s1 + $0x1008] ss:$16 sps:$4 sm:$0xff]  }
 0x1cb   :  { %6947 = vmatpush1.bf16.msra.mxu0 %v10404_v4  ;;  %7795 = vmatpush1.bf16.msra.mxu1 %v10407_v5  ;;  %v10496_v4 = vld [vmem:[%s14717_s1 + $0x1024] ss:$16 sps:$4 sm:$0xff]   ;;  %v10497_v5 = vld [vmem:[%s14717_s1 + $0x1028] ss:$16 sps:$4 sm:$0xff]  }
 0x1cc   :  { %6948 = vmatprep.subr.bf16.mxu0 %v10412_v6  ;;  %7796 = vmatprep.subr.bf16.mxu1 %v10415_v7  ;;  %v8422_v6 = vcombine.high %v60_v61, %v76_v62  ;;  %v10502_v7 = vld [vmem:[%s14717_s1 + $0x1044] ss:$16 sps:$4 sm:$0xff]  }
 0x1cd   :  { %6974 = vmatprep.mubr.bf16.mxu0 %v8390_v8  ;;  %7822 = vmatprep.mubr.bf16.mxu1 %v8390_v8  ;;  %v10505_v8 = vld [vmem:[%s14717_s1 + $0x104c] ss:$16 sps:$4 sm:$0xff]  }
 0x1cf   :  { %6949 = vmatpush1.bf16.msra.mxu0 %v10410_v9  ;;  %7797 = vmatpush1.bf16.msra.mxu1 %v10413_v10  ;;  %v13011_v9 = vld [vmem:[%s14718_s0 + $0x40] sm:$0xff] }
 0x1d0   :  { %6950 = vmatprep.subr.bf16.mxu0 %v10418_v11  ;;  %7798 = vmatprep.subr.bf16.mxu1 %v10421_v12  ;;  %v13016_v10 = vld [vmem:[%s14718_s0 + $0xc0] sm:$0xff]  ;;  %v8421_v11 = vcombine.low %v60_v61, %v76_v62  ;;  %v10575_v62 = vld [vmem:[%s14717_s1 + $0x11c8] ss:$16 sps:$4 sm:$0xff]  }
 0x1d1   :  { %v10500_v12 = vld [vmem:[%s14717_s1 + $0x1040] ss:$16 sps:$4 sm:$0xff]  }
 0x1d2   :  { %v10572_v61 = vld [vmem:[%s14717_s1 + $0x11c0] ss:$16 sps:$4 sm:$0xff]  }
 0x1d3   :  { %6951 = vmatpush1.bf16.msra.mxu0 %v10416_v13  ;;  %7799 = vmatpush1.bf16.msra.mxu1 %v10419_v14  ;;  %v10503_v13 = vld [vmem:[%s14717_s1 + $0x1048] ss:$16 sps:$4 sm:$0xff]   ;;  %v10508_v14 = vld [vmem:[%s14717_s1 + $0x1064] ss:$16 sps:$4 sm:$0xff]  }
 0x1d4   :  { %6952 = vmatprep.subr.bf16.mxu0 %v10424_v15  ;;  %7800 = vmatprep.subr.bf16.mxu1 %v10427_v16  ;;  %v10511_v15 = vld [vmem:[%s14717_s1 + $0x106c] ss:$16 sps:$4 sm:$0xff]   ;;  %v8392_v16 = vcombine.high %v13011_v9, %v13016_v10 }
 0x1d7   :  { %6953 = vmatpush1.bf16.msra.mxu0 %v10422_v17  ;;  %7801 = vmatpush1.bf16.msra.mxu1 %v10425_v18  ;;  %v10506_v17 = vld [vmem:[%s14717_s1 + $0x1060] ss:$16 sps:$4 sm:$0xff]   ;;  %v10509_v18 = vld [vmem:[%s14717_s1 + $0x1068] ss:$16 sps:$4 sm:$0xff]  }
 0x1d8   :  { %6954 = vmatprep.subr.bf16.mxu0 %v10430_v19  ;;  %7802 = vmatprep.subr.bf16.mxu1 %v10433_v20  ;;  %v10514_v19 = vld [vmem:[%s14717_s1 + $0x1084] ss:$16 sps:$4 sm:$0xff]   ;;  %v10517_v20 = vld [vmem:[%s14717_s1 + $0x108c] ss:$16 sps:$4 sm:$0xff]  }
 0x1db   :  { %6955 = vmatpush1.bf16.msra.mxu0 %v10428_v21  ;;  %7803 = vmatpush1.bf16.msra.mxu1 %v10431_v22  ;;  %v10512_v21 = vld [vmem:[%s14717_s1 + $0x1080] ss:$16 sps:$4 sm:$0xff]   ;;  %v10515_v22 = vld [vmem:[%s14717_s1 + $0x1088] ss:$16 sps:$4 sm:$0xff]  }
 0x1dc   :  { %6956 = vmatprep.subr.bf16.mxu0 %v10436_v23  ;;  %7804 = vmatprep.subr.bf16.mxu1 %v10439_v24  ;;  %v10520_v23 = vld [vmem:[%s14717_s1 + $0x10a4] ss:$16 sps:$4 sm:$0xff]   ;;  %v10523_v24 = vld [vmem:[%s14717_s1 + $0x10ac] ss:$16 sps:$4 sm:$0xff]  }
 0x1df   :  { %6957 = vmatpush1.bf16.msra.mxu0 %v10434_v26  ;;  %7805 = vmatpush1.bf16.msra.mxu1 %v10437_v25  ;;  %v10518_v26 = vld [vmem:[%s14717_s1 + $0x10a0] ss:$16 sps:$4 sm:$0xff]   ;;  %v10521_v25 = vld [vmem:[%s14717_s1 + $0x10a8] ss:$16 sps:$4 sm:$0xff]  }
 0x1e0   :  { %6958 = vmatprep.subr.bf16.mxu0 %v10442_v27  ;;  %7806 = vmatprep.subr.bf16.mxu1 %v10445_v28  ;;  %v10526_v27 = vld [vmem:[%s14717_s1 + $0x10c4] ss:$16 sps:$4 sm:$0xff]   ;;  %v10529_v28 = vld [vmem:[%s14717_s1 + $0x10cc] ss:$16 sps:$4 sm:$0xff]  }
 0x1e3   :  { %6959 = vmatpush1.bf16.msra.mxu0 %v10440_v29  ;;  %7807 = vmatpush1.bf16.msra.mxu1 %v10443_v30  ;;  %v10524_v29 = vld [vmem:[%s14717_s1 + $0x10c0] ss:$16 sps:$4 sm:$0xff]   ;;  %v10527_v30 = vld [vmem:[%s14717_s1 + $0x10c8] ss:$16 sps:$4 sm:$0xff]  }
 0x1e4   :  { %6960 = vmatprep.subr.bf16.mxu0 %v10448_v31  ;;  %7808 = vmatprep.subr.bf16.mxu1 %v10451_v32  ;;  %v10532_v31 = vld [vmem:[%s14717_s1 + $0x10e4] ss:$16 sps:$4 sm:$0xff]   ;;  %v10535_v32 = vld [vmem:[%s14717_s1 + $0x10ec] ss:$16 sps:$4 sm:$0xff]  }
 0x1e7   :  { %6961 = vmatpush1.bf16.msra.mxu0 %v10446_v34  ;;  %7809 = vmatpush1.bf16.msra.mxu1 %v10449_v36  ;;  %v10530_v34 = vld [vmem:[%s14717_s1 + $0x10e0] ss:$16 sps:$4 sm:$0xff]   ;;  %v10533_v36 = vld [vmem:[%s14717_s1 + $0x10e8] ss:$16 sps:$4 sm:$0xff]  }
 0x1e8   :  { %6962 = vmatprep.subr.bf16.mxu0 %v10454_v33  ;;  %7810 = vmatprep.subr.bf16.mxu1 %v10457_v35  ;;  %v10538_v33 = vld [vmem:[%s14717_s1 + $0x1104] ss:$16 sps:$4 sm:$0xff]   ;;  %v10541_v35 = vld [vmem:[%s14717_s1 + $0x110c] ss:$16 sps:$4 sm:$0xff]  }
 0x1eb   :  { %6963 = vmatpush1.bf16.msra.mxu0 %v10452_v37  ;;  %7811 = vmatpush1.bf16.msra.mxu1 %v10455_v38  ;;  %v10536_v37 = vld [vmem:[%s14717_s1 + $0x1100] ss:$16 sps:$4 sm:$0xff]   ;;  %v10539_v38 = vld [vmem:[%s14717_s1 + $0x1108] ss:$16 sps:$4 sm:$0xff]  }
 0x1ec   :  { %6964 = vmatprep.subr.bf16.mxu0 %v10460_v39  ;;  %7812 = vmatprep.subr.bf16.mxu1 %v10463_v40  ;;  %v10544_v39 = vld [vmem:[%s14717_s1 + $0x1124] ss:$16 sps:$4 sm:$0xff]   ;;  %v10547_v40 = vld [vmem:[%s14717_s1 + $0x112c] ss:$16 sps:$4 sm:$0xff]  }
 0x1ef   :  { %6965 = vmatpush1.bf16.msra.mxu0 %v10458_v42  ;;  %7813 = vmatpush1.bf16.msra.mxu1 %v10461_v44  ;;  %v10542_v42 = vld [vmem:[%s14717_s1 + $0x1120] ss:$16 sps:$4 sm:$0xff]   ;;  %v10545_v44 = vld [vmem:[%s14717_s1 + $0x1128] ss:$16 sps:$4 sm:$0xff]  }
 0x1f0   :  { %6966 = vmatprep.subr.bf16.mxu0 %v10466_v41  ;;  %7814 = vmatprep.subr.bf16.mxu1 %v10469_v43  ;;  %v10550_v41 = vld [vmem:[%s14717_s1 + $0x1144] ss:$16 sps:$4 sm:$0xff]   ;;  %v10553_v43 = vld [vmem:[%s14717_s1 + $0x114c] ss:$16 sps:$4 sm:$0xff]  }
 0x1f3   :  { %6967 = vmatpush1.bf16.msra.mxu0 %v10464_v45  ;;  %7815 = vmatpush1.bf16.msra.mxu1 %v10467_v46  ;;  %v10548_v45 = vld [vmem:[%s14717_s1 + $0x1140] ss:$16 sps:$4 sm:$0xff]   ;;  %v10551_v46 = vld [vmem:[%s14717_s1 + $0x1148] ss:$16 sps:$4 sm:$0xff]  }
 0x1f4   :  { %6968 = vmatprep.subr.bf16.mxu0 %v10472_v47  ;;  %7816 = vmatprep.subr.bf16.mxu1 %v10475_v48  ;;  %v10556_v47 = vld [vmem:[%s14717_s1 + $0x1164] ss:$16 sps:$4 sm:$0xff]   ;;  %v10559_v48 = vld [vmem:[%s14717_s1 + $0x116c] ss:$16 sps:$4 sm:$0xff]  }
 0x1f7   :  { %6969 = vmatpush1.bf16.msra.mxu0 %v10470_v51  ;;  %7817 = vmatpush1.bf16.msra.mxu1 %v10473_v52  ;;  %v10554_v51 = vld [vmem:[%s14717_s1 + $0x1160] ss:$16 sps:$4 sm:$0xff]   ;;  %v10557_v52 = vld [vmem:[%s14717_s1 + $0x1168] ss:$16 sps:$4 sm:$0xff]  }
 0x1f8   :  { %6970 = vmatprep.subr.bf16.mxu0 %v10478_v49  ;;  %7818 = vmatprep.subr.bf16.mxu1 %v10481_v50  ;;  %v10562_v49 = vld [vmem:[%s14717_s1 + $0x1184] ss:$16 sps:$4 sm:$0xff]   ;;  %v10565_v50 = vld [vmem:[%s14717_s1 + $0x118c] ss:$16 sps:$4 sm:$0xff]  }
 0x1fb   :  { %6971 = vmatpush1.bf16.msra.mxu0 %v10476_v53  ;;  %7819 = vmatpush1.bf16.msra.mxu1 %v10479_v54  ;;  %v10560_v53 = vld [vmem:[%s14717_s1 + $0x1180] ss:$16 sps:$4 sm:$0xff]   ;;  %v10563_v54 = vld [vmem:[%s14717_s1 + $0x1188] ss:$16 sps:$4 sm:$0xff]  }
 0x1fc   :  { %6972 = vmatprep.subr.bf16.mxu0 %v10484_v55  ;;  %7820 = vmatprep.subr.bf16.mxu1 %v10487_v56  ;;  %v10568_v55 = vld [vmem:[%s14717_s1 + $0x11a4] ss:$16 sps:$4 sm:$0xff]   ;;  %v10571_v56 = vld [vmem:[%s14717_s1 + $0x11ac] ss:$16 sps:$4 sm:$0xff]  }
 0x1ff   :  { %6973 = vmatpush1.bf16.msra.mxu0 %v10482_v59  ;;  %7821 = vmatpush1.bf16.msra.mxu1 %v10485_v60  ;;  %v10566_v59 = vld [vmem:[%s14717_s1 + $0x11a0] ss:$16 sps:$4 sm:$0xff]   ;;  %v10569_v60 = vld [vmem:[%s14717_s1 + $0x11a8] ss:$16 sps:$4 sm:$0xff]  }
 0x200   :  { %6995 = vmatprep.subr.bf16.mxu0 %v10490_v57  ;;  %7843 = vmatprep.subr.bf16.mxu1 %v10493_v58  ;;  %v10574_v57 = vld [vmem:[%s14717_s1 + $0x11c4] ss:$16 sps:$4 sm:$0xff]   ;;  %v10577_v58 = vld [vmem:[%s14717_s1 + $0x11cc] ss:$16 sps:$4 sm:$0xff]  }
 0x202   :  { %6975 = vmatmul.mubr.bf16.vlgmr.msra.gmra.mrb[0].mxu0 %v8389_v63  ;;  %7823 = vmatmul.mubr.bf16.vlgmr.msra.gmra.mrb[0].mxu1 %v8389_v63  ;;  %v10580_v63 = vld [vmem:[%s14717_s1 + $0x11e4] ss:$16 sps:$4 sm:$0xff]  }
 0x203   :  { %6996 = vmatpush1.bf16.msra.mxu0 %v10488_v0  ;;  %7844 = vmatpush1.bf16.msra.mxu1 %v10491_v3  ;;  %v10583_v0 = vld [vmem:[%s14717_s1 + $0x11ec] ss:$16 sps:$4 sm:$0xff]   ;;  %v10578_v3 = vld [vmem:[%s14717_s1 + $0x11e0] ss:$16 sps:$4 sm:$0xff]  }
 0x204   :  { %6997 = vmatprep.subr.bf16.mxu0 %v10496_v4  ;;  %7845 = vmatprep.subr.bf16.mxu1 %v10499_v1  ;;  %v10581_v4 = vld [vmem:[%s14717_s1 + $0x11e8] ss:$16 sps:$4 sm:$0xff]   ;;  %v10586_v1 = vld [vmem:[%s14717_s1 + $0x1204] ss:$16 sps:$4 sm:$0xff]  }
 0x205   :  { %6984 = vmatprep.mubr.bf16.mxu0 %v8422_v6  ;;  %7832 = vmatprep.mubr.bf16.mxu1 %v8422_v6  ;;  %v77_v6 = vld [vmem:[%s14718_s0 + $0x1c0] sm:$0xff] }
 0x207   :  { %6998 = vmatpush1.bf16.msra.mxu0 %v10494_v2  ;;  %7846 = vmatpush1.bf16.msra.mxu1 %v10497_v5  ;;  %v10589_v2 = vld [vmem:[%s14717_s1 + $0x120c] ss:$16 sps:$4 sm:$0xff]   ;;  %v61_v5 = vld [vmem:[%s14718_s0 + $0x140] sm:$0xff] }
 0x208   :  { %6999 = vmatprep.subr.bf16.mxu0 %v10502_v7  ;;  %7847 = vmatprep.subr.bf16.mxu1 %v10505_v8  ;;  %v8391_v7 = vcombine.low %v13011_v9, %v13016_v10  ;;  %v10584_v8 = vld [vmem:[%s14717_s1 + $0x1200] ss:$16 sps:$4 sm:$0xff]   ;;  %v10595_v9 = vld [vmem:[%s14717_s1 + $0x122c] ss:$16 sps:$4 sm:$0xff]  }
 0x209   :  { %v10590_v10 = vld [vmem:[%s14717_s1 + $0x1220] ss:$16 sps:$4 sm:$0xff]  }
 0x20a   :  { %6985 = vmatmul.mubr.bf16.gmra.mrb[4].mxu0 %v8421_v11  ;;  %7833 = vmatmul.mubr.bf16.gmra.mrb[4].mxu1 %v8421_v11  ;;  %v10587_v11 = vld [vmem:[%s14717_s1 + $0x1208] ss:$16 sps:$4 sm:$0xff]  }
 0x20b   :  { %7000 = vmatpush1.bf16.msra.mxu0 %v10500_v12  ;;  %7848 = vmatpush1.bf16.msra.mxu1 %v10503_v13  ;;  %v10592_v12 = vld [vmem:[%s14717_s1 + $0x1224] ss:$16 sps:$4 sm:$0xff]   ;;  %v10593_v13 = vld [vmem:[%s14717_s1 + $0x1228] ss:$16 sps:$4 sm:$0xff]  }
 0x20c   :  { %7001 = vmatprep.subr.bf16.mxu0 %v10508_v14  ;;  %7849 = vmatprep.subr.bf16.mxu1 %v10511_v15  ;;  %v8424_v14 = vcombine.high %v61_v5, %v77_v6  ;;  %v10598_v15 = vld [vmem:[%s14717_s1 + $0x1244] ss:$16 sps:$4 sm:$0xff]  }
 0x20d   :  { %7027 = vmatprep.mubr.bf16.mxu0 %v8392_v16  ;;  %7875 = vmatprep.mubr.bf16.mxu1 %v8392_v16  ;;  %v10601_v16 = vld [vmem:[%s14717_s1 + $0x124c] ss:$16 sps:$4 sm:$0xff]  }
 0x20f   :  { %7002 = vmatpush1.bf16.msra.mxu0 %v10506_v17  ;;  %7850 = vmatpush1.bf16.msra.mxu1 %v10509_v18  ;;  %v13223_v17 = vld [vmem:[%s14718_s0 + $0x48] sm:$0xff] }
 0x210   :  { %7003 = vmatprep.subr.bf16.mxu0 %v10514_v19  ;;  %7851 = vmatprep.subr.bf16.mxu1 %v10517_v20  ;;  %v13228_v18 = vld [vmem:[%s14718_s0 + $0xc8] sm:$0xff]  ;;  %v8423_v19 = vcombine.low %v61_v5, %v77_v6  ;;  %v10596_v20 = vld [vmem:[%s14717_s1 + $0x1240] ss:$16 sps:$4 sm:$0xff]  }
 0x211   :  { %v10668_v5 = vld [vmem:[%s14717_s1 + $0x13c0] ss:$16 sps:$4 sm:$0xff]   ;;  %v10671_v6 = vld [vmem:[%s14717_s1 + $0x13c8] ss:$16 sps:$4 sm:$0xff]  }
 0x213   :  { %7004 = vmatpush1.bf16.msra.mxu0 %v10512_v21  ;;  %7852 = vmatpush1.bf16.msra.mxu1 %v10515_v22  ;;  %v10599_v21 = vld [vmem:[%s14717_s1 + $0x1248] ss:$16 sps:$4 sm:$0xff]   ;;  %v10604_v22 = vld [vmem:[%s14717_s1 + $0x1264] ss:$16 sps:$4 sm:$0xff]  }
 0x214   :  { %7005 = vmatprep.subr.bf16.mxu0 %v10520_v23  ;;  %7853 = vmatprep.subr.bf16.mxu1 %v10523_v24  ;;  %v10607_v23 = vld [vmem:[%s14717_s1 + $0x126c] ss:$16 sps:$4 sm:$0xff]   ;;  %v8394_v24 = vcombine.high %v13223_v17, %v13228_v18 }
 0x217   :  { %7006 = vmatpush1.bf16.msra.mxu0 %v10518_v26  ;;  %7854 = vmatpush1.bf16.msra.mxu1 %v10521_v25  ;;  %v10602_v26 = vld [vmem:[%s14717_s1 + $0x1260] ss:$16 sps:$4 sm:$0xff]   ;;  %v10605_v25 = vld [vmem:[%s14717_s1 + $0x1268] ss:$16 sps:$4 sm:$0xff]  }
 0x218   :  { %7007 = vmatprep.subr.bf16.mxu0 %v10526_v27  ;;  %7855 = vmatprep.subr.bf16.mxu1 %v10529_v28  ;;  %v10610_v27 = vld [vmem:[%s14717_s1 + $0x1284] ss:$16 sps:$4 sm:$0xff]   ;;  %v10613_v28 = vld [vmem:[%s14717_s1 + $0x128c] ss:$16 sps:$4 sm:$0xff]  }
 0x21b   :  { %7008 = vmatpush1.bf16.msra.mxu0 %v10524_v29  ;;  %7856 = vmatpush1.bf16.msra.mxu1 %v10527_v30  ;;  %v10608_v29 = vld [vmem:[%s14717_s1 + $0x1280] ss:$16 sps:$4 sm:$0xff]   ;;  %v10611_v30 = vld [vmem:[%s14717_s1 + $0x1288] ss:$16 sps:$4 sm:$0xff]  }
 0x21c   :  { %7009 = vmatprep.subr.bf16.mxu0 %v10532_v31  ;;  %7857 = vmatprep.subr.bf16.mxu1 %v10535_v32  ;;  %v10616_v31 = vld [vmem:[%s14717_s1 + $0x12a4] ss:$16 sps:$4 sm:$0xff]   ;;  %v10619_v32 = vld [vmem:[%s14717_s1 + $0x12ac] ss:$16 sps:$4 sm:$0xff]  }
 0x21f   :  { %7010 = vmatpush1.bf16.msra.mxu0 %v10530_v34  ;;  %7858 = vmatpush1.bf16.msra.mxu1 %v10533_v36  ;;  %v10614_v34 = vld [vmem:[%s14717_s1 + $0x12a0] ss:$16 sps:$4 sm:$0xff]   ;;  %v10617_v36 = vld [vmem:[%s14717_s1 + $0x12a8] ss:$16 sps:$4 sm:$0xff]  }
 0x220   :  { %7011 = vmatprep.subr.bf16.mxu0 %v10538_v33  ;;  %7859 = vmatprep.subr.bf16.mxu1 %v10541_v35  ;;  %v10622_v33 = vld [vmem:[%s14717_s1 + $0x12c4] ss:$16 sps:$4 sm:$0xff]   ;;  %v10625_v35 = vld [vmem:[%s14717_s1 + $0x12cc] ss:$16 sps:$4 sm:$0xff]  }
 0x223   :  { %7012 = vmatpush1.bf16.msra.mxu0 %v10536_v37  ;;  %7860 = vmatpush1.bf16.msra.mxu1 %v10539_v38  ;;  %v10620_v37 = vld [vmem:[%s14717_s1 + $0x12c0] ss:$16 sps:$4 sm:$0xff]   ;;  %v10623_v38 = vld [vmem:[%s14717_s1 + $0x12c8] ss:$16 sps:$4 sm:$0xff]  }
 0x224   :  { %7013 = vmatprep.subr.bf16.mxu0 %v10544_v39  ;;  %7861 = vmatprep.subr.bf16.mxu1 %v10547_v40  ;;  %v10628_v39 = vld [vmem:[%s14717_s1 + $0x12e4] ss:$16 sps:$4 sm:$0xff]   ;;  %v10631_v40 = vld [vmem:[%s14717_s1 + $0x12ec] ss:$16 sps:$4 sm:$0xff]  }
 0x227   :  { %7014 = vmatpush1.bf16.msra.mxu0 %v10542_v42  ;;  %7862 = vmatpush1.bf16.msra.mxu1 %v10545_v44  ;;  %v10626_v42 = vld [vmem:[%s14717_s1 + $0x12e0] ss:$16 sps:$4 sm:$0xff]   ;;  %v10629_v44 = vld [vmem:[%s14717_s1 + $0x12e8] ss:$16 sps:$4 sm:$0xff]  }
 0x228   :  { %7015 = vmatprep.subr.bf16.mxu0 %v10550_v41  ;;  %7863 = vmatprep.subr.bf16.mxu1 %v10553_v43  ;;  %v10634_v41 = vld [vmem:[%s14717_s1 + $0x1304] ss:$16 sps:$4 sm:$0xff]   ;;  %v10637_v43 = vld [vmem:[%s14717_s1 + $0x130c] ss:$16 sps:$4 sm:$0xff]  }
 0x22b   :  { %7016 = vmatpush1.bf16.msra.mxu0 %v10548_v45  ;;  %7864 = vmatpush1.bf16.msra.mxu1 %v10551_v46  ;;  %v10632_v45 = vld [vmem:[%s14717_s1 + $0x1300] ss:$16 sps:$4 sm:$0xff]   ;;  %v10635_v46 = vld [vmem:[%s14717_s1 + $0x1308] ss:$16 sps:$4 sm:$0xff]  }
 0x22c   :  { %7017 = vmatprep.subr.bf16.mxu0 %v10556_v47  ;;  %7865 = vmatprep.subr.bf16.mxu1 %v10559_v48  ;;  %v10640_v47 = vld [vmem:[%s14717_s1 + $0x1324] ss:$16 sps:$4 sm:$0xff]   ;;  %v10643_v48 = vld [vmem:[%s14717_s1 + $0x132c] ss:$16 sps:$4 sm:$0xff]  }
 0x22f   :  { %7018 = vmatpush1.bf16.msra.mxu0 %v10554_v51  ;;  %7866 = vmatpush1.bf16.msra.mxu1 %v10557_v52  ;;  %v10638_v51 = vld [vmem:[%s14717_s1 + $0x1320] ss:$16 sps:$4 sm:$0xff]   ;;  %v10641_v52 = vld [vmem:[%s14717_s1 + $0x1328] ss:$16 sps:$4 sm:$0xff]  }
 0x230   :  { %7019 = vmatprep.subr.bf16.mxu0 %v10562_v49  ;;  %7867 = vmatprep.subr.bf16.mxu1 %v10565_v50  ;;  %v10646_v49 = vld [vmem:[%s14717_s1 + $0x1344] ss:$16 sps:$4 sm:$0xff]   ;;  %v10649_v50 = vld [vmem:[%s14717_s1 + $0x134c] ss:$16 sps:$4 sm:$0xff]  }
 0x233   :  { %7020 = vmatpush1.bf16.msra.mxu0 %v10560_v53  ;;  %7868 = vmatpush1.bf16.msra.mxu1 %v10563_v54  ;;  %v10644_v53 = vld [vmem:[%s14717_s1 + $0x1340] ss:$16 sps:$4 sm:$0xff]   ;;  %v10647_v54 = vld [vmem:[%s14717_s1 + $0x1348] ss:$16 sps:$4 sm:$0xff]  }
 0x234   :  { %7021 = vmatprep.subr.bf16.mxu0 %v10568_v55  ;;  %7869 = vmatprep.subr.bf16.mxu1 %v10571_v56  ;;  %v10652_v55 = vld [vmem:[%s14717_s1 + $0x1364] ss:$16 sps:$4 sm:$0xff]   ;;  %v10655_v56 = vld [vmem:[%s14717_s1 + $0x136c] ss:$16 sps:$4 sm:$0xff]  }
 0x237   :  { %7022 = vmatpush1.bf16.msra.mxu0 %v10566_v59  ;;  %7870 = vmatpush1.bf16.msra.mxu1 %v10569_v60  ;;  %v10650_v59 = vld [vmem:[%s14717_s1 + $0x1360] ss:$16 sps:$4 sm:$0xff]   ;;  %v10653_v60 = vld [vmem:[%s14717_s1 + $0x1368] ss:$16 sps:$4 sm:$0xff]  }
 0x238   :  { %7023 = vmatprep.subr.bf16.mxu0 %v10574_v57  ;;  %7871 = vmatprep.subr.bf16.mxu1 %v10577_v58  ;;  %v10658_v57 = vld [vmem:[%s14717_s1 + $0x1384] ss:$16 sps:$4 sm:$0xff]   ;;  %v10661_v58 = vld [vmem:[%s14717_s1 + $0x138c] ss:$16 sps:$4 sm:$0xff]  }
 0x23b   :  { %7024 = vmatpush1.bf16.msra.mxu0 %v10572_v61  ;;  %7872 = vmatpush1.bf16.msra.mxu1 %v10575_v62  ;;  %v10656_v61 = vld [vmem:[%s14717_s1 + $0x1380] ss:$16 sps:$4 sm:$0xff]   ;;  %v10659_v62 = vld [vmem:[%s14717_s1 + $0x1388] ss:$16 sps:$4 sm:$0xff]  }
 0x23c   :  { %7025 = vmatprep.subr.bf16.mxu0 %v10580_v63  ;;  %7873 = vmatprep.subr.bf16.mxu1 %v10583_v0  ;;  %v10664_v63 = vld [vmem:[%s14717_s1 + $0x13a4] ss:$16 sps:$4 sm:$0xff]   ;;  %v10667_v0 = vld [vmem:[%s14717_s1 + $0x13ac] ss:$16 sps:$4 sm:$0xff]  }
 0x23f   :  { %7026 = vmatpush1.bf16.msra.mxu0 %v10578_v3  ;;  %7874 = vmatpush1.bf16.msra.mxu1 %v10581_v4  ;;  %v10662_v3 = vld [vmem:[%s14717_s1 + $0x13a0] ss:$16 sps:$4 sm:$0xff]   ;;  %v10665_v4 = vld [vmem:[%s14717_s1 + $0x13a8] ss:$16 sps:$4 sm:$0xff]  }
 0x240   :  { %7048 = vmatprep.subr.bf16.mxu0 %v10586_v1  ;;  %7896 = vmatprep.subr.bf16.mxu1 %v10589_v2  ;;  %v10670_v1 = vld [vmem:[%s14717_s1 + $0x13c4] ss:$16 sps:$4 sm:$0xff]   ;;  %v10673_v2 = vld [vmem:[%s14717_s1 + $0x13cc] ss:$16 sps:$4 sm:$0xff]  }
 0x242   :  { %7028 = vmatmul.mubr.bf16.vlgmr.msra.gmra.mrb[0].mxu0 %v8391_v7  ;;  %7876 = vmatmul.mubr.bf16.vlgmr.msra.gmra.mrb[0].mxu1 %v8391_v7  ;;  %v10676_v7 = vld [vmem:[%s14717_s1 + $0x13e4] ss:$16 sps:$4 sm:$0xff]  }
 0x243   :  { %7049 = vmatpush1.bf16.msra.mxu0 %v10584_v8  ;;  %7897 = vmatpush1.bf16.msra.mxu1 %v10587_v11  ;;  %v10679_v8 = vld [vmem:[%s14717_s1 + $0x13ec] ss:$16 sps:$4 sm:$0xff]   ;;  %v10674_v11 = vld [vmem:[%s14717_s1 + $0x13e0] ss:$16 sps:$4 sm:$0xff]  }
 0x244   :  { %7050 = vmatprep.subr.bf16.mxu0 %v10592_v12  ;;  %7898 = vmatprep.subr.bf16.mxu1 %v10595_v9  ;;  %v10677_v12 = vld [vmem:[%s14717_s1 + $0x13e8] ss:$16 sps:$4 sm:$0xff]   ;;  %v10682_v9 = vld [vmem:[%s14717_s1 + $0x1404] ss:$16 sps:$4 sm:$0xff]  }
 0x245   :  { %7037 = vmatprep.mubr.bf16.mxu0 %v8424_v14  ;;  %7885 = vmatprep.mubr.bf16.mxu1 %v8424_v14  ;;  %v62_v14 = vld [vmem:[%s14718_s0 + $0x148] sm:$0xff] }
 0x247   :  { %7051 = vmatpush1.bf16.msra.mxu0 %v10590_v10  ;;  %7899 = vmatpush1.bf16.msra.mxu1 %v10593_v13  ;;  %v10685_v10 = vld [vmem:[%s14717_s1 + $0x140c] ss:$16 sps:$4 sm:$0xff]   ;;  %v8393_v13 = vcombine.low %v13223_v17, %v13228_v18  ;;  %v10688_v17 = vld [vmem:[%s14717_s1 + $0x1424] ss:$16 sps:$4 sm:$0xff]  }
 0x248   :  { %7052 = vmatprep.subr.bf16.mxu0 %v10598_v15  ;;  %7900 = vmatprep.subr.bf16.mxu1 %v10601_v16  ;;  %v78_v15 = vld [vmem:[%s14718_s0 + $0x1c8] sm:$0xff]  ;;  %v10680_v16 = vld [vmem:[%s14717_s1 + $0x1400] ss:$16 sps:$4 sm:$0xff]  }
 0x249   :  { %v10691_v18 = vld [vmem:[%s14717_s1 + $0x142c] ss:$16 sps:$4 sm:$0xff]  }
 0x24a   :  { %7038 = vmatmul.mubr.bf16.gmra.mrb[4].mxu0 %v8423_v19  ;;  %7886 = vmatmul.mubr.bf16.gmra.mrb[4].mxu1 %v8423_v19  ;;  %v10683_v19 = vld [vmem:[%s14717_s1 + $0x1408] ss:$16 sps:$4 sm:$0xff]  }
 0x24b   :  { %7053 = vmatpush1.bf16.msra.mxu0 %v10596_v20  ;;  %7901 = vmatpush1.bf16.msra.mxu1 %v10599_v21  ;;  %v8426_v20 = vcombine.high %v62_v14, %v78_v15  ;;  %v10686_v21 = vld [vmem:[%s14717_s1 + $0x1420] ss:$16 sps:$4 sm:$0xff]  }
 0x24c   :  { %7054 = vmatprep.subr.bf16.mxu0 %v10604_v22  ;;  %7902 = vmatprep.subr.bf16.mxu1 %v10607_v23  ;;  %v10689_v22 = vld [vmem:[%s14717_s1 + $0x1428] ss:$16 sps:$4 sm:$0xff]   ;;  %v10694_v23 = vld [vmem:[%s14717_s1 + $0x1444] ss:$16 sps:$4 sm:$0xff]  }
 0x24d   :  { %7080 = vmatprep.mubr.bf16.mxu0 %v8394_v24  ;;  %7928 = vmatprep.mubr.bf16.mxu1 %v8394_v24  ;;  %v10697_v24 = vld [vmem:[%s14717_s1 + $0x144c] ss:$16 sps:$4 sm:$0xff]  }
 0x24f   :  { %7055 = vmatpush1.bf16.msra.mxu0 %v10602_v26  ;;  %7903 = vmatpush1.bf16.msra.mxu1 %v10605_v25  ;;  %v8425_v26 = vcombine.low %v62_v14, %v78_v15  ;;  %v13435_v25 = vld [vmem:[%s14718_s0 + $0x50] sm:$0xff]  ;;  %v10767_v14 = vld [vmem:[%s14717_s1 + $0x15c8] ss:$16 sps:$4 sm:$0xff]  }
 0x250   :  { %7056 = vmatprep.subr.bf16.mxu0 %v10610_v27  ;;  %7904 = vmatprep.subr.bf16.mxu1 %v10613_v28  ;;  %v13440_v27 = vld [vmem:[%s14718_s0 + $0xd0] sm:$0xff] }
 0x251   :  { %v10692_v28 = vld [vmem:[%s14717_s1 + $0x1440] ss:$16 sps:$4 sm:$0xff]   ;;  %v10772_v15 = vld [vmem:[%s14717_s1 + $0x15e4] ss:$16 sps:$4 sm:$0xff]  }
 0x253   :  { %7057 = vmatpush1.bf16.msra.mxu0 %v10608_v29  ;;  %7905 = vmatpush1.bf16.msra.mxu1 %v10611_v30  ;;  %v10695_v29 = vld [vmem:[%s14717_s1 + $0x1448] ss:$16 sps:$4 sm:$0xff]   ;;  %v10700_v30 = vld [vmem:[%s14717_s1 + $0x1464] ss:$16 sps:$4 sm:$0xff]  }
 0x254   :  { %7058 = vmatprep.subr.bf16.mxu0 %v10616_v31  ;;  %7906 = vmatprep.subr.bf16.mxu1 %v10619_v32  ;;  %v10703_v31 = vld [vmem:[%s14717_s1 + $0x146c] ss:$16 sps:$4 sm:$0xff]   ;;  %v8396_v32 = vcombine.high %v13435_v25, %v13440_v27 }
 0x257   :  { %7059 = vmatpush1.bf16.msra.mxu0 %v10614_v34  ;;  %7907 = vmatpush1.bf16.msra.mxu1 %v10617_v36  ;;  %v10698_v34 = vld [vmem:[%s14717_s1 + $0x1460] ss:$16 sps:$4 sm:$0xff]   ;;  %v10701_v36 = vld [vmem:[%s14717_s1 + $0x1468] ss:$16 sps:$4 sm:$0xff]  }
 0x258   :  { %7060 = vmatprep.subr.bf16.mxu0 %v10622_v33  ;;  %7908 = vmatprep.subr.bf16.mxu1 %v10625_v35  ;;  %v10706_v33 = vld [vmem:[%s14717_s1 + $0x1484] ss:$16 sps:$4 sm:$0xff]   ;;  %v10709_v35 = vld [vmem:[%s14717_s1 + $0x148c] ss:$16 sps:$4 sm:$0xff]  }
 0x25b   :  { %7061 = vmatpush1.bf16.msra.mxu0 %v10620_v37  ;;  %7909 = vmatpush1.bf16.msra.mxu1 %v10623_v38  ;;  %v10704_v37 = vld [vmem:[%s14717_s1 + $0x1480] ss:$16 sps:$4 sm:$0xff]   ;;  %v10707_v38 = vld [vmem:[%s14717_s1 + $0x1488] ss:$16 sps:$4 sm:$0xff]  }
 0x25c   :  { %7062 = vmatprep.subr.bf16.mxu0 %v10628_v39  ;;  %7910 = vmatprep.subr.bf16.mxu1 %v10631_v40  ;;  %v10712_v39 = vld [vmem:[%s14717_s1 + $0x14a4] ss:$16 sps:$4 sm:$0xff]   ;;  %v10715_v40 = vld [vmem:[%s14717_s1 + $0x14ac] ss:$16 sps:$4 sm:$0xff]  }
 0x25f   :  { %7063 = vmatpush1.bf16.msra.mxu0 %v10626_v42  ;;  %7911 = vmatpush1.bf16.msra.mxu1 %v10629_v44  ;;  %v10710_v42 = vld [vmem:[%s14717_s1 + $0x14a0] ss:$16 sps:$4 sm:$0xff]   ;;  %v10713_v44 = vld [vmem:[%s14717_s1 + $0x14a8] ss:$16 sps:$4 sm:$0xff]  }
 0x260   :  { %7064 = vmatprep.subr.bf16.mxu0 %v10634_v41  ;;  %7912 = vmatprep.subr.bf16.mxu1 %v10637_v43  ;;  %v10718_v41 = vld [vmem:[%s14717_s1 + $0x14c4] ss:$16 sps:$4 sm:$0xff]   ;;  %v10721_v43 = vld [vmem:[%s14717_s1 + $0x14cc] ss:$16 sps:$4 sm:$0xff]  }
 0x263   :  { %7065 = vmatpush1.bf16.msra.mxu0 %v10632_v45  ;;  %7913 = vmatpush1.bf16.msra.mxu1 %v10635_v46  ;;  %v10716_v45 = vld [vmem:[%s14717_s1 + $0x14c0] ss:$16 sps:$4 sm:$0xff]   ;;  %v10719_v46 = vld [vmem:[%s14717_s1 + $0x14c8] ss:$16 sps:$4 sm:$0xff]  }
 0x264   :  { %7066 = vmatprep.subr.bf16.mxu0 %v10640_v47  ;;  %7914 = vmatprep.subr.bf16.mxu1 %v10643_v48  ;;  %v10724_v47 = vld [vmem:[%s14717_s1 + $0x14e4] ss:$16 sps:$4 sm:$0xff]   ;;  %v10727_v48 = vld [vmem:[%s14717_s1 + $0x14ec] ss:$16 sps:$4 sm:$0xff]  }
 0x267   :  { %7067 = vmatpush1.bf16.msra.mxu0 %v10638_v51  ;;  %7915 = vmatpush1.bf16.msra.mxu1 %v10641_v52  ;;  %v10722_v51 = vld [vmem:[%s14717_s1 + $0x14e0] ss:$16 sps:$4 sm:$0xff]   ;;  %v10725_v52 = vld [vmem:[%s14717_s1 + $0x14e8] ss:$16 sps:$4 sm:$0xff]  }
 0x268   :  { %7068 = vmatprep.subr.bf16.mxu0 %v10646_v49  ;;  %7916 = vmatprep.subr.bf16.mxu1 %v10649_v50  ;;  %v10730_v49 = vld [vmem:[%s14717_s1 + $0x1504] ss:$16 sps:$4 sm:$0xff]   ;;  %v10733_v50 = vld [vmem:[%s14717_s1 + $0x150c] ss:$16 sps:$4 sm:$0xff]  }
 0x26b   :  { %7069 = vmatpush1.bf16.msra.mxu0 %v10644_v53  ;;  %7917 = vmatpush1.bf16.msra.mxu1 %v10647_v54  ;;  %v10728_v53 = vld [vmem:[%s14717_s1 + $0x1500] ss:$16 sps:$4 sm:$0xff]   ;;  %v10731_v54 = vld [vmem:[%s14717_s1 + $0x1508] ss:$16 sps:$4 sm:$0xff]  }
 0x26c   :  { %7070 = vmatprep.subr.bf16.mxu0 %v10652_v55  ;;  %7918 = vmatprep.subr.bf16.mxu1 %v10655_v56  ;;  %v10736_v55 = vld [vmem:[%s14717_s1 + $0x1524] ss:$16 sps:$4 sm:$0xff]   ;;  %v10739_v56 = vld [vmem:[%s14717_s1 + $0x152c] ss:$16 sps:$4 sm:$0xff]  }
 0x26f   :  { %7071 = vmatpush1.bf16.msra.mxu0 %v10650_v59  ;;  %7919 = vmatpush1.bf16.msra.mxu1 %v10653_v60  ;;  %v10734_v59 = vld [vmem:[%s14717_s1 + $0x1520] ss:$16 sps:$4 sm:$0xff]   ;;  %v10737_v60 = vld [vmem:[%s14717_s1 + $0x1528] ss:$16 sps:$4 sm:$0xff]  }
 0x270   :  { %7072 = vmatprep.subr.bf16.mxu0 %v10658_v57  ;;  %7920 = vmatprep.subr.bf16.mxu1 %v10661_v58  ;;  %v10742_v57 = vld [vmem:[%s14717_s1 + $0x1544] ss:$16 sps:$4 sm:$0xff]   ;;  %v10745_v58 = vld [vmem:[%s14717_s1 + $0x154c] ss:$16 sps:$4 sm:$0xff]  }
 0x273   :  { %7073 = vmatpush1.bf16.msra.mxu0 %v10656_v61  ;;  %7921 = vmatpush1.bf16.msra.mxu1 %v10659_v62  ;;  %v10740_v61 = vld [vmem:[%s14717_s1 + $0x1540] ss:$16 sps:$4 sm:$0xff]   ;;  %v10743_v62 = vld [vmem:[%s14717_s1 + $0x1548] ss:$16 sps:$4 sm:$0xff]  }
 0x274   :  { %7074 = vmatprep.subr.bf16.mxu0 %v10664_v63  ;;  %7922 = vmatprep.subr.bf16.mxu1 %v10667_v0  ;;  %v10748_v63 = vld [vmem:[%s14717_s1 + $0x1564] ss:$16 sps:$4 sm:$0xff]   ;;  %v10751_v0 = vld [vmem:[%s14717_s1 + $0x156c] ss:$16 sps:$4 sm:$0xff]  }
 0x277   :  { %7075 = vmatpush1.bf16.msra.mxu0 %v10662_v3  ;;  %7923 = vmatpush1.bf16.msra.mxu1 %v10665_v4  ;;  %v10746_v3 = vld [vmem:[%s14717_s1 + $0x1560] ss:$16 sps:$4 sm:$0xff]   ;;  %v10749_v4 = vld [vmem:[%s14717_s1 + $0x1568] ss:$16 sps:$4 sm:$0xff]  }
 0x278   :  { %7076 = vmatprep.subr.bf16.mxu0 %v10670_v1  ;;  %7924 = vmatprep.subr.bf16.mxu1 %v10673_v2  ;;  %v10754_v1 = vld [vmem:[%s14717_s1 + $0x1584] ss:$16 sps:$4 sm:$0xff]   ;;  %v10757_v2 = vld [vmem:[%s14717_s1 + $0x158c] ss:$16 sps:$4 sm:$0xff]  }
 0x27b   :  { %7077 = vmatpush1.bf16.msra.mxu0 %v10668_v5  ;;  %7925 = vmatpush1.bf16.msra.mxu1 %v10671_v6  ;;  %v10752_v5 = vld [vmem:[%s14717_s1 + $0x1580] ss:$16 sps:$4 sm:$0xff]   ;;  %v10755_v6 = vld [vmem:[%s14717_s1 + $0x1588] ss:$16 sps:$4 sm:$0xff]  }
 0x27c   :  { %7078 = vmatprep.subr.bf16.mxu0 %v10676_v7  ;;  %7926 = vmatprep.subr.bf16.mxu1 %v10679_v8  ;;  %v10760_v7 = vld [vmem:[%s14717_s1 + $0x15a4] ss:$16 sps:$4 sm:$0xff]   ;;  %v10763_v8 = vld [vmem:[%s14717_s1 + $0x15ac] ss:$16 sps:$4 sm:$0xff]  }
 0x27f   :  { %7079 = vmatpush1.bf16.msra.mxu0 %v10674_v11  ;;  %7927 = vmatpush1.bf16.msra.mxu1 %v10677_v12  ;;  %v10758_v11 = vld [vmem:[%s14717_s1 + $0x15a0] ss:$16 sps:$4 sm:$0xff]   ;;  %v10761_v12 = vld [vmem:[%s14717_s1 + $0x15a8] ss:$16 sps:$4 sm:$0xff]  }
 0x280   :  { %7101 = vmatprep.subr.bf16.mxu0 %v10682_v9  ;;  %7949 = vmatprep.subr.bf16.mxu1 %v10685_v10  ;;  %v10766_v9 = vld [vmem:[%s14717_s1 + $0x15c4] ss:$16 sps:$4 sm:$0xff]   ;;  %v10769_v10 = vld [vmem:[%s14717_s1 + $0x15cc] ss:$16 sps:$4 sm:$0xff]  }
 0x282   :  { %7081 = vmatmul.mubr.bf16.vlgmr.msra.gmra.mrb[0].mxu0 %v8393_v13  ;;  %7929 = vmatmul.mubr.bf16.vlgmr.msra.gmra.mrb[0].mxu1 %v8393_v13  ;;  %v10764_v13 = vld [vmem:[%s14717_s1 + $0x15c0] ss:$16 sps:$4 sm:$0xff]  }
 0x283   :  { %7102 = vmatpush1.bf16.msra.mxu0 %v10680_v16  ;;  %7950 = vmatpush1.bf16.msra.mxu1 %v10683_v19  ;;  %v10775_v16 = vld [vmem:[%s14717_s1 + $0x15ec] ss:$16 sps:$4 sm:$0xff]   ;;  %v10770_v19 = vld [vmem:[%s14717_s1 + $0x15e0] ss:$16 sps:$4 sm:$0xff]  }
 0x284   :  { %7103 = vmatprep.subr.bf16.mxu0 %v10688_v17  ;;  %7951 = vmatprep.subr.bf16.mxu1 %v10691_v18  ;;  %v10773_v17 = vld [vmem:[%s14717_s1 + $0x15e8] ss:$16 sps:$4 sm:$0xff]   ;;  %v10778_v18 = vld [vmem:[%s14717_s1 + $0x1604] ss:$16 sps:$4 sm:$0xff]  }
 0x285   :  { %7090 = vmatprep.mubr.bf16.mxu0 %v8426_v20  ;;  %7938 = vmatprep.mubr.bf16.mxu1 %v8426_v20  ;;  %v10781_v20 = vld [vmem:[%s14717_s1 + $0x160c] ss:$16 sps:$4 sm:$0xff]  }
 0x287   :  { %7104 = vmatpush1.bf16.msra.mxu0 %v10686_v21  ;;  %7952 = vmatpush1.bf16.msra.mxu1 %v10689_v22  ;;  %v8395_v21 = vcombine.low %v13435_v25, %v13440_v27  ;;  %v63_v22 = vld [vmem:[%s14718_s0 + $0x150] sm:$0xff]  ;;  %v10787_v27 = vld [vmem:[%s14717_s1 + $0x162c] ss:$16 sps:$4 sm:$0xff]  }
 0x288   :  { %7105 = vmatprep.subr.bf16.mxu0 %v10694_v23  ;;  %7953 = vmatprep.subr.bf16.mxu1 %v10697_v24  ;;  %v79_v23 = vld [vmem:[%s14718_s0 + $0x1d0] sm:$0xff] }
 0x289   :  { %v10776_v24 = vld [vmem:[%s14717_s1 + $0x1600] ss:$16 sps:$4 sm:$0xff]   ;;  %v10784_v25 = vld [vmem:[%s14717_s1 + $0x1624] ss:$16 sps:$4 sm:$0xff]  }
 0x28a   :  { %7091 = vmatmul.mubr.bf16.gmra.mrb[4].mxu0 %v8425_v26  ;;  %7939 = vmatmul.mubr.bf16.gmra.mrb[4].mxu1 %v8425_v26  ;;  %v10779_v26 = vld [vmem:[%s14717_s1 + $0x1608] ss:$16 sps:$4 sm:$0xff]  }
 0x28b   :  { %7106 = vmatpush1.bf16.msra.mxu0 %v10692_v28  ;;  %7954 = vmatpush1.bf16.msra.mxu1 %v10695_v29  ;;  %v8428_v28 = vcombine.high %v63_v22, %v79_v23  ;;  %v10782_v29 = vld [vmem:[%s14717_s1 + $0x1620] ss:$16 sps:$4 sm:$0xff]  }
 0x28c   :  { %7107 = vmatprep.subr.bf16.mxu0 %v10700_v30  ;;  %7955 = vmatprep.subr.bf16.mxu1 %v10703_v31  ;;  %v10785_v30 = vld [vmem:[%s14717_s1 + $0x1628] ss:$16 sps:$4 sm:$0xff]   ;;  %v10790_v31 = vld [vmem:[%s14717_s1 + $0x1644] ss:$16 sps:$4 sm:$0xff]  }
 0x28d   :  { %7133 = vmatprep.mubr.bf16.mxu0 %v8396_v32  ;;  %7981 = vmatprep.mubr.bf16.mxu1 %v8396_v32  ;;  %v10793_v32 = vld [vmem:[%s14717_s1 + $0x164c] ss:$16 sps:$4 sm:$0xff]  }
 0x28f   :  { %7108 = vmatpush1.bf16.msra.mxu0 %v10698_v34  ;;  %7956 = vmatpush1.bf16.msra.mxu1 %v10701_v36  ;;  %v8427_v34 = vcombine.low %v63_v22, %v79_v23  ;;  %v13647_v36 = vld [vmem:[%s14718_s0 + $0x58] sm:$0xff]  ;;  %v10868_v23 = vld [vmem:[%s14717_s1 + $0x17e4] ss:$16 sps:$4 sm:$0xff]  }
 0x290   :  { %7109 = vmatprep.subr.bf16.mxu0 %v10706_v33  ;;  %7957 = vmatprep.subr.bf16.mxu1 %v10709_v35  ;;  %v13652_v33 = vld [vmem:[%s14718_s0 + $0xd8] sm:$0xff]  ;;  %v10788_v35 = vld [vmem:[%s14717_s1 + $0x1640] ss:$16 sps:$4 sm:$0xff]  }
 0x291   :  { %v10863_v22 = vld [vmem:[%s14717_s1 + $0x17c8] ss:$16 sps:$4 sm:$0xff]  }
 0x293   :  { %7110 = vmatpush1.bf16.msra.mxu0 %v10704_v37  ;;  %7958 = vmatpush1.bf16.msra.mxu1 %v10707_v38  ;;  %v10791_v37 = vld [vmem:[%s14717_s1 + $0x1648] ss:$16 sps:$4 sm:$0xff]   ;;  %v10796_v38 = vld [vmem:[%s14717_s1 + $0x1664] ss:$16 sps:$4 sm:$0xff]  }
 0x294   :  { %7111 = vmatprep.subr.bf16.mxu0 %v10712_v39  ;;  %7959 = vmatprep.subr.bf16.mxu1 %v10715_v40  ;;  %v10799_v39 = vld [vmem:[%s14717_s1 + $0x166c] ss:$16 sps:$4 sm:$0xff]   ;;  %v8398_v40 = vcombine.high %v13647_v36, %v13652_v33 }
 0x297   :  { %7112 = vmatpush1.bf16.msra.mxu0 %v10710_v42  ;;  %7960 = vmatpush1.bf16.msra.mxu1 %v10713_v44  ;;  %v10794_v42 = vld [vmem:[%s14717_s1 + $0x1660] ss:$16 sps:$4 sm:$0xff]   ;;  %v10797_v44 = vld [vmem:[%s14717_s1 + $0x1668] ss:$16 sps:$4 sm:$0xff]  }
 0x298   :  { %7113 = vmatprep.subr.bf16.mxu0 %v10718_v41  ;;  %7961 = vmatprep.subr.bf16.mxu1 %v10721_v43  ;;  %v10802_v41 = vld [vmem:[%s14717_s1 + $0x1684] ss:$16 sps:$4 sm:$0xff]   ;;  %v10805_v43 = vld [vmem:[%s14717_s1 + $0x168c] ss:$16 sps:$4 sm:$0xff]  }
 0x29b   :  { %7114 = vmatpush1.bf16.msra.mxu0 %v10716_v45  ;;  %7962 = vmatpush1.bf16.msra.mxu1 %v10719_v46  ;;  %v10800_v45 = vld [vmem:[%s14717_s1 + $0x1680] ss:$16 sps:$4 sm:$0xff]   ;;  %v10803_v46 = vld [vmem:[%s14717_s1 + $0x1688] ss:$16 sps:$4 sm:$0xff]  }
 0x29c   :  { %7115 = vmatprep.subr.bf16.mxu0 %v10724_v47  ;;  %7963 = vmatprep.subr.bf16.mxu1 %v10727_v48  ;;  %v10808_v47 = vld [vmem:[%s14717_s1 + $0x16a4] ss:$16 sps:$4 sm:$0xff]   ;;  %v10811_v48 = vld [vmem:[%s14717_s1 + $0x16ac] ss:$16 sps:$4 sm:$0xff]  }
 0x29f   :  { %7116 = vmatpush1.bf16.msra.mxu0 %v10722_v51  ;;  %7964 = vmatpush1.bf16.msra.mxu1 %v10725_v52  ;;  %v10806_v51 = vld [vmem:[%s14717_s1 + $0x16a0] ss:$16 sps:$4 sm:$0xff]   ;;  %v10809_v52 = vld [vmem:[%s14717_s1 + $0x16a8] ss:$16 sps:$4 sm:$0xff]  }
 0x2a0   :  { %7117 = vmatprep.subr.bf16.mxu0 %v10730_v49  ;;  %7965 = vmatprep.subr.bf16.mxu1 %v10733_v50  ;;  %v10814_v49 = vld [vmem:[%s14717_s1 + $0x16c4] ss:$16 sps:$4 sm:$0xff]   ;;  %v10817_v50 = vld [vmem:[%s14717_s1 + $0x16cc] ss:$16 sps:$4 sm:$0xff]  }
 0x2a3   :  { %7118 = vmatpush1.bf16.msra.mxu0 %v10728_v53  ;;  %7966 = vmatpush1.bf16.msra.mxu1 %v10731_v54  ;;  %v10812_v53 = vld [vmem:[%s14717_s1 + $0x16c0] ss:$16 sps:$4 sm:$0xff]   ;;  %v10815_v54 = vld [vmem:[%s14717_s1 + $0x16c8] ss:$16 sps:$4 sm:$0xff]  }
 0x2a4   :  { %7119 = vmatprep.subr.bf16.mxu0 %v10736_v55  ;;  %7967 = vmatprep.subr.bf16.mxu1 %v10739_v56  ;;  %v10820_v55 = vld [vmem:[%s14717_s1 + $0x16e4] ss:$16 sps:$4 sm:$0xff]   ;;  %v10823_v56 = vld [vmem:[%s14717_s1 + $0x16ec] ss:$16 sps:$4 sm:$0xff]  }
 0x2a7   :  { %7120 = vmatpush1.bf16.msra.mxu0 %v10734_v59  ;;  %7968 = vmatpush1.bf16.msra.mxu1 %v10737_v60  ;;  %v10818_v59 = vld [vmem:[%s14717_s1 + $0x16e0] ss:$16 sps:$4 sm:$0xff]   ;;  %v10821_v60 = vld [vmem:[%s14717_s1 + $0x16e8] ss:$16 sps:$4 sm:$0xff]  }
 0x2a8   :  { %7121 = vmatprep.subr.bf16.mxu0 %v10742_v57  ;;  %7969 = vmatprep.subr.bf16.mxu1 %v10745_v58  ;;  %v10826_v57 = vld [vmem:[%s14717_s1 + $0x1704] ss:$16 sps:$4 sm:$0xff]   ;;  %v10829_v58 = vld [vmem:[%s14717_s1 + $0x170c] ss:$16 sps:$4 sm:$0xff]  }
 0x2ab   :  { %7122 = vmatpush1.bf16.msra.mxu0 %v10740_v61  ;;  %7970 = vmatpush1.bf16.msra.mxu1 %v10743_v62  ;;  %v10824_v61 = vld [vmem:[%s14717_s1 + $0x1700] ss:$16 sps:$4 sm:$0xff]   ;;  %v10827_v62 = vld [vmem:[%s14717_s1 + $0x1708] ss:$16 sps:$4 sm:$0xff]  }
 0x2ac   :  { %7123 = vmatprep.subr.bf16.mxu0 %v10748_v63  ;;  %7971 = vmatprep.subr.bf16.mxu1 %v10751_v0  ;;  %v10832_v63 = vld [vmem:[%s14717_s1 + $0x1724] ss:$16 sps:$4 sm:$0xff]   ;;  %v10835_v0 = vld [vmem:[%s14717_s1 + $0x172c] ss:$16 sps:$4 sm:$0xff]  }
 0x2af   :  { %7124 = vmatpush1.bf16.msra.mxu0 %v10746_v3  ;;  %7972 = vmatpush1.bf16.msra.mxu1 %v10749_v4  ;;  %v10830_v3 = vld [vmem:[%s14717_s1 + $0x1720] ss:$16 sps:$4 sm:$0xff]   ;;  %v10833_v4 = vld [vmem:[%s14717_s1 + $0x1728] ss:$16 sps:$4 sm:$0xff]  }
 0x2b0   :  { %7125 = vmatprep.subr.bf16.mxu0 %v10754_v1  ;;  %7973 = vmatprep.subr.bf16.mxu1 %v10757_v2  ;;  %v10838_v1 = vld [vmem:[%s14717_s1 + $0x1744] ss:$16 sps:$4 sm:$0xff]   ;;  %v10841_v2 = vld [vmem:[%s14717_s1 + $0x174c] ss:$16 sps:$4 sm:$0xff]  }
 0x2b3   :  { %7126 = vmatpush1.bf16.msra.mxu0 %v10752_v5  ;;  %7974 = vmatpush1.bf16.msra.mxu1 %v10755_v6  ;;  %v10836_v5 = vld [vmem:[%s14717_s1 + $0x1740] ss:$16 sps:$4 sm:$0xff]   ;;  %v10839_v6 = vld [vmem:[%s14717_s1 + $0x1748] ss:$16 sps:$4 sm:$0xff]  }
 0x2b4   :  { %7127 = vmatprep.subr.bf16.mxu0 %v10760_v7  ;;  %7975 = vmatprep.subr.bf16.mxu1 %v10763_v8  ;;  %v10844_v7 = vld [vmem:[%s14717_s1 + $0x1764] ss:$16 sps:$4 sm:$0xff]   ;;  %v10847_v8 = vld [vmem:[%s14717_s1 + $0x176c] ss:$16 sps:$4 sm:$0xff]  }
 0x2b7   :  { %7128 = vmatpush1.bf16.msra.mxu0 %v10758_v11  ;;  %7976 = vmatpush1.bf16.msra.mxu1 %v10761_v12  ;;  %v10842_v11 = vld [vmem:[%s14717_s1 + $0x1760] ss:$16 sps:$4 sm:$0xff]   ;;  %v10845_v12 = vld [vmem:[%s14717_s1 + $0x1768] ss:$16 sps:$4 sm:$0xff]  }
 0x2b8   :  { %7129 = vmatprep.subr.bf16.mxu0 %v10766_v9  ;;  %7977 = vmatprep.subr.bf16.mxu1 %v10769_v10  ;;  %v10850_v9 = vld [vmem:[%s14717_s1 + $0x1784] ss:$16 sps:$4 sm:$0xff]   ;;  %v10853_v10 = vld [vmem:[%s14717_s1 + $0x178c] ss:$16 sps:$4 sm:$0xff]  }
 0x2bb   :  { %7130 = vmatpush1.bf16.msra.mxu0 %v10764_v13  ;;  %7978 = vmatpush1.bf16.msra.mxu1 %v10767_v14  ;;  %v10848_v13 = vld [vmem:[%s14717_s1 + $0x1780] ss:$16 sps:$4 sm:$0xff]   ;;  %v10851_v14 = vld [vmem:[%s14717_s1 + $0x1788] ss:$16 sps:$4 sm:$0xff]  }
 0x2bc   :  { %7131 = vmatprep.subr.bf16.mxu0 %v10772_v15  ;;  %7979 = vmatprep.subr.bf16.mxu1 %v10775_v16  ;;  %v10856_v15 = vld [vmem:[%s14717_s1 + $0x17a4] ss:$16 sps:$4 sm:$0xff]   ;;  %v10859_v16 = vld [vmem:[%s14717_s1 + $0x17ac] ss:$16 sps:$4 sm:$0xff]  }
 0x2bf   :  { %7132 = vmatpush1.bf16.msra.mxu0 %v10770_v19  ;;  %7980 = vmatpush1.bf16.msra.mxu1 %v10773_v17  ;;  %v10854_v19 = vld [vmem:[%s14717_s1 + $0x17a0] ss:$16 sps:$4 sm:$0xff]   ;;  %v10857_v17 = vld [vmem:[%s14717_s1 + $0x17a8] ss:$16 sps:$4 sm:$0xff]  }
 0x2c0   :  { %7154 = vmatprep.subr.bf16.mxu0 %v10778_v18  ;;  %8002 = vmatprep.subr.bf16.mxu1 %v10781_v20  ;;  %v10862_v18 = vld [vmem:[%s14717_s1 + $0x17c4] ss:$16 sps:$4 sm:$0xff]   ;;  %v10865_v20 = vld [vmem:[%s14717_s1 + $0x17cc] ss:$16 sps:$4 sm:$0xff]  }
 0x2c2   :  { %7134 = vmatmul.mubr.bf16.vlgmr.msra.gmra.mrb[0].mxu0 %v8395_v21  ;;  %7982 = vmatmul.mubr.bf16.vlgmr.msra.gmra.mrb[0].mxu1 %v8395_v21  ;;  %v10860_v21 = vld [vmem:[%s14717_s1 + $0x17c0] ss:$16 sps:$4 sm:$0xff]  }
 0x2c3   :  { %7155 = vmatpush1.bf16.msra.mxu0 %v10776_v24  ;;  %8003 = vmatpush1.bf16.msra.mxu1 %v10779_v26  ;;  %v10871_v24 = vld [vmem:[%s14717_s1 + $0x17ec] ss:$16 sps:$4 sm:$0xff]   ;;  %v10866_v26 = vld [vmem:[%s14717_s1 + $0x17e0] ss:$16 sps:$4 sm:$0xff]  }
 0x2c4   :  { %7156 = vmatprep.subr.bf16.mxu0 %v10784_v25  ;;  %8004 = vmatprep.subr.bf16.mxu1 %v10787_v27  ;;  %v10869_v25 = vld [vmem:[%s14717_s1 + $0x17e8] ss:$16 sps:$4 sm:$0xff]   ;;  %v10874_v27 = vld [vmem:[%s14717_s1 + $0x1804] ss:$16 sps:$4 sm:$0xff]  }
 0x2c5   :  { %7143 = vmatprep.mubr.bf16.mxu0 %v8428_v28  ;;  %7991 = vmatprep.mubr.bf16.mxu1 %v8428_v28  ;;  %v10877_v28 = vld [vmem:[%s14717_s1 + $0x180c] ss:$16 sps:$4 sm:$0xff]  }
 0x2c7   :  { %7157 = vmatpush1.bf16.msra.mxu0 %v10782_v29  ;;  %8005 = vmatpush1.bf16.msra.mxu1 %v10785_v30  ;;  %v8397_v29 = vcombine.low %v13647_v36, %v13652_v33  ;;  %v64_v30 = vld [vmem:[%s14718_s0 + $0x158] sm:$0xff]  ;;  %v10880_v36 = vld [vmem:[%s14717_s1 + $0x1824] ss:$16 sps:$4 sm:$0xff]  }
 0x2c8   :  { %7158 = vmatprep.subr.bf16.mxu0 %v10790_v31  ;;  %8006 = vmatprep.subr.bf16.mxu1 %v10793_v32  ;;  %v80_v31 = vld [vmem:[%s14718_s0 + $0x1d8] sm:$0xff]  ;;  %v10872_v32 = vld [vmem:[%s14717_s1 + $0x1800] ss:$16 sps:$4 sm:$0xff]  }
 0x2c9   :  { %v10883_v33 = vld [vmem:[%s14717_s1 + $0x182c] ss:$16 sps:$4 sm:$0xff]  }
 0x2ca   :  { %7144 = vmatmul.mubr.bf16.gmra.mrb[4].mxu0 %v8427_v34  ;;  %7992 = vmatmul.mubr.bf16.gmra.mrb[4].mxu1 %v8427_v34  ;;  %v10875_v34 = vld [vmem:[%s14717_s1 + $0x1808] ss:$16 sps:$4 sm:$0xff]  }
 0x2cb   :  { %7159 = vmatpush1.bf16.msra.mxu0 %v10788_v35  ;;  %8007 = vmatpush1.bf16.msra.mxu1 %v10791_v37  ;;  %v8430_v35 = vcombine.high %v64_v30, %v80_v31  ;;  %v10878_v37 = vld [vmem:[%s14717_s1 + $0x1820] ss:$16 sps:$4 sm:$0xff]  }
 0x2cc   :  { %7160 = vmatprep.subr.bf16.mxu0 %v10796_v38  ;;  %8008 = vmatprep.subr.bf16.mxu1 %v10799_v39  ;;  %v10881_v38 = vld [vmem:[%s14717_s1 + $0x1828] ss:$16 sps:$4 sm:$0xff]   ;;  %v10886_v39 = vld [vmem:[%s14717_s1 + $0x1844] ss:$16 sps:$4 sm:$0xff]  }
 0x2cd   :  { %7186 = vmatprep.mubr.bf16.mxu0 %v8398_v40  ;;  %8034 = vmatprep.mubr.bf16.mxu1 %v8398_v40  ;;  %v10889_v40 = vld [vmem:[%s14717_s1 + $0x184c] ss:$16 sps:$4 sm:$0xff]  }
 0x2cf   :  { %7161 = vmatpush1.bf16.msra.mxu0 %v10794_v42  ;;  %8009 = vmatpush1.bf16.msra.mxu1 %v10797_v44  ;;  %v8429_v42 = vcombine.low %v64_v30, %v80_v31  ;;  %v13859_v44 = vld [vmem:[%s14718_s0 + $0x60] sm:$0xff]  ;;  %v10959_v30 = vld [vmem:[%s14717_s1 + $0x19c8] ss:$16 sps:$4 sm:$0xff]  }
 0x2d0   :  { %7162 = vmatprep.subr.bf16.mxu0 %v10802_v41  ;;  %8010 = vmatprep.subr.bf16.mxu1 %v10805_v43  ;;  %v13864_v41 = vld [vmem:[%s14718_s0 + $0xe0] sm:$0xff] }
 0x2d1   :  { %v10884_v43 = vld [vmem:[%s14717_s1 + $0x1840] ss:$16 sps:$4 sm:$0xff]   ;;  %v10964_v31 = vld [vmem:[%s14717_s1 + $0x19e4] ss:$16 sps:$4 sm:$0xff]  }
 0x2d3   :  { %7163 = vmatpush1.bf16.msra.mxu0 %v10800_v45  ;;  %8011 = vmatpush1.bf16.msra.mxu1 %v10803_v46  ;;  %v10887_v45 = vld [vmem:[%s14717_s1 + $0x1848] ss:$16 sps:$4 sm:$0xff]   ;;  %v10892_v46 = vld [vmem:[%s14717_s1 + $0x1864] ss:$16 sps:$4 sm:$0xff]  }
 0x2d4   :  { %7164 = vmatprep.subr.bf16.mxu0 %v10808_v47  ;;  %8012 = vmatprep.subr.bf16.mxu1 %v10811_v48  ;;  %v10895_v47 = vld [vmem:[%s14717_s1 + $0x186c] ss:$16 sps:$4 sm:$0xff]   ;;  %v8400_v48 = vcombine.high %v13859_v44, %v13864_v41 }
 0x2d7   :  { %7165 = vmatpush1.bf16.msra.mxu0 %v10806_v51  ;;  %8013 = vmatpush1.bf16.msra.mxu1 %v10809_v52  ;;  %v10890_v51 = vld [vmem:[%s14717_s1 + $0x1860] ss:$16 sps:$4 sm:$0xff]   ;;  %v10893_v52 = vld [vmem:[%s14717_s1 + $0x1868] ss:$16 sps:$4 sm:$0xff]  }
 0x2d8   :  { %7166 = vmatprep.subr.bf16.mxu0 %v10814_v49  ;;  %8014 = vmatprep.subr.bf16.mxu1 %v10817_v50  ;;  %v10898_v49 = vld [vmem:[%s14717_s1 + $0x1884] ss:$16 sps:$4 sm:$0xff]   ;;  %v10901_v50 = vld [vmem:[%s14717_s1 + $0x188c] ss:$16 sps:$4 sm:$0xff]  }
 0x2db   :  { %7167 = vmatpush1.bf16.msra.mxu0 %v10812_v53  ;;  %8015 = vmatpush1.bf16.msra.mxu1 %v10815_v54  ;;  %v10896_v53 = vld [vmem:[%s14717_s1 + $0x1880] ss:$16 sps:$4 sm:$0xff]   ;;  %v10899_v54 = vld [vmem:[%s14717_s1 + $0x1888] ss:$16 sps:$4 sm:$0xff]  }
 0x2dc   :  { %7168 = vmatprep.subr.bf16.mxu0 %v10820_v55  ;;  %8016 = vmatprep.subr.bf16.mxu1 %v10823_v56  ;;  %v10904_v55 = vld [vmem:[%s14717_s1 + $0x18a4] ss:$16 sps:$4 sm:$0xff]   ;;  %v10907_v56 = vld [vmem:[%s14717_s1 + $0x18ac] ss:$16 sps:$4 sm:$0xff]  }
 0x2df   :  { %7169 = vmatpush1.bf16.msra.mxu0 %v10818_v59  ;;  %8017 = vmatpush1.bf16.msra.mxu1 %v10821_v60  ;;  %v10902_v59 = vld [vmem:[%s14717_s1 + $0x18a0] ss:$16 sps:$4 sm:$0xff]   ;;  %v10905_v60 = vld [vmem:[%s14717_s1 + $0x18a8] ss:$16 sps:$4 sm:$0xff]  }
 0x2e0   :  { %7170 = vmatprep.subr.bf16.mxu0 %v10826_v57  ;;  %8018 = vmatprep.subr.bf16.mxu1 %v10829_v58  ;;  %v10910_v57 = vld [vmem:[%s14717_s1 + $0x18c4] ss:$16 sps:$4 sm:$0xff]   ;;  %v10913_v58 = vld [vmem:[%s14717_s1 + $0x18cc] ss:$16 sps:$4 sm:$0xff]  }
 0x2e3   :  { %7171 = vmatpush1.bf16.msra.mxu0 %v10824_v61  ;;  %8019 = vmatpush1.bf16.msra.mxu1 %v10827_v62  ;;  %v10908_v61 = vld [vmem:[%s14717_s1 + $0x18c0] ss:$16 sps:$4 sm:$0xff]   ;;  %v10911_v62 = vld [vmem:[%s14717_s1 + $0x18c8] ss:$16 sps:$4 sm:$0xff]  }
 0x2e4   :  { %7172 = vmatprep.subr.bf16.mxu0 %v10832_v63  ;;  %8020 = vmatprep.subr.bf16.mxu1 %v10835_v0  ;;  %v10916_v63 = vld [vmem:[%s14717_s1 + $0x18e4] ss:$16 sps:$4 sm:$0xff]   ;;  %v10919_v0 = vld [vmem:[%s14717_s1 + $0x18ec] ss:$16 sps:$4 sm:$0xff]  }
 0x2e7   :  { %7173 = vmatpush1.bf16.msra.mxu0 %v10830_v3  ;;  %8021 = vmatpush1.bf16.msra.mxu1 %v10833_v4  ;;  %v10914_v3 = vld [vmem:[%s14717_s1 + $0x18e0] ss:$16 sps:$4 sm:$0xff]   ;;  %v10917_v4 = vld [vmem:[%s14717_s1 + $0x18e8] ss:$16 sps:$4 sm:$0xff]  }
 0x2e8   :  { %7174 = vmatprep.subr.bf16.mxu0 %v10838_v1  ;;  %8022 = vmatprep.subr.bf16.mxu1 %v10841_v2  ;;  %v10922_v1 = vld [vmem:[%s14717_s1 + $0x1904] ss:$16 sps:$4 sm:$0xff]   ;;  %v10925_v2 = vld [vmem:[%s14717_s1 + $0x190c] ss:$16 sps:$4 sm:$0xff]  }
 0x2eb   :  { %7175 = vmatpush1.bf16.msra.mxu0 %v10836_v5  ;;  %8023 = vmatpush1.bf16.msra.mxu1 %v10839_v6  ;;  %v10920_v5 = vld [vmem:[%s14717_s1 + $0x1900] ss:$16 sps:$4 sm:$0xff]   ;;  %v10923_v6 = vld [vmem:[%s14717_s1 + $0x1908] ss:$16 sps:$4 sm:$0xff]  }
 0x2ec   :  { %7176 = vmatprep.subr.bf16.mxu0 %v10844_v7  ;;  %8024 = vmatprep.subr.bf16.mxu1 %v10847_v8  ;;  %v10928_v7 = vld [vmem:[%s14717_s1 + $0x1924] ss:$16 sps:$4 sm:$0xff]   ;;  %v10931_v8 = vld [vmem:[%s14717_s1 + $0x192c] ss:$16 sps:$4 sm:$0xff]  }
 0x2ef   :  { %7177 = vmatpush1.bf16.msra.mxu0 %v10842_v11  ;;  %8025 = vmatpush1.bf16.msra.mxu1 %v10845_v12  ;;  %v10926_v11 = vld [vmem:[%s14717_s1 + $0x1920] ss:$16 sps:$4 sm:$0xff]   ;;  %v10929_v12 = vld [vmem:[%s14717_s1 + $0x1928] ss:$16 sps:$4 sm:$0xff]  }
 0x2f0   :  { %7178 = vmatprep.subr.bf16.mxu0 %v10850_v9  ;;  %8026 = vmatprep.subr.bf16.mxu1 %v10853_v10  ;;  %v10934_v9 = vld [vmem:[%s14717_s1 + $0x1944] ss:$16 sps:$4 sm:$0xff]   ;;  %v10937_v10 = vld [vmem:[%s14717_s1 + $0x194c] ss:$16 sps:$4 sm:$0xff]  }
 0x2f3   :  { %7179 = vmatpush1.bf16.msra.mxu0 %v10848_v13  ;;  %8027 = vmatpush1.bf16.msra.mxu1 %v10851_v14  ;;  %v10932_v13 = vld [vmem:[%s14717_s1 + $0x1940] ss:$16 sps:$4 sm:$0xff]   ;;  %v10935_v14 = vld [vmem:[%s14717_s1 + $0x1948] ss:$16 sps:$4 sm:$0xff]  }
 0x2f4   :  { %7180 = vmatprep.subr.bf16.mxu0 %v10856_v15  ;;  %8028 = vmatprep.subr.bf16.mxu1 %v10859_v16  ;;  %v10940_v15 = vld [vmem:[%s14717_s1 + $0x1964] ss:$16 sps:$4 sm:$0xff]   ;;  %v10943_v16 = vld [vmem:[%s14717_s1 + $0x196c] ss:$16 sps:$4 sm:$0xff]  }
 0x2f7   :  { %7181 = vmatpush1.bf16.msra.mxu0 %v10854_v19  ;;  %8029 = vmatpush1.bf16.msra.mxu1 %v10857_v17  ;;  %v10938_v19 = vld [vmem:[%s14717_s1 + $0x1960] ss:$16 sps:$4 sm:$0xff]   ;;  %v10941_v17 = vld [vmem:[%s14717_s1 + $0x1968] ss:$16 sps:$4 sm:$0xff]  }
 0x2f8   :  { %7182 = vmatprep.subr.bf16.mxu0 %v10862_v18  ;;  %8030 = vmatprep.subr.bf16.mxu1 %v10865_v20  ;;  %v10946_v18 = vld [vmem:[%s14717_s1 + $0x1984] ss:$16 sps:$4 sm:$0xff]   ;;  %v10949_v20 = vld [vmem:[%s14717_s1 + $0x198c] ss:$16 sps:$4 sm:$0xff]  }
 0x2fb   :  { %7183 = vmatpush1.bf16.msra.mxu0 %v10860_v21  ;;  %8031 = vmatpush1.bf16.msra.mxu1 %v10863_v22  ;;  %v10944_v21 = vld [vmem:[%s14717_s1 + $0x1980] ss:$16 sps:$4 sm:$0xff]   ;;  %v10947_v22 = vld [vmem:[%s14717_s1 + $0x1988] ss:$16 sps:$4 sm:$0xff]  }
 0x2fc   :  { %7184 = vmatprep.subr.bf16.mxu0 %v10868_v23  ;;  %8032 = vmatprep.subr.bf16.mxu1 %v10871_v24  ;;  %v10952_v23 = vld [vmem:[%s14717_s1 + $0x19a4] ss:$16 sps:$4 sm:$0xff]   ;;  %v10955_v24 = vld [vmem:[%s14717_s1 + $0x19ac] ss:$16 sps:$4 sm:$0xff]  }
 0x2ff   :  { %7185 = vmatpush1.bf16.msra.mxu0 %v10866_v26  ;;  %8033 = vmatpush1.bf16.msra.mxu1 %v10869_v25  ;;  %v10950_v26 = vld [vmem:[%s14717_s1 + $0x19a0] ss:$16 sps:$4 sm:$0xff]   ;;  %v10953_v25 = vld [vmem:[%s14717_s1 + $0x19a8] ss:$16 sps:$4 sm:$0xff]  }
 0x300   :  { %7207 = vmatprep.subr.bf16.mxu0 %v10874_v27  ;;  %8055 = vmatprep.subr.bf16.mxu1 %v10877_v28  ;;  %v10958_v27 = vld [vmem:[%s14717_s1 + $0x19c4] ss:$16 sps:$4 sm:$0xff]   ;;  %v10961_v28 = vld [vmem:[%s14717_s1 + $0x19cc] ss:$16 sps:$4 sm:$0xff]  }
 0x302   :  { %7187 = vmatmul.mubr.bf16.vlgmr.msra.gmra.mrb[0].mxu0 %v8397_v29  ;;  %8035 = vmatmul.mubr.bf16.vlgmr.msra.gmra.mrb[0].mxu1 %v8397_v29  ;;  %v10956_v29 = vld [vmem:[%s14717_s1 + $0x19c0] ss:$16 sps:$4 sm:$0xff]  }
 0x303   :  { %7208 = vmatpush1.bf16.msra.mxu0 %v10872_v32  ;;  %8056 = vmatpush1.bf16.msra.mxu1 %v10875_v34  ;;  %v10967_v32 = vld [vmem:[%s14717_s1 + $0x19ec] ss:$16 sps:$4 sm:$0xff]   ;;  %v10962_v34 = vld [vmem:[%s14717_s1 + $0x19e0] ss:$16 sps:$4 sm:$0xff]  }
 0x304   :  { %7209 = vmatprep.subr.bf16.mxu0 %v10880_v36  ;;  %8057 = vmatprep.subr.bf16.mxu1 %v10883_v33  ;;  %v10965_v36 = vld [vmem:[%s14717_s1 + $0x19e8] ss:$16 sps:$4 sm:$0xff]   ;;  %v10970_v33 = vld [vmem:[%s14717_s1 + $0x1a04] ss:$16 sps:$4 sm:$0xff]  }
 0x305   :  { %7196 = vmatprep.mubr.bf16.mxu0 %v8430_v35  ;;  %8044 = vmatprep.mubr.bf16.mxu1 %v8430_v35  ;;  %v10973_v35 = vld [vmem:[%s14717_s1 + $0x1a0c] ss:$16 sps:$4 sm:$0xff]  }
 0x307   :  { %7210 = vmatpush1.bf16.msra.mxu0 %v10878_v37  ;;  %8058 = vmatpush1.bf16.msra.mxu1 %v10881_v38  ;;  %v8399_v37 = vcombine.low %v13859_v44, %v13864_v41  ;;  %v65_v38 = vld [vmem:[%s14718_s0 + $0x160] sm:$0xff]  ;;  %v10979_v41 = vld [vmem:[%s14717_s1 + $0x1a2c] ss:$16 sps:$4 sm:$0xff]  }
 0x308   :  { %7211 = vmatprep.subr.bf16.mxu0 %v10886_v39  ;;  %8059 = vmatprep.subr.bf16.mxu1 %v10889_v40  ;;  %v81_v39 = vld [vmem:[%s14718_s0 + $0x1e0] sm:$0xff] }
 0x309   :  { %v10968_v40 = vld [vmem:[%s14717_s1 + $0x1a00] ss:$16 sps:$4 sm:$0xff]   ;;  %v10976_v44 = vld [vmem:[%s14717_s1 + $0x1a24] ss:$16 sps:$4 sm:$0xff]  }
 0x30a   :  { %7197 = vmatmul.mubr.bf16.gmra.mrb[4].mxu0 %v8429_v42  ;;  %8045 = vmatmul.mubr.bf16.gmra.mrb[4].mxu1 %v8429_v42  ;;  %v10971_v42 = vld [vmem:[%s14717_s1 + $0x1a08] ss:$16 sps:$4 sm:$0xff]  }
 0x30b   :  { %7212 = vmatpush1.bf16.msra.mxu0 %v10884_v43  ;;  %8060 = vmatpush1.bf16.msra.mxu1 %v10887_v45  ;;  %v8432_v43 = vcombine.high %v65_v38, %v81_v39  ;;  %v10974_v45 = vld [vmem:[%s14717_s1 + $0x1a20] ss:$16 sps:$4 sm:$0xff]  }
 0x30c   :  { %7213 = vmatprep.subr.bf16.mxu0 %v10892_v46  ;;  %8061 = vmatprep.subr.bf16.mxu1 %v10895_v47  ;;  %v10977_v46 = vld [vmem:[%s14717_s1 + $0x1a28] ss:$16 sps:$4 sm:$0xff]   ;;  %v10982_v47 = vld [vmem:[%s14717_s1 + $0x1a44] ss:$16 sps:$4 sm:$0xff]  }
 0x30d   :  { %7239 = vmatprep.mubr.bf16.mxu0 %v8400_v48  ;;  %8087 = vmatprep.mubr.bf16.mxu1 %v8400_v48  ;;  %v10985_v48 = vld [vmem:[%s14717_s1 + $0x1a4c] ss:$16 sps:$4 sm:$0xff]  }
 0x30f   :  { %7214 = vmatpush1.bf16.msra.mxu0 %v10890_v51  ;;  %8062 = vmatpush1.bf16.msra.mxu1 %v10893_v52  ;;  %v8431_v51 = vcombine.low %v65_v38, %v81_v39  ;;  %v14071_v52 = vld [vmem:[%s14718_s0 + $0x68] sm:$0xff]  ;;  %v11060_v39 = vld [vmem:[%s14717_s1 + $0x1be4] ss:$16 sps:$4 sm:$0xff]  }
 0x310   :  { %7215 = vmatprep.subr.bf16.mxu0 %v10898_v49  ;;  %8063 = vmatprep.subr.bf16.mxu1 %v10901_v50  ;;  %v14076_v49 = vld [vmem:[%s14718_s0 + $0xe8] sm:$0xff]  ;;  %v10980_v50 = vld [vmem:[%s14717_s1 + $0x1a40] ss:$16 sps:$4 sm:$0xff]  }
 0x311   :  { %v11055_v38 = vld [vmem:[%s14717_s1 + $0x1bc8] ss:$16 sps:$4 sm:$0xff]  }
 0x313   :  { %7216 = vmatpush1.bf16.msra.mxu0 %v10896_v53  ;;  %8064 = vmatpush1.bf16.msra.mxu1 %v10899_v54  ;;  %v10983_v53 = vld [vmem:[%s14717_s1 + $0x1a48] ss:$16 sps:$4 sm:$0xff]   ;;  %v10988_v54 = vld [vmem:[%s14717_s1 + $0x1a64] ss:$16 sps:$4 sm:$0xff]  }
 0x314   :  { %7217 = vmatprep.subr.bf16.mxu0 %v10904_v55  ;;  %8065 = vmatprep.subr.bf16.mxu1 %v10907_v56  ;;  %v10991_v55 = vld [vmem:[%s14717_s1 + $0x1a6c] ss:$16 sps:$4 sm:$0xff]   ;;  %v8402_v56 = vcombine.high %v14071_v52, %v14076_v49 }
 0x317   :  { %7218 = vmatpush1.bf16.msra.mxu0 %v10902_v59  ;;  %8066 = vmatpush1.bf16.msra.mxu1 %v10905_v60  ;;  %v10986_v59 = vld [vmem:[%s14717_s1 + $0x1a60] ss:$16 sps:$4 sm:$0xff]   ;;  %v10989_v60 = vld [vmem:[%s14717_s1 + $0x1a68] ss:$16 sps:$4 sm:$0xff]  }
 0x318   :  { %7219 = vmatprep.subr.bf16.mxu0 %v10910_v57  ;;  %8067 = vmatprep.subr.bf16.mxu1 %v10913_v58  ;;  %v10994_v57 = vld [vmem:[%s14717_s1 + $0x1a84] ss:$16 sps:$4 sm:$0xff]   ;;  %v10997_v58 = vld [vmem:[%s14717_s1 + $0x1a8c] ss:$16 sps:$4 sm:$0xff]  }
 0x31b   :  { %7220 = vmatpush1.bf16.msra.mxu0 %v10908_v61  ;;  %8068 = vmatpush1.bf16.msra.mxu1 %v10911_v62  ;;  %v10992_v61 = vld [vmem:[%s14717_s1 + $0x1a80] ss:$16 sps:$4 sm:$0xff]   ;;  %v10995_v62 = vld [vmem:[%s14717_s1 + $0x1a88] ss:$16 sps:$4 sm:$0xff]  }
 0x31c   :  { %7221 = vmatprep.subr.bf16.mxu0 %v10916_v63  ;;  %8069 = vmatprep.subr.bf16.mxu1 %v10919_v0  ;;  %v11000_v63 = vld [vmem:[%s14717_s1 + $0x1aa4] ss:$16 sps:$4 sm:$0xff]   ;;  %v11003_v0 = vld [vmem:[%s14717_s1 + $0x1aac] ss:$16 sps:$4 sm:$0xff]  }
 0x31f   :  { %7222 = vmatpush1.bf16.msra.mxu0 %v10914_v3  ;;  %8070 = vmatpush1.bf16.msra.mxu1 %v10917_v4  ;;  %v10998_v3 = vld [vmem:[%s14717_s1 + $0x1aa0] ss:$16 sps:$4 sm:$0xff]   ;;  %v11001_v4 = vld [vmem:[%s14717_s1 + $0x1aa8] ss:$16 sps:$4 sm:$0xff]  }
 0x320   :  { %7223 = vmatprep.subr.bf16.mxu0 %v10922_v1  ;;  %8071 = vmatprep.subr.bf16.mxu1 %v10925_v2  ;;  %v11006_v1 = vld [vmem:[%s14717_s1 + $0x1ac4] ss:$16 sps:$4 sm:$0xff]   ;;  %v11009_v2 = vld [vmem:[%s14717_s1 + $0x1acc] ss:$16 sps:$4 sm:$0xff]  }
 0x323   :  { %7224 = vmatpush1.bf16.msra.mxu0 %v10920_v5  ;;  %8072 = vmatpush1.bf16.msra.mxu1 %v10923_v6  ;;  %v11004_v5 = vld [vmem:[%s14717_s1 + $0x1ac0] ss:$16 sps:$4 sm:$0xff]   ;;  %v11007_v6 = vld [vmem:[%s14717_s1 + $0x1ac8] ss:$16 sps:$4 sm:$0xff]  }
 0x324   :  { %7225 = vmatprep.subr.bf16.mxu0 %v10928_v7  ;;  %8073 = vmatprep.subr.bf16.mxu1 %v10931_v8  ;;  %v11012_v7 = vld [vmem:[%s14717_s1 + $0x1ae4] ss:$16 sps:$4 sm:$0xff]   ;;  %v11015_v8 = vld [vmem:[%s14717_s1 + $0x1aec] ss:$16 sps:$4 sm:$0xff]  }
 0x327   :  { %7226 = vmatpush1.bf16.msra.mxu0 %v10926_v11  ;;  %8074 = vmatpush1.bf16.msra.mxu1 %v10929_v12  ;;  %v11010_v11 = vld [vmem:[%s14717_s1 + $0x1ae0] ss:$16 sps:$4 sm:$0xff]   ;;  %v11013_v12 = vld [vmem:[%s14717_s1 + $0x1ae8] ss:$16 sps:$4 sm:$0xff]  }
 0x328   :  { %7227 = vmatprep.subr.bf16.mxu0 %v10934_v9  ;;  %8075 = vmatprep.subr.bf16.mxu1 %v10937_v10  ;;  %v11018_v9 = vld [vmem:[%s14717_s1 + $0x1b04] ss:$16 sps:$4 sm:$0xff]   ;;  %v11021_v10 = vld [vmem:[%s14717_s1 + $0x1b0c] ss:$16 sps:$4 sm:$0xff]  }
 0x32b   :  { %7228 = vmatpush1.bf16.msra.mxu0 %v10932_v13  ;;  %8076 = vmatpush1.bf16.msra.mxu1 %v10935_v14  ;;  %v11016_v13 = vld [vmem:[%s14717_s1 + $0x1b00] ss:$16 sps:$4 sm:$0xff]   ;;  %v11019_v14 = vld [vmem:[%s14717_s1 + $0x1b08] ss:$16 sps:$4 sm:$0xff]  }
 0x32c   :  { %7229 = vmatprep.subr.bf16.mxu0 %v10940_v15  ;;  %8077 = vmatprep.subr.bf16.mxu1 %v10943_v16  ;;  %v11024_v15 = vld [vmem:[%s14717_s1 + $0x1b24] ss:$16 sps:$4 sm:$0xff]   ;;  %v11027_v16 = vld [vmem:[%s14717_s1 + $0x1b2c] ss:$16 sps:$4 sm:$0xff]  }
 0x32f   :  { %7230 = vmatpush1.bf16.msra.mxu0 %v10938_v19  ;;  %8078 = vmatpush1.bf16.msra.mxu1 %v10941_v17  ;;  %v11022_v19 = vld [vmem:[%s14717_s1 + $0x1b20] ss:$16 sps:$4 sm:$0xff]   ;;  %v11025_v17 = vld [vmem:[%s14717_s1 + $0x1b28] ss:$16 sps:$4 sm:$0xff]  }
 0x330   :  { %7231 = vmatprep.subr.bf16.mxu0 %v10946_v18  ;;  %8079 = vmatprep.subr.bf16.mxu1 %v10949_v20  ;;  %v11030_v18 = vld [vmem:[%s14717_s1 + $0x1b44] ss:$16 sps:$4 sm:$0xff]   ;;  %v11033_v20 = vld [vmem:[%s14717_s1 + $0x1b4c] ss:$16 sps:$4 sm:$0xff]  }
 0x333   :  { %7232 = vmatpush1.bf16.msra.mxu0 %v10944_v21  ;;  %8080 = vmatpush1.bf16.msra.mxu1 %v10947_v22  ;;  %v11028_v21 = vld [vmem:[%s14717_s1 + $0x1b40] ss:$16 sps:$4 sm:$0xff]   ;;  %v11031_v22 = vld [vmem:[%s14717_s1 + $0x1b48] ss:$16 sps:$4 sm:$0xff]  }
 0x334   :  { %7233 = vmatprep.subr.bf16.mxu0 %v10952_v23  ;;  %8081 = vmatprep.subr.bf16.mxu1 %v10955_v24  ;;  %v11036_v23 = vld [vmem:[%s14717_s1 + $0x1b64] ss:$16 sps:$4 sm:$0xff]   ;;  %v11039_v24 = vld [vmem:[%s14717_s1 + $0x1b6c] ss:$16 sps:$4 sm:$0xff]  }
 0x337   :  { %7234 = vmatpush1.bf16.msra.mxu0 %v10950_v26  ;;  %8082 = vmatpush1.bf16.msra.mxu1 %v10953_v25  ;;  %v11034_v26 = vld [vmem:[%s14717_s1 + $0x1b60] ss:$16 sps:$4 sm:$0xff]   ;;  %v11037_v25 = vld [vmem:[%s14717_s1 + $0x1b68] ss:$16 sps:$4 sm:$0xff]  }
 0x338   :  { %7235 = vmatprep.subr.bf16.mxu0 %v10958_v27  ;;  %8083 = vmatprep.subr.bf16.mxu1 %v10961_v28  ;;  %v11042_v27 = vld [vmem:[%s14717_s1 + $0x1b84] ss:$16 sps:$4 sm:$0xff]   ;;  %v11045_v28 = vld [vmem:[%s14717_s1 + $0x1b8c] ss:$16 sps:$4 sm:$0xff]  }
 0x33b   :  { %7236 = vmatpush1.bf16.msra.mxu0 %v10956_v29  ;;  %8084 = vmatpush1.bf16.msra.mxu1 %v10959_v30  ;;  %v11040_v29 = vld [vmem:[%s14717_s1 + $0x1b80] ss:$16 sps:$4 sm:$0xff]   ;;  %v11043_v30 = vld [vmem:[%s14717_s1 + $0x1b88] ss:$16 sps:$4 sm:$0xff]  }
 0x33c   :  { %7237 = vmatprep.subr.bf16.mxu0 %v10964_v31  ;;  %8085 = vmatprep.subr.bf16.mxu1 %v10967_v32  ;;  %v11048_v31 = vld [vmem:[%s14717_s1 + $0x1ba4] ss:$16 sps:$4 sm:$0xff]   ;;  %v11051_v32 = vld [vmem:[%s14717_s1 + $0x1bac] ss:$16 sps:$4 sm:$0xff]  }
 0x33f   :  { %7238 = vmatpush1.bf16.msra.mxu0 %v10962_v34  ;;  %8086 = vmatpush1.bf16.msra.mxu1 %v10965_v36  ;;  %v11046_v34 = vld [vmem:[%s14717_s1 + $0x1ba0] ss:$16 sps:$4 sm:$0xff]   ;;  %v11049_v36 = vld [vmem:[%s14717_s1 + $0x1ba8] ss:$16 sps:$4 sm:$0xff]  }
 0x340   :  { %7260 = vmatprep.subr.bf16.mxu0 %v10970_v33  ;;  %8108 = vmatprep.subr.bf16.mxu1 %v10973_v35  ;;  %v11054_v33 = vld [vmem:[%s14717_s1 + $0x1bc4] ss:$16 sps:$4 sm:$0xff]   ;;  %v11057_v35 = vld [vmem:[%s14717_s1 + $0x1bcc] ss:$16 sps:$4 sm:$0xff]  }
 0x342   :  { %7240 = vmatmul.mubr.bf16.vlgmr.msra.gmra.mrb[0].mxu0 %v8399_v37  ;;  %8088 = vmatmul.mubr.bf16.vlgmr.msra.gmra.mrb[0].mxu1 %v8399_v37  ;;  %v11052_v37 = vld [vmem:[%s14717_s1 + $0x1bc0] ss:$16 sps:$4 sm:$0xff]  }
 0x343   :  { %7261 = vmatpush1.bf16.msra.mxu0 %v10968_v40  ;;  %8109 = vmatpush1.bf16.msra.mxu1 %v10971_v42  ;;  %v11063_v40 = vld [vmem:[%s14717_s1 + $0x1bec] ss:$16 sps:$4 sm:$0xff]   ;;  %v11058_v42 = vld [vmem:[%s14717_s1 + $0x1be0] ss:$16 sps:$4 sm:$0xff]  }
 0x344   :  { %7262 = vmatprep.subr.bf16.mxu0 %v10976_v44  ;;  %8110 = vmatprep.subr.bf16.mxu1 %v10979_v41  ;;  %v11061_v44 = vld [vmem:[%s14717_s1 + $0x1be8] ss:$16 sps:$4 sm:$0xff]   ;;  %v11066_v41 = vld [vmem:[%s14717_s1 + $0x1c04] ss:$16 sps:$4 sm:$0xff]  }
 0x345   :  { %7249 = vmatprep.mubr.bf16.mxu0 %v8432_v43  ;;  %8097 = vmatprep.mubr.bf16.mxu1 %v8432_v43  ;;  %v11069_v43 = vld [vmem:[%s14717_s1 + $0x1c0c] ss:$16 sps:$4 sm:$0xff]  }
 0x347   :  { %7263 = vmatpush1.bf16.msra.mxu0 %v10974_v45  ;;  %8111 = vmatpush1.bf16.msra.mxu1 %v10977_v46  ;;  %v8401_v45 = vcombine.low %v14071_v52, %v14076_v49  ;;  %v66_v46 = vld [vmem:[%s14718_s0 + $0x168] sm:$0xff]  ;;  %v11072_v52 = vld [vmem:[%s14717_s1 + $0x1c24] ss:$16 sps:$4 sm:$0xff]  }
 0x348   :  { %7264 = vmatprep.subr.bf16.mxu0 %v10982_v47  ;;  %8112 = vmatprep.subr.bf16.mxu1 %v10985_v48  ;;  %v82_v47 = vld [vmem:[%s14718_s0 + $0x1e8] sm:$0xff]  ;;  %v11064_v48 = vld [vmem:[%s14717_s1 + $0x1c00] ss:$16 sps:$4 sm:$0xff]  }
 0x349   :  { %v11075_v49 = vld [vmem:[%s14717_s1 + $0x1c2c] ss:$16 sps:$4 sm:$0xff]  }
 0x34a   :  { %7250 = vmatmul.mubr.bf16.gmra.mrb[4].mxu0 %v8431_v51  ;;  %8098 = vmatmul.mubr.bf16.gmra.mrb[4].mxu1 %v8431_v51  ;;  %v11067_v51 = vld [vmem:[%s14717_s1 + $0x1c08] ss:$16 sps:$4 sm:$0xff]  }
 0x34b   :  { %7265 = vmatpush1.bf16.msra.mxu0 %v10980_v50  ;;  %8113 = vmatpush1.bf16.msra.mxu1 %v10983_v53  ;;  %v8434_v50 = vcombine.high %v66_v46, %v82_v47  ;;  %v11070_v53 = vld [vmem:[%s14717_s1 + $0x1c20] ss:$16 sps:$4 sm:$0xff]  }
 0x34c   :  { %7266 = vmatprep.subr.bf16.mxu0 %v10988_v54  ;;  %8114 = vmatprep.subr.bf16.mxu1 %v10991_v55  ;;  %v11073_v54 = vld [vmem:[%s14717_s1 + $0x1c28] ss:$16 sps:$4 sm:$0xff]   ;;  %v11078_v55 = vld [vmem:[%s14717_s1 + $0x1c44] ss:$16 sps:$4 sm:$0xff]  }
 0x34d   :  { %7292 = vmatprep.mubr.bf16.mxu0 %v8402_v56  ;;  %8140 = vmatprep.mubr.bf16.mxu1 %v8402_v56  ;;  %v11081_v56 = vld [vmem:[%s14717_s1 + $0x1c4c] ss:$16 sps:$4 sm:$0xff]  }
 0x34f   :  { %7267 = vmatpush1.bf16.msra.mxu0 %v10986_v59  ;;  %8115 = vmatpush1.bf16.msra.mxu1 %v10989_v60  ;;  %v8433_v59 = vcombine.low %v66_v46, %v82_v47  ;;  %v14283_v60 = vld [vmem:[%s14718_s0 + $0x70] sm:$0xff]  ;;  %v11151_v46 = vld [vmem:[%s14717_s1 + $0x1dc8] ss:$16 sps:$4 sm:$0xff]  }
 0x350   :  { %7268 = vmatprep.subr.bf16.mxu0 %v10994_v57  ;;  %8116 = vmatprep.subr.bf16.mxu1 %v10997_v58  ;;  %v14288_v57 = vld [vmem:[%s14718_s0 + $0xf0] sm:$0xff] }
 0x351   :  { %v11076_v58 = vld [vmem:[%s14717_s1 + $0x1c40] ss:$16 sps:$4 sm:$0xff]   ;;  %v11156_v47 = vld [vmem:[%s14717_s1 + $0x1de4] ss:$16 sps:$4 sm:$0xff]  }
 0x353   :  { %7269 = vmatpush1.bf16.msra.mxu0 %v10992_v61  ;;  %8117 = vmatpush1.bf16.msra.mxu1 %v10995_v62  ;;  %v11079_v61 = vld [vmem:[%s14717_s1 + $0x1c48] ss:$16 sps:$4 sm:$0xff]   ;;  %v11084_v62 = vld [vmem:[%s14717_s1 + $0x1c64] ss:$16 sps:$4 sm:$0xff]  }
 0x354   :  { %7270 = vmatprep.subr.bf16.mxu0 %v11000_v63  ;;  %8118 = vmatprep.subr.bf16.mxu1 %v11003_v0  ;;  %v11087_v63 = vld [vmem:[%s14717_s1 + $0x1c6c] ss:$16 sps:$4 sm:$0xff]   ;;  %v8404_v0 = vcombine.high %v14283_v60, %v14288_v57 }
 0x357   :  { %7271 = vmatpush1.bf16.msra.mxu0 %v10998_v3  ;;  %8119 = vmatpush1.bf16.msra.mxu1 %v11001_v4  ;;  %v11082_v3 = vld [vmem:[%s14717_s1 + $0x1c60] ss:$16 sps:$4 sm:$0xff]   ;;  %v11085_v4 = vld [vmem:[%s14717_s1 + $0x1c68] ss:$16 sps:$4 sm:$0xff]  }
 0x358   :  { %7272 = vmatprep.subr.bf16.mxu0 %v11006_v1  ;;  %8120 = vmatprep.subr.bf16.mxu1 %v11009_v2  ;;  %v11090_v1 = vld [vmem:[%s14717_s1 + $0x1c84] ss:$16 sps:$4 sm:$0xff]   ;;  %v11093_v2 = vld [vmem:[%s14717_s1 + $0x1c8c] ss:$16 sps:$4 sm:$0xff]  }
 0x35b   :  { %7273 = vmatpush1.bf16.msra.mxu0 %v11004_v5  ;;  %8121 = vmatpush1.bf16.msra.mxu1 %v11007_v6  ;;  %v11088_v5 = vld [vmem:[%s14717_s1 + $0x1c80] ss:$16 sps:$4 sm:$0xff]   ;;  %v11091_v6 = vld [vmem:[%s14717_s1 + $0x1c88] ss:$16 sps:$4 sm:$0xff]  }
 0x35c   :  { %7274 = vmatprep.subr.bf16.mxu0 %v11012_v7  ;;  %8122 = vmatprep.subr.bf16.mxu1 %v11015_v8  ;;  %v11096_v7 = vld [vmem:[%s14717_s1 + $0x1ca4] ss:$16 sps:$4 sm:$0xff]   ;;  %v11099_v8 = vld [vmem:[%s14717_s1 + $0x1cac] ss:$16 sps:$4 sm:$0xff]  }
 0x35f   :  { %7275 = vmatpush1.bf16.msra.mxu0 %v11010_v11  ;;  %8123 = vmatpush1.bf16.msra.mxu1 %v11013_v12  ;;  %v11094_v11 = vld [vmem:[%s14717_s1 + $0x1ca0] ss:$16 sps:$4 sm:$0xff]   ;;  %v11097_v12 = vld [vmem:[%s14717_s1 + $0x1ca8] ss:$16 sps:$4 sm:$0xff]  }
 0x360   :  { %7276 = vmatprep.subr.bf16.mxu0 %v11018_v9  ;;  %8124 = vmatprep.subr.bf16.mxu1 %v11021_v10  ;;  %v11102_v9 = vld [vmem:[%s14717_s1 + $0x1cc4] ss:$16 sps:$4 sm:$0xff]   ;;  %v11105_v10 = vld [vmem:[%s14717_s1 + $0x1ccc] ss:$16 sps:$4 sm:$0xff]  }
 0x363   :  { %7277 = vmatpush1.bf16.msra.mxu0 %v11016_v13  ;;  %8125 = vmatpush1.bf16.msra.mxu1 %v11019_v14  ;;  %v11100_v13 = vld [vmem:[%s14717_s1 + $0x1cc0] ss:$16 sps:$4 sm:$0xff]   ;;  %v11103_v14 = vld [vmem:[%s14717_s1 + $0x1cc8] ss:$16 sps:$4 sm:$0xff]  }
 0x364   :  { %7278 = vmatprep.subr.bf16.mxu0 %v11024_v15  ;;  %8126 = vmatprep.subr.bf16.mxu1 %v11027_v16  ;;  %v11108_v15 = vld [vmem:[%s14717_s1 + $0x1ce4] ss:$16 sps:$4 sm:$0xff]   ;;  %v11111_v16 = vld [vmem:[%s14717_s1 + $0x1cec] ss:$16 sps:$4 sm:$0xff]  }
 0x367   :  { %7279 = vmatpush1.bf16.msra.mxu0 %v11022_v19  ;;  %8127 = vmatpush1.bf16.msra.mxu1 %v11025_v17  ;;  %v11106_v19 = vld [vmem:[%s14717_s1 + $0x1ce0] ss:$16 sps:$4 sm:$0xff]   ;;  %v11109_v17 = vld [vmem:[%s14717_s1 + $0x1ce8] ss:$16 sps:$4 sm:$0xff]  }
 0x368   :  { %7280 = vmatprep.subr.bf16.mxu0 %v11030_v18  ;;  %8128 = vmatprep.subr.bf16.mxu1 %v11033_v20  ;;  %v11114_v18 = vld [vmem:[%s14717_s1 + $0x1d04] ss:$16 sps:$4 sm:$0xff]   ;;  %v11117_v20 = vld [vmem:[%s14717_s1 + $0x1d0c] ss:$16 sps:$4 sm:$0xff]  }
 0x36b   :  { %7281 = vmatpush1.bf16.msra.mxu0 %v11028_v21  ;;  %8129 = vmatpush1.bf16.msra.mxu1 %v11031_v22  ;;  %v11112_v21 = vld [vmem:[%s14717_s1 + $0x1d00] ss:$16 sps:$4 sm:$0xff]   ;;  %v11115_v22 = vld [vmem:[%s14717_s1 + $0x1d08] ss:$16 sps:$4 sm:$0xff]  }
 0x36c   :  { %7282 = vmatprep.subr.bf16.mxu0 %v11036_v23  ;;  %8130 = vmatprep.subr.bf16.mxu1 %v11039_v24  ;;  %v11120_v23 = vld [vmem:[%s14717_s1 + $0x1d24] ss:$16 sps:$4 sm:$0xff]   ;;  %v11123_v24 = vld [vmem:[%s14717_s1 + $0x1d2c] ss:$16 sps:$4 sm:$0xff]  }
 0x36f   :  { %7283 = vmatpush1.bf16.msra.mxu0 %v11034_v26  ;;  %8131 = vmatpush1.bf16.msra.mxu1 %v11037_v25  ;;  %v11118_v26 = vld [vmem:[%s14717_s1 + $0x1d20] ss:$16 sps:$4 sm:$0xff]   ;;  %v11121_v25 = vld [vmem:[%s14717_s1 + $0x1d28] ss:$16 sps:$4 sm:$0xff]  }
 0x370   :  { %7284 = vmatprep.subr.bf16.mxu0 %v11042_v27  ;;  %8132 = vmatprep.subr.bf16.mxu1 %v11045_v28  ;;  %v11126_v27 = vld [vmem:[%s14717_s1 + $0x1d44] ss:$16 sps:$4 sm:$0xff]   ;;  %v11129_v28 = vld [vmem:[%s14717_s1 + $0x1d4c] ss:$16 sps:$4 sm:$0xff]  }
 0x373   :  { %7285 = vmatpush1.bf16.msra.mxu0 %v11040_v29  ;;  %8133 = vmatpush1.bf16.msra.mxu1 %v11043_v30  ;;  %v11124_v29 = vld [vmem:[%s14717_s1 + $0x1d40] ss:$16 sps:$4 sm:$0xff]   ;;  %v11127_v30 = vld [vmem:[%s14717_s1 + $0x1d48] ss:$16 sps:$4 sm:$0xff]  }
 0x374   :  { %7286 = vmatprep.subr.bf16.mxu0 %v11048_v31  ;;  %8134 = vmatprep.subr.bf16.mxu1 %v11051_v32  ;;  %v11132_v31 = vld [vmem:[%s14717_s1 + $0x1d64] ss:$16 sps:$4 sm:$0xff]   ;;  %v11135_v32 = vld [vmem:[%s14717_s1 + $0x1d6c] ss:$16 sps:$4 sm:$0xff]  }
 0x377   :  { %7287 = vmatpush1.bf16.msra.mxu0 %v11046_v34  ;;  %8135 = vmatpush1.bf16.msra.mxu1 %v11049_v36  ;;  %v11130_v34 = vld [vmem:[%s14717_s1 + $0x1d60] ss:$16 sps:$4 sm:$0xff]   ;;  %v11133_v36 = vld [vmem:[%s14717_s1 + $0x1d68] ss:$16 sps:$4 sm:$0xff]  }
 0x378   :  { %7288 = vmatprep.subr.bf16.mxu0 %v11054_v33  ;;  %8136 = vmatprep.subr.bf16.mxu1 %v11057_v35  ;;  %v11138_v33 = vld [vmem:[%s14717_s1 + $0x1d84] ss:$16 sps:$4 sm:$0xff]   ;;  %v11141_v35 = vld [vmem:[%s14717_s1 + $0x1d8c] ss:$16 sps:$4 sm:$0xff]  }
 0x37b   :  { %7289 = vmatpush1.bf16.msra.mxu0 %v11052_v37  ;;  %8137 = vmatpush1.bf16.msra.mxu1 %v11055_v38  ;;  %v11136_v37 = vld [vmem:[%s14717_s1 + $0x1d80] ss:$16 sps:$4 sm:$0xff]   ;;  %v11139_v38 = vld [vmem:[%s14717_s1 + $0x1d88] ss:$16 sps:$4 sm:$0xff]  }
 0x37c   :  { %7290 = vmatprep.subr.bf16.mxu0 %v11060_v39  ;;  %8138 = vmatprep.subr.bf16.mxu1 %v11063_v40  ;;  %v11144_v39 = vld [vmem:[%s14717_s1 + $0x1da4] ss:$16 sps:$4 sm:$0xff]   ;;  %v11147_v40 = vld [vmem:[%s14717_s1 + $0x1dac] ss:$16 sps:$4 sm:$0xff]  }
 0x37f   :  { %7291 = vmatpush1.bf16.msra.mxu0 %v11058_v42  ;;  %8139 = vmatpush1.bf16.msra.mxu1 %v11061_v44  ;;  %v11142_v42 = vld [vmem:[%s14717_s1 + $0x1da0] ss:$16 sps:$4 sm:$0xff]   ;;  %v11145_v44 = vld [vmem:[%s14717_s1 + $0x1da8] ss:$16 sps:$4 sm:$0xff]  }
 0x380   :  { %7313 = vmatprep.subr.bf16.mxu0 %v11066_v41  ;;  %8161 = vmatprep.subr.bf16.mxu1 %v11069_v43  ;;  %v11150_v41 = vld [vmem:[%s14717_s1 + $0x1dc4] ss:$16 sps:$4 sm:$0xff]   ;;  %v11153_v43 = vld [vmem:[%s14717_s1 + $0x1dcc] ss:$16 sps:$4 sm:$0xff]  }
 0x382   :  { %7293 = vmatmul.mubr.bf16.vlgmr.msra.gmra.mrb[0].mxu0 %v8401_v45  ;;  %8141 = vmatmul.mubr.bf16.vlgmr.msra.gmra.mrb[0].mxu1 %v8401_v45  ;;  %v11148_v45 = vld [vmem:[%s14717_s1 + $0x1dc0] ss:$16 sps:$4 sm:$0xff]  }
 0x383   :  { %7314 = vmatpush1.bf16.msra.mxu0 %v11064_v48  ;;  %8162 = vmatpush1.bf16.msra.mxu1 %v11067_v51  ;;  %v11159_v48 = vld [vmem:[%s14717_s1 + $0x1dec] ss:$16 sps:$4 sm:$0xff]   ;;  %v11154_v51 = vld [vmem:[%s14717_s1 + $0x1de0] ss:$16 sps:$4 sm:$0xff]  }
 0x384   :  { %7315 = vmatprep.subr.bf16.mxu0 %v11072_v52  ;;  %8163 = vmatprep.subr.bf16.mxu1 %v11075_v49  ;;  %v11157_v52 = vld [vmem:[%s14717_s1 + $0x1de8] ss:$16 sps:$4 sm:$0xff]   ;;  %v11162_v49 = vld [vmem:[%s14717_s1 + $0x1e04] ss:$16 sps:$4 sm:$0xff]  }
 0x385   :  { %7302 = vmatprep.mubr.bf16.mxu0 %v8434_v50  ;;  %8150 = vmatprep.mubr.bf16.mxu1 %v8434_v50  ;;  %v11165_v50 = vld [vmem:[%s14717_s1 + $0x1e0c] ss:$16 sps:$4 sm:$0xff]  }
 0x387   :  { %7316 = vmatpush1.bf16.msra.mxu0 %v11070_v53  ;;  %8164 = vmatpush1.bf16.msra.mxu1 %v11073_v54  ;;  %v8403_v53 = vcombine.low %v14283_v60, %v14288_v57  ;;  %v67_v54 = vld [vmem:[%s14718_s0 + $0x170] sm:$0xff]  ;;  %v11171_v57 = vld [vmem:[%s14717_s1 + $0x1e2c] ss:$16 sps:$4 sm:$0xff]  }
 0x388   :  { %7317 = vmatprep.subr.bf16.mxu0 %v11078_v55  ;;  %8165 = vmatprep.subr.bf16.mxu1 %v11081_v56  ;;  %v83_v55 = vld [vmem:[%s14718_s0 + $0x1f0] sm:$0xff] }
 0x389   :  { %v11160_v56 = vld [vmem:[%s14717_s1 + $0x1e00] ss:$16 sps:$4 sm:$0xff]   ;;  %v11168_v60 = vld [vmem:[%s14717_s1 + $0x1e24] ss:$16 sps:$4 sm:$0xff]  }
 0x38a   :  { %7303 = vmatmul.mubr.bf16.gmra.mrb[4].mxu0 %v8433_v59  ;;  %8151 = vmatmul.mubr.bf16.gmra.mrb[4].mxu1 %v8433_v59  ;;  %v11163_v59 = vld [vmem:[%s14717_s1 + $0x1e08] ss:$16 sps:$4 sm:$0xff]  }
 0x38b   :  { %7318 = vmatpush1.bf16.msra.mxu0 %v11076_v58  ;;  %8166 = vmatpush1.bf16.msra.mxu1 %v11079_v61  ;;  %v8436_v58 = vcombine.high %v67_v54, %v83_v55  ;;  %v11166_v61 = vld [vmem:[%s14717_s1 + $0x1e20] ss:$16 sps:$4 sm:$0xff]  }
 0x38c   :  { %7319 = vmatprep.subr.bf16.mxu0 %v11084_v62  ;;  %8167 = vmatprep.subr.bf16.mxu1 %v11087_v63  ;;  %v11169_v62 = vld [vmem:[%s14717_s1 + $0x1e28] ss:$16 sps:$4 sm:$0xff]   ;;  %v11174_v63 = vld [vmem:[%s14717_s1 + $0x1e44] ss:$16 sps:$4 sm:$0xff]  }
 0x38d   :  { %7345 = vmatprep.mubr.bf16.mxu0 %v8404_v0  ;;  %8193 = vmatprep.mubr.bf16.mxu1 %v8404_v0  ;;  %v11177_v0 = vld [vmem:[%s14717_s1 + $0x1e4c] ss:$16 sps:$4 sm:$0xff]  }
 0x38f   :  { %7320 = vmatpush1.bf16.msra.mxu0 %v11082_v3  ;;  %8168 = vmatpush1.bf16.msra.mxu1 %v11085_v4  ;;  %v8435_v3 = vcombine.low %v67_v54, %v83_v55  ;;  %v14495_v4 = vld [vmem:[%s14718_s0 + $0x78] sm:$0xff]  ;;  %v11252_v55 = vld [vmem:[%s14717_s1 + $0x1fe4] ss:$16 sps:$4 sm:$0xff]  }
 0x390   :  { %7321 = vmatprep.subr.bf16.mxu0 %v11090_v1  ;;  %8169 = vmatprep.subr.bf16.mxu1 %v11093_v2  ;;  %v14500_v1 = vld [vmem:[%s14718_s0 + $0xf8] sm:$0xff]  ;;  %v11172_v2 = vld [vmem:[%s14717_s1 + $0x1e40] ss:$16 sps:$4 sm:$0xff]  }
 0x391   :  { %v11247_v54 = vld [vmem:[%s14717_s1 + $0x1fc8] ss:$16 sps:$4 sm:$0xff]  }
 0x393   :  { %7322 = vmatpush1.bf16.msra.mxu0 %v11088_v5  ;;  %8170 = vmatpush1.bf16.msra.mxu1 %v11091_v6  ;;  %v11175_v5 = vld [vmem:[%s14717_s1 + $0x1e48] ss:$16 sps:$4 sm:$0xff]   ;;  %v11180_v6 = vld [vmem:[%s14717_s1 + $0x1e64] ss:$16 sps:$4 sm:$0xff]  }
 0x394   :  { %7323 = vmatprep.subr.bf16.mxu0 %v11096_v7  ;;  %8171 = vmatprep.subr.bf16.mxu1 %v11099_v8  ;;  %v11183_v7 = vld [vmem:[%s14717_s1 + $0x1e6c] ss:$16 sps:$4 sm:$0xff]   ;;  %v8406_v8 = vcombine.high %v14495_v4, %v14500_v1 }
 0x397   :  { %7324 = vmatpush1.bf16.msra.mxu0 %v11094_v11  ;;  %8172 = vmatpush1.bf16.msra.mxu1 %v11097_v12  ;;  %v11178_v11 = vld [vmem:[%s14717_s1 + $0x1e60] ss:$16 sps:$4 sm:$0xff]   ;;  %v11181_v12 = vld [vmem:[%s14717_s1 + $0x1e68] ss:$16 sps:$4 sm:$0xff]  }
 0x398   :  { %7325 = vmatprep.subr.bf16.mxu0 %v11102_v9  ;;  %8173 = vmatprep.subr.bf16.mxu1 %v11105_v10  ;;  %v11186_v9 = vld [vmem:[%s14717_s1 + $0x1e84] ss:$16 sps:$4 sm:$0xff]   ;;  %v11189_v10 = vld [vmem:[%s14717_s1 + $0x1e8c] ss:$16 sps:$4 sm:$0xff]  }
 0x39b   :  { %7326 = vmatpush1.bf16.msra.mxu0 %v11100_v13  ;;  %8174 = vmatpush1.bf16.msra.mxu1 %v11103_v14  ;;  %v11184_v13 = vld [vmem:[%s14717_s1 + $0x1e80] ss:$16 sps:$4 sm:$0xff]   ;;  %v11187_v14 = vld [vmem:[%s14717_s1 + $0x1e88] ss:$16 sps:$4 sm:$0xff]  }
 0x39c   :  { %7327 = vmatprep.subr.bf16.mxu0 %v11108_v15  ;;  %8175 = vmatprep.subr.bf16.mxu1 %v11111_v16  ;;  %v11192_v15 = vld [vmem:[%s14717_s1 + $0x1ea4] ss:$16 sps:$4 sm:$0xff]   ;;  %v11195_v16 = vld [vmem:[%s14717_s1 + $0x1eac] ss:$16 sps:$4 sm:$0xff]  }
 0x39f   :  { %7328 = vmatpush1.bf16.msra.mxu0 %v11106_v19  ;;  %8176 = vmatpush1.bf16.msra.mxu1 %v11109_v17  ;;  %v11190_v19 = vld [vmem:[%s14717_s1 + $0x1ea0] ss:$16 sps:$4 sm:$0xff]   ;;  %v11193_v17 = vld [vmem:[%s14717_s1 + $0x1ea8] ss:$16 sps:$4 sm:$0xff]  }
 0x3a0   :  { %7329 = vmatprep.subr.bf16.mxu0 %v11114_v18  ;;  %8177 = vmatprep.subr.bf16.mxu1 %v11117_v20  ;;  %v11198_v18 = vld [vmem:[%s14717_s1 + $0x1ec4] ss:$16 sps:$4 sm:$0xff]   ;;  %v11201_v20 = vld [vmem:[%s14717_s1 + $0x1ecc] ss:$16 sps:$4 sm:$0xff]  }
 0x3a3   :  { %7330 = vmatpush1.bf16.msra.mxu0 %v11112_v21  ;;  %8178 = vmatpush1.bf16.msra.mxu1 %v11115_v22  ;;  %v11196_v21 = vld [vmem:[%s14717_s1 + $0x1ec0] ss:$16 sps:$4 sm:$0xff]   ;;  %v11199_v22 = vld [vmem:[%s14717_s1 + $0x1ec8] ss:$16 sps:$4 sm:$0xff]  }
 0x3a4   :  { %7331 = vmatprep.subr.bf16.mxu0 %v11120_v23  ;;  %8179 = vmatprep.subr.bf16.mxu1 %v11123_v24  ;;  %v11204_v23 = vld [vmem:[%s14717_s1 + $0x1ee4] ss:$16 sps:$4 sm:$0xff]   ;;  %v11207_v24 = vld [vmem:[%s14717_s1 + $0x1eec] ss:$16 sps:$4 sm:$0xff]  }
 0x3a7   :  { %7332 = vmatpush1.bf16.msra.mxu0 %v11118_v26  ;;  %8180 = vmatpush1.bf16.msra.mxu1 %v11121_v25  ;;  %v11202_v26 = vld [vmem:[%s14717_s1 + $0x1ee0] ss:$16 sps:$4 sm:$0xff]   ;;  %v11205_v25 = vld [vmem:[%s14717_s1 + $0x1ee8] ss:$16 sps:$4 sm:$0xff]  }
 0x3a8   :  { %7333 = vmatprep.subr.bf16.mxu0 %v11126_v27  ;;  %8181 = vmatprep.subr.bf16.mxu1 %v11129_v28  ;;  %v11210_v27 = vld [vmem:[%s14717_s1 + $0x1f04] ss:$16 sps:$4 sm:$0xff]   ;;  %v11213_v28 = vld [vmem:[%s14717_s1 + $0x1f0c] ss:$16 sps:$4 sm:$0xff]  }
 0x3ab   :  { %7334 = vmatpush1.bf16.msra.mxu0 %v11124_v29  ;;  %8182 = vmatpush1.bf16.msra.mxu1 %v11127_v30  ;;  %v11208_v29 = vld [vmem:[%s14717_s1 + $0x1f00] ss:$16 sps:$4 sm:$0xff]   ;;  %v11211_v30 = vld [vmem:[%s14717_s1 + $0x1f08] ss:$16 sps:$4 sm:$0xff]  }
 0x3ac   :  { %7335 = vmatprep.subr.bf16.mxu0 %v11132_v31  ;;  %8183 = vmatprep.subr.bf16.mxu1 %v11135_v32  ;;  %v11216_v31 = vld [vmem:[%s14717_s1 + $0x1f24] ss:$16 sps:$4 sm:$0xff]   ;;  %v11219_v32 = vld [vmem:[%s14717_s1 + $0x1f2c] ss:$16 sps:$4 sm:$0xff]  }
 0x3af   :  { %7336 = vmatpush1.bf16.msra.mxu0 %v11130_v34  ;;  %8184 = vmatpush1.bf16.msra.mxu1 %v11133_v36  ;;  %v11214_v34 = vld [vmem:[%s14717_s1 + $0x1f20] ss:$16 sps:$4 sm:$0xff]   ;;  %v11217_v36 = vld [vmem:[%s14717_s1 + $0x1f28] ss:$16 sps:$4 sm:$0xff]  }
 0x3b0   :  { %7337 = vmatprep.subr.bf16.mxu0 %v11138_v33  ;;  %8185 = vmatprep.subr.bf16.mxu1 %v11141_v35  ;;  %v11222_v33 = vld [vmem:[%s14717_s1 + $0x1f44] ss:$16 sps:$4 sm:$0xff]   ;;  %v11225_v35 = vld [vmem:[%s14717_s1 + $0x1f4c] ss:$16 sps:$4 sm:$0xff]  }
 0x3b3   :  { %7338 = vmatpush1.bf16.msra.mxu0 %v11136_v37  ;;  %8186 = vmatpush1.bf16.msra.mxu1 %v11139_v38  ;;  %v11220_v37 = vld [vmem:[%s14717_s1 + $0x1f40] ss:$16 sps:$4 sm:$0xff]   ;;  %v11223_v38 = vld [vmem:[%s14717_s1 + $0x1f48] ss:$16 sps:$4 sm:$0xff]  }
 0x3b4   :  { %7339 = vmatprep.subr.bf16.mxu0 %v11144_v39  ;;  %8187 = vmatprep.subr.bf16.mxu1 %v11147_v40  ;;  %v11228_v39 = vld [vmem:[%s14717_s1 + $0x1f64] ss:$16 sps:$4 sm:$0xff]   ;;  %v11231_v40 = vld [vmem:[%s14717_s1 + $0x1f6c] ss:$16 sps:$4 sm:$0xff]  }
 0x3b7   :  { %7340 = vmatpush1.bf16.msra.mxu0 %v11142_v42  ;;  %8188 = vmatpush1.bf16.msra.mxu1 %v11145_v44  ;;  %v11226_v42 = vld [vmem:[%s14717_s1 + $0x1f60] ss:$16 sps:$4 sm:$0xff]   ;;  %v11229_v44 = vld [vmem:[%s14717_s1 + $0x1f68] ss:$16 sps:$4 sm:$0xff]  }
 0x3b8   :  { %7341 = vmatprep.subr.bf16.mxu0 %v11150_v41  ;;  %8189 = vmatprep.subr.bf16.mxu1 %v11153_v43  ;;  %v11234_v41 = vld [vmem:[%s14717_s1 + $0x1f84] ss:$16 sps:$4 sm:$0xff]   ;;  %v11237_v43 = vld [vmem:[%s14717_s1 + $0x1f8c] ss:$16 sps:$4 sm:$0xff]  }
 0x3bb   :  { %7342 = vmatpush1.bf16.msra.mxu0 %v11148_v45  ;;  %8190 = vmatpush1.bf16.msra.mxu1 %v11151_v46  ;;  %v11232_v45 = vld [vmem:[%s14717_s1 + $0x1f80] ss:$16 sps:$4 sm:$0xff]   ;;  %v11235_v46 = vld [vmem:[%s14717_s1 + $0x1f88] ss:$16 sps:$4 sm:$0xff]  }
 0x3bc   :  { %7343 = vmatprep.subr.bf16.mxu0 %v11156_v47  ;;  %8191 = vmatprep.subr.bf16.mxu1 %v11159_v48  ;;  %v11240_v47 = vld [vmem:[%s14717_s1 + $0x1fa4] ss:$16 sps:$4 sm:$0xff]   ;;  %v11243_v48 = vld [vmem:[%s14717_s1 + $0x1fac] ss:$16 sps:$4 sm:$0xff]  }
 0x3bf   :  { %7344 = vmatpush1.bf16.msra.mxu0 %v11154_v51  ;;  %8192 = vmatpush1.bf16.msra.mxu1 %v11157_v52  ;;  %v11238_v51 = vld [vmem:[%s14717_s1 + $0x1fa0] ss:$16 sps:$4 sm:$0xff]   ;;  %v11241_v52 = vld [vmem:[%s14717_s1 + $0x1fa8] ss:$16 sps:$4 sm:$0xff]  }
 0x3c0   :  { %7366 = vmatprep.subr.bf16.mxu0 %v11162_v49  ;;  %8214 = vmatprep.subr.bf16.mxu1 %v11165_v50  ;;  %v11246_v49 = vld [vmem:[%s14717_s1 + $0x1fc4] ss:$16 sps:$4 sm:$0xff]   ;;  %v11249_v50 = vld [vmem:[%s14717_s1 + $0x1fcc] ss:$16 sps:$4 sm:$0xff]  }
 0x3c2   :  { %7346 = vmatmul.mubr.bf16.vlgmr.msra.gmra.mrb[0].mxu0 %v8403_v53  ;;  %8194 = vmatmul.mubr.bf16.vlgmr.msra.gmra.mrb[0].mxu1 %v8403_v53  ;;  %v11244_v53 = vld [vmem:[%s14717_s1 + $0x1fc0] ss:$16 sps:$4 sm:$0xff]  }
 0x3c3   :  { %7367 = vmatpush1.bf16.msra.mxu0 %v11160_v56  ;;  %8215 = vmatpush1.bf16.msra.mxu1 %v11163_v59  ;;  %v11255_v56 = vld [vmem:[%s14717_s1 + $0x1fec] ss:$16 sps:$4 sm:$0xff]   ;;  %v11250_v59 = vld [vmem:[%s14717_s1 + $0x1fe0] ss:$16 sps:$4 sm:$0xff]  }
 0x3c4   :  { %7368 = vmatprep.subr.bf16.mxu0 %v11168_v60  ;;  %8216 = vmatprep.subr.bf16.mxu1 %v11171_v57  ;;  %v11253_v60 = vld [vmem:[%s14717_s1 + $0x1fe8] ss:$16 sps:$4 sm:$0xff]  }
 0x3c5   :  { %7355 = vmatprep.mubr.bf16.mxu0 %v8436_v58  ;;  %8203 = vmatprep.mubr.bf16.mxu1 %v8436_v58  ;;  %v68_v57 = vld [vmem:[%s14718_s0 + $0x178] sm:$0xff] }
 0x3c6   :  { %v84_v58 = vld [vmem:[%s14718_s0 + $0x1f8] sm:$0xff] }
 0x3c7   :  { %7369 = vmatpush1.bf16.msra.mxu0 %v11166_v61  ;;  %8217 = vmatpush1.bf16.msra.mxu1 %v11169_v62  ;;  %v8405_v61 = vcombine.low %v14495_v4, %v14500_v1  ;;  %v8438_v62 = vcombine.high %v68_v57, %v84_v58  ;;  %v1109_v4 = vld [vmem:[%s14719_s2] sm:$0xf] }
 0x3c8   :  { %7370 = vmatprep.subr.bf16.mxu0 %v11174_v63  ;;  %8218 = vmatprep.subr.bf16.mxu1 %v11177_v0  ;;  %v8437_v63 = vcombine.low %v68_v57, %v84_v58  ;;  %v1111_v0 = vlaneseq }
 0x3ca   :  { %7356 = vmatmul.mubr.bf16.gmra.mrb[4].mxu0 %v8435_v3  ;;  %8204 = vmatmul.mubr.bf16.gmra.mrb[4].mxu1 %v8435_v3  ;;  %v14675_v3 = vshrl.u32 %v1111_v0, 7 }
 0x3cb   :  { %7371 = vmatpush1.bf16.msra.mxu0 %v11172_v2  ;;  %8219 = vmatpush1.bf16.msra.mxu1 %v11175_v5 }
 0x3cc   :  { %7372 = vmatprep.subr.bf16.mxu0 %v11180_v6  ;;  %8220 = vmatprep.subr.bf16.mxu1 %v11183_v7  ;;  %v1113_v2 = vsub.s32 0, %v14675_v3  ;;  %v1121_v5 = vsub.s32 2, %v14675_v3  ;;  %v1117_v1 = vsub.s32 1, %v14675_v3  ;;  %v1125_v6 = vsub.s32 3, %v14675_v3 }
 0x3cd   :  { %7398 = vmatprep.mubr.bf16.mxu0 %v8406_v8  ;;  %8246 = vmatprep.mubr.bf16.mxu1 %v8406_v8 }
 0x3ce   :  { %v1114_v7 = vrot.slane %v1109_v4, %v1113_v2  ;;  %v1122_v8 = vrot.slane %v1109_v4, %v1121_v5 }
 0x3cf   :  { %7373 = vmatpush1.bf16.msra.mxu0 %v11178_v11  ;;  %8221 = vmatpush1.bf16.msra.mxu1 %v11181_v12  ;;  %v1118_v11 = vrot.slane %v1109_v4, %v1117_v1  ;;  %v1126_v12 = vrot.slane %v1109_v4, %v1125_v6  ;;  %v8290_v4 = vld [vmem:[%s14720_s3 + $0x38] sm:$0xff] }
 0x3d0   :  { %7374 = vmatprep.subr.bf16.mxu0 %v11186_v9  ;;  %8222 = vmatprep.subr.bf16.mxu1 %v11189_v10 }
 0x3d3   :  { %7375 = vmatpush1.bf16.msra.mxu0 %v11184_v13  ;;  %8223 = vmatpush1.bf16.msra.mxu1 %v11187_v14 }
 0x3d4   :  { %7376 = vmatprep.subr.bf16.mxu0 %v11192_v15  ;;  %8224 = vmatprep.subr.bf16.mxu1 %v11195_v16 }
 0x3d7   :  { %7377 = vmatpush1.bf16.msra.mxu0 %v11190_v19  ;;  %8225 = vmatpush1.bf16.msra.mxu1 %v11193_v17  ;;  %v8283_v19 = vld [vmem:[%s14720_s3] sm:$0xff] }
 0x3d8   :  { %7378 = vmatprep.subr.bf16.mxu0 %v11198_v18  ;;  %8226 = vmatprep.subr.bf16.mxu1 %v11201_v20 }
 0x3db   :  { %7379 = vmatpush1.bf16.msra.mxu0 %v11196_v21  ;;  %8227 = vmatpush1.bf16.msra.mxu1 %v11199_v22  ;;  %v8284_v22 = vld [vmem:[%s14720_s3 + $0x8] sm:$0xff] }
 0x3dc   :  { %7380 = vmatprep.subr.bf16.mxu0 %v11204_v23  ;;  %8228 = vmatprep.subr.bf16.mxu1 %v11207_v24 }
 0x3df   :  { %7381 = vmatpush1.bf16.msra.mxu0 %v11202_v26  ;;  %8229 = vmatpush1.bf16.msra.mxu1 %v11205_v25 }
 0x3e0   :  { %7382 = vmatprep.subr.bf16.mxu0 %v11210_v27  ;;  %8230 = vmatprep.subr.bf16.mxu1 %v11213_v28 }
 0x3e3   :  { %7383 = vmatpush1.bf16.msra.mxu0 %v11208_v29  ;;  %8231 = vmatpush1.bf16.msra.mxu1 %v11211_v30  ;;  %v8287_v29 = vld [vmem:[%s14720_s3 + $0x20] sm:$0xff] }
 0x3e4   :  { %7384 = vmatprep.subr.bf16.mxu0 %v11216_v31  ;;  %8232 = vmatprep.subr.bf16.mxu1 %v11219_v32  ;;  %v8285_v32 = vld [vmem:[%s14720_s3 + $0x10] sm:$0xff] }
 0x3e7   :  { %7385 = vmatpush1.bf16.msra.mxu0 %v11214_v34  ;;  %8233 = vmatpush1.bf16.msra.mxu1 %v11217_v36 }
 0x3e8   :  { %7386 = vmatprep.subr.bf16.mxu0 %v11222_v33  ;;  %8234 = vmatprep.subr.bf16.mxu1 %v11225_v35  ;;  %v8288_v33 = vld [vmem:[%s14720_s3 + $0x28] sm:$0xff] }
 0x3eb   :  { %7387 = vmatpush1.bf16.msra.mxu0 %v11220_v37  ;;  %8235 = vmatpush1.bf16.msra.mxu1 %v11223_v38 }
 0x3ec   :  { %7388 = vmatprep.subr.bf16.mxu0 %v11228_v39  ;;  %8236 = vmatprep.subr.bf16.mxu1 %v11231_v40 }
 0x3ef   :  { %7389 = vmatpush1.bf16.msra.mxu0 %v11226_v42  ;;  %8237 = vmatpush1.bf16.msra.mxu1 %v11229_v44 }
 0x3f0   :  { %7390 = vmatprep.subr.bf16.mxu0 %v11234_v41  ;;  %8238 = vmatprep.subr.bf16.mxu1 %v11237_v43 }
 0x3f3   :  { %7391 = vmatpush1.bf16.msra.mxu0 %v11232_v45  ;;  %8239 = vmatpush1.bf16.msra.mxu1 %v11235_v46  ;;  %v8286_v45 = vld [vmem:[%s14720_s3 + $0x18] sm:$0xff] }
 0x3f4   :  { %7392 = vmatprep.subr.bf16.mxu0 %v11240_v47  ;;  %8240 = vmatprep.subr.bf16.mxu1 %v11243_v48 }
 0x3f7   :  { %7393 = vmatpush1.bf16.msra.mxu0 %v11238_v51  ;;  %8241 = vmatpush1.bf16.msra.mxu1 %v11241_v52 }
 0x3f8   :  { %7394 = vmatprep.subr.bf16.mxu0 %v11246_v49  ;;  %8242 = vmatprep.subr.bf16.mxu1 %v11249_v50 }
 0x3fb   :  { %7395 = vmatpush1.bf16.msra.mxu0 %v11244_v53  ;;  %8243 = vmatpush1.bf16.msra.mxu1 %v11247_v54  ;;  %v8289_v53 = vld [vmem:[%s14720_s3 + $0x30] sm:$0xff] }
 0x3fc   :  { %7396 = vmatprep.subr.bf16.mxu0 %v11252_v55  ;;  %8244 = vmatprep.subr.bf16.mxu1 %v11255_v56 }
 0x3ff   :  { %7397 = vmatpush1.bf16.msra.mxu0 %v11250_v59  ;;  %8245 = vmatpush1.bf16.msra.mxu1 %v11253_v60 }
 0x402   :  { %7399 = vmatmul.mubr.bf16.vlgmr.msra.gmra.mrb[0].mxu0 %v8405_v61  ;;  %8247 = vmatmul.mubr.bf16.vlgmr.msra.gmra.mrb[0].mxu1 %v8405_v61 }
 0x403   :  { %7408 = vmatprep.mubr.bf16.mxu0 %v8438_v62  ;;  %8256 = vmatprep.mubr.bf16.mxu1 %v8438_v62 }
 0x40a   :  { %7409 = vmatmul.mubr.bf16.gmra.mrb[4].mxu0 %v8437_v63  ;;  %8257 = vmatmul.mubr.bf16.gmra.mrb[4].mxu1 %v8437_v63 }
 0x4d5   :  { %v7400_v9 = vpop.f32.mrb[0].mxu0  ;;  %v8248_v10 = vpop.f32.mrb[0].mxu1 }
 0x4d6   :  { %v9464_v13 = vadd.f32 %v7400_v9, %v1114_v7  ;;  %v9472_v14 = vadd.f32 %v8248_v10, %v1122_v8  ;;  %v7402_v15 = vpop.f32.mrb[1].mxu0  ;;  %v8250_v16 = vpop.f32.mrb[1].mxu1 }
 0x4d7   :  { %v9465_v17 = vadd.f32 %v7402_v15, %v1118_v11  ;;  %v7404_v18 = vpop.f32.mrb[2].mxu0  ;;  %v8252_v20 = vpop.f32.mrb[2].mxu1  ;;  %v9473_v23 = vadd.f32 %v8250_v16, %v1126_v12 }
 0x4d8   :  { %v8267_v21 = vmax.f32 %v9464_v13, 0.0  ;;  %v9466_v24 = vadd.f32 %v7404_v18, %v1114_v7  ;;  %v7406_v26 = vpop.f32.mrb[3].mxu0  ;;  %v8254_v25 = vpop.f32.mrb[3].mxu1  ;;  %v8269_v27 = vmax.f32 %v9472_v14, 0.0  ;;  %v9474_v36 = vadd.f32 %v8252_v20, %v1122_v8 }
 0x4d9   :  { %v8268_v28 = vmax.f32 %v9465_v17, 0.0  ;;  %v9467_v30 = vadd.f32 %v7406_v26, %v1118_v11  ;;  %v9475_v35 = vadd.f32 %v8254_v25, %v1126_v12  ;;  %v8270_v39 = vmax.f32 %v9473_v23, 0.0 }
 0x4da   :  { %v8291_v31 = vmul.f32 %v8283_v19, %v8267_v21  ;;  %v8271_v34 = vmax.f32 %v9466_v24, 0.0  ;;  %v8293_v42 = vmul.f32 %v8285_v32, %v8269_v27  ;;  %v8273_v47 = vmax.f32 %v9474_v36, 0.0 }
 0x4db   :  { %v8292_v37 = vmul.f32 %v8284_v22, %v8268_v28  ;;  %v8272_v38 = vmax.f32 %v9467_v30, 0.0  ;;  %v8274_v48 = vmax.f32 %v9475_v35, 0.0  ;;  %v8294_v5 = vmul.f32 %v8286_v45, %v8270_v39 }
 0x4dc   :  { %v8295_v40 = vmul.f32 %v8287_v29, %v8271_v34  ;;  %v8297_v13 = vmul.f32 %v8289_v53, %v8273_v47 }
 0x4dd   :  { %v8296_v44 = vmul.f32 %v8288_v33, %v8272_v38  ;;  %v7410_v41 = vpop.f32.mrb[4].mxu0  ;;  %v8258_v43 = vpop.f32.mrb[4].mxu1  ;;  %v8307_v46 = vadd.f32 %v8292_v37, %v8291_v31 }
 0x4de   :  { %v9468_v51 = vadd.f32 %v7410_v41, %v1114_v7  ;;  %v9476_v52 = vadd.f32 %v8258_v43, %v1122_v8  ;;  %v7412_v49 = vpop.f32.mrb[5].mxu0  ;;  %v8260_v50 = vpop.f32.mrb[5].mxu1 }
 0x4df   :  { %v8312_v54 = vadd.f32 %v8296_v44, %v8295_v40  ;;  %v9469_v55 = vadd.f32 %v7412_v49, %v1118_v11  ;;  %v9477_v56 = vadd.f32 %v8260_v50, %v1126_v12  ;;  %v7414_v59 = vpop.f32.mrb[6].mxu0  ;;  %v8262_v60 = vpop.f32.mrb[6].mxu1  ;;  %v8308_v57 = vadd.f32 %v8307_v46, %v8293_v42 }
 0x4e0   :  { %v8275_v58 = vmax.f32 %v9468_v51, 0.0  ;;  %v9470_v61 = vadd.f32 %v7414_v59, %v1114_v7  ;;  %v9478_v62 = vadd.f32 %v8262_v60, %v1122_v8  ;;  %v7416_v63 = vpop.f32.mrb[7].mxu0  ;;  %v8264_v2 = vpop.f32.mrb[7].mxu1  ;;  %v8277_v1 = vmax.f32 %v9476_v52, 0.0 }
 0x4e1   :  { %v8276_v6 = vmax.f32 %v9469_v55, 0.0  ;;  %v9471_v9 = vadd.f32 %v7416_v63, %v1118_v11  ;;  %v9479_v10 = vadd.f32 %v8264_v2, %v1126_v12  ;;  %v8278_v15 = vmax.f32 %v9477_v56, 0.0 }
 0x4e2   :  { %v8299_v14 = vmul.f32 %v8283_v19, %v8275_v58  ;;  %v8279_v16 = vmax.f32 %v9470_v61, 0.0  ;;  %v8281_v18 = vmax.f32 %v9478_v62, 0.0  ;;  %v8309_v7 = vadd.f32 %v8308_v57, %v8294_v5 }
 0x4e3   :  { %v8300_v17 = vmul.f32 %v8284_v22, %v8276_v6  ;;  %v8280_v20 = vmax.f32 %v9471_v9, 0.0  ;;  %v8298_v8 = vmul.f32 %v8290_v4, %v8274_v48  ;;  %v8313_v23 = vadd.f32 %v8312_v54, %v8297_v13 }
 0x4e4   :  { %v8303_v21 = vmul.f32 %v8287_v29, %v8279_v16  ;;  %v8301_v24 = vmul.f32 %v8285_v32, %v8277_v1  ;;  %v8282_v25 = vmax.f32 %v9479_v10, 0.0  ;;  %8310 = vadd.xlane.f32.xlu0 %v8309_v7  ;;  %v8305_v30 = vmul.f32 %v8289_v53, %v8281_v18 }
 0x4e5   :  { %v8304_v26 = vmul.f32 %v8288_v33, %v8280_v20  ;;  %v8317_v27 = vadd.f32 %v8300_v17, %v8299_v14  ;;  %v8314_v28 = vadd.f32 %v8313_v23, %v8298_v8  ;;  %v8302_v12 = vmul.f32 %v8286_v45, %v8278_v15 }
 0x4e6   :  { %v8306_v19 = vmul.f32 %v8290_v4, %v8282_v25  ;;  %v8332_v29 = vand.u32 127, %v1111_v0  ;;  %v8361_v48 = vstv %s14721_s4 }
 0x4e7   :  { %v8322_v11 = vadd.f32 %v8304_v26, %v8303_v21  ;;  %v8318_v31 = vadd.f32 %v8317_v27, %v8301_v24 }
 0x4e8   :  { %8315 = vadd.xlane.f32.xlu0 %v8314_v28  ;;  %v8337_v32 = vadd.s32 4294967288, %v8332_v29  ;;  %v8335_v39 = vsub.s32 %v8332_v29, %v14675_v3 }
 0x4e9   :  { %v8319_v34 = vadd.f32 %v8318_v31, %v8302_v12  ;;  %v8323_v22 = vadd.f32 %v8322_v11, %v8305_v30 }
 0x4ea   :  { %v8340_v33 = vsub.s32 %v8337_v32, %v14675_v3 }
 0x4eb   :  { %8320 = vadd.xlane.f32.xlu1 %v8319_v34  ;;  %v8324_v36 = vadd.f32 %v8323_v22, %v8306_v19 }
 0x4ef   :  { %8325 = vadd.xlane.f32.xlu1 %v8324_v36 }
 0x571   :  { %v8311_v35 = vpop.xlane.xlu0 %8310 }
 0x572   :  { %v8336_v44 = vrot.slane %v8311_v35, %v8335_v39 }
 0x575   :  { %v8316_v37 = vpop.xlane.xlu0 %8315 }
 0x576   :  { %v8341_v40 = vrot.slane %v8316_v37, %v8340_v33 }
 0x578   :  { %v8321_v38 = vpop.xlane.xlu1 %8320  ;;  %v8343_v45 = vsel %vm8342_vm0, %v8341_v40, %v8336_v44 }
 0x579   :  { %v8347_v41 = vrot.slane %v8321_v38, %v8335_v39 }
 0x57c   :  { %v8326_v42 = vpop.xlane.xlu1 %8325 }
 0x57d   :  { %v8351_v43 = vrot.slane %v8326_v42, %v8340_v33 }
 0x57f   :  { %v8352_v46 = vsel %vm8342_vm0, %v8351_v43, %v8347_v41 }
 0x580   :  { %v8354_v47 = vsel %vm8353_vm1, %v8352_v46, %v8343_v45 }
 0x581   :  { %v8357_v0 = vsel %vm8356_vm2, %v8354_v47, 0.0 }
 0x582   :  { %8358 = vadd.xlane.f32.xlu0 %v8357_v0 }
 0x60f   :  { %v8359_v51 = vpop.xlane.xlu0 %8358 }
 0x610   :  { %v8362_v52 = vadd.f32 %v8361_v48, %v8359_v51 }
 0x612   :  { %v9463_v3 = vmul.f32 -1.442695, %v8362_v52 }
 0x614   :  { %11256 = vpow2.f32 %v9463_v3 }
 0x61e   :  { %v11257_v49 = vpop.eup %11256 }
 0x61f   :  { %v8366_v50 = vadd.f32 1.0, %v11257_v49 }
 0x621   :  { %11258 = vrcp.f32 %v8366_v50 }
 0x62b   :  { %v11259_v53 = vpop.eup %11258 }
 0x62c   :  { %8370 = vst.msk [vmem:[%s14722_s5] sm:$0x3] %vm8369_vm3, %v11259_v53 }

</bundles_post_ra>
